<compile_context>
chip_gen: v5e
topology: v5e:2x2
jax: 0.10.0
libtpu: 0.0.40
codegen_flags: <defaults>
</compile_context>

<pallas_src>
import functools

import jax
import jax.numpy as jnp
from jax.experimental import pallas as pl
from jax.experimental.pallas import tpu as pltpu

EPS = 1e-5  # nn.BatchNorm2d default eps


def _conv3x3_im2col(src_ref, patch_ref, w_ref, Ho, Wo, stride):
    """3x3 conv over a zero-padded (Hsrc, Wsrc, C) ref as ONE MXU matmul.

    The 9 taps are read directly from the (padded) source ref into an im2col
    scratch of shape (Ho*Wo, 9*C); the conv is then a single
    (Ho*Wo, 9*C) @ (9*C, Cout) bf16 dot with f32 accumulation, feeding the MXU
    a contraction depth of 9*C instead of nine K=C matmuls + 8 VALU adds.
    """
    C = src_ref.shape[-1]
    for kh in range(3):
        for kw in range(3):
            if stride == 1:
                tap = src_ref[pl.ds(kh, Ho), pl.ds(kw, Wo), :]
            else:
                # TODO(synk): strided-tap path (stride > 1) is untested on HW.
                tap = src_ref[pl.ds(kh, Ho, stride), pl.ds(kw, Wo, stride), :]
            col = (kh * 3 + kw) * C
            patch_ref[:, pl.ds(col, C)] = (
                tap.reshape(Ho * Wo, C).astype(patch_ref.dtype))
    # TODO(synk): at real channel counts keep the im2col buffer in bf16 (here
    #             f32 is kept for the sub-128-lane column stores; the dot
    #             inputs are cast to bf16 either way).
    patches = patch_ref[...].astype(jnp.bfloat16)
    return jnp.dot(patches, w_ref[...], preferred_element_type=jnp.float32)


def _trunk(xp_ref, w1_ref, b1_ref, w2_ref, b2_ref, mid_ref, p1_ref, p2_ref,
           Ho, Wo, stride):
    """conv1(stride)+bn1+relu -> conv2(1)+bn2. Returns (Ho*Wo, Cout) float32."""
    Cout = w2_ref.shape[-1]

    out1 = _conv3x3_im2col(xp_ref, p1_ref, w1_ref, Ho, Wo, stride)
    out1 = jnp.maximum(out1 + b1_ref[...], 0.0)          # folded bn1 + relu

    # conv2 needs a zero-padded copy of out1; zero only the 1-px halo frame
    # (the interior is fully overwritten right below, every grid step, so this
    # is safe under "parallel" grid semantics without any pl.when guard).
    zrow = jnp.zeros((1, Wo + 2, Cout), mid_ref.dtype)
    zcol = jnp.zeros((Ho + 2, 1, Cout), mid_ref.dtype)
    mid_ref[pl.ds(0, 1), :, :] = zrow
    mid_ref[pl.ds(Ho + 1, 1), :, :] = zrow
    mid_ref[:, pl.ds(0, 1), :] = zcol
    mid_ref[:, pl.ds(Wo + 1, 1), :] = zcol
    mid_ref[pl.ds(1, Ho), pl.ds(1, Wo), :] = (
        out1.reshape(Ho, Wo, Cout).astype(mid_ref.dtype))

    out2 = _conv3x3_im2col(mid_ref, p2_ref, w2_ref, Ho, Wo, 1)
    return out2 + b2_ref[...]                             # folded bn2


def _basic_block_proj_kernel(xp_ref, w1_ref, b1_ref, w2_ref, b2_ref,
                             wsc_ref, bsc_ref, o_ref,
                             mid_ref, p1_ref, p2_ref, *, stride):
    """BasicBlock with a projection (1x1 conv + BN) shortcut."""
    Ho, Wo, Cout = o_ref.shape
    Cin = xp_ref.shape[-1]

    out2 = _trunk(xp_ref, w1_ref, b1_ref, w2_ref, b2_ref,
                  mid_ref, p1_ref, p2_ref, Ho, Wo, stride)

    if stride == 1:
        xs = xp_ref[pl.ds(1, Ho), pl.ds(1, Wo), :]
    else:
        xs = xp_ref[pl.ds(1, Ho, stride), pl.ds(1, Wo, stride), :]
    sc = jnp.dot(xs.reshape(Ho * Wo, Cin), wsc_ref[...],
                 preferred_element_type=jnp.float32) + bsc_ref[...]

    o_ref[...] = (out2 + sc).reshape(Ho, Wo, Cout).astype(o_ref.dtype)


def _basic_block_ident_kernel(xp_ref, w1_ref, b1_ref, w2_ref, b2_ref, o_ref,
                              mid_ref, p1_ref, p2_ref):
    """BasicBlock with the identity shortcut (stride==1, Cin==Cout): no matmul."""
    Ho, Wo, Cout = o_ref.shape

    out2 = _trunk(xp_ref, w1_ref, b1_ref, w2_ref, b2_ref,
                  mid_ref, p1_ref, p2_ref, Ho, Wo, 1)

    sc = xp_ref[pl.ds(1, Ho), pl.ds(1, Wo), :].astype(jnp.float32)
    o_ref[...] = (out2.reshape(Ho, Wo, Cout) + sc).astype(o_ref.dtype)


def basic_block_forward(x_nchw, params, stride=1):
    """Runs the BasicBlock forward (NCHW in / NCHW out) via the Pallas kernel."""
    N, Cin, H, W = x_nchw.shape
    Cout = params["w1"].shape[0]
    Ho = (H - 1) // stride + 1
    Wo = (W - 1) // stride + 1
    Hp, Wp = H + 2, W + 2

    # NHWC, zero-padded by 1 for the 3x3 convs; bf16 halves HBM->VMEM bytes.
    # TODO(synk): with an H row-band grid axis the halo rows could come from
    #             overlapping BlockSpec windows instead of a padded HBM copy.
    x_nhwc = jnp.transpose(x_nchw, (0, 2, 3, 1))
    x_pad = jnp.pad(x_nhwc, ((0, 0), (1, 1), (1, 1), (0, 0))).astype(jnp.bfloat16)

    def fold_bn(bn):
        gamma, beta, mean, var = bn
        scale = gamma / jnp.sqrt(var + EPS)
        shift = beta - mean * scale
        return scale, shift.reshape(1, -1).astype(jnp.float32)

    def fold_conv3x3(w_oihw, bn):
        # OIHW -> HWIO, fold BN scale into the weight, flatten to (9*Ci, Co)
        # in the same (kh, kw, ci) order the kernel builds its im2col columns.
        scale, shift = fold_bn(bn)
        w = jnp.transpose(w_oihw, (2, 3, 1, 0)) * scale[None, None, None, :]
        ci, co = w.shape[2], w.shape[3]
        return w.reshape(9 * ci, co).astype(jnp.bfloat16), shift

    w1, b1 = fold_conv3x3(params["w1"], params["bn1"])
    w2, b2 = fold_conv3x3(params["w2"], params["bn2"])

    has_proj = params.get("wsc") is not None
    operands = [x_pad, w1, b1, w2, b2]
    in_specs = [
        pl.BlockSpec((None, Hp, Wp, Cin), lambda n: (n, 0, 0, 0)),
        pl.BlockSpec((9 * Cin, Cout), lambda n: (0, 0)),
        pl.BlockSpec((1, Cout), lambda n: (0, 0)),
        pl.BlockSpec((9 * Cout, Cout), lambda n: (0, 0)),
        pl.BlockSpec((1, Cout), lambda n: (0, 0)),
    ]
    sc_flops = 0
    wsc_bytes = 0
    if has_proj:
        ssc, bsc = fold_bn(params["bnsc"])
        wsc = (params["wsc"][:, :, 0, 0].T * ssc[None, :]).astype(jnp.bfloat16)
        operands += [wsc, bsc]
        in_specs += [pl.BlockSpec((Cin, Cout), lambda n: (0, 0)),
                     pl.BlockSpec((1, Cout), lambda n: (0, 0))]
        kernel = functools.partial(_basic_block_proj_kernel, stride=stride)
        sc_flops = 2 * N * Ho * Wo * Cin * Cout
        wsc_bytes = wsc.size * 2 + bsc.size * 4
    else:
        if stride != 1 or Cin != Cout:
            raise ValueError(
                "identity shortcut requires stride == 1 and in_planes == out_planes")
        kernel = _basic_block_ident_kernel

    flops = 2 * N * Ho * Wo * 9 * Cout * (Cin + Cout) + sc_flops
    bytes_accessed = int(x_pad.size * 2 + (w1.size + w2.size) * 2
                         + (b1.size + b2.size) * 4 + wsc_bytes
                         + N * Ho * Wo * Cout * 4)

    out_nhwc = pl.pallas_call(
        kernel,
        out_shape=jax.ShapeDtypeStruct((N, Ho, Wo, Cout), jnp.float32),
        grid=(N,),
        in_specs=in_specs,
        # TODO(synk): Cout < 128 makes the output stores lane-sparse; for real
        #             ResNet channel counts pad C to 128 (or fold W onto lanes).
        out_specs=pl.BlockSpec((None, Ho, Wo, Cout), lambda n: (n, 0, 0, 0)),
        scratch_shapes=[
            pltpu.VMEM((Ho + 2, Wo + 2, Cout), jnp.float32),   # padded conv2 input
            pltpu.VMEM((Ho * Wo, 9 * Cin), jnp.float32),       # im2col buf, conv1
            pltpu.VMEM((Ho * Wo, 9 * Cout), jnp.float32),      # im2col buf, conv2
        ],
        compiler_params=pltpu.CompilerParams(
            dimension_semantics=("parallel",),      # batch over TCs (v7x megacore)
            vmem_limit_bytes=64 * 1024 * 1024),     # explicit cap (v7x = 64 MiB)
        cost_estimate=pl.CostEstimate(flops=flops, transcendentals=0,
                                      bytes_accessed=bytes_accessed),
    )(*operands)

    return jnp.transpose(out_nhwc, (0, 3, 1, 2))


def basic_block_reference(x, params, stride=1):
    """Pure-JAX reference matching the PyTorch module (eval-mode BN)."""
    def conv(x, w, s, pad):
        return jax.lax.conv_general_dilated(
            x, w, window_strides=(s, s), padding=((pad, pad), (pad, pad)),
            dimension_numbers=("NCHW", "OIHW", "NCHW"))

    def bn(x, bnp):
        gamma, beta, mean, var = bnp
        inv = gamma / jnp.sqrt(var + EPS)
        return ((x - mean[None, :, None, None]) * inv[None, :, None, None]
                + beta[None, :, None, None])

    out = jax.nn.relu(bn(conv(x, params["w1"], stride, 1), params["bn1"]))
    out = bn(conv(out, params["w2"], 1, 1), params["bn2"])
    if params.get("wsc") is not None:
        sc = bn(conv(x, params["wsc"], stride, 0), params["bnsc"])
    else:
        sc = x
    return out + sc


if __name__ == "__main__":
    def bn_init(keys, c):
        kg, kb, km, kv = keys
        return (1.0 + 0.1 * jax.random.normal(kg, (c,), jnp.float32),   # gamma
                0.1 * jax.random.normal(kb, (c,), jnp.float32),          # beta
                0.1 * jax.random.normal(km, (c,), jnp.float32),          # running_mean
                jax.random.uniform(kv, (c,), jnp.float32, 0.5, 1.5))     # running_var

    key = jax.random.PRNGKey(0)
    configs = [
        # (name, N, Cin, Cout, H, W, stride)
        ("projection_shortcut", 2, 4, 8, 16, 16, 1),   # Cin != Cout -> 1x1 conv + BN
        ("identity_shortcut",   2, 8, 8, 16, 16, 1),   # nn.Sequential() shortcut
    ]

    for name, N, Cin, Cout, H, W, stride in configs:
        key, *ks = jax.random.split(key, 17)
        params = {
            "w1": 0.1 * jax.random.normal(ks[0], (Cout, Cin, 3, 3), jnp.float32),
            "bn1": bn_init(ks[1:5], Cout),
            "w2": 0.1 * jax.random.normal(ks[5], (Cout, Cout, 3, 3), jnp.float32),
            "bn2": bn_init(ks[6:10], Cout),
        }
        if stride != 1 or Cin != Cout:
            params["wsc"] = 0.1 * jax.random.normal(ks[10], (Cout, Cin, 1, 1),
                                                    jnp.float32)
            params["bnsc"] = bn_init(ks[11:15], Cout)
        else:
            params["wsc"] = None
            params["bnsc"] = None
        x = jax.random.normal(ks[15], (N, Cin, H, W), jnp.float32)

        out = jax.block_until_ready(basic_block_forward(x, params, stride))
        ref = jax.block_until_ready(basic_block_reference(x, params, stride))

        Ho = (H - 1) // stride + 1
        Wo = (W - 1) // stride + 1
        assert out.shape == ref.shape == (N, Cout, Ho, Wo), (name, out.shape)
        max_err = float(jnp.max(jnp.abs(out - ref)))
        # bf16 MXU inputs with f32 accumulation -> a few-percent tolerance.
        assert jnp.allclose(out, ref, atol=3e-2, rtol=3e-2), (name, max_err)

    print("KERNEL_OK")
</pallas_src>

<mosaic_0001>
module attributes {stable_mosaic.version = 11 : i64} {
  func.func @_basic_block_proj_kernel(%arg0: i32, %arg1: memref<1x18x18x4xbf16, #tpu.memory_space<vmem>>, %arg2: memref<36x8xbf16, #tpu.memory_space<vmem>>, %arg3: memref<1x8xf32, #tpu.memory_space<vmem>>, %arg4: memref<72x8xbf16, #tpu.memory_space<vmem>>, %arg5: memref<1x8xf32, #tpu.memory_space<vmem>>, %arg6: memref<4x8xbf16, #tpu.memory_space<vmem>>, %arg7: memref<1x8xf32, #tpu.memory_space<vmem>>, %arg8: memref<1x16x16x8xf32, #tpu.memory_space<vmem>>, %arg9: memref<18x18x8xf32, #tpu.memory_space<vmem>>, %arg10: memref<256x36xf32, #tpu.memory_space<vmem>>, %arg11: memref<256x72xf32, #tpu.memory_space<vmem>>) attributes {dimension_semantics = [#tpu.dimension_semantics<parallel>], iteration_bounds = array<i64: 2>, scalar_prefetch = 0 : i64, scratch_operands = 3 : i64, tpu.core_type = #tpu.core_type<tc>, window_params = [{transform_indices = @transform_0, window_bounds = array<i64: 1, 18, 18, 4>}, {pipeline_mode = #tpu.pipeline_mode<synchronous>, transform_indices = @transform_1, window_bounds = array<i64: 36, 8>}, {pipeline_mode = #tpu.pipeline_mode<synchronous>, transform_indices = @transform_2, window_bounds = array<i64: 1, 8>}, {pipeline_mode = #tpu.pipeline_mode<synchronous>, transform_indices = @transform_3, window_bounds = array<i64: 72, 8>}, {pipeline_mode = #tpu.pipeline_mode<synchronous>, transform_indices = @transform_4, window_bounds = array<i64: 1, 8>}, {pipeline_mode = #tpu.pipeline_mode<synchronous>, transform_indices = @transform_5, window_bounds = array<i64: 4, 8>}, {pipeline_mode = #tpu.pipeline_mode<synchronous>, transform_indices = @transform_6, window_bounds = array<i64: 1, 8>}, {transform_indices = @transform_7, window_bounds = array<i64: 1, 16, 16, 8>}]} {
    %c0 = arith.constant 0 : index
    %c0_0 = arith.constant 0 : index
    %c0_1 = arith.constant 0 : index
    %c0_2 = arith.constant 0 : index
    %0 = vector.load %arg1[%c0, %c0_0, %c0_1, %c0_2] : memref<1x18x18x4xbf16, #tpu.memory_space<vmem>>, vector<1x16x16x4xbf16>
    %1 = vector.shape_cast %0 : vector<1x16x16x4xbf16> to vector<16x16x4xbf16>
    %2 = vector.shape_cast %1 : vector<16x16x4xbf16> to vector<256x4xbf16>
    %3 = arith.extf %2 : vector<256x4xbf16> to vector<256x4xf32>
    %c0_3 = arith.constant 0 : index
    %c0_4 = arith.constant 0 : index
    %4 = vector.load %arg10[%c0_3, %c0_4] : memref<256x36xf32, #tpu.memory_space<vmem>>, vector<256x4xf32>
    tpu.vector_store %arg10[%c0_3, %c0_4], %3 {strides = array<i32>} : memref<256x36xf32, #tpu.memory_space<vmem>>, vector<256x4xf32>,
    %c0_5 = arith.constant 0 : index
    %c0_6 = arith.constant 0 : index
    %c1 = arith.constant 1 : index
    %c0_7 = arith.constant 0 : index
    %5 = vector.load %arg1[%c0_5, %c0_6, %c1, %c0_7] : memref<1x18x18x4xbf16, #tpu.memory_space<vmem>>, vector<1x16x16x4xbf16>
    %6 = vector.shape_cast %5 : vector<1x16x16x4xbf16> to vector<16x16x4xbf16>
    %7 = vector.shape_cast %6 : vector<16x16x4xbf16> to vector<256x4xbf16>
    %8 = arith.extf %7 : vector<256x4xbf16> to vector<256x4xf32>
    %c0_8 = arith.constant 0 : index
    %c4 = arith.constant 4 : index
    %9 = vector.load %arg10[%c0_8, %c4] : memref<256x36xf32, #tpu.memory_space<vmem>>, vector<256x4xf32>
    tpu.vector_store %arg10[%c0_8, %c4], %8 {strides = array<i32>} : memref<256x36xf32, #tpu.memory_space<vmem>>, vector<256x4xf32>,
    %c0_9 = arith.constant 0 : index
    %c0_10 = arith.constant 0 : index
    %c2 = arith.constant 2 : index
    %c0_11 = arith.constant 0 : index
    %10 = vector.load %arg1[%c0_9, %c0_10, %c2, %c0_11] : memref<1x18x18x4xbf16, #tpu.memory_space<vmem>>, vector<1x16x16x4xbf16>
    %11 = vector.shape_cast %10 : vector<1x16x16x4xbf16> to vector<16x16x4xbf16>
    %12 = vector.shape_cast %11 : vector<16x16x4xbf16> to vector<256x4xbf16>
    %13 = arith.extf %12 : vector<256x4xbf16> to vector<256x4xf32>
    %c0_12 = arith.constant 0 : index
    %c8 = arith.constant 8 : index
    %14 = vector.load %arg10[%c0_12, %c8] : memref<256x36xf32, #tpu.memory_space<vmem>>, vector<256x4xf32>
    tpu.vector_store %arg10[%c0_12, %c8], %13 {strides = array<i32>} : memref<256x36xf32, #tpu.memory_space<vmem>>, vector<256x4xf32>,
    %c0_13 = arith.constant 0 : index
    %c1_14 = arith.constant 1 : index
    %c0_15 = arith.constant 0 : index
    %c0_16 = arith.constant 0 : index
    %15 = vector.load %arg1[%c0_13, %c1_14, %c0_15, %c0_16] : memref<1x18x18x4xbf16, #tpu.memory_space<vmem>>, vector<1x16x16x4xbf16>
    %16 = vector.shape_cast %15 : vector<1x16x16x4xbf16> to vector<16x16x4xbf16>
    %17 = vector.shape_cast %16 : vector<16x16x4xbf16> to vector<256x4xbf16>
    %18 = arith.extf %17 : vector<256x4xbf16> to vector<256x4xf32>
    %c0_17 = arith.constant 0 : index
    %c12 = arith.constant 12 : index
    %19 = vector.load %arg10[%c0_17, %c12] : memref<256x36xf32, #tpu.memory_space<vmem>>, vector<256x4xf32>
    tpu.vector_store %arg10[%c0_17, %c12], %18 {strides = array<i32>} : memref<256x36xf32, #tpu.memory_space<vmem>>, vector<256x4xf32>,
    %c0_18 = arith.constant 0 : index
    %c1_19 = arith.constant 1 : index
    %c1_20 = arith.constant 1 : index
    %c0_21 = arith.constant 0 : index
    %20 = vector.load %arg1[%c0_18, %c1_19, %c1_20, %c0_21] : memref<1x18x18x4xbf16, #tpu.memory_space<vmem>>, vector<1x16x16x4xbf16>
    %21 = vector.shape_cast %20 : vector<1x16x16x4xbf16> to vector<16x16x4xbf16>
    %22 = vector.shape_cast %21 : vector<16x16x4xbf16> to vector<256x4xbf16>
    %23 = arith.extf %22 : vector<256x4xbf16> to vector<256x4xf32>
    %c0_22 = arith.constant 0 : index
    %c16 = arith.constant 16 : index
    %24 = vector.load %arg10[%c0_22, %c16] : memref<256x36xf32, #tpu.memory_space<vmem>>, vector<256x4xf32>
    tpu.vector_store %arg10[%c0_22, %c16], %23 {strides = array<i32>} : memref<256x36xf32, #tpu.memory_space<vmem>>, vector<256x4xf32>,
    %c0_23 = arith.constant 0 : index
    %c1_24 = arith.constant 1 : index
    %c2_25 = arith.constant 2 : index
    %c0_26 = arith.constant 0 : index
    %25 = vector.load %arg1[%c0_23, %c1_24, %c2_25, %c0_26] : memref<1x18x18x4xbf16, #tpu.memory_space<vmem>>, vector<1x16x16x4xbf16>
    %26 = vector.shape_cast %25 : vector<1x16x16x4xbf16> to vector<16x16x4xbf16>
    %27 = vector.shape_cast %26 : vector<16x16x4xbf16> to vector<256x4xbf16>
    %28 = arith.extf %27 : vector<256x4xbf16> to vector<256x4xf32>
    %c0_27 = arith.constant 0 : index
    %c20 = arith.constant 20 : index
    %29 = vector.load %arg10[%c0_27, %c20] : memref<256x36xf32, #tpu.memory_space<vmem>>, vector<256x4xf32>
    tpu.vector_store %arg10[%c0_27, %c20], %28 {strides = array<i32>} : memref<256x36xf32, #tpu.memory_space<vmem>>, vector<256x4xf32>,
    %c0_28 = arith.constant 0 : index
    %c2_29 = arith.constant 2 : index
    %c0_30 = arith.constant 0 : index
    %c0_31 = arith.constant 0 : index
    %30 = vector.load %arg1[%c0_28, %c2_29, %c0_30, %c0_31] : memref<1x18x18x4xbf16, #tpu.memory_space<vmem>>, vector<1x16x16x4xbf16>
    %31 = vector.shape_cast %30 : vector<1x16x16x4xbf16> to vector<16x16x4xbf16>
    %32 = vector.shape_cast %31 : vector<16x16x4xbf16> to vector<256x4xbf16>
    %33 = arith.extf %32 : vector<256x4xbf16> to vector<256x4xf32>
    %c0_32 = arith.constant 0 : index
    %c24 = arith.constant 24 : index
    %34 = vector.load %arg10[%c0_32, %c24] : memref<256x36xf32, #tpu.memory_space<vmem>>, vector<256x4xf32>
    tpu.vector_store %arg10[%c0_32, %c24], %33 {strides = array<i32>} : memref<256x36xf32, #tpu.memory_space<vmem>>, vector<256x4xf32>,
    %c0_33 = arith.constant 0 : index
    %c2_34 = arith.constant 2 : index
    %c1_35 = arith.constant 1 : index
    %c0_36 = arith.constant 0 : index
    %35 = vector.load %arg1[%c0_33, %c2_34, %c1_35, %c0_36] : memref<1x18x18x4xbf16, #tpu.memory_space<vmem>>, vector<1x16x16x4xbf16>
    %36 = vector.shape_cast %35 : vector<1x16x16x4xbf16> to vector<16x16x4xbf16>
    %37 = vector.shape_cast %36 : vector<16x16x4xbf16> to vector<256x4xbf16>
    %38 = arith.extf %37 : vector<256x4xbf16> to vector<256x4xf32>
    %c0_37 = arith.constant 0 : index
    %c28 = arith.constant 28 : index
    %39 = vector.load %arg10[%c0_37, %c28] : memref<256x36xf32, #tpu.memory_space<vmem>>, vector<256x4xf32>
    tpu.vector_store %arg10[%c0_37, %c28], %38 {strides = array<i32>} : memref<256x36xf32, #tpu.memory_space<vmem>>, vector<256x4xf32>,
    %c0_38 = arith.constant 0 : index
    %c2_39 = arith.constant 2 : index
    %c2_40 = arith.constant 2 : index
    %c0_41 = arith.constant 0 : index
    %40 = vector.load %arg1[%c0_38, %c2_39, %c2_40, %c0_41] : memref<1x18x18x4xbf16, #tpu.memory_space<vmem>>, vector<1x16x16x4xbf16>
    %41 = vector.shape_cast %40 : vector<1x16x16x4xbf16> to vector<16x16x4xbf16>
    %42 = vector.shape_cast %41 : vector<16x16x4xbf16> to vector<256x4xbf16>
    %43 = arith.extf %42 : vector<256x4xbf16> to vector<256x4xf32>
    %c0_42 = arith.constant 0 : index
    %c32 = arith.constant 32 : index
    %44 = vector.load %arg10[%c0_42, %c32] : memref<256x36xf32, #tpu.memory_space<vmem>>, vector<256x4xf32>
    tpu.vector_store %arg10[%c0_42, %c32], %43 {strides = array<i32>} : memref<256x36xf32, #tpu.memory_space<vmem>>, vector<256x4xf32>,
    %c0_43 = arith.constant 0 : index
    %c0_44 = arith.constant 0 : index
    %45 = vector.load %arg10[%c0_43, %c0_44] : memref<256x36xf32, #tpu.memory_space<vmem>>, vector<256x36xf32>
    %46 = arith.truncf %45 : vector<256x36xf32> to vector<256x36xbf16>
    %c0_45 = arith.constant 0 : index
    %c0_46 = arith.constant 0 : index
    %47 = vector.load %arg2[%c0_45, %c0_46] : memref<36x8xbf16, #tpu.memory_space<vmem>>, vector<36x8xbf16>
    %cst = arith.constant dense<0.000000e+00> : vector<256x8xf32>
    %48 = tpu.matmul %46, %47, %cst {dimension_numbers = #tpu.dot_dimension_numbers<[1], [0], [0], [1], [0, 0, 1, 1], [], []>} : vector<256x36xbf16>, vector<36x8xbf16>, vector<256x8xf32> -> vector<256x8xf32>
    %c0_47 = arith.constant 0 : index
    %c0_48 = arith.constant 0 : index
    %49 = vector.load %arg3[%c0_47, %c0_48] : memref<1x8xf32, #tpu.memory_space<vmem>>, vector<1x8xf32>
    %50 = vector.broadcast %49 : vector<1x8xf32> to vector<256x8xf32>
    %51 = arith.addf %48, %50 : vector<256x8xf32>
    %cst_49 = arith.constant 0.000000e+00 : f32
    %52 = vector.broadcast %cst_49 : f32 to vector<256x8xf32>
    %53 = arith.maximumf %51, %52 : vector<256x8xf32>
    %cst_50 = arith.constant 0.000000e+00 : f32
    %54 = vector.broadcast %cst_50 : f32 to vector<1x18x8xf32>
    %cst_51 = arith.constant 0.000000e+00 : f32
    %55 = vector.broadcast %cst_51 : f32 to vector<18x1x8xf32>
    %c0_52 = arith.constant 0 : index
    %c0_53 = arith.constant 0 : index
    %c0_54 = arith.constant 0 : index
    %56 = vector.load %arg9[%c0_52, %c0_53, %c0_54] : memref<18x18x8xf32, #tpu.memory_space<vmem>>, vector<1x18x8xf32>
    tpu.vector_store %arg9[%c0_52, %c0_53, %c0_54], %54 {strides = array<i32>} : memref<18x18x8xf32, #tpu.memory_space<vmem>>, vector<1x18x8xf32>,
    %c17 = arith.constant 17 : index
    %c0_55 = arith.constant 0 : index
    %c0_56 = arith.constant 0 : index
    %57 = vector.load %arg9[%c17, %c0_55, %c0_56] : memref<18x18x8xf32, #tpu.memory_space<vmem>>, vector<1x18x8xf32>
    tpu.vector_store %arg9[%c17, %c0_55, %c0_56], %54 {strides = array<i32>} : memref<18x18x8xf32, #tpu.memory_space<vmem>>, vector<1x18x8xf32>,
    %c0_57 = arith.constant 0 : index
    %c0_58 = arith.constant 0 : index
    %c0_59 = arith.constant 0 : index
    %58 = vector.load %arg9[%c0_57, %c0_58, %c0_59] : memref<18x18x8xf32, #tpu.memory_space<vmem>>, vector<18x1x8xf32>
    tpu.vector_store %arg9[%c0_57, %c0_58, %c0_59], %55 {strides = array<i32>} : memref<18x18x8xf32, #tpu.memory_space<vmem>>, vector<18x1x8xf32>,
    %c0_60 = arith.constant 0 : index
    %c17_61 = arith.constant 17 : index
    %c0_62 = arith.constant 0 : index
    %59 = vector.load %arg9[%c0_60, %c17_61, %c0_62] : memref<18x18x8xf32, #tpu.memory_space<vmem>>, vector<18x1x8xf32>
    tpu.vector_store %arg9[%c0_60, %c17_61, %c0_62], %55 {strides = array<i32>} : memref<18x18x8xf32, #tpu.memory_space<vmem>>, vector<18x1x8xf32>,
    %60 = vector.shape_cast %53 : vector<256x8xf32> to vector<16x16x8xf32>
    %c1_63 = arith.constant 1 : index
    %c1_64 = arith.constant 1 : index
    %c0_65 = arith.constant 0 : index
    %61 = vector.load %arg9[%c1_63, %c1_64, %c0_65] : memref<18x18x8xf32, #tpu.memory_space<vmem>>, vector<16x16x8xf32>
    tpu.vector_store %arg9[%c1_63, %c1_64, %c0_65], %60 {strides = array<i32>} : memref<18x18x8xf32, #tpu.memory_space<vmem>>, vector<16x16x8xf32>,
    %c0_66 = arith.constant 0 : index
    %c0_67 = arith.constant 0 : index
    %c0_68 = arith.constant 0 : index
    %62 = vector.load %arg9[%c0_66, %c0_67, %c0_68] : memref<18x18x8xf32, #tpu.memory_space<vmem>>, vector<16x16x8xf32>
    %63 = vector.shape_cast %62 : vector<16x16x8xf32> to vector<256x8xf32>
    %c0_69 = arith.constant 0 : index
    %c0_70 = arith.constant 0 : index
    %64 = vector.load %arg11[%c0_69, %c0_70] : memref<256x72xf32, #tpu.memory_space<vmem>>, vector<256x8xf32>
    tpu.vector_store %arg11[%c0_69, %c0_70], %63 {strides = array<i32>} : memref<256x72xf32, #tpu.memory_space<vmem>>, vector<256x8xf32>,
    %c0_71 = arith.constant 0 : index
    %c1_72 = arith.constant 1 : index
    %c0_73 = arith.constant 0 : index
    %65 = vector.load %arg9[%c0_71, %c1_72, %c0_73] : memref<18x18x8xf32, #tpu.memory_space<vmem>>, vector<16x16x8xf32>
    %66 = vector.shape_cast %65 : vector<16x16x8xf32> to vector<256x8xf32>
    %c0_74 = arith.constant 0 : index
    %c8_75 = arith.constant 8 : index
    %67 = vector.load %arg11[%c0_74, %c8_75] : memref<256x72xf32, #tpu.memory_space<vmem>>, vector<256x8xf32>
    tpu.vector_store %arg11[%c0_74, %c8_75], %66 {strides = array<i32>} : memref<256x72xf32, #tpu.memory_space<vmem>>, vector<256x8xf32>,
    %c0_76 = arith.constant 0 : index
    %c2_77 = arith.constant 2 : index
    %c0_78 = arith.constant 0 : index
    %68 = vector.load %arg9[%c0_76, %c2_77, %c0_78] : memref<18x18x8xf32, #tpu.memory_space<vmem>>, vector<16x16x8xf32>
    %69 = vector.shape_cast %68 : vector<16x16x8xf32> to vector<256x8xf32>
    %c0_79 = arith.constant 0 : index
    %c16_80 = arith.constant 16 : index
    %70 = vector.load %arg11[%c0_79, %c16_80] : memref<256x72xf32, #tpu.memory_space<vmem>>, vector<256x8xf32>
    tpu.vector_store %arg11[%c0_79, %c16_80], %69 {strides = array<i32>} : memref<256x72xf32, #tpu.memory_space<vmem>>, vector<256x8xf32>,
    %c1_81 = arith.constant 1 : index
    %c0_82 = arith.constant 0 : index
    %c0_83 = arith.constant 0 : index
    %71 = vector.load %arg9[%c1_81, %c0_82, %c0_83] : memref<18x18x8xf32, #tpu.memory_space<vmem>>, vector<16x16x8xf32>
    %72 = vector.shape_cast %71 : vector<16x16x8xf32> to vector<256x8xf32>
    %c0_84 = arith.constant 0 : index
    %c24_85 = arith.constant 24 : index
    %73 = vector.load %arg11[%c0_84, %c24_85] : memref<256x72xf32, #tpu.memory_space<vmem>>, vector<256x8xf32>
    tpu.vector_store %arg11[%c0_84, %c24_85], %72 {strides = array<i32>} : memref<256x72xf32, #tpu.memory_space<vmem>>, vector<256x8xf32>,
    %c1_86 = arith.constant 1 : index
    %c1_87 = arith.constant 1 : index
    %c0_88 = arith.constant 0 : index
    %74 = vector.load %arg9[%c1_86, %c1_87, %c0_88] : memref<18x18x8xf32, #tpu.memory_space<vmem>>, vector<16x16x8xf32>
    %75 = vector.shape_cast %74 : vector<16x16x8xf32> to vector<256x8xf32>
    %c0_89 = arith.constant 0 : index
    %c32_90 = arith.constant 32 : index
    %76 = vector.load %arg11[%c0_89, %c32_90] : memref<256x72xf32, #tpu.memory_space<vmem>>, vector<256x8xf32>
    tpu.vector_store %arg11[%c0_89, %c32_90], %75 {strides = array<i32>} : memref<256x72xf32, #tpu.memory_space<vmem>>, vector<256x8xf32>,
    %c1_91 = arith.constant 1 : index
    %c2_92 = arith.constant 2 : index
    %c0_93 = arith.constant 0 : index
    %77 = vector.load %arg9[%c1_91, %c2_92, %c0_93] : memref<18x18x8xf32, #tpu.memory_space<vmem>>, vector<16x16x8xf32>
    %78 = vector.shape_cast %77 : vector<16x16x8xf32> to vector<256x8xf32>
    %c0_94 = arith.constant 0 : index
    %c40 = arith.constant 40 : index
    %79 = vector.load %arg11[%c0_94, %c40] : memref<256x72xf32, #tpu.memory_space<vmem>>, vector<256x8xf32>
    tpu.vector_store %arg11[%c0_94, %c40], %78 {strides = array<i32>} : memref<256x72xf32, #tpu.memory_space<vmem>>, vector<256x8xf32>,
    %c2_95 = arith.constant 2 : index
    %c0_96 = arith.constant 0 : index
    %c0_97 = arith.constant 0 : index
    %80 = vector.load %arg9[%c2_95, %c0_96, %c0_97] : memref<18x18x8xf32, #tpu.memory_space<vmem>>, vector<16x16x8xf32>
    %81 = vector.shape_cast %80 : vector<16x16x8xf32> to vector<256x8xf32>
    %c0_98 = arith.constant 0 : index
    %c48 = arith.constant 48 : index
    %82 = vector.load %arg11[%c0_98, %c48] : memref<256x72xf32, #tpu.memory_space<vmem>>, vector<256x8xf32>
    tpu.vector_store %arg11[%c0_98, %c48], %81 {strides = array<i32>} : memref<256x72xf32, #tpu.memory_space<vmem>>, vector<256x8xf32>,
    %c2_99 = arith.constant 2 : index
    %c1_100 = arith.constant 1 : index
    %c0_101 = arith.constant 0 : index
    %83 = vector.load %arg9[%c2_99, %c1_100, %c0_101] : memref<18x18x8xf32, #tpu.memory_space<vmem>>, vector<16x16x8xf32>
    %84 = vector.shape_cast %83 : vector<16x16x8xf32> to vector<256x8xf32>
    %c0_102 = arith.constant 0 : index
    %c56 = arith.constant 56 : index
    %85 = vector.load %arg11[%c0_102, %c56] : memref<256x72xf32, #tpu.memory_space<vmem>>, vector<256x8xf32>
    tpu.vector_store %arg11[%c0_102, %c56], %84 {strides = array<i32>} : memref<256x72xf32, #tpu.memory_space<vmem>>, vector<256x8xf32>,
    %c2_103 = arith.constant 2 : index
    %c2_104 = arith.constant 2 : index
    %c0_105 = arith.constant 0 : index
    %86 = vector.load %arg9[%c2_103, %c2_104, %c0_105] : memref<18x18x8xf32, #tpu.memory_space<vmem>>, vector<16x16x8xf32>
    %87 = vector.shape_cast %86 : vector<16x16x8xf32> to vector<256x8xf32>
    %c0_106 = arith.constant 0 : index
    %c64 = arith.constant 64 : index
    %88 = vector.load %arg11[%c0_106, %c64] : memref<256x72xf32, #tpu.memory_space<vmem>>, vector<256x8xf32>
    tpu.vector_store %arg11[%c0_106, %c64], %87 {strides = array<i32>} : memref<256x72xf32, #tpu.memory_space<vmem>>, vector<256x8xf32>,
    %c0_107 = arith.constant 0 : index
    %c0_108 = arith.constant 0 : index
    %89 = vector.load %arg11[%c0_107, %c0_108] : memref<256x72xf32, #tpu.memory_space<vmem>>, vector<256x72xf32>
    %90 = arith.truncf %89 : vector<256x72xf32> to vector<256x72xbf16>
    %c0_109 = arith.constant 0 : index
    %c0_110 = arith.constant 0 : index
    %91 = vector.load %arg4[%c0_109, %c0_110] : memref<72x8xbf16, #tpu.memory_space<vmem>>, vector<72x8xbf16>
    %cst_111 = arith.constant dense<0.000000e+00> : vector<256x8xf32>
    %92 = tpu.matmul %90, %91, %cst_111 {dimension_numbers = #tpu.dot_dimension_numbers<[1], [0], [0], [1], [0, 0, 1, 1], [], []>} : vector<256x72xbf16>, vector<72x8xbf16>, vector<256x8xf32> -> vector<256x8xf32>
    %c0_112 = arith.constant 0 : index
    %c0_113 = arith.constant 0 : index
    %93 = vector.load %arg5[%c0_112, %c0_113] : memref<1x8xf32, #tpu.memory_space<vmem>>, vector<1x8xf32>
    %94 = vector.broadcast %93 : vector<1x8xf32> to vector<256x8xf32>
    %95 = arith.addf %92, %94 : vector<256x8xf32>
    %c0_114 = arith.constant 0 : index
    %c1_115 = arith.constant 1 : index
    %c1_116 = arith.constant 1 : index
    %c0_117 = arith.constant 0 : index
    %96 = vector.load %arg1[%c0_114, %c1_115, %c1_116, %c0_117] : memref<1x18x18x4xbf16, #tpu.memory_space<vmem>>, vector<1x16x16x4xbf16>
    %97 = vector.shape_cast %96 : vector<1x16x16x4xbf16> to vector<16x16x4xbf16>
    %98 = vector.shape_cast %97 : vector<16x16x4xbf16> to vector<256x4xbf16>
    %c0_118 = arith.constant 0 : index
    %c0_119 = arith.constant 0 : index
    %99 = vector.load %arg6[%c0_118, %c0_119] : memref<4x8xbf16, #tpu.memory_space<vmem>>, vector<4x8xbf16>
    %cst_120 = arith.constant dense<0.000000e+00> : vector<256x8xf32>
    %100 = tpu.matmul %98, %99, %cst_120 {dimension_numbers = #tpu.dot_dimension_numbers<[1], [0], [0], [1], [0, 0, 1, 1], [], []>} : vector<256x4xbf16>, vector<4x8xbf16>, vector<256x8xf32> -> vector<256x8xf32>
    %c0_121 = arith.constant 0 : index
    %c0_122 = arith.constant 0 : index
    %101 = vector.load %arg7[%c0_121, %c0_122] : memref<1x8xf32, #tpu.memory_space<vmem>>, vector<1x8xf32>
    %102 = vector.broadcast %101 : vector<1x8xf32> to vector<256x8xf32>
    %103 = arith.addf %100, %102 : vector<256x8xf32>
    %104 = arith.addf %95, %103 : vector<256x8xf32>
    %105 = vector.shape_cast %104 : vector<256x8xf32> to vector<16x16x8xf32>
    %c0_123 = arith.constant 0 : index
    %c0_124 = arith.constant 0 : index
    %c0_125 = arith.constant 0 : index
    %c0_126 = arith.constant 0 : index
    %106 = vector.load %arg8[%c0_123, %c0_124, %c0_125, %c0_126] : memref<1x16x16x8xf32, #tpu.memory_space<vmem>>, vector<1x16x16x8xf32>
    %107 = vector.shape_cast %106 : vector<1x16x16x8xf32> to vector<16x16x8xf32>
    %108 = vector.shape_cast %105 : vector<16x16x8xf32> to vector<1x16x16x8xf32>
    tpu.vector_store %arg8[%c0_123, %c0_124, %c0_125, %c0_126], %108 {strides = array<i32>} : memref<1x16x16x8xf32, #tpu.memory_space<vmem>>, vector<1x16x16x8xf32>,
    return
  }
  func.func @transform_0(%arg0: i32) -> (i32, i32, i32, i32) {
    %c0_i32 = arith.constant 0 : i32
    %c0_i32_0 = arith.constant 0 : i32
    %c0_i32_1 = arith.constant 0 : i32
    %c0_i32_2 = arith.constant 0 : i32
    return %arg0, %c0_i32, %c0_i32_0, %c0_i32_1 : i32, i32, i32, i32
  }
  func.func @transform_1(%arg0: i32) -> (i32, i32) {
    %c0_i32 = arith.constant 0 : i32
    %c0_i32_0 = arith.constant 0 : i32
    %c0_i32_1 = arith.constant 0 : i32
    return %c0_i32, %c0_i32_0 : i32, i32
  }
  func.func @transform_2(%arg0: i32) -> (i32, i32) {
    %c0_i32 = arith.constant 0 : i32
    %c0_i32_0 = arith.constant 0 : i32
    %c0_i32_1 = arith.constant 0 : i32
    return %c0_i32, %c0_i32_0 : i32, i32
  }
  func.func @transform_3(%arg0: i32) -> (i32, i32) {
    %c0_i32 = arith.constant 0 : i32
    %c0_i32_0 = arith.constant 0 : i32
    %c0_i32_1 = arith.constant 0 : i32
    return %c0_i32, %c0_i32_0 : i32, i32
  }
  func.func @transform_4(%arg0: i32) -> (i32, i32) {
    %c0_i32 = arith.constant 0 : i32
    %c0_i32_0 = arith.constant 0 : i32
    %c0_i32_1 = arith.constant 0 : i32
    return %c0_i32, %c0_i32_0 : i32, i32
  }
  func.func @transform_5(%arg0: i32) -> (i32, i32) {
    %c0_i32 = arith.constant 0 : i32
    %c0_i32_0 = arith.constant 0 : i32
    %c0_i32_1 = arith.constant 0 : i32
    return %c0_i32, %c0_i32_0 : i32, i32
  }
  func.func @transform_6(%arg0: i32) -> (i32, i32) {
    %c0_i32 = arith.constant 0 : i32
    %c0_i32_0 = arith.constant 0 : i32
    %c0_i32_1 = arith.constant 0 : i32
    return %c0_i32, %c0_i32_0 : i32, i32
  }
  func.func @transform_7(%arg0: i32) -> (i32, i32, i32, i32) {
    %c0_i32 = arith.constant 0 : i32
    %c0_i32_0 = arith.constant 0 : i32
    %c0_i32_1 = arith.constant 0 : i32
    %c0_i32_2 = arith.constant 0 : i32
    return %arg0, %c0_i32, %c0_i32_0, %c0_i32_1 : i32, i32, i32, i32
  }
}

</mosaic_0001>

<bundles_post_ra>
// kernel: tpu_custom_call.1
= control target key start
LH: loop header
LB: loop body
LE: loop exit
PB: predicated region body
PF: predicated region fallthrough
CT: control target
= control target key end

     0   :  { %s8308_s24 = smov 0   ;;  %s11212_s0 = inlined_call_operand.vmem [shape: bf16[2,18,18,4], index: 0, kind: input, shape index: {}]   ;;  %s11213_s1 = inlined_call_operand.vmem [shape: bf16[36,8], index: 1, kind: input, shape index: {}]   ;;  %s11214_s2 = inlined_call_operand.vmem [shape: f32[1,8], index: 2, kind: input, shape index: {}]   ;;  %s11215_s3 = inlined_call_operand.vmem [shape: bf16[72,8], index: 3, kind: input, shape index: {}]   ;;  %s11216_s4 = inlined_call_operand.vmem [shape: f32[1,8], index: 4, kind: input, shape index: {}]   ;;  %s11217_s5 = inlined_call_operand.vmem [shape: bf16[4,8], index: 5, kind: input, shape index: {}]   ;;  %s11218_s6 = inlined_call_operand.vmem [shape: f32[1,8], index: 6, kind: input, shape index: {}]   ;;  %s11219_s7 = inlined_call_operand.vmem [shape: f32[2,16,16,8], index: 7, kind: output, shape index: {}]  }
   0x1 LB: > { %s7013_s25 = sadd.s32 4294967295, %s8253_s24   ;;  %p7017_p0 = scmp.ge.s32.totalorder %s8253_s24, 1  ;;  %s8253_s24 = sphi %s8308_s24, %s17_s24  }
   0x2   : > { %p237_p1 = scmp.lt.s32.totalorder %s8253_s24, 3 }
   0x4   : > { %p238_p2 = pnand %p7017_p0, %p237_p1 }
   0x6   : > { %241 = sbr.rel (%p238_p2) target bundleno = 1627 (0x65b), region = 48 }
   0xb   : > { %p269_p3 = scmp.lt.s32.totalorder %s7013_s25, 1  ;;  %vm425_vm0 = vsmask.f32 3328  ;;  %vm426_vm1 = vsmask.f32 7440  ;;  %v11227_v26 = vmov 0 }
   0xc   : > { %vm8334_vm2 = vmor %vm425_vm0, %vm426_vm1  ;;  %s8255_s30 = smov 4   ;;  %vm1133_vm3 = vcmask 1042432   ;;  %vm1134_vm4 = vcmask 1046532   ;;  %s8256_s8 = smov 8   ;;  %vm344_vm6 = vcmask 31744   ;;  %vm1004_vm7 = vcmask 64544  }
   0xd   : > { %s11242_s25 = smov (!%p269_p3, %s7013_s25), 1  ;;  %v11228_v26 = vsel %vm8334_vm2, 4294967295, %v11227_v26  ;;  %vm8403_vm5 = vmor %vm1133_vm3, %vm1134_vm4  ;;  %s8257_s9 = smov 12   ;;  %vm1440_vm8 = vcmask 97344   ;;  %vm1666_vm9 = vcmask 130144   ;;  %vm2323_vm10 = vcmask 162944  }
   0xe   : > { %s7582_s26 = smul.u32 216, %s11242_s25  ;;  %11229 = vst [vmem:[#allocation5_spill] sm:$0xff] %v11228_v26  ;;  %s8258_s10 = smov 16   ;;  %vm2756_vm11 = vcmask 195744   ;;  %vm2982_vm12 = vcmask 228544   ;;  %vm3639_vm13 = vcmask 261344  }
   0xf   : > { %s8259_s11 = smov 20   ;;  %s8260_s12 = smov 24   ;;  %vm4226_vm14 = vcmask 1041408   ;;  %vm4072_vm15 = vcmask 294144   ;;  %vm4177_vm0 = vcmask 293888   ;;  %vm4351_vm1 = vcmask 64512  }
  0x10   : > { %s8322_s29 = scalar_lea.vmem %s11212_s0, %s7582_s26  ;;  %s8261_s13 = smov 28   ;;  %vm4360_vm3 = vcmask 57344   ;;  %vm4354_vm4 = vcmask 58368  }
  0x11   : > { %v383_v0 = vld [vmem:[%s8322_s29 + $0x18] sm:$0xf]  ;;  %v384_v1 = vld [vmem:[%s8322_s29 + $0x1c] sm:$0xf]  ;;  %v385_v2 = vld [vmem:[%s8322_s29 + $0x20] sm:$0x1] }
  0x12   : > { %v477_v3 = vshrl.u32 %v383_v0, 16  ;;  %v480_v4 = vshll.u32 %v383_v0, 16  ;;  %v486_v5 = vshll.u32 %v384_v1, 16  ;;  %v490_v6 = vshrl.u32 %v384_v1, 16  ;;  %v386_v7 = vld [vmem:[%s8322_s29 + $0x24] sm:$0xf] }
  0x13   : > { %v496_v8 = vshll.u32 %v385_v2, 16  ;;  %v387_v9 = vld [vmem:[%s8322_s29 + $0x28] sm:$0xf]  ;;  %v388_v10 = vld [vmem:[%s8322_s29 + $0x2c] sm:$0x1]  ;;  %v501_v11 = vshrl.u32 %v386_v7, 16 }
  0x14   : > { %v479_v12 = vrot.slane %v477_v3, 4  ;;  %v482_v13 = vrot.slane %v480_v4, 5  ;;  %v488_v14 = vrot.slane %v486_v5, 5  ;;  %v492_v15 = vrot.slane %v490_v6, 4  ;;  %v398_v16 = vld [vmem:[%s8322_s29 + $0x54] sm:$0xf] }
  0x15   : > { %v498_v17 = vrot.slane %v496_v8, 5  ;;  %v503_v18 = vrot.slane %v501_v11, 4  ;;  %v504_v19 = vshll.u32 %v386_v7, 16  ;;  %v510_v20 = vshll.u32 %v387_v9, 16  ;;  %v399_v25 = vld [vmem:[%s8322_s29 + $0x58] sm:$0xf] }
  0x16   : > { %v483_v21 = vor.u32 %v482_v13, %v479_v12  ;;  %v493_v22 = vor.u32 %v492_v15, %v488_v14  ;;  %v514_v23 = vshrl.u32 %v387_v9, 16  ;;  %v520_v24 = vshll.u32 %v388_v10, 16  ;;  %v400_v36 = vld [vmem:[%s8322_s29 + $0x5c] sm:$0x1]  ;;  %v407_v44 = vld [vmem:[%s8322_s29 + $0x78] sm:$0xf] }
  0x17   : > { %v506_v27 = vrot.slane %v504_v19, 5  ;;  %v512_v28 = vrot.slane %v510_v20, 5  ;;  %v597_v29 = vshrl.u32 %v398_v16, 16  ;;  %v600_v30 = vshll.u32 %v398_v16, 16  ;;  %v408_v56 = vld [vmem:[%s8322_s29 + $0x7c] sm:$0xf] }
  0x18   : > { %v484_v31 = vrot.slane %v483_v21, 4  ;;  %v494_v32 = vrot.slane %v493_v22, 4  ;;  %v516_v33 = vrot.slane %v514_v23, 4  ;;  %v522_v34 = vrot.slane %v520_v24, 5  ;;  %v409_v62 = vld [vmem:[%s8322_s29 + $0x80] sm:$0x1] }
  0x19   : > { %v507_v35 = vor.u32 %v506_v27, %v503_v18  ;;  %v599_v37 = vrot.slane %v597_v29, 4  ;;  %v602_v38 = vrot.slane %v600_v30, 5  ;;  %v606_v39 = vshll.u32 %v399_v25, 16  ;;  %v377_v63 = vld [vmem:[%s8322_s29] sm:$0xf]  ;;  %s8262_s14 = smov 32  }
  0x1a   : > { %v489_v40 = vsel %vm8334_vm2, %v484_v31, %v488_v14  ;;  %v499_v41 = vsel %vm8334_vm2, %v494_v32, %v498_v17  ;;  %v517_v42 = vor.u32 %v516_v33, %v512_v28  ;;  %v610_v43 = vshrl.u32 %v399_v25, 16  ;;  %v378_v8 = vld [vmem:[%s8322_s29 + $0x4] sm:$0xf]  ;;  %v379_v12 = vld [vmem:[%s8322_s29 + $0x8] sm:$0x1]  ;;  %s8264_s23 = smov 40  }
  0x1b   : > { %v848_v45 = vunpack.c.l.bf16 %v489_v40  ;;  %v849_v46 = vunpack.c.l.bf16 %v499_v41  ;;  %v508_v47 = vrot.slane %v507_v35, 4  ;;  %v603_v48 = vor.u32 %v602_v38, %v599_v37  ;;  %v416_v18 = vld [vmem:[%s8322_s29 + $0x9c] sm:$0xf]  ;;  %v417_v31 = vld [vmem:[%s8322_s29 + $0xa0] sm:$0xf]  ;;  %s8265_s26 = smov 48  }
  0x1c   : > { %v518_v49 = vrot.slane %v517_v42, 4  ;;  %v608_v50 = vrot.slane %v606_v39, 5  ;;  %v612_v51 = vrot.slane %v610_v43, 4  ;;  %v616_v52 = vshll.u32 %v400_v36, 16  ;;  %v418_v37 = vld [vmem:[%s8322_s29 + $0xa4] sm:$0x1] }
  0x1d   : > { %v7614_v53 = vpack.i.bf16 %v849_v46, %v848_v45  ;;  %v513_v54 = vsel %vm8334_vm2, %v508_v47, %v512_v28  ;;  %v604_v55 = vrot.slane %v603_v48, 4  ;;  %v669_v57 = vshrl.u32 %v407_v44, 16  ;;  %v380_v42 = vld [vmem:[%s8322_s29 + $0xc] sm:$0xf]  ;;  %s8266_s27 = smov 56   ;;  %s7447_s28 = sshll.u32 %s11242_s25, 8 }
  0x1e   : > { %v523_v58 = vsel %vm8334_vm2, %v518_v49, %v522_v34  ;;  %v850_v59 = vunpack.c.l.bf16 %v513_v54  ;;  %v613_v60 = vor.u32 %v612_v51, %v608_v50  ;;  %v618_v61 = vrot.slane %v616_v52, 5  ;;  %v381_v54 = vld [vmem:[%s8322_s29 + $0x10] sm:$0xf] }
  0x1f   : > { %7615 = vrot.lane.b32.xlu1 %v7614_v53, %s8255_s30  ;;  %v851_v0 = vunpack.c.l.bf16 %v523_v58  ;;  %v609_v1 = vsel %vm8334_vm2, %v604_v55, %v608_v50  ;;  %v671_v2 = vrot.slane %v669_v57, 4  ;;  %v672_v3 = vshll.u32 %v407_v44, 16 }
  0x20   : > { %v614_v4 = vrot.slane %v613_v60, 4  ;;  %v8354_v5 = vunpack.c.l.bf16 %v609_v1  ;;  %v678_v6 = vshll.u32 %v408_v56, 16  ;;  %v682_v7 = vshrl.u32 %v408_v56, 16  ;;  %v382_v60 = vld [vmem:[%s8322_s29 + $0x14] sm:$0x1] }
  0x21   : > { %v7619_v9 = vpack.i.bf16 %v851_v0, %v850_v59  ;;  %v674_v10 = vrot.slane %v672_v3, 5  ;;  %v688_v11 = vshll.u32 %v409_v62, 16  ;;  %v429_v13 = vshrl.u32 %v377_v63, 16 }
  0x22   : > { %v619_v14 = vsel %vm8334_vm2, %v614_v4, %v618_v61  ;;  %v680_v15 = vrot.slane %v678_v6, 5  ;;  %v684_v16 = vrot.slane %v682_v7, 4  ;;  %v432_v17 = vshll.u32 %v377_v63, 16  ;;  %v389_v61 = vld [vmem:[%s8322_s29 + $0x30] sm:$0xf] }
  0x23   : > { %v859_v19 = vunpack.c.l.bf16 %v619_v14  ;;  %v675_v20 = vor.u32 %v674_v10, %v671_v2  ;;  %v690_v21 = vrot.slane %v688_v11, 5  ;;  %v431_v22 = vrot.slane %v429_v13, 4 }
  0x24   : > { %v685_v23 = vor.u32 %v684_v16, %v680_v15  ;;  %v434_v24 = vrot.slane %v432_v17, 5  ;;  %v438_v25 = vshll.u32 %v378_v8, 16  ;;  %v442_v27 = vshrl.u32 %v378_v8, 16 }
  0x25   : > { %v7639_v28 = vpack.i.bf16 %v859_v19, %v8354_v5  ;;  %v676_v29 = vrot.slane %v675_v20, 4  ;;  %v448_v30 = vshll.u32 %v379_v12, 16  ;;  %v741_v32 = vshrl.u32 %v416_v18, 16 }
  0x26   : > { %v686_v33 = vrot.slane %v685_v23, 4  ;;  %v435_v34 = vor.u32 %v434_v24, %v431_v22  ;;  %v440_v35 = vrot.slane %v438_v25, 5  ;;  %v444_v36 = vrot.slane %v442_v27, 4 }
  0x27   : > { %7620 = vrot.lane.b32.xlu1 %v7619_v9, %s8255_s30  ;;  %v681_v38 = vsel %vm8334_vm2, %v676_v29, %v680_v15  ;;  %v450_v39 = vrot.slane %v448_v30, 5  ;;  %v743_v40 = vrot.slane %v741_v32, 4  ;;  %v744_v41 = vshll.u32 %v416_v18, 16  ;;  %v390_v9 = vld [vmem:[%s8322_s29 + $0x34] sm:$0xf] }
  0x28   : > { %v691_v43 = vsel %vm8334_vm2, %v686_v33, %v690_v21  ;;  %v8370_v44 = vunpack.c.l.bf16 %v681_v38  ;;  %v436_v45 = vrot.slane %v435_v34, 4  ;;  %v445_v46 = vor.u32 %v444_v36, %v440_v35  ;;  %v391_v15 = vld [vmem:[%s8322_s29 + $0x38] sm:$0x1]  ;;  %v1037_v29 = vld [vmem:[%s8322_s29] sm:$0xe] }
  0x29   : > { %v8372_v47 = vunpack.c.l.bf16 %v691_v43  ;;  %v746_v48 = vrot.slane %v744_v41, 5  ;;  %v750_v49 = vshll.u32 %v417_v31, 16  ;;  %v754_v50 = vshrl.u32 %v417_v31, 16  ;;  %v1038_v34 = vld [vmem:[%s8322_s29 + $0x4] sm:$0xf] }
  0x2a   : > { %v441_v51 = vsel %vm8334_vm2, %v436_v45, %v440_v35  ;;  %v446_v52 = vrot.slane %v445_v46, 4  ;;  %v760_v53 = vshll.u32 %v418_v37, 16  ;;  %v453_v55 = vshrl.u32 %v380_v42, 16  ;;  %v1039_v38 = vld [vmem:[%s8322_s29 + $0x8] sm:$0x1] }
  0x2b   : > { %v7654_v56 = vpack.i.bf16 %v8372_v47, %v8370_v44  ;;  %v844_v57 = vunpack.c.l.bf16 %v441_v51  ;;  %v747_v58 = vor.u32 %v746_v48, %v743_v40  ;;  %v752_v59 = vrot.slane %v750_v49, 5  ;;  %v396_v43 = vld [vmem:[%s8322_s29 + $0x4c] sm:$0xf] }
  0x2c   : > { %v451_v62 = vsel %vm8334_vm2, %v446_v52, %v450_v39  ;;  %v756_v63 = vrot.slane %v754_v50, 4  ;;  %v762_v0 = vrot.slane %v760_v53, 5  ;;  %v455_v1 = vrot.slane %v453_v55, 4 }
  0x2d   : > { %v845_v2 = vunpack.c.l.bf16 %v451_v62  ;;  %v748_v3 = vrot.slane %v747_v58, 4  ;;  %v456_v4 = vshll.u32 %v380_v42, 16  ;;  %v462_v5 = vshll.u32 %v381_v54, 16  ;;  %v395_v42 = vld [vmem:[%s8322_s29 + $0x48] sm:$0xf] }
  0x2e   : > { %v757_v6 = vor.u32 %v756_v63, %v752_v59  ;;  %v466_v7 = vshrl.u32 %v381_v54, 16  ;;  %v472_v8 = vshll.u32 %v382_v60, 16  ;;  %v525_v10 = vshrl.u32 %v389_v61, 16  ;;  %v397_v62 = vld [vmem:[%s8322_s29 + $0x50] sm:$0x1] }
  0x2f   : > { %7640 = vrot.lane.b32.xlu1 %v7639_v28, %s8255_s30  ;;  %v7604_v11 = vpack.i.bf16 %v845_v2, %v844_v57  ;;  %v753_v12 = vsel %vm8334_vm2, %v748_v3, %v752_v59  ;;  %v458_v13 = vrot.slane %v456_v4, 5  ;;  %v464_v14 = vrot.slane %v462_v5, 5  ;;  %v393_v3 = vld [vmem:[%s8322_s29 + $0x40] sm:$0xf] }
  0x30   : > { %v758_v16 = vrot.slane %v757_v6, 4  ;;  %v8388_v17 = vunpack.c.l.bf16 %v753_v12  ;;  %v468_v18 = vrot.slane %v466_v7, 4  ;;  %v474_v19 = vrot.slane %v472_v8, 5 }
  0x31   : > { %7605 = vrot.lane.b32.xlu0 %v7604_v11, %s8255_s30  ;;  %v459_v20 = vor.u32 %v458_v13, %v455_v1  ;;  %v527_v21 = vrot.slane %v525_v10, 4  ;;  %v528_v22 = vshll.u32 %v389_v61, 16  ;;  %v534_v23 = vshll.u32 %v390_v9, 16  ;;  %v394_v11 = vld [vmem:[%s8322_s29 + $0x44] sm:$0x1] }
  0x32   : > { %v763_v24 = vsel %vm8334_vm2, %v758_v16, %v762_v0  ;;  %v469_v25 = vor.u32 %v468_v18, %v464_v14  ;;  %v538_v27 = vshrl.u32 %v390_v9, 16  ;;  %v544_v28 = vshll.u32 %v391_v15, 16  ;;  %v1047_v18 = vld [vmem:[%s8322_s29 + $0x28] sm:$0xf] }
  0x33   : > { %v871_v30 = vunpack.c.l.bf16 %v763_v24  ;;  %v460_v31 = vrot.slane %v459_v20, 4  ;;  %v530_v32 = vrot.slane %v528_v22, 5  ;;  %v536_v33 = vrot.slane %v534_v23, 5  ;;  %v1048_v23 = vld [vmem:[%s8322_s29 + $0x2c] sm:$0x1] }
  0x34   : > { %v470_v35 = vrot.slane %v469_v25, 4  ;;  %v540_v36 = vrot.slane %v538_v27, 4  ;;  %v546_v37 = vrot.slane %v544_v28, 5  ;;  %v7021_v48 = vrot.slane %v1037_v29, 9 }
  0x35   : > { %v7669_v39 = vpack.i.bf16 %v871_v30, %v8388_v17  ;;  %v465_v40 = vsel %vm8334_vm2, %v460_v31, %v464_v14  ;;  %v531_v41 = vor.u32 %v530_v32, %v527_v21  ;;  %v1138_v51 = vrot.slane %v1038_v34, 5  ;;  %v1046_v17 = vld [vmem:[%s8322_s29 + $0x24] sm:$0xe] }
  0x36   : > { %v475_v44 = vsel %vm8334_vm2, %v470_v35, %v474_v19  ;;  %v846_v45 = vunpack.c.l.bf16 %v465_v40  ;;  %v541_v46 = vor.u32 %v540_v36, %v536_v33  ;;  %v1141_v52 = vrot.slane %v1039_v38, 5  ;;  %v405_v38 = vld [vmem:[%s8322_s29 + $0x70] sm:$0xf] }
  0x37   : > { %7655 = vrot.lane.b32.xlu1 %v7654_v56, %s8255_s30  ;;  %v847_v49 = vunpack.c.l.bf16 %v475_v44  ;;  %v532_v50 = vrot.slane %v531_v41, 4  ;;  %v573_v54 = vshrl.u32 %v395_v42, 16  ;;  %v576_v55 = vshll.u32 %v395_v42, 16  ;;  %v392_v56 = vld [vmem:[%s8322_s29 + $0x3c] sm:$0xf] }
  0x38   : > { %v542_v53 = vrot.slane %v541_v46, 4  ;;  %v582_v57 = vshll.u32 %v396_v43, 16  ;;  %v1139_v60 = vsel %vm8403_vm5, %v7021_v48, %v1138_v51  ;;  %v1140_v61 = vrot.slane %v1138_v51, 4 }
  0x39   : > { %v7609_v58 = vpack.i.bf16 %v847_v49, %v846_v45  ;;  %v537_v59 = vsel %vm8334_vm2, %v532_v50, %v536_v33  ;;  %v1280_v1 = vunpack.c.l.bf16 %v1139_v60  ;;  %v575_v2 = vrot.slane %v573_v54, 4 }
  0x3a   : > { %v547_v63 = vsel %vm8334_vm2, %v542_v53, %v546_v37  ;;  %v852_v0 = vunpack.c.l.bf16 %v537_v59  ;;  %v1142_v5 = vsel %vm8403_vm5, %v1140_v61, %v1141_v52  ;;  %v578_v6 = vrot.slane %v576_v55, 5  ;;  %v404_v37 = vld [vmem:[%s8322_s29 + $0x6c] sm:$0xf] }
  0x3b   : > { %7610 = vrot.lane.b32.xlu0 %v7609_v58, %s8255_s30  ;;  %v853_v4 = vunpack.c.l.bf16 %v547_v63  ;;  %v584_v7 = vrot.slane %v582_v57, 5  ;;  %v1281_v8 = vunpack.c.l.bf16 %v1142_v5  ;;  %v586_v9 = vshrl.u32 %v396_v43, 16  ;;  %v406_v57 = vld [vmem:[%s8322_s29 + $0x74] sm:$0x1] }
  0x3c   : > { %v592_v10 = vshll.u32 %v397_v62, 16  ;;  %v549_v12 = vshrl.u32 %v392_v56, 16  ;;  %v579_v14 = vor.u32 %v578_v6, %v575_v2  ;;  %v552_v15 = vshll.u32 %v392_v56, 16  ;;  %v401_v62 = vld [vmem:[%s8322_s29 + $0x60] sm:$0xf] }
  0x3d   : > { %v7624_v13 = vpack.i.bf16 %v853_v4, %v852_v0  ;;  %v558_v16 = vshll.u32 %v393_v3, 16  ;;  %v7684_v19 = vpack.i.bf16 %v1281_v8, %v1280_v1  ;;  %v588_v20 = vrot.slane %v586_v9, 4  ;;  %v402_v56 = vld [vmem:[%s8322_s29 + $0x64] sm:$0xf] }
  0x3e   : > { %v594_v21 = vrot.slane %v592_v10, 5  ;;  %v551_v22 = vrot.slane %v549_v12, 4  ;;  %v580_v24 = vrot.slane %v579_v14, 4  ;;  %v554_v25 = vrot.slane %v552_v15, 5  ;;  %v1055_v12 = vld [vmem:[%s8322_s29 + $0x48] sm:$0xe] }
  0x3f   : > { %7670 = vrot.lane.b32.xlu1 %v7669_v39, %s8255_s30  ;;  %7625 = vrot.lane.b32.xlu2 %v7624_v13, %s8255_s30  ;;  %v560_v27 = vrot.slane %v558_v16, 5  ;;  %v562_v28 = vshrl.u32 %v393_v3, 16  ;;  %v589_v29 = vor.u32 %v588_v20, %v584_v7  ;;  %v568_v30 = vshll.u32 %v394_v11, 16  ;;  %v413_v13 = vld [vmem:[%s8322_s29 + $0x90] sm:$0xf] }
  0x40   : > { %v7024_v31 = vrot.slane %v1046_v17, 9  ;;  %v1159_v32 = vrot.slane %v1047_v18, 5  ;;  %v585_v33 = vsel %vm8334_vm2, %v580_v24, %v584_v7  ;;  %v555_v34 = vor.u32 %v554_v25, %v551_v22  ;;  %v403_v7 = vld [vmem:[%s8322_s29 + $0x68] sm:$0x1]  ;;  %v1056_v18 = vld [vmem:[%s8322_s29 + $0x4c] sm:$0xf] }
  0x41   : > { %v564_v35 = vrot.slane %v562_v28, 4  ;;  %v1162_v36 = vrot.slane %v1048_v23, 5  ;;  %v590_v40 = vrot.slane %v589_v29, 4  ;;  %v856_v39 = vunpack.c.l.bf16 %v585_v33  ;;  %v1057_v23 = vld [vmem:[%s8322_s29 + $0x50] sm:$0x1] }
  0x42   : > { %v570_v41 = vrot.slane %v568_v30, 5  ;;  %v1160_v42 = vsel %vm8403_vm5, %v7024_v31, %v1159_v32  ;;  %v556_v43 = vrot.slane %v555_v34, 4  ;;  %v1161_v45 = vrot.slane %v1159_v32, 4 }
  0x43   : > { %v565_v44 = vor.u32 %v564_v35, %v560_v27  ;;  %v1286_v46 = vunpack.c.l.bf16 %v1160_v42  ;;  %v595_v48 = vsel %vm8334_vm2, %v590_v40, %v594_v21  ;;  %v645_v49 = vshrl.u32 %v404_v37, 16 }
  0x44   : > { %v648_v50 = vshll.u32 %v404_v37, 16  ;;  %v654_v51 = vshll.u32 %v405_v38, 16  ;;  %v857_v52 = vunpack.c.l.bf16 %v595_v48  ;;  %v561_v53 = vsel %vm8334_vm2, %v556_v43, %v560_v27 }
  0x45   : > { %v566_v54 = vrot.slane %v565_v44, 4  ;;  %v1163_v55 = vsel %vm8403_vm5, %v1161_v45, %v1162_v36  ;;  %v854_v58 = vunpack.c.l.bf16 %v561_v53  ;;  %v647_v60 = vrot.slane %v645_v49, 4  ;;  %v414_v36 = vld [vmem:[%s8322_s29 + $0x94] sm:$0xf]  ;;  %v415_v49 = vld [vmem:[%s8322_s29 + $0x98] sm:$0x1] }
  0x46   : > { %v1287_v59 = vunpack.c.l.bf16 %v1163_v55  ;;  %v650_v61 = vrot.slane %v648_v50, 5  ;;  %v7634_v63 = vpack.i.bf16 %v857_v52, %v856_v39  ;;  %v656_v1 = vrot.slane %v654_v51, 5  ;;  %v410_v52 = vld [vmem:[%s8322_s29 + $0x84] sm:$0xf] }
  0x47   : > { %7685 = vrot.lane.b32.xlu1 %v7684_v19, %s8256_s8  ;;  %v571_v0 = vsel %vm8334_vm2, %v566_v54, %v570_v41  ;;  %v658_v2 = vshrl.u32 %v405_v38, 16  ;;  %v664_v6 = vshll.u32 %v406_v57, 16  ;;  %v621_v9 = vshrl.u32 %v401_v62, 16 }
  0x48   : > { %v855_v3 = vunpack.c.l.bf16 %v571_v0  ;;  %v7699_v4 = vpack.i.bf16 %v1287_v59, %v1286_v46  ;;  %v651_v5 = vor.u32 %v650_v61, %v647_v60  ;;  %7635 = vrot.lane.b32.xlu0 %v7634_v63, %s8255_s30  ;;  %v624_v10 = vshll.u32 %v401_v62, 16  ;;  %v412_v0 = vld [vmem:[%s8322_s29 + $0x8c] sm:$0x1] }
  0x49   : > { %v660_v8 = vrot.slane %v658_v2, 4  ;;  %v630_v11 = vshll.u32 %v402_v56, 16  ;;  %v666_v16 = vrot.slane %v664_v6, 5  ;;  %v634_v17 = vshrl.u32 %v402_v56, 16 }
  0x4a   : > { %v7629_v14 = vpack.i.bf16 %v855_v3, %v854_v58  ;;  %v652_v15 = vrot.slane %v651_v5, 4  ;;  %v623_v20 = vrot.slane %v621_v9, 4  ;;  %v626_v21 = vrot.slane %v624_v10, 5  ;;  %v411_v58 = vld [vmem:[%s8322_s29 + $0x88] sm:$0xf] }
  0x4b   : > { %v661_v19 = vor.u32 %v660_v8, %v656_v1  ;;  %v632_v22 = vrot.slane %v630_v11, 5  ;;  %v636_v25 = vrot.slane %v634_v17, 4  ;;  %v640_v27 = vshll.u32 %v403_v7, 16  ;;  %v1064_v7 = vld [vmem:[%s8322_s29 + $0x6c] sm:$0xe] }
  0x4c   : > { %7630 = vrot.lane.b32.xlu2 %v7629_v14, %s8255_s30  ;;  %v657_v24 = vsel %vm8334_vm2, %v652_v15, %v656_v1  ;;  %v7027_v28 = vrot.slane %v1055_v12, 9  ;;  %v627_v31 = vor.u32 %v626_v21, %v623_v20  ;;  %v1180_v32 = vrot.slane %v1056_v18, 5  ;;  %v1065_v8 = vld [vmem:[%s8322_s29 + $0x70] sm:$0xf] }
  0x4d   : > { %v662_v29 = vrot.slane %v661_v19, 4  ;;  %v862_v30 = vunpack.c.l.bf16 %v657_v24  ;;  %v637_v33 = vor.u32 %v636_v25, %v632_v22  ;;  %v642_v34 = vrot.slane %v640_v27, 5 }
  0x4e   : > { %v1183_v35 = vrot.slane %v1057_v23, 5  ;;  %v717_v37 = vshrl.u32 %v413_v13, 16  ;;  %v628_v40 = vrot.slane %v627_v31, 4  ;;  %v1181_v39 = vsel %vm8403_vm5, %v7027_v28, %v1180_v32 }
  0x4f   : > { %7700 = vrot.lane.b32.xlu1 %v7699_v4, %s8256_s8  ;;  %v667_v38 = vsel %vm8334_vm2, %v662_v29, %v666_v16  ;;  %v1182_v41 = vrot.slane %v1180_v32, 4  ;;  %v638_v43 = vrot.slane %v637_v33, 4  ;;  %v1292_v44 = vunpack.c.l.bf16 %v1181_v39  ;;  %v423_v32 = vld [vmem:[%s8322_s29 + $0xb8] sm:$0xf]  ;;  %v424_v39 = vld [vmem:[%s8322_s29 + $0xbc] sm:$0x1] }
  0x50   : > { %v863_v42 = vunpack.c.l.bf16 %v667_v38  ;;  %v719_v45 = vrot.slane %v717_v37, 4  ;;  %v633_v46 = vsel %vm8334_vm2, %v628_v40, %v632_v22  ;;  %v720_v50 = vshll.u32 %v413_v13, 16  ;;  %v1066_v13 = vld [vmem:[%s8322_s29 + $0x74] sm:$0x1] }
  0x51   : > { %v1184_v48 = vsel %vm8403_vm5, %v1182_v41, %v1183_v35  ;;  %v726_v51 = vshll.u32 %v414_v36, 16  ;;  %v643_v54 = vsel %vm8334_vm2, %v638_v43, %v642_v34  ;;  %v860_v55 = vunpack.c.l.bf16 %v633_v46  ;;  %v422_v22 = vld [vmem:[%s8322_s29 + $0xb4] sm:$0xf]  ;;  %v419_v46 = vld [vmem:[%s8322_s29 + $0xa8] sm:$0xf] }
  0x52   : > { %v7649_v53 = vpack.i.bf16 %v863_v42, %v862_v30  ;;  %v1293_v57 = vunpack.c.l.bf16 %v1184_v48  ;;  %v861_v59 = vunpack.c.l.bf16 %v643_v54  ;;  %v722_v60 = vrot.slane %v720_v50, 5 }
  0x53   : > { %v728_v61 = vrot.slane %v726_v51, 5  ;;  %v730_v62 = vshrl.u32 %v414_v36, 16  ;;  %v736_v63 = vshll.u32 %v415_v49, 16  ;;  %v693_v1 = vshrl.u32 %v410_v52, 16 }
  0x54   : > { %7650 = vrot.lane.b32.xlu0 %v7649_v53, %s8255_s30  ;;  %v7714_v56 = vpack.i.bf16 %v1293_v57, %v1292_v44  ;;  %v696_v2 = vshll.u32 %v410_v52, 16  ;;  %v7644_v3 = vpack.i.bf16 %v861_v59, %v860_v55  ;;  %v723_v4 = vor.u32 %v722_v60, %v719_v45  ;;  %v420_v52 = vld [vmem:[%s8322_s29 + $0xac] sm:$0xf]  ;;  %v421_v60 = vld [vmem:[%s8322_s29 + $0xb0] sm:$0x1] }
  0x55   : > { %v732_v5 = vrot.slane %v730_v62, 4  ;;  %v702_v6 = vshll.u32 %v411_v58, 16  ;;  %v738_v9 = vrot.slane %v736_v63, 5  ;;  %v695_v10 = vrot.slane %v693_v1, 4 }
  0x56   : > { %v698_v11 = vrot.slane %v696_v2, 5  ;;  %v706_v12 = vshrl.u32 %v411_v58, 16  ;;  %7645 = vrot.lane.b32.xlu2 %v7644_v3, %s8255_s30  ;;  %v724_v14 = vrot.slane %v723_v4, 4  ;;  %v712_v17 = vshll.u32 %v412_v0, 16  ;;  %v1074_v3 = vld [vmem:[%s8322_s29 + $0x94] sm:$0xf] }
  0x57   : > { %7715 = vrot.lane.b32.xlu1 %v7714_v56, %s8256_s8  ;;  %v733_v15 = vor.u32 %v732_v5, %v728_v61  ;;  %v704_v16 = vrot.slane %v702_v6, 5  ;;  %v7030_v20 = vrot.slane %v1064_v7, 9  ;;  %v1201_v21 = vrot.slane %v1065_v8, 5  ;;  %v1073_v56 = vld [vmem:[%s8322_s29 + $0x90] sm:$0xe] }
  0x58   : > { %v699_v18 = vor.u32 %v698_v11, %v695_v10  ;;  %v708_v19 = vrot.slane %v706_v12, 4  ;;  %v729_v23 = vsel %vm8334_vm2, %v724_v14, %v728_v61  ;;  %v714_v25 = vrot.slane %v712_v17, 5  ;;  %v1075_v8 = vld [vmem:[%s8322_s29 + $0x98] sm:$0x1]  ;;  %v1043_v17 = vld [vmem:[%s8322_s29 + $0x18] sm:$0xe] }
  0x59   : > { %v734_v24 = vrot.slane %v733_v15, 4  ;;  %v1204_v27 = vrot.slane %v1066_v13, 5  ;;  %v868_v28 = vunpack.c.l.bf16 %v729_v23  ;;  %v1202_v31 = vsel %vm8403_vm5, %v7030_v20, %v1201_v21 }
  0x5a   : > { %v700_v29 = vrot.slane %v699_v18, 4  ;;  %v709_v30 = vor.u32 %v708_v19, %v704_v16  ;;  %v1203_v34 = vrot.slane %v1201_v21, 4  ;;  %v1298_v35 = vunpack.c.l.bf16 %v1202_v31  ;;  %v1044_v18 = vld [vmem:[%s8322_s29 + $0x1c] sm:$0xf] }
  0x5b   : > { %v739_v33 = vsel %vm8334_vm2, %v734_v24, %v738_v9  ;;  %v789_v36 = vshrl.u32 %v422_v22, 16  ;;  %v792_v41 = vshll.u32 %v422_v22, 16  ;;  %v798_v45 = vshll.u32 %v423_v32, 16 }
  0x5c   : > { %v869_v37 = vunpack.c.l.bf16 %v739_v33  ;;  %v705_v38 = vsel %vm8334_vm2, %v700_v29, %v704_v16  ;;  %v710_v40 = vrot.slane %v709_v30, 4  ;;  %v1205_v43 = vsel %vm8403_vm5, %v1203_v34, %v1204_v27  ;;  %v1045_v30 = vld [vmem:[%s8322_s29 + $0x20] sm:$0x1]  ;;  %v1041_v33 = vld [vmem:[%s8322_s29 + $0x10] sm:$0xf] }
  0x5d   : > { %v866_v42 = vunpack.c.l.bf16 %v705_v38  ;;  %v791_v44 = vrot.slane %v789_v36, 4  ;;  %v1299_v50 = vunpack.c.l.bf16 %v1205_v43  ;;  %v794_v51 = vrot.slane %v792_v41, 5  ;;  %v1040_v38 = vld [vmem:[%s8322_s29 + $0xc] sm:$0xe] }
  0x5e   : > { %v7664_v48 = vpack.i.bf16 %v869_v37, %v868_v28  ;;  %v715_v49 = vsel %vm8334_vm2, %v710_v40, %v714_v25  ;;  %v800_v54 = vrot.slane %v798_v45, 5  ;;  %v802_v55 = vshrl.u32 %v423_v32, 16  ;;  %v1083_v40 = vld [vmem:[%s8322_s29 + $0xb8] sm:$0xf]  ;;  %v1082_v45 = vld [vmem:[%s8322_s29 + $0xb4] sm:$0xe] }
  0x5f   : > { %v867_v53 = vunpack.c.l.bf16 %v715_v49  ;;  %v808_v57 = vshll.u32 %v424_v39, 16  ;;  %v7729_v58 = vpack.i.bf16 %v1299_v50, %v1298_v35  ;;  %v795_v59 = vor.u32 %v794_v51, %v791_v44  ;;  %v1042_v44 = vld [vmem:[%s8322_s29 + $0x14] sm:$0x1] }
  0x60   : > { %7665 = vrot.lane.b32.xlu0 %v7664_v48, %s8255_s30  ;;  %v765_v61 = vshrl.u32 %v419_v46, 16  ;;  %v768_v62 = vshll.u32 %v419_v46, 16  ;;  %v804_v0 = vrot.slane %v802_v55, 4  ;;  %v774_v2 = vshll.u32 %v420_v52, 16  ;;  %v1084_v55 = vld [vmem:[%s8322_s29 + $0xbc] sm:$0x1] }
  0x61   : > { %v7659_v63 = vpack.i.bf16 %v867_v53, %v866_v42  ;;  %v810_v1 = vrot.slane %v808_v57, 5  ;;  %7730 = vrot.lane.b32.xlu1 %v7729_v58, %s8256_s8  ;;  %v796_v4 = vrot.slane %v795_v59, 4  ;;  %v778_v7 = vshrl.u32 %v420_v52, 16  ;;  %v1053_v57 = vld [vmem:[%s8322_s29 + $0x40] sm:$0xf] }
  0x62   : > { %v767_v5 = vrot.slane %v765_v61, 4  ;;  %v770_v6 = vrot.slane %v768_v62, 5  ;;  %v805_v9 = vor.u32 %v804_v0, %v800_v54  ;;  %v776_v10 = vrot.slane %v774_v2, 5  ;;  %v1052_v62 = vld [vmem:[%s8322_s29 + $0x3c] sm:$0xe] }
  0x63   : > { %7660 = vrot.lane.b32.xlu2 %v7659_v63, %s8255_s30  ;;  %v784_v11 = vshll.u32 %v421_v60, 16  ;;  %v7033_v12 = vrot.slane %v1073_v56, 9  ;;  %v801_v13 = vsel %vm8334_vm2, %v796_v4, %v800_v54  ;;  %v780_v15 = vrot.slane %v778_v7, 4  ;;  %v1054_v2 = vld [vmem:[%s8322_s29 + $0x44] sm:$0x1] }
  0x64   : > { %v771_v14 = vor.u32 %v770_v6, %v767_v5  ;;  %v1222_v16 = vrot.slane %v1074_v3, 5  ;;  %v806_v19 = vrot.slane %v805_v9, 4  ;;  %v874_v20 = vunpack.c.l.bf16 %v801_v13  ;;  %v1050_v3 = vld [vmem:[%s8322_s29 + $0x34] sm:$0xf]  ;;  %v1051_v9 = vld [vmem:[%s8322_s29 + $0x38] sm:$0x1] }
  0x65   : > { %v786_v21 = vrot.slane %v784_v11, 5  ;;  %v1225_v22 = vrot.slane %v1075_v8, 5  ;;  %v781_v24 = vor.u32 %v780_v15, %v776_v10  ;;  %v7023_v31 = vrot.slane %v1043_v17, 9  ;;  %v1049_v8 = vld [vmem:[%s8322_s29 + $0x30] sm:$0xe] }
  0x66   : > { %v772_v23 = vrot.slane %v771_v14, 4  ;;  %v1223_v25 = vsel %vm8403_vm5, %v7033_v12, %v1222_v16  ;;  %v1224_v27 = vrot.slane %v1222_v16, 4  ;;  %v811_v28 = vsel %vm8334_vm2, %v806_v19, %v810_v1 }
  0x67   : > { %v1304_v29 = vunpack.c.l.bf16 %v1223_v25  ;;  %v1152_v32 = vrot.slane %v1044_v18, 5  ;;  %v875_v34 = vunpack.c.l.bf16 %v811_v28  ;;  %v782_v36 = vrot.slane %v781_v24, 4  ;;  %v7041_v18 = vld [vmem:[%s8322_s29 + $0x24] sm:$0xff]  }
  0x68   : > { %v777_v35 = vsel %vm8334_vm2, %v772_v23, %v776_v10  ;;  %v1226_v37 = vsel %vm8403_vm5, %v1224_v27, %v1225_v22  ;;  %v1155_v49 = vrot.slane %v1045_v30, 5  ;;  %v7022_v53 = vrot.slane %v1040_v38, 9  ;;  %v1061_v23 = vld [vmem:[%s8322_s29 + $0x60] sm:$0xe]  ;;  %v1062_v28 = vld [vmem:[%s8322_s29 + $0x64] sm:$0xf] }
  0x69   : > { %v872_v39 = vunpack.c.l.bf16 %v777_v35  ;;  %v1305_v41 = vunpack.c.l.bf16 %v1226_v37  ;;  %v1153_v42 = vsel %vm8403_vm5, %v7023_v31, %v1152_v32  ;;  %v1154_v43 = vrot.slane %v1152_v32, 4  ;;  %v1059_v35 = vld [vmem:[%s8322_s29 + $0x58] sm:$0xf] }
  0x6a   : > { %v7679_v46 = vpack.i.bf16 %v875_v34, %v874_v20  ;;  %v787_v48 = vsel %vm8334_vm2, %v782_v36, %v786_v21  ;;  %v1284_v50 = vunpack.c.l.bf16 %v1153_v42  ;;  %v1145_v54 = vrot.slane %v1041_v33, 5  ;;  %v1058_v34 = vld [vmem:[%s8322_s29 + $0x54] sm:$0xe] }
  0x6b   : > { %v873_v51 = vunpack.c.l.bf16 %v787_v48  ;;  %v7744_v52 = vpack.i.bf16 %v1305_v41, %v1304_v29  ;;  %v1156_v58 = vsel %vm8403_vm5, %v1154_v43, %v1155_v49  ;;  %v1148_v59 = vrot.slane %v1042_v44, 5  ;;  %v1063_v29 = vld [vmem:[%s8322_s29 + $0x68] sm:$0x1] }
  0x6c   : > { %7680 = vrot.lane.b32.xlu0 %v7679_v46, %s8255_s30  ;;  %v7036_v60 = vrot.slane %v1082_v45, 9  ;;  %v1243_v61 = vrot.slane %v1083_v40, 5  ;;  %v1285_v63 = vunpack.c.l.bf16 %v1156_v58  ;;  %v1146_v0 = vsel %vm8403_vm5, %v7022_v53, %v1145_v54  ;;  %v8559_v49 = vld [vmem:[%s8322_s29 + $0x48] sm:$0xff]  }
  0x6d   : > { %v7674_v56 = vpack.i.bf16 %v873_v51, %v872_v39  ;;  %7745 = vrot.lane.b32.xlu1 %v7744_v52, %s8256_s8  ;;  %v1147_v1 = vrot.slane %v1145_v54, 4  ;;  %v1282_v4 = vunpack.c.l.bf16 %v1146_v0  ;;  %v1246_v7 = vrot.slane %v1084_v55, 5  ;;  %v1060_v39 = vld [vmem:[%s8322_s29 + $0x5c] sm:$0x1]  ;;  %v1070_v54 = vld [vmem:[%s8322_s29 + $0x84] sm:$0xe] }
  0x6e   : > { %v1244_v5 = vsel %vm8403_vm5, %v7036_v60, %v1243_v61  ;;  %v1245_v6 = vrot.slane %v1243_v61, 4  ;;  %v7694_v10 = vpack.i.bf16 %v1285_v63, %v1284_v50  ;;  %v7026_v13 = vrot.slane %v1052_v62, 9  ;;  %v1071_v55 = vld [vmem:[%s8322_s29 + $0x88] sm:$0xf]  ;;  %v1072_v61 = vld [vmem:[%s8322_s29 + $0x8c] sm:$0x1] }
  0x6f   : > { %7675 = vrot.lane.b32.xlu2 %v7674_v56, %s8255_s30  ;;  %v1149_v11 = vsel %vm8403_vm5, %v1147_v1, %v1148_v59  ;;  %v1310_v12 = vunpack.c.l.bf16 %v1244_v5  ;;  %v1173_v16 = vrot.slane %v1053_v57, 5  ;;  %v1176_v17 = vrot.slane %v1054_v2, 5  ;;  %v1067_v62 = vld [vmem:[%s8322_s29 + $0x78] sm:$0xe]  ;;  %v1068_v2 = vld [vmem:[%s8322_s29 + $0x7c] sm:$0xf] }
  0x70   : > { %v1283_v14 = vunpack.c.l.bf16 %v1149_v11  ;;  %v1247_v15 = vsel %vm8403_vm5, %v1245_v6, %v1246_v7  ;;  %v7025_v20 = vrot.slane %v1049_v8, 9  ;;  %v1166_v21 = vrot.slane %v1050_v3, 5  ;;  %v1069_v7 = vld [vmem:[%s8322_s29 + $0x80] sm:$0x1] }
  0x71   : > { %v1311_v19 = vunpack.c.l.bf16 %v1247_v15  ;;  %v1169_v22 = vrot.slane %v1051_v9, 5  ;;  %v1174_v25 = vsel %vm8403_vm5, %v7026_v13, %v1173_v16  ;;  %v1175_v27 = vrot.slane %v1173_v16, 4 }
  0x72   : > { %v7689_v24 = vpack.i.bf16 %v1283_v14, %v1282_v4  ;;  %v1167_v31 = vsel %vm8403_vm5, %v7025_v20, %v1166_v21  ;;  %v1168_v32 = vrot.slane %v1166_v21, 4  ;;  %v1510_v33 = vunpack.c.l.bf16 %v7041_v18 }
  0x73   : > { %v7759_v30 = vpack.i.bf16 %v1311_v19, %v1310_v12  ;;  %v1177_v36 = vsel %vm8403_vm5, %v1175_v27, %v1176_v17  ;;  %v1290_v37 = vunpack.c.l.bf16 %v1174_v25  ;;  %v1511_v38 = vunpack.c.h.bf16 %v7041_v18  ;;  %v7053_v12 = vld [vmem:[%s8322_s29 + $0x6c] sm:$0xff]   ;;  %v1079_v17 = vld [vmem:[%s8322_s29 + $0xa8] sm:$0xe] }
  0x74   : > { %7695 = vrot.lane.b32.xlu0 %v7694_v10, %s8256_s8  ;;  %v7029_v40 = vrot.slane %v1061_v23, 9  ;;  %v1291_v41 = vunpack.c.l.bf16 %v1177_v36  ;;  %v1170_v42 = vsel %vm8403_vm5, %v1168_v32, %v1169_v22  ;;  %v1194_v43 = vrot.slane %v1062_v28, 5  ;;  %v1080_v18 = vld [vmem:[%s8322_s29 + $0xac] sm:$0xf]  ;;  %v1081_v23 = vld [vmem:[%s8322_s29 + $0xb0] sm:$0x1] }
  0x75   : > { %7760 = vrot.lane.b32.xlu1 %v7759_v30, %s8256_s8  ;;  %v1197_v44 = vrot.slane %v1063_v29, 5  ;;  %v1288_v45 = vunpack.c.l.bf16 %v1167_v31  ;;  %v7028_v46 = vrot.slane %v1058_v34, 9  ;;  %v1187_v48 = vrot.slane %v1059_v35, 5  ;;  %v1077_v30 = vld [vmem:[%s8322_s29 + $0xa0] sm:$0xf]  ;;  %v8599_v36 = vld [vmem:[%s8322_s29 + $0x90] sm:$0xff]  }
  0x76   : > { %v1289_v50 = vunpack.c.l.bf16 %v1170_v42  ;;  %v1195_v51 = vsel %vm8403_vm5, %v7029_v40, %v1194_v43  ;;  %v1196_v52 = vrot.slane %v1194_v43, 4  ;;  %v1190_v53 = vrot.slane %v1060_v39, 5  ;;  %v1078_v35 = vld [vmem:[%s8322_s29 + $0xa4] sm:$0x1] }
  0x77   : > { %7690 = vrot.lane.b32.xlu2 %v7689_v24, %s8256_s8  ;;  %v7709_v57 = vpack.i.bf16 %v1291_v41, %v1290_v37  ;;  %v7774_v58 = vpack.i.bf16 %v1511_v38, %v1510_v33  ;;  %v1188_v59 = vsel %vm8403_vm5, %v7028_v46, %v1187_v48  ;;  %v1189_v60 = vrot.slane %v1187_v48, 4  ;;  %v1076_v24 = vld [vmem:[%s8322_s29 + $0x9c] sm:$0xe] }
  0x78   : > { %v1198_v56 = vsel %vm8403_vm5, %v1196_v52, %v1197_v44  ;;  %v1296_v63 = vunpack.c.l.bf16 %v1195_v51  ;;  %v7496_v0 = vunpack.c.l.bf16 %v8559_v49  ;;  %v7497_v1 = vunpack.c.h.bf16 %v8559_v49  ;;  %v7082_v49 = vld [vmem:[%s8322_s29 + $0x40] sm:$0xf] }
  0x79   : > { %v1297_v3 = vunpack.c.l.bf16 %v1198_v56  ;;  %v1191_v4 = vsel %vm8403_vm5, %v1189_v60, %v1190_v53  ;;  %v7032_v5 = vrot.slane %v1070_v54, 9  ;;  %v1215_v6 = vrot.slane %v1071_v55, 5 }
  0x7a   : > { %v7704_v8 = vpack.i.bf16 %v1289_v50, %v1288_v45  ;;  %v1294_v9 = vunpack.c.l.bf16 %v1188_v59  ;;  %v1218_v10 = vrot.slane %v1072_v61, 5  ;;  %v7031_v11 = vrot.slane %v1067_v62, 9  ;;  %v7557_v45 = vld [vmem:[%s8322_s29 + $0x18] sm:$0xff]   ;;  %357 = vst.msk [vmem:[#allocation3 + $0x60] sm:$0xff] %vm344_vm6, %v7496_v0 }
  0x7b   : > { %v1295_v13 = vunpack.c.l.bf16 %v1191_v4  ;;  %v1216_v14 = vsel %vm8403_vm5, %v7032_v5, %v1215_v6  ;;  %v1217_v15 = vrot.slane %v1215_v6, 4  ;;  %v1208_v16 = vrot.slane %v1068_v2, 5  ;;  %v7065_v62 = vld [vmem:[%s8322_s29 + $0xb4] sm:$0xff]   ;;  %v286_v4 = vld [vmem:[%s8322_s29 + $0x24] sm:$0xff]   ;;  %358 = vst.msk [vmem:[#allocation3 + $0x68] sm:$0xff] %vm344_vm6, %v7497_v1 }
  0x7c   : > { %7710 = vrot.lane.b32.xlu0 %v7709_v57, %s8256_s8  ;;  %v7724_v19 = vpack.i.bf16 %v1297_v3, %v1296_v63  ;;  %v7789_v20 = vpack.i.bf16 %v7497_v1, %v7496_v0  ;;  %v1302_v21 = vunpack.c.l.bf16 %v1216_v14  ;;  %v1211_v22 = vrot.slane %v1069_v7, 5  ;;  %v7037_v57 = vld [vmem:[%s8322_s29 + $0xc] sm:$0xff]   ;;  %v7045_v3 = vld [vmem:[%s8322_s29 + $0x3c] sm:$0xff]   ;;  %v7072_v14 = vld [vmem:[%s8322_s29 + $0x18] sm:$0xf] }
  0x7d   : > { %7775 = vrot.lane.b32.xlu1 %v7774_v58, %s8257_s9  ;;  %v1219_v25 = vsel %vm8403_vm5, %v1217_v15, %v1218_v10  ;;  %v1209_v27 = vsel %vm8403_vm5, %v7031_v11, %v1208_v16  ;;  %v1210_v28 = vrot.slane %v1208_v16, 4  ;;  %v1522_v29 = vunpack.c.l.bf16 %v7053_v12 }
  0x7e   : > { %v1303_v31 = vunpack.c.l.bf16 %v1219_v25  ;;  %v1523_v32 = vunpack.c.h.bf16 %v7053_v12  ;;  %v7035_v33 = vrot.slane %v1079_v17, 9  ;;  %v1236_v34 = vrot.slane %v1080_v18, 5 }
  0x7f   : > { %7705 = vrot.lane.b32.xlu2 %v7704_v8, %s8256_s8  ;;  %v7719_v37 = vpack.i.bf16 %v1295_v13, %v1294_v9  ;;  %v1212_v38 = vsel %vm8403_vm5, %v1210_v28, %v1211_v22  ;;  %v1239_v40 = vrot.slane %v1081_v23, 5  ;;  %v7034_v39 = vrot.slane %v1076_v24, 9  ;;  %v7558_v9 = vld [vmem:[%s8322_s29 + $0x30] sm:$0xff]  }
  0x80   : > { %v1300_v41 = vunpack.c.l.bf16 %v1209_v27  ;;  %v1301_v42 = vunpack.c.l.bf16 %v1212_v38  ;;  %v1237_v43 = vsel %vm8403_vm5, %v7035_v33, %v1236_v34  ;;  %v1238_v44 = vrot.slane %v1236_v34, 4 }
  0x81   : > { %v1308_v46 = vunpack.c.l.bf16 %v1237_v43  ;;  %v1229_v48 = vrot.slane %v1077_v30, 5  ;;  %v1232_v50 = vrot.slane %v1078_v35, 5  ;;  %v7508_v51 = vunpack.c.l.bf16 %v8599_v36  ;;  %v7081_v30 = vld [vmem:[%s8322_s29 + $0x3c] sm:$0xf] }
  0x82   : > { %v7739_v52 = vpack.i.bf16 %v1303_v31, %v1302_v21  ;;  %v8607_v53 = vpack.i.bf16 %v1523_v32, %v1522_v29  ;;  %v1240_v54 = vsel %vm8403_vm5, %v1238_v44, %v1239_v40  ;;  %v7509_v55 = vunpack.c.h.bf16 %v8599_v36  ;;  %v7560_v21 = vld [vmem:[%s8322_s29 + $0x60] sm:$0xff]   ;;  %v294_v40 = vld [vmem:[%s8322_s29 + $0x54] sm:$0xff]  }
  0x83   : > { %v1309_v58 = vunpack.c.l.bf16 %v1240_v54  ;;  %v1230_v59 = vsel %vm8403_vm5, %v7034_v39, %v1229_v48  ;;  %v1231_v60 = vrot.slane %v1229_v48, 4  ;;  %v7488_v61 = vunpack.c.l.bf16 %v7557_v45  ;;  %v7049_v39 = vld [vmem:[%s8322_s29 + $0x54] sm:$0xff]   ;;  %369 = vst.msk [vmem:[#allocation3 + $0xc0] sm:$0xff] %vm344_vm6, %v7508_v51 }
  0x84   : > { %7725 = vrot.lane.b32.xlu0 %v7724_v19, %s8256_s8  ;;  %v8618_v56 = vpack.i.bf16 %v1301_v42, %v1300_v41  ;;  %v1306_v63 = vunpack.c.l.bf16 %v1230_v59  ;;  %v7489_v2 = vunpack.c.h.bf16 %v7557_v45  ;;  %v8630_v7 = vpack.i.bf16 %v7509_v55, %v7508_v51  ;;  %v7073_v19 = vld [vmem:[%s8322_s29 + $0x1c] sm:$0xf]  ;;  %v7083_v45 = vld [vmem:[%s8322_s29 + $0x44] sm:$0x1]  ;;  %370 = vst.msk [vmem:[#allocation3 + $0xc8] sm:$0xff] %vm344_vm6, %v7509_v55 }
  0x85   : > { %7790 = vrot.lane.b32.xlu1 %v7789_v20, %s8257_s9  ;;  %v8622_v5 = vpack.i.bf16 %v1309_v58, %v1308_v46  ;;  %v1233_v6 = vsel %vm8403_vm5, %v1231_v60, %v1232_v50  ;;  %349 = vst.msk [vmem:[#allocation3 + $0x20] sm:$0xff] %vm344_vm6, %v7488_v61  ;;  %v1506_v8 = vunpack.c.l.bf16 %v7037_v57  ;;  %v1507_v11 = vunpack.c.h.bf16 %v7037_v57  ;;  %v7074_v20 = vld [vmem:[%s8322_s29 + $0x20] sm:$0x1] }
  0x86   : > { %v1307_v10 = vunpack.c.l.bf16 %v1233_v6  ;;  %350 = vst.msk [vmem:[#allocation3 + $0x28] sm:$0xff] %vm344_vm6, %v7489_v2  ;;  %v1534_v12 = vunpack.c.l.bf16 %v7065_v62  ;;  %v1535_v13 = vunpack.c.h.bf16 %v7065_v62  ;;  %v1514_v15 = vunpack.c.l.bf16 %v7045_v3 }
  0x87   : > { %7720 = vrot.lane.b32.xlu2 %v7719_v37, %s8256_s8  ;;  %v1515_v16 = vunpack.c.h.bf16 %v7045_v3  ;;  %v318_v17 = vunpack.c.l.bf16 %v286_v4  ;;  %v319_v18 = vunpack.c.h.bf16 %v286_v4  ;;  %v8645_v23 = vpack.i.bf16 %v7489_v2, %v7488_v61 }
  0x88   : > { %v8643_v22 = vpack.i.bf16 %v1307_v10, %v1306_v63  ;;  %v8647_v24 = vpack.i.bf16 %v1507_v11, %v1506_v8  ;;  %v7492_v25 = vunpack.c.l.bf16 %v7558_v9  ;;  %v8652_v27 = vpack.i.bf16 %v1535_v13, %v1534_v12  ;;  %v7057_v8 = vld [vmem:[%s8322_s29 + $0x84] sm:$0xff]  }
  0x89   : > { %351 = vst.msk [vmem:[#allocation3 + $0x30] sm:$0xff] %vm344_vm6, %v318_v17  ;;  %v7493_v28 = vunpack.c.h.bf16 %v7558_v9  ;;  %v1772_v0 = vshrl.u32 %v7072_v14, 16  ;;  %v1775_v29 = vshll.u32 %v7072_v14, 16  ;;  %v1781_v31 = vshll.u32 %v7073_v19, 16 }
  0x8a   : > { %352 = vst.msk [vmem:[#allocation3 + $0x38] sm:$0xff] %vm344_vm6, %v319_v18  ;;  %v1785_v32 = vshrl.u32 %v7073_v19, 16  ;;  %v1791_v33 = vshll.u32 %v7074_v20, 16  ;;  %v7500_v34 = vunpack.c.l.bf16 %v7560_v21  ;;  %v8659_v1 = vpack.i.bf16 %v1515_v16, %v1514_v15  ;;  %v290_v19 = vld [vmem:[%s8322_s29 + $0x3c] sm:$0xff]  }
  0x8b   : > { %v1774_v35 = vrot.slane %v1772_v0, 4  ;;  %v1777_v37 = vrot.slane %v1775_v29, 5  ;;  %v7501_v38 = vunpack.c.h.bf16 %v7560_v21  ;;  %353 = vst.msk [vmem:[#allocation3 + $0x40] sm:$0xff] %vm344_vm6, %v7492_v25  ;;  %v8666_v41 = vpack.i.bf16 %v7493_v28, %v7492_v25  ;;  %v7554_v20 = vld [vmem:[%s8322_s29 + $0x78] sm:$0xff]   ;;  %v8699_v21 = vld [vmem:[%s8322_s29] sm:$0xff]  }
  0x8c   : > { %7740 = vrot.lane.b32.xlu0 %v7739_v52, %s8256_s8  ;;  %v1783_v42 = vrot.slane %v1781_v31, 5  ;;  %v1787_v43 = vrot.slane %v1785_v32, 4  ;;  %354 = vst.msk [vmem:[#allocation3 + $0x48] sm:$0xff] %vm344_vm6, %v7493_v28  ;;  %v326_v44 = vunpack.c.l.bf16 %v294_v40  ;;  %v1793_v48 = vrot.slane %v1791_v33, 5  ;;  %v7090_v28 = vld [vmem:[%s8322_s29 + $0x60] sm:$0xf] }
  0x8d   : > { %7805 = vrot.lane.b32.xlu1 %v8607_v53, %s8257_s9  ;;  %v1778_v46 = vor.u32 %v1777_v37, %v1774_v35  ;;  %v8670_v50 = vpack.i.bf16 %v7501_v38, %v7500_v34  ;;  %v327_v52 = vunpack.c.h.bf16 %v294_v40  ;;  %361 = vst.msk [vmem:[#allocation3 + $0x80] sm:$0xff] %vm344_vm6, %v7500_v34  ;;  %v1518_v54 = vunpack.c.l.bf16 %v7049_v39  ;;  %v7091_v32 = vld [vmem:[%s8322_s29 + $0x64] sm:$0xf]  ;;  %v7092_v33 = vld [vmem:[%s8322_s29 + $0x68] sm:$0x1] }
  0x8e   : > { %v1788_v53 = vor.u32 %v1787_v43, %v1783_v42  ;;  %359 = vst.msk [vmem:[#allocation3 + $0x70] sm:$0xff] %vm344_vm6, %v326_v44  ;;  %v1844_v57 = vshrl.u32 %v7081_v30, 16  ;;  %v1847_v58 = vshll.u32 %v7081_v30, 16  ;;  %v1853_v60 = vshll.u32 %v7082_v49, 16 }
  0x8f   : > { %7735 = vrot.lane.b32.xlu2 %v8618_v56, %s8256_s8  ;;  %v1779_v59 = vrot.slane %v1778_v46, 4  ;;  %360 = vst.msk [vmem:[#allocation3 + $0x78] sm:$0xff] %vm344_vm6, %v327_v52  ;;  %v1857_v61 = vshrl.u32 %v7082_v49, 16  ;;  %v1863_v62 = vshll.u32 %v7083_v45, 16  ;;  %v1519_v3 = vunpack.c.h.bf16 %v7049_v39 }
  0x90   : > { %v1789_v2 = vrot.slane %v1788_v53, 4  ;;  %v1846_v4 = vrot.slane %v1844_v57, 4  ;;  %v1849_v6 = vrot.slane %v1847_v58, 5  ;;  %362 = vst.msk [vmem:[#allocation3 + $0x88] sm:$0xff] %vm344_vm6, %v7501_v38  ;;  %v1855_v11 = vrot.slane %v1853_v60, 5 }
  0x91   : > { %v7616_v63 = vpop.permute.xlu1 %7615  ;;  %v1784_v10 = vsel %vm8334_vm2, %v1779_v59, %v1783_v42  ;;  %v1859_v15 = vrot.slane %v1857_v61, 4  ;;  %v1865_v51 = vrot.slane %v1863_v62, 5  ;;  %v1526_v17 = vunpack.c.l.bf16 %v7057_v8  ;;  %v7099_v62 = vld [vmem:[%s8322_s29 + $0x84] sm:$0xf] }
  0x92   : > { %v7618_v56 = vunpack.i.h.bf16 %v7616_v63  ;;  %v7617_v9 = vunpack.i.l.bf16 %v7616_v63  ;;  %v1794_v12 = vsel %vm8334_vm2, %v1789_v2, %v1793_v48  ;;  %v8686_v13 = vunpack.c.l.bf16 %v1784_v10  ;;  %v8727_v48 = vld [vmem:[%s8322_s29 + $0xa8] sm:$0xff]  }
  0x93   : > { %v1850_v14 = vor.u32 %v1849_v6, %v1846_v4  ;;  %v8694_v16 = vunpack.c.l.bf16 %v1794_v12  ;;  %v1527_v18 = vunpack.c.h.bf16 %v7057_v8  ;;  %v1860_v55 = vor.u32 %v1859_v15, %v1855_v11  ;;  %v306_v6 = vld [vmem:[%s8322_s29 + $0x9c] sm:$0xff]   ;;  %v8743_v8 = vld [vmem:[%s8322_s29 + $0xc] sm:$0xff]   ;;  %v7100_v12 = vld [vmem:[%s8322_s29 + $0x88] sm:$0xf] }
  0x94   : > { %7755 = vrot.lane.b32.xlu0 %v8622_v5, %s8256_s8  ;;  %1009 = vst.msk [vmem:[#allocation3 + $0x20] sm:$0xff] %vm1004_vm7, %v7617_v9  ;;  %v322_v5 = vunpack.c.l.bf16 %v290_v19  ;;  %v323_v25 = vunpack.c.h.bf16 %v290_v19  ;;  %v8707_v29 = vpack.i.bf16 %v1519_v3, %v1518_v54  ;;  %v7476_v30 = vunpack.c.l.bf16 %v7554_v20 }
  0x95   : > { %7820 = vrot.lane.b32.xlu1 %v8630_v7, %s8257_s9  ;;  %1010 = vst.msk [vmem:[#allocation3 + $0x28] sm:$0xff] %vm1004_vm7, %v7618_v56  ;;  %v1851_v36 = vrot.slane %v1850_v14, 4  ;;  %v7849_v0 = vpack.i.bf16 %v8694_v16, %v8686_v13  ;;  %v7477_v31 = vunpack.c.h.bf16 %v7554_v20  ;;  %v1861_v34 = vrot.slane %v1860_v55, 4  ;;  %v7061_v56 = vld [vmem:[%s8322_s29 + $0x9c] sm:$0xff]  }
  0x96   : > { %v8715_v49 = vpack.i.bf16 %v1527_v18, %v1526_v17  ;;  %355 = vst.msk [vmem:[#allocation3 + $0x50] sm:$0xff] %vm344_vm6, %v322_v5  ;;  %v7456_v35 = vunpack.c.l.bf16 %v8699_v21  ;;  %v7457_v38 = vunpack.c.h.bf16 %v8699_v21  ;;  %v1916_v40 = vshrl.u32 %v7090_v28, 16  ;;  %v7101_v17 = vld [vmem:[%s8322_s29 + $0x8c] sm:$0x1] }
  0x97   : > { %7750 = vrot.lane.b32.xlu2 %v8643_v22, %s8256_s8  ;;  %v1856_v7 = vsel %vm8334_vm2, %v1851_v36, %v1855_v11  ;;  %356 = vst.msk [vmem:[#allocation3 + $0x58] sm:$0xff] %vm344_vm6, %v323_v25  ;;  %v1919_v39 = vshll.u32 %v7090_v28, 16  ;;  %v1866_v43 = vsel %vm8334_vm2, %v1861_v34, %v1865_v51  ;;  %v1925_v44 = vshll.u32 %v7091_v32, 16 }
  0x98   : > { %v8719_v37 = vunpack.c.l.bf16 %v1856_v7  ;;  %365 = vst.msk [vmem:[#allocation3 + $0xa0] sm:$0xff] %vm344_vm6, %v7476_v30  ;;  %v1929_v45 = vshrl.u32 %v7091_v32, 16  ;;  %v1935_v46 = vshll.u32 %v7092_v33, 16  ;;  %v8730_v58 = vunpack.c.l.bf16 %v1866_v43  ;;  %v7069_v33 = vld [vmem:[%s8322_s29 + $0xc] sm:$0xf] }
  0x99   : > { %v7621_v22 = vpop.permute.xlu1 %7620  ;;  %v7626_v42 = vpop.permute.xlu2 %7625  ;;  %366 = vst.msk [vmem:[#allocation3 + $0xa8] sm:$0xff] %vm344_vm6, %v7477_v31  ;;  %v1918_v59 = vrot.slane %v1916_v40, 4  ;;  %v1921_v60 = vrot.slane %v1919_v39, 5  ;;  %v1927_v61 = vrot.slane %v1925_v44, 5  ;;  %v8737_v63 = vpack.i.bf16 %v7477_v31, %v7476_v30  ;;  %v7070_v40 = vld [vmem:[%s8322_s29 + $0x10] sm:$0xf] }
  0x9a   : > { %v7623_v52 = vunpack.i.h.bf16 %v7621_v22  ;;  %v7622_v53 = vunpack.i.l.bf16 %v7621_v22  ;;  %v7628_v54 = vunpack.i.h.bf16 %v7626_v42  ;;  %v7627_v57 = vunpack.i.l.bf16 %v7626_v42  ;;  %345 = vst.msk [vmem:[#allocation3] sm:$0xff] %vm344_vm6, %v7456_v35 }
  0x9b   : > { %v1931_v2 = vrot.slane %v1929_v45, 4  ;;  %v7512_v3 = vunpack.c.l.bf16 %v8727_v48  ;;  %v7513_v4 = vunpack.c.h.bf16 %v8727_v48  ;;  %v1922_v9 = vor.u32 %v1921_v60, %v1918_v59  ;;  %346 = vst.msk [vmem:[#allocation3 + $0x8] sm:$0xff] %vm344_vm6, %v7457_v38  ;;  %v7071_v45 = vld [vmem:[%s8322_s29 + $0x14] sm:$0x1] }
  0x9c   : > { %7770 = vrot.lane.b32.xlu0 %v8645_v23, %s8257_s9  ;;  %1011 = vst.msk [vmem:[#allocation3 + $0x30] sm:$0xff] %vm1004_vm7, %v7622_v53  ;;  %v7864_v23 = vpack.i.bf16 %v8730_v58, %v8719_v37  ;;  %v1937_v10 = vrot.slane %v1935_v46, 5  ;;  %v338_v11 = vunpack.c.l.bf16 %v306_v6  ;;  %v339_v51 = vunpack.c.h.bf16 %v306_v6 }
  0x9d   : > { %7835 = vrot.lane.b32.xlu1 %v8652_v27, %s8257_s9  ;;  %1012 = vst.msk [vmem:[#allocation3 + $0x38] sm:$0xff] %vm1004_vm7, %v7623_v52  ;;  %v1932_v14 = vor.u32 %v1931_v2, %v1927_v61  ;;  %v8757_v15 = vpack.i.bf16 %v7513_v4, %v7512_v3  ;;  %v314_v27 = vunpack.c.l.bf16 %v8743_v8  ;;  %v1923_v18 = vrot.slane %v1922_v9, 4 }
  0x9e   : > { %1013 = vst.msk [vmem:[#allocation3 + $0x40] sm:$0xff] %vm1004_vm7, %v7627_v57  ;;  %v1530_v19 = vunpack.c.l.bf16 %v7061_v56  ;;  %v1531_v20 = vunpack.c.h.bf16 %v7061_v56  ;;  %v1988_v21 = vshrl.u32 %v7099_v62, 16  ;;  %v1991_v55 = vshll.u32 %v7099_v62, 16  ;;  %v302_v56 = vld [vmem:[%s8322_s29 + $0x84] sm:$0xff]  }
  0x9f   : > { %7765 = vrot.lane.b32.xlu2 %v8647_v24, %s8257_s9  ;;  %1014 = vst.msk [vmem:[#allocation3 + $0x48] sm:$0xff] %vm1004_vm7, %v7628_v54  ;;  %v1933_v36 = vrot.slane %v1932_v14, 4  ;;  %v1997_v5 = vshll.u32 %v7100_v12, 16  ;;  %v2001_v25 = vshrl.u32 %v7100_v12, 16  ;;  %v1928_v30 = vsel %vm8334_vm2, %v1923_v18, %v1927_v61 }
  0xa0   : > { %371 = vst.msk [vmem:[#allocation3 + $0xd0] sm:$0xff] %vm344_vm6, %v338_v11  ;;  %v315_v24 = vunpack.c.h.bf16 %v8743_v8  ;;  %v1990_v31 = vrot.slane %v1988_v21, 4  ;;  %v2007_v32 = vshll.u32 %v7101_v17, 16  ;;  %v8773_v38 = vpack.i.bf16 %v1531_v20, %v1530_v19  ;;  %v7108_v20 = vld [vmem:[%s8322_s29 + $0xa8] sm:$0xf] }
  0xa1   : > { %v7641_v28 = vpop.permute.xlu1 %7640  ;;  %v1938_v35 = vsel %vm8334_vm2, %v1933_v36, %v1937_v10  ;;  %372 = vst.msk [vmem:[#allocation3 + $0xd8] sm:$0xff] %vm344_vm6, %v339_v51  ;;  %v8776_v22 = vunpack.c.l.bf16 %v1928_v30  ;;  %v1993_v42 = vrot.slane %v1991_v55, 5  ;;  %v1999_v43 = vrot.slane %v1997_v5, 5  ;;  %v7564_v51 = vld [vmem:[%s8322_s29 + $0xc0] sm:$0xff]  }
  0xa2   : > { %v7643_v7 = vunpack.i.h.bf16 %v7641_v28  ;;  %v7642_v34 = vunpack.i.l.bf16 %v7641_v28  ;;  %347 = vst.msk [vmem:[#allocation3 + $0x10] sm:$0xff] %vm344_vm6, %v314_v27  ;;  %v2003_v44 = vrot.slane %v2001_v25, 4  ;;  %v8783_v53 = vunpack.c.l.bf16 %v1938_v35  ;;  %v7109_v25 = vld [vmem:[%s8322_s29 + $0xac] sm:$0xf] }
  0xa3   : > { %v7606_v39 = vpop.permute.xlu0 %7605  ;;  %v1748_v54 = vshrl.u32 %v7069_v33, 16  ;;  %v1994_v57 = vor.u32 %v1993_v42, %v1990_v31  ;;  %v2009_v60 = vrot.slane %v2007_v32, 5  ;;  %v1757_v2 = vshll.u32 %v7070_v40, 16  ;;  %348 = vst.msk [vmem:[#allocation3 + $0x18] sm:$0xff] %vm344_vm6, %v315_v24 }
  0xa4   : > { %7785 = vrot.lane.b32.xlu0 %v8659_v1, %s8257_s9  ;;  %1019 = vst.msk [vmem:[#allocation3 + $0x70] sm:$0xff] %vm1004_vm7, %v7642_v34  ;;  %v7608_v46 = vunpack.i.h.bf16 %v7606_v39  ;;  %v7607_v52 = vunpack.i.l.bf16 %v7606_v39  ;;  %v2004_v59 = vor.u32 %v2003_v44, %v1999_v43  ;;  %v1751_v1 = vshll.u32 %v7069_v33, 16 }
  0xa5   : > { %7850 = vrot.lane.b32.xlu1 %v7849_v0, %s8258_s10  ;;  %1020 = vst.msk [vmem:[#allocation3 + $0x78] sm:$0xff] %vm1004_vm7, %v7643_v7  ;;  %v1750_v62 = vrot.slane %v1748_v54, 4  ;;  %v1761_v6 = vshrl.u32 %v7070_v40, 16  ;;  %v1767_v8 = vshll.u32 %v7071_v45, 16  ;;  %v1995_v0 = vrot.slane %v1994_v57, 4 }
  0xa6   : > { %v7631_v61 = vpop.permute.xlu2 %7630  ;;  %1005 = vst.msk [vmem:[#allocation3] sm:$0xff] %vm1004_vm7, %v7607_v52  ;;  %v2005_v9 = vrot.slane %v2004_v59, 4  ;;  %v7879_v10 = vpack.i.bf16 %v8783_v53, %v8776_v22  ;;  %v1753_v11 = vrot.slane %v1751_v1, 5  ;;  %v1759_v12 = vrot.slane %v1757_v2, 5  ;;  %v7110_v7 = vld [vmem:[%s8322_s29 + $0xb0] sm:$0x1] }
  0xa7   : > { %7780 = vrot.lane.b32.xlu2 %v8666_v41, %s8257_s9  ;;  %v7633_v13 = vunpack.i.h.bf16 %v7631_v61  ;;  %v7632_v16 = vunpack.i.l.bf16 %v7631_v61  ;;  %1006 = vst.msk [vmem:[#allocation3 + $0x8] sm:$0xff] %vm1004_vm7, %v7608_v46  ;;  %v1763_v14 = vrot.slane %v1761_v6, 4  ;;  %v2000_v27 = vsel %vm8334_vm2, %v1995_v0, %v1999_v43  ;;  %v7078_v54 = vld [vmem:[%s8322_s29 + $0x30] sm:$0xf]  ;;  %v7079_v57 = vld [vmem:[%s8322_s29 + $0x34] sm:$0xf] }
  0xa8   : > { %v2010_v17 = vsel %vm8334_vm2, %v2005_v9, %v2009_v60  ;;  %v334_v18 = vunpack.c.l.bf16 %v302_v56  ;;  %v335_v19 = vunpack.c.h.bf16 %v302_v56  ;;  %v8806_v55 = vunpack.c.l.bf16 %v2000_v27  ;;  %373 = vst.msk [vmem:[#allocation3 + $0xe0] sm:$0xff] %vm344_vm6, %v7512_v3 }
  0xa9   : > { %1015 = vst.msk [vmem:[#allocation3 + $0x50] sm:$0xff] %vm1004_vm7, %v7632_v16  ;;  %v7656_v41 = vpop.permute.xlu1 %7655  ;;  %v8808_v5 = vunpack.c.l.bf16 %v2010_v17  ;;  %v1754_v28 = vor.u32 %v1753_v11, %v1750_v62  ;;  %v1764_v30 = vor.u32 %v1763_v14, %v1759_v12  ;;  %v1769_v24 = vrot.slane %v1767_v8, 5  ;;  %v7080_v11 = vld [vmem:[%s8322_s29 + $0x38] sm:$0x1]  ;;  %v7075_v17 = vld [vmem:[%s8322_s29 + $0x24] sm:$0xf] }
  0xaa   : > { %1016 = vst.msk [vmem:[#allocation3 + $0x58] sm:$0xff] %vm1004_vm7, %v7633_v13  ;;  %v7658_v21 = vunpack.i.h.bf16 %v7656_v41  ;;  %v7657_v36 = vunpack.i.l.bf16 %v7656_v41  ;;  %v7516_v31 = vunpack.c.l.bf16 %v7564_v51  ;;  %v7517_v33 = vunpack.c.h.bf16 %v7564_v51 }
  0xab   : > { %367 = vst.msk [vmem:[#allocation3 + $0xb0] sm:$0xff] %vm344_vm6, %v334_v18  ;;  %v7894_v32 = vpack.i.bf16 %v8808_v5, %v8806_v55  ;;  %v2060_v34 = vshrl.u32 %v7108_v20, 16  ;;  %v2063_v35 = vshll.u32 %v7108_v20, 16  ;;  %v1765_v39 = vrot.slane %v1764_v30, 4  ;;  %v7088_v55 = vld [vmem:[%s8322_s29 + $0x58] sm:$0xf] }
  0xac   : > { %7800 = vrot.lane.b32.xlu0 %v8670_v50, %s8257_s9  ;;  %1025 = vst.msk [vmem:[#allocation3 + $0xa0] sm:$0xff] %vm1004_vm7, %v7657_v36  ;;  %v1755_v50 = vrot.slane %v1754_v28, 4  ;;  %v2069_v42 = vshll.u32 %v7109_v25, 16  ;;  %v2073_v43 = vshrl.u32 %v7109_v25, 16  ;;  %v8824_v46 = vpack.i.bf16 %v7517_v33, %v7516_v31  ;;  %v7076_v25 = vld [vmem:[%s8322_s29 + $0x28] sm:$0xf] }
  0xad   : > { %7865 = vrot.lane.b32.xlu1 %v7864_v23, %s8258_s10  ;;  %1026 = vst.msk [vmem:[#allocation3 + $0xa8] sm:$0xff] %vm1004_vm7, %v7658_v21  ;;  %v7611_v40 = vpop.permute.xlu0 %7610  ;;  %v2062_v52 = vrot.slane %v2060_v34, 4  ;;  %v1770_v58 = vsel %vm8334_vm2, %v1765_v39, %v1769_v24  ;;  %v2065_v23 = vrot.slane %v2063_v35, 5  ;;  %v2079_v61 = vshll.u32 %v7110_v7, 16  ;;  %v7077_v33 = vld [vmem:[%s8322_s29 + $0x2c] sm:$0x1] }
  0xae   : > { %v7613_v44 = vunpack.i.h.bf16 %v7611_v40  ;;  %v7612_v45 = vunpack.i.l.bf16 %v7611_v40  ;;  %368 = vst.msk [vmem:[#allocation3 + $0xb8] sm:$0xff] %vm344_vm6, %v335_v19  ;;  %v1760_v37 = vsel %vm8334_vm2, %v1755_v50, %v1759_v12  ;;  %v2071_v59 = vrot.slane %v2069_v42, 5  ;;  %v298_v12 = vld [vmem:[%s8322_s29 + $0x6c] sm:$0xff]  }
  0xaf   : > { %7795 = vrot.lane.b32.xlu2 %v8707_v29, %s8257_s9  ;;  %v8838_v60 = vunpack.c.l.bf16 %v1760_v37  ;;  %v8840_v1 = vunpack.c.l.bf16 %v1770_v58  ;;  %v2075_v29 = vrot.slane %v2073_v43, 4  ;;  %v2066_v6 = vor.u32 %v2065_v23, %v2062_v52  ;;  %374 = vst.msk [vmem:[#allocation3 + $0xe8] sm:$0xff] %vm344_vm6, %v7513_v4  ;;  %v7117_v37 = vld [vmem:[%s8322_s29 + $0xc] sm:$0xe]  ;;  %v7118_v58 = vld [vmem:[%s8322_s29 + $0x10] sm:$0xf] }
  0xb0   : > { %1007 = vst.msk [vmem:[#allocation3 + $0x10] sm:$0xff] %vm1004_vm7, %v7612_v45  ;;  %v7646_v62 = vpop.permute.xlu2 %7645  ;;  %v1820_v8 = vshrl.u32 %v7078_v54, 16  ;;  %v1823_v56 = vshll.u32 %v7078_v54, 16  ;;  %v1829_v3 = vshll.u32 %v7079_v57, 16  ;;  %v2081_v27 = vrot.slane %v2079_v61, 5 }
  0xb1   : > { %v7671_v2 = vpop.permute.xlu1 %7670  ;;  %1008 = vst.msk [vmem:[#allocation3 + $0x18] sm:$0xff] %vm1004_vm7, %v7613_v44  ;;  %v7648_v13 = vunpack.i.h.bf16 %v7646_v62  ;;  %v7647_v16 = vunpack.i.l.bf16 %v7646_v62  ;;  %v7844_v14 = vpack.i.bf16 %v8840_v1, %v8838_v60  ;;  %v2067_v51 = vrot.slane %v2066_v6, 4 }
  0xb2   : > { %v7673_v0 = vunpack.i.h.bf16 %v7671_v2  ;;  %v7672_v9 = vunpack.i.l.bf16 %v7671_v2  ;;  %v2076_v41 = vor.u32 %v2075_v29, %v2071_v59  ;;  %v1822_v18 = vrot.slane %v1820_v8, 4 }
  0xb3   : > { %1021 = vst.msk [vmem:[#allocation3 + $0x80] sm:$0xff] %vm1004_vm7, %v7647_v16  ;;  %v1825_v19 = vrot.slane %v1823_v56, 5  ;;  %v1831_v48 = vrot.slane %v1829_v3, 5  ;;  %v1833_v20 = vshrl.u32 %v7079_v57, 16  ;;  %v2072_v4 = vsel %vm8334_vm2, %v2067_v51, %v2071_v59  ;;  %v7119_v3 = vld [vmem:[%s8322_s29 + $0x14] sm:$0x1] }
  0xb4   : > { %7815 = vrot.lane.b32.xlu0 %v8715_v49, %s8257_s9  ;;  %1022 = vst.msk [vmem:[#allocation3 + $0x88] sm:$0xff] %vm1004_vm7, %v7648_v13  ;;  %v2077_v21 = vrot.slane %v2076_v41, 4  ;;  %v1839_v36 = vshll.u32 %v7080_v11, 16  ;;  %v330_v49 = vunpack.c.l.bf16 %v298_v12  ;;  %v8863_v28 = vunpack.c.l.bf16 %v2072_v4  ;;  %v7089_v4 = vld [vmem:[%s8322_s29 + $0x5c] sm:$0x1] }
  0xb5   : > { %7880 = vrot.lane.b32.xlu1 %v7879_v10, %s8258_s10  ;;  %1031 = vst.msk [vmem:[#allocation3 + $0xd0] sm:$0xff] %vm1004_vm7, %v7672_v9  ;;  %v1826_v30 = vor.u32 %v1825_v19, %v1822_v18  ;;  %v1835_v24 = vrot.slane %v1833_v20, 4  ;;  %v331_v31 = vunpack.c.h.bf16 %v298_v12  ;;  %v1796_v10 = vshrl.u32 %v7075_v17, 16 }
  0xb6   : > { %1032 = vst.msk [vmem:[#allocation3 + $0xd8] sm:$0xff] %vm1004_vm7, %v7673_v0  ;;  %v2082_v22 = vsel %vm8334_vm2, %v2077_v21, %v2081_v27  ;;  %v1841_v53 = vrot.slane %v1839_v36, 5  ;;  %v1799_v7 = vshll.u32 %v7075_v17, 16  ;;  %v1805_v50 = vshll.u32 %v7076_v25, 16  ;;  %v7087_v27 = vld [vmem:[%s8322_s29 + $0x54] sm:$0xf] }
  0xb7   : > { %7810 = vrot.lane.b32.xlu2 %v8737_v63, %s8257_s9  ;;  %v8871_v34 = vunpack.c.l.bf16 %v2082_v22  ;;  %v1827_v35 = vrot.slane %v1826_v30, 4  ;;  %v1836_v40 = vor.u32 %v1835_v24, %v1831_v48  ;;  %363 = vst.msk [vmem:[#allocation3 + $0x90] sm:$0xff] %vm344_vm6, %v330_v49  ;;  %v1798_v63 = vrot.slane %v1796_v10, 4  ;;  %v7084_v24 = vld [vmem:[%s8322_s29 + $0x48] sm:$0xf] }
  0xb8   : > { %364 = vst.msk [vmem:[#allocation3 + $0x98] sm:$0xff] %vm344_vm6, %v331_v31  ;;  %v1801_v42 = vrot.slane %v1799_v7, 5  ;;  %v1809_v43 = vshrl.u32 %v7076_v25, 16  ;;  %v1815_v44 = vshll.u32 %v7077_v33, 16  ;;  %v1807_v62 = vrot.slane %v1805_v50, 5 }
  0xb9   : > { %v7686_v39 = vpop.permute.xlu1 %7685  ;;  %v7909_v54 = vpack.i.bf16 %v8871_v34, %v8863_v28  ;;  %v1832_v57 = vsel %vm8334_vm2, %v1827_v35, %v1831_v48  ;;  %v1837_v59 = vrot.slane %v1836_v40, 4  ;;  %v7165_v0 = vrot.slane %v7117_v37, 9  ;;  %v7085_v10 = vld [vmem:[%s8322_s29 + $0x4c] sm:$0xf] }
  0xba   : > { %v7688_v45 = vunpack.i.h.bf16 %v7686_v39  ;;  %v7687_v52 = vunpack.i.l.bf16 %v7686_v39  ;;  %v7636_v23 = vpop.permute.xlu0 %7635  ;;  %v8881_v29 = vunpack.c.l.bf16 %v1832_v57  ;;  %v1802_v61 = vor.u32 %v1801_v42, %v1798_v63 }
  0xbb   : > { %v7638_v2 = vunpack.i.h.bf16 %v7636_v23  ;;  %v7637_v6 = vunpack.i.l.bf16 %v7636_v23  ;;  %v1811_v8 = vrot.slane %v1809_v43, 4  ;;  %v1817_v56 = vrot.slane %v1815_v44, 5  ;;  %v7086_v43 = vld [vmem:[%s8322_s29 + $0x50] sm:$0x1] }
  0xbc   : > { %7830 = vrot.lane.b32.xlu0 %v8757_v15, %s8257_s9  ;;  %1441 = vst.msk [vmem:[#allocation3] sm:$0xff] %vm1440_vm8, %v7687_v52  ;;  %v1842_v15 = vsel %vm8334_vm2, %v1837_v59, %v1841_v53  ;;  %v1803_v16 = vrot.slane %v1802_v61, 4  ;;  %v2454_v9 = vrot.slane %v7118_v58, 5  ;;  %v2457_v18 = vrot.slane %v7119_v3, 5  ;;  %v7127_v52 = vld [vmem:[%s8322_s29 + $0x34] sm:$0xf] }
  0xbd   : > { %7895 = vrot.lane.b32.xlu1 %v7894_v32, %s8258_s10  ;;  %v7661_v13 = vpop.permute.xlu2 %7660  ;;  %1442 = vst.msk [vmem:[#allocation3 + $0x8] sm:$0xff] %vm1440_vm8, %v7688_v45  ;;  %v8895_v51 = vunpack.c.l.bf16 %v1842_v15  ;;  %v1812_v41 = vor.u32 %v1811_v8, %v1807_v62  ;;  %v1892_v49 = vshrl.u32 %v7087_v27, 16  ;;  %v1895_v25 = vshll.u32 %v7087_v27, 16  ;;  %v7126_v61 = vld [vmem:[%s8322_s29 + $0x30] sm:$0xe] }
  0xbe   : > { %v7663_v11 = vunpack.i.h.bf16 %v7661_v13  ;;  %v7662_v12 = vunpack.i.l.bf16 %v7661_v13  ;;  %1017 = vst.msk [vmem:[#allocation3 + $0x60] sm:$0xff] %vm1004_vm7, %v7637_v6  ;;  %v1808_v5 = vsel %vm8334_vm2, %v1803_v16, %v1807_v62  ;;  %v2455_v32 = vsel %vm8403_vm5, %v7165_v0, %v2454_v9  ;;  %v7128_v27 = vld [vmem:[%s8322_s29 + $0x38] sm:$0x1] }
  0xbf   : > { %7825 = vrot.lane.b32.xlu2 %v8773_v38, %s8257_s9  ;;  %1018 = vst.msk [vmem:[#allocation3 + $0x68] sm:$0xff] %vm1004_vm7, %v7638_v2  ;;  %v2456_v17 = vrot.slane %v2454_v9, 4  ;;  %v7859_v19 = vpack.i.bf16 %v8895_v51, %v8881_v29  ;;  %v1813_v48 = vrot.slane %v1812_v41, 4  ;;  %v8909_v20 = vunpack.c.l.bf16 %v1808_v5 }
  0xc0   : > { %1027 = vst.msk [vmem:[#allocation3 + $0xb0] sm:$0xff] %vm1004_vm7, %v7662_v12  ;;  %v2596_v38 = vunpack.c.l.bf16 %v2455_v32  ;;  %v1901_v30 = vshll.u32 %v7088_v55, 16  ;;  %v1894_v35 = vrot.slane %v1892_v49, 4  ;;  %v1897_v40 = vrot.slane %v1895_v25, 5 }
  0xc1   : > { %1028 = vst.msk [vmem:[#allocation3 + $0xb8] sm:$0xff] %vm1004_vm7, %v7663_v11  ;;  %v7701_v21 = vpop.permute.xlu1 %7700  ;;  %v2458_v36 = vsel %vm8403_vm5, %v2456_v17, %v2457_v18  ;;  %v1818_v22 = vsel %vm8334_vm2, %v1813_v48, %v1817_v56  ;;  %v1905_v63 = vshrl.u32 %v7088_v55, 16  ;;  %v1911_v42 = vshll.u32 %v7089_v4, 16  ;;  %v7096_v18 = vld [vmem:[%s8322_s29 + $0x78] sm:$0xf] }
  0xc2   : > { %v7703_v31 = vunpack.i.h.bf16 %v7701_v21  ;;  %v7702_v33 = vunpack.i.l.bf16 %v7701_v21  ;;  %v2597_v53 = vunpack.c.l.bf16 %v2458_v36  ;;  %v8919_v7 = vunpack.c.l.bf16 %v1818_v22  ;;  %v7097_v21 = vld [vmem:[%s8322_s29 + $0x7c] sm:$0xf] }
  0xc3   : > { %v1903_v50 = vrot.slane %v1901_v30, 5  ;;  %v1868_v44 = vshrl.u32 %v7084_v24, 16  ;;  %v1898_v60 = vor.u32 %v1897_v40, %v1894_v35  ;;  %v1871_v1 = vshll.u32 %v7084_v24, 16  ;;  %v7098_v30 = vld [vmem:[%s8322_s29 + $0x80] sm:$0x1] }
  0xc4   : > { %7845 = vrot.lane.b32.xlu0 %v7844_v14, %s8258_s10  ;;  %1447 = vst.msk [vmem:[#allocation3 + $0x30] sm:$0xff] %vm1440_vm8, %v7702_v33  ;;  %v7924_v39 = vpack.i.bf16 %v2597_v53, %v2596_v38  ;;  %v7854_v45 = vpack.i.bf16 %v8919_v7, %v8909_v20  ;;  %v1877_v14 = vshll.u32 %v7085_v10, 16  ;;  %v1907_v37 = vrot.slane %v1905_v63, 4  ;;  %v8961_v33 = vld [vmem:[%s8322_s29 + $0xb4] sm:$0xff]  }
  0xc5   : > { %7910 = vrot.lane.b32.xlu1 %v7909_v54, %s8258_s10  ;;  %1448 = vst.msk [vmem:[#allocation3 + $0x38] sm:$0xff] %vm1440_vm8, %v7703_v31  ;;  %v1913_v58 = vrot.slane %v1911_v42, 5  ;;  %v1870_v23 = vrot.slane %v1868_v44, 4  ;;  %v1881_v59 = vshrl.u32 %v7085_v10, 16  ;;  %v1899_v54 = vrot.slane %v1898_v60, 4 }
  0xc6   : > { %v7651_v57 = vpop.permute.xlu0 %7650  ;;  %v1873_v62 = vrot.slane %v1871_v1, 5  ;;  %v1908_v2 = vor.u32 %v1907_v37, %v1903_v50  ;;  %v1879_v6 = vrot.slane %v1877_v14, 5  ;;  %v1887_v56 = vshll.u32 %v7086_v43, 16  ;;  %v7093_v60 = vld [vmem:[%s8322_s29 + $0x6c] sm:$0xf] }
  0xc7   : > { %7840 = vrot.lane.b32.xlu2 %v8824_v46, %s8257_s9  ;;  %v7653_v28 = vunpack.i.h.bf16 %v7651_v57  ;;  %v7652_v34 = vunpack.i.l.bf16 %v7651_v57  ;;  %v1883_v8 = vrot.slane %v1881_v59, 4  ;;  %v1904_v13 = vsel %vm8334_vm2, %v1899_v54, %v1903_v50 }
  0xc8   : > { %v1874_v16 = vor.u32 %v1873_v62, %v1870_v23  ;;  %v7168_v0 = vrot.slane %v7126_v61, 9  ;;  %v2475_v46 = vrot.slane %v7127_v52, 5  ;;  %v1909_v12 = vrot.slane %v1908_v2, 4 }
  0xc9   : > { %v7676_v3 = vpop.permute.xlu2 %7675  ;;  %1023 = vst.msk [vmem:[#allocation3 + $0x90] sm:$0xff] %vm1004_vm7, %v7652_v34  ;;  %v7716_v15 = vpop.permute.xlu1 %7715  ;;  %v2175_v41 = vunpack.c.l.bf16 %v1904_v13  ;;  %v1884_v17 = vor.u32 %v1883_v8, %v1879_v6  ;;  %v1889_v20 = vrot.slane %v1887_v56, 5  ;;  %v2478_v36 = vrot.slane %v7128_v27, 5  ;;  %v7095_v34 = vld [vmem:[%s8322_s29 + $0x74] sm:$0x1] }
  0xca   : > { %v7678_v9 = vunpack.i.h.bf16 %v7676_v3  ;;  %v7677_v11 = vunpack.i.l.bf16 %v7676_v3  ;;  %1024 = vst.msk [vmem:[#allocation3 + $0x98] sm:$0xff] %vm1004_vm7, %v7653_v28  ;;  %v7718_v55 = vunpack.i.h.bf16 %v7716_v15  ;;  %v7717_v5 = vunpack.i.l.bf16 %v7716_v15  ;;  %v7094_v28 = vld [vmem:[%s8322_s29 + $0x70] sm:$0xf]  ;;  %v7135_v56 = vld [vmem:[%s8322_s29 + $0x54] sm:$0xe] }
  0xcb   : > { %v1875_v32 = vrot.slane %v1874_v16, 4  ;;  %v1914_v48 = vsel %vm8334_vm2, %v1909_v12, %v1913_v58  ;;  %v2476_v38 = vsel %vm8403_vm5, %v7168_v0, %v2475_v46  ;;  %v2477_v4 = vrot.slane %v2475_v46, 4  ;;  %v7136_v0 = vld [vmem:[%s8322_s29 + $0x58] sm:$0xf]  ;;  %v7137_v46 = vld [vmem:[%s8322_s29 + $0x5c] sm:$0x1] }
  0xcc   : > { %7860 = vrot.lane.b32.xlu0 %v7859_v19, %s8258_s10  ;;  %1033 = vst.msk [vmem:[#allocation3 + $0xe0] sm:$0xff] %vm1004_vm7, %v7677_v11  ;;  %v2176_v29 = vunpack.c.l.bf16 %v1914_v48  ;;  %v1885_v19 = vrot.slane %v1884_v17, 4  ;;  %v2602_v25 = vunpack.c.l.bf16 %v2476_v38  ;;  %v1964_v24 = vshrl.u32 %v7096_v18, 16  ;;  %v7105_v38 = vld [vmem:[%s8322_s29 + $0x9c] sm:$0xf] }
  0xcd   : > { %1034 = vst.msk [vmem:[#allocation3 + $0xe8] sm:$0xff] %vm1004_vm7, %v7678_v9  ;;  %7925 = vrot.lane.b32.xlu1 %v7924_v39, %s8259_s11  ;;  %v1880_v51 = vsel %vm8334_vm2, %v1875_v32, %v1879_v6  ;;  %v1967_v31 = vshll.u32 %v7096_v18, 16  ;;  %v2479_v10 = vsel %vm8403_vm5, %v2477_v4, %v2478_v36  ;;  %v1973_v7 = vshll.u32 %v7097_v21, 16 }
  0xce   : > { %1453 = vst.msk [vmem:[#allocation3 + $0x60] sm:$0xff] %vm1440_vm8, %v7717_v5  ;;  %v2173_v49 = vunpack.c.l.bf16 %v1880_v51  ;;  %v7874_v22 = vpack.i.bf16 %v2176_v29, %v2175_v41  ;;  %v1890_v53 = vsel %vm8334_vm2, %v1885_v19, %v1889_v20  ;;  %v2603_v40 = vunpack.c.l.bf16 %v2479_v10 }
  0xcf   : > { %7855 = vrot.lane.b32.xlu2 %v7854_v45, %s8258_s10  ;;  %1454 = vst.msk [vmem:[#allocation3 + $0x68] sm:$0xff] %vm1440_vm8, %v7718_v55  ;;  %v2174_v35 = vunpack.c.l.bf16 %v1890_v53  ;;  %v1966_v50 = vrot.slane %v1964_v24, 4  ;;  %v1969_v39 = vrot.slane %v1967_v31, 5  ;;  %v1975_v42 = vrot.slane %v1973_v7, 5 }
  0xd0   : > { %v1977_v43 = vshrl.u32 %v7097_v21, 16  ;;  %v1983_v44 = vshll.u32 %v7098_v30, 16  ;;  %v342_v45 = vunpack.c.l.bf16 %v8961_v33  ;;  %v7939_v37 = vpack.i.bf16 %v2603_v40, %v2602_v25  ;;  %v7107_v40 = vld [vmem:[%s8322_s29 + $0xa4] sm:$0x1] }
  0xd1   : > { %v7691_v63 = vpop.permute.xlu2 %7690  ;;  %v7869_v57 = vpack.i.bf16 %v2174_v35, %v2173_v49  ;;  %v1970_v59 = vor.u32 %v1969_v39, %v1966_v50  ;;  %v343_v2 = vunpack.c.h.bf16 %v8961_v33  ;;  %v1940_v6 = vshrl.u32 %v7093_v60, 16 }
  0xd2   : > { %v7693_v1 = vunpack.i.h.bf16 %v7691_v63  ;;  %v7692_v14 = vunpack.i.l.bf16 %v7691_v63  ;;  %v7666_v52 = vpop.permute.xlu0 %7665  ;;  %v1979_v61 = vrot.slane %v1977_v43, 4  ;;  %375 = vst.msk [vmem:[#allocation3 + $0xf0] sm:$0xff] %vm344_vm6, %v342_v45  ;;  %v1985_v54 = vrot.slane %v1983_v44, 5 }
  0xd3   : > { %v7668_v58 = vunpack.i.h.bf16 %v7666_v52  ;;  %v7667_v23 = vunpack.i.l.bf16 %v7666_v52  ;;  %v7731_v62 = vpop.permute.xlu1 %7730  ;;  %v1943_v8 = vshll.u32 %v7093_v60, 16  ;;  %v1971_v3 = vrot.slane %v1970_v59, 4  ;;  %376 = vst.msk [vmem:[#allocation3 + $0xf8] sm:$0xff] %vm344_vm6, %v343_v2  ;;  %v7102_v59 = vld [vmem:[%s8322_s29 + $0x90] sm:$0xf] }
  0xd4   : > { %7875 = vrot.lane.b32.xlu0 %v7874_v22, %s8258_s10  ;;  %1443 = vst.msk [vmem:[#allocation3 + $0x10] sm:$0xff] %vm1440_vm8, %v7692_v14  ;;  %v1980_v13 = vor.u32 %v1979_v61, %v1975_v42  ;;  %v7733_v15 = vunpack.i.h.bf16 %v7731_v62  ;;  %v7732_v16 = vunpack.i.l.bf16 %v7731_v62  ;;  %v1942_v9 = vrot.slane %v1940_v6, 4  ;;  %v7106_v22 = vld [vmem:[%s8322_s29 + $0xa0] sm:$0xf]  ;;  %v7103_v62 = vld [vmem:[%s8322_s29 + $0x94] sm:$0xf] }
  0xd5   : > { %1444 = vst.msk [vmem:[#allocation3 + $0x18] sm:$0xff] %vm1440_vm8, %v7693_v1  ;;  %7940 = vrot.lane.b32.xlu1 %v7939_v37, %s8259_s11  ;;  %v1945_v11 = vrot.slane %v1943_v8, 5  ;;  %v1949_v12 = vshll.u32 %v7094_v28, 16  ;;  %v1953_v41 = vshrl.u32 %v7094_v28, 16  ;;  %v1976_v27 = vsel %vm8334_vm2, %v1971_v3, %v1975_v42  ;;  %v7104_v2 = vld [vmem:[%s8322_s29 + $0x98] sm:$0x1] }
  0xd6   : > { %1029 = vst.msk [vmem:[#allocation3 + $0xc0] sm:$0xff] %vm1004_vm7, %v7667_v23  ;;  %v1981_v55 = vrot.slane %v1980_v13, 4  ;;  %v1959_v5 = vshll.u32 %v7095_v34, 16  ;;  %v7171_v32 = vrot.slane %v7135_v56, 9  ;;  %v2181_v17 = vunpack.c.l.bf16 %v1976_v27 }
  0xd7   : > { %1030 = vst.msk [vmem:[#allocation3 + $0xc8] sm:$0xff] %vm1004_vm7, %v7668_v58  ;;  %7870 = vrot.lane.b32.xlu2 %v7869_v57, %s8258_s10  ;;  %v1946_v18 = vor.u32 %v1945_v11, %v1942_v9  ;;  %v1951_v48 = vrot.slane %v1949_v12, 5  ;;  %v1955_v20 = vrot.slane %v1953_v41, 4  ;;  %v2496_v51 = vrot.slane %v7136_v0, 5 }
  0xd8   : > { %1459 = vst.msk [vmem:[#allocation3 + $0x90] sm:$0xff] %vm1440_vm8, %v7732_v16  ;;  %v1986_v4 = vsel %vm8334_vm2, %v1981_v55, %v1985_v54  ;;  %v1961_v29 = vrot.slane %v1959_v5, 5  ;;  %v2499_v19 = vrot.slane %v7137_v46, 5  ;;  %v2036_v53 = vshrl.u32 %v7105_v38, 16  ;;  %v7145_v55 = vld [vmem:[%s8322_s29 + $0x7c] sm:$0xf] }
  0xd9   : > { %v7706_v21 = vpop.permute.xlu2 %7705  ;;  %1460 = vst.msk [vmem:[#allocation3 + $0x98] sm:$0xff] %vm1440_vm8, %v7733_v15  ;;  %v2182_v36 = vunpack.c.l.bf16 %v1986_v4  ;;  %v1947_v30 = vrot.slane %v1946_v18, 4  ;;  %v1956_v24 = vor.u32 %v1955_v20, %v1951_v48  ;;  %v2497_v31 = vsel %vm8403_vm5, %v7171_v32, %v2496_v51  ;;  %v7144_v15 = vld [vmem:[%s8322_s29 + $0x78] sm:$0xe] }
  0xda   : > { %v7708_v49 = vunpack.i.h.bf16 %v7706_v21  ;;  %v7707_v25 = vunpack.i.l.bf16 %v7706_v21  ;;  %v2498_v33 = vrot.slane %v2496_v51, 4  ;;  %v2608_v35 = vunpack.c.l.bf16 %v2497_v31 }
  0xdb   : > { %v7889_v10 = vpack.i.bf16 %v2182_v36, %v2181_v17  ;;  %v1952_v7 = vsel %vm8334_vm2, %v1947_v30, %v1951_v48  ;;  %v2039_v50 = vshll.u32 %v7105_v38, 16  ;;  %v1957_v39 = vrot.slane %v1956_v24, 4  ;;  %v7114_v48 = vld [vmem:[%s8322_s29 + $0xc0] sm:$0xf] }
  0xdc   : > { %1449 = vst.msk [vmem:[#allocation3 + $0x40] sm:$0xff] %vm1440_vm8, %v7707_v25  ;;  %v2179_v63 = vunpack.c.l.bf16 %v1952_v7  ;;  %v2500_v42 = vsel %vm8403_vm5, %v2498_v33, %v2499_v19  ;;  %v2038_v43 = vrot.slane %v2036_v53, 4  ;;  %v2045_v1 = vshll.u32 %v7106_v22, 16 }
  0xdd   : > { %1450 = vst.msk [vmem:[#allocation3 + $0x48] sm:$0xff] %vm1440_vm8, %v7708_v49  ;;  %7890 = vrot.lane.b32.xlu0 %v7889_v10, %s8258_s10  ;;  %v2609_v45 = vunpack.c.l.bf16 %v2500_v42  ;;  %v2041_v60 = vrot.slane %v2039_v50, 5  ;;  %v2049_v14 = vshrl.u32 %v7106_v22, 16  ;;  %v1962_v37 = vsel %vm8334_vm2, %v1957_v39, %v1961_v29  ;;  %v7146_v29 = vld [vmem:[%s8322_s29 + $0x80] sm:$0x1] }
  0xde   : > { %v7681_v44 = vpop.permute.xlu0 %7680  ;;  %v2055_v58 = vshll.u32 %v7107_v40, 16  ;;  %v2180_v61 = vunpack.c.l.bf16 %v1962_v37  ;;  %v2047_v54 = vrot.slane %v2045_v1, 5  ;;  %v2012_v12 = vshrl.u32 %v7102_v59, 16  ;;  %v7115_v22 = vld [vmem:[%s8322_s29 + $0xc4] sm:$0xf] }
  0xdf   : > { %v7683_v52 = vunpack.i.h.bf16 %v7681_v44  ;;  %v7682_v57 = vunpack.i.l.bf16 %v7681_v44  ;;  %v7746_v23 = vpop.permute.xlu1 %7745  ;;  %v7954_v28 = vpack.i.bf16 %v2609_v45, %v2608_v35  ;;  %v2042_v34 = vor.u32 %v2041_v60, %v2038_v43  ;;  %v7116_v60 = vld [vmem:[%s8322_s29 + $0xc8] sm:$0x1] }
  0xe0   : > { %v2051_v6 = vrot.slane %v2049_v14, 4  ;;  %v2057_v8 = vrot.slane %v2055_v58, 5  ;;  %v7748_v3 = vunpack.i.h.bf16 %v7746_v23  ;;  %v7747_v13 = vunpack.i.l.bf16 %v7746_v23 }
  0xe1   : > { %1035 = vst.msk [vmem:[#allocation3 + $0xf0] sm:$0xff] %vm1004_vm7, %v7682_v57  ;;  %v7721_v56 = vpop.permute.xlu2 %7720  ;;  %v7884_v16 = vpack.i.bf16 %v2180_v61, %v2179_v63  ;;  %7955 = vrot.lane.b32.xlu1 %v7954_v28, %s8259_s11  ;;  %v2043_v0 = vrot.slane %v2042_v34, 4  ;;  %v2015_v41 = vshll.u32 %v7102_v59, 16  ;;  %v2021_v27 = vshll.u32 %v7103_v62, 16 }
  0xe2   : > { %1036 = vst.msk [vmem:[#allocation3 + $0xf8] sm:$0xff] %vm1004_vm7, %v7683_v52  ;;  %v7723_v46 = vunpack.i.h.bf16 %v7721_v56  ;;  %v7722_v9 = vunpack.i.l.bf16 %v7721_v56  ;;  %v2052_v11 = vor.u32 %v2051_v6, %v2047_v54  ;;  %v2025_v32 = vshrl.u32 %v7103_v62, 16 }
  0xe3   : > { %1465 = vst.msk [vmem:[#allocation3 + $0xc0] sm:$0xff] %vm1440_vm8, %v7747_v13  ;;  %7885 = vrot.lane.b32.xlu2 %v7884_v16, %s8258_s10  ;;  %v2048_v5 = vsel %vm8334_vm2, %v2043_v0, %v2047_v54  ;;  %v2031_v17 = vshll.u32 %v7104_v2, 16  ;;  %v7174_v18 = vrot.slane %v7144_v15, 9  ;;  %v2014_v4 = vrot.slane %v2012_v12, 4  ;;  %v7111_v15 = vld [vmem:[%s8322_s29 + $0xb4] sm:$0xf] }
  0xe4   : > { %1455 = vst.msk [vmem:[#allocation3 + $0x70] sm:$0xff] %vm1440_vm8, %v7722_v9  ;;  %v2053_v20 = vrot.slane %v2052_v11, 4  ;;  %v2187_v38 = vunpack.c.l.bf16 %v2048_v5  ;;  %v2017_v21 = vrot.slane %v2015_v41, 5  ;;  %v2023_v19 = vrot.slane %v2021_v27, 5  ;;  %v7112_v16 = vld [vmem:[%s8322_s29 + $0xb8] sm:$0xf] }
  0xe5   : > { %1456 = vst.msk [vmem:[#allocation3 + $0x78] sm:$0xff] %vm1440_vm8, %v7723_v46  ;;  %v2027_v36 = vrot.slane %v2025_v32, 4  ;;  %v2033_v49 = vrot.slane %v2031_v17, 5  ;;  %v2517_v25 = vrot.slane %v7145_v55, 5  ;;  %v2520_v39 = vrot.slane %v7146_v29, 5 }
  0xe6   : > { %1466 = vst.msk [vmem:[#allocation3 + $0xc8] sm:$0xff] %vm1440_vm8, %v7748_v3  ;;  %v7696_v51 = vpop.permute.xlu0 %7695  ;;  %v2058_v30 = vsel %vm8334_vm2, %v2053_v20, %v2057_v8  ;;  %v2018_v33 = vor.u32 %v2017_v21, %v2014_v4  ;;  %v2108_v42 = vshrl.u32 %v7114_v48, 16  ;;  %v2111_v1 = vshll.u32 %v7114_v48, 16  ;;  %v7113_v12 = vld [vmem:[%s8322_s29 + $0xbc] sm:$0x1] }
  0xe7   : > { %v7698_v24 = vunpack.i.h.bf16 %v7696_v51  ;;  %v7697_v31 = vunpack.i.l.bf16 %v7696_v51  ;;  %v9026_v53 = vpop.permute.xlu1 %7760  ;;  %v2188_v10 = vunpack.c.l.bf16 %v2058_v30  ;;  %v2028_v7 = vor.u32 %v2027_v36, %v2023_v19  ;;  %v7153_v41 = vld [vmem:[%s8322_s29 + $0x9c] sm:$0xe]  ;;  %v7155_v48 = vld [vmem:[%s8322_s29 + $0xa4] sm:$0x1]  ;;  %v7123_v20 = vld [vmem:[%s8322_s29 + $0x24] sm:$0xe] }
  0xe8   : > { %v2518_v35 = vsel %vm8403_vm5, %v7174_v18, %v2517_v25  ;;  %v2519_v40 = vrot.slane %v2517_v25, 4  ;;  %v2019_v50 = vrot.slane %v2018_v33, 4  ;;  %v2117_v14 = vshll.u32 %v7115_v22, 16  ;;  %v7154_v18 = vld [vmem:[%s8322_s29 + $0xa0] sm:$0xf] }
  0xe9   : > { %1445 = vst.msk [vmem:[#allocation3 + $0x20] sm:$0xff] %vm1440_vm8, %v7697_v31  ;;  %v2614_v63 = vunpack.c.l.bf16 %v2518_v35  ;;  %v7736_v43 = vpop.permute.xlu2 %7735  ;;  %v7904_v44 = vpack.i.bf16 %v2188_v10, %v2187_v38  ;;  %v2029_v45 = vrot.slane %v2028_v7, 4  ;;  %v2110_v37 = vrot.slane %v2108_v42, 4  ;;  %v7124_v30 = vld [vmem:[%s8322_s29 + $0x28] sm:$0xf] }
  0xea   : > { %1446 = vst.msk [vmem:[#allocation3 + $0x28] sm:$0xff] %vm1440_vm8, %v7698_v24  ;;  %v2024_v52 = vsel %vm8334_vm2, %v2019_v50, %v2023_v19  ;;  %v2521_v57 = vsel %vm8403_vm5, %v2519_v40, %v2520_v39  ;;  %v2121_v58 = vshrl.u32 %v7115_v22, 16  ;;  %v2113_v28 = vrot.slane %v2111_v1, 5 }
  0xeb   : > { %7905 = vrot.lane.b32.xlu0 %v7904_v44, %s8258_s10  ;;  %v2034_v23 = vsel %vm8334_vm2, %v2029_v45, %v2033_v49  ;;  %v2185_v59 = vunpack.c.l.bf16 %v2024_v52  ;;  %v2615_v61 = vunpack.c.l.bf16 %v2521_v57  ;;  %v2119_v54 = vrot.slane %v2117_v14, 5 }
  0xec   : > { %v2186_v34 = vunpack.c.l.bf16 %v2034_v23  ;;  %v2123_v62 = vrot.slane %v2121_v58, 4  ;;  %v2127_v2 = vshll.u32 %v7116_v60, 16  ;;  %v2114_v8 = vor.u32 %v2113_v28, %v2110_v37 }
  0xed   : > { %v7969_v6 = vpack.i.bf16 %v2615_v61, %v2614_v63  ;;  %v7738_v56 = vunpack.i.h.bf16 %v7736_v43  ;;  %v7737_v3 = vunpack.i.l.bf16 %v7736_v43  ;;  %v7763_v11 = vunpack.i.h.bf16 %v9026_v53 }
  0xee   : > { %v7711_v13 = vpop.permute.xlu0 %7710  ;;  %v7899_v0 = vpack.i.bf16 %v2186_v34, %v2185_v59  ;;  %v2124_v46 = vor.u32 %v2123_v62, %v2119_v54  ;;  %v2129_v9 = vrot.slane %v2127_v2, 5  ;;  %v2115_v55 = vrot.slane %v2114_v8, 4 }
  0xef   : > { %v9045_v27 = vpop.permute.xlu1 %7775  ;;  %7970 = vrot.lane.b32.xlu1 %v7969_v6, %s8259_s11  ;;  %1461 = vst.msk [vmem:[#allocation3 + $0xa0] sm:$0xff] %vm1440_vm8, %v7737_v3  ;;  %v7762_v5 = vunpack.i.l.bf16 %v9026_v53  ;;  %v7713_v32 = vunpack.i.h.bf16 %v7711_v13  ;;  %v7712_v17 = vunpack.i.l.bf16 %v7711_v13  ;;  %v2084_v4 = vshrl.u32 %v7111_v15, 16  ;;  %v7125_v53 = vld [vmem:[%s8322_s29 + $0x2c] sm:$0x1]  ;;  %v7121_v6 = vld [vmem:[%s8322_s29 + $0x1c] sm:$0xf] }
  0xf0   : > { %7900 = vrot.lane.b32.xlu2 %v7899_v0, %s8258_s10  ;;  %v2125_v38 = vrot.slane %v2124_v46, 4  ;;  %1462 = vst.msk [vmem:[#allocation3 + $0xa8] sm:$0xff] %vm1440_vm8, %v7738_v56  ;;  %v2087_v21 = vshll.u32 %v7111_v15, 16  ;;  %v2093_v29 = vshll.u32 %v7112_v16, 16  ;;  %v2120_v19 = vsel %vm8334_vm2, %v2115_v55, %v2119_v54  ;;  %v7122_v0 = vld [vmem:[%s8322_s29 + $0x20] sm:$0x1] }
  0xf1   : > { %v7751_v51 = vpop.permute.xlu2 %7750  ;;  %1471 = vst.msk [vmem:[#allocation3 + $0xf0] sm:$0xff] %vm1440_vm8, %v7762_v5  ;;  %v2097_v36 = vshrl.u32 %v7112_v16, 16  ;;  %v2103_v49 = vshll.u32 %v7113_v12, 16  ;;  %v7177_v25 = vrot.slane %v7153_v41, 9  ;;  %v2193_v31 = vunpack.c.l.bf16 %v2120_v19  ;;  %v7120_v16 = vld [vmem:[%s8322_s29 + $0x18] sm:$0xe] }
  0xf2   : > { %v2130_v24 = vsel %vm8334_vm2, %v2125_v38, %v2129_v9  ;;  %1472 = vst.msk [vmem:[#allocation3 + $0xf8] sm:$0xff] %vm1440_vm8, %v7763_v11  ;;  %v2086_v33 = vrot.slane %v2084_v4, 4  ;;  %v2089_v22 = vrot.slane %v2087_v21, 5  ;;  %v2095_v7 = vrot.slane %v2093_v29, 5  ;;  %v7163_v46 = vld [vmem:[%s8322_s29 + $0xc4] sm:$0xf] }
  0xf3   : > { %v2194_v10 = vunpack.c.l.bf16 %v2130_v24  ;;  %1451 = vst.msk [vmem:[#allocation3 + $0x50] sm:$0xff] %vm1440_vm8, %v7712_v17  ;;  %v2099_v35 = vrot.slane %v2097_v36, 4  ;;  %v2105_v40 = vrot.slane %v2103_v49, 5  ;;  %v2538_v39 = vrot.slane %v7154_v18, 5  ;;  %v7162_v41 = vld [vmem:[%s8322_s29 + $0xc0] sm:$0xe] }
  0xf4   : > { %1452 = vst.msk [vmem:[#allocation3 + $0x58] sm:$0xff] %vm1440_vm8, %v7713_v32  ;;  %v2090_v50 = vor.u32 %v2089_v22, %v2086_v33  ;;  %v2541_v63 = vrot.slane %v7155_v48, 5  ;;  %v7167_v42 = vrot.slane %v7123_v20, 9  ;;  %v2468_v45 = vrot.slane %v7124_v30, 5  ;;  %v7164_v55 = vld [vmem:[%s8322_s29 + $0xc8] sm:$0x1] }
  0xf5   : > { %v7919_v43 = vpack.i.bf16 %v2194_v10, %v2193_v31  ;;  %v2100_v44 = vor.u32 %v2099_v35, %v2095_v7  ;;  %v2471_v60 = vrot.slane %v7125_v53, 5  ;;  %v2539_v52 = vsel %vm8403_vm5, %v7177_v25, %v2538_v39  ;;  %v7132_v48 = vld [vmem:[%s8322_s29 + $0x48] sm:$0xe]  ;;  %v7133_v20 = vld [vmem:[%s8322_s29 + $0x4c] sm:$0xf] }
  0xf6   : > { %v7726_v1 = vpop.permute.xlu0 %7725  ;;  %v2091_v14 = vrot.slane %v2090_v50, 4  ;;  %v2540_v57 = vrot.slane %v2538_v39, 4  ;;  %v7753_v37 = vunpack.i.h.bf16 %v7751_v51  ;;  %v2620_v59 = vunpack.c.l.bf16 %v2539_v52 }
  0xf7   : > { %v9067_v58 = vpop.permute.xlu1 %7790  ;;  %7920 = vrot.lane.b32.xlu0 %v7919_v43, %s8258_s10  ;;  %v2101_v23 = vrot.slane %v2100_v44, 4  ;;  %v2469_v61 = vsel %vm8403_vm5, %v7167_v42, %v2468_v45  ;;  %v2470_v28 = vrot.slane %v2468_v45, 4  ;;  %v7752_v2 = vunpack.i.l.bf16 %v7751_v51  ;;  %v7134_v51 = vld [vmem:[%s8322_s29 + $0x50] sm:$0x1] }
  0xf8   : > { %v2096_v34 = vsel %vm8334_vm2, %v2091_v14, %v2095_v7  ;;  %v2542_v54 = vsel %vm8403_vm5, %v2540_v57, %v2541_v63  ;;  %v2600_v62 = vunpack.c.l.bf16 %v2469_v61  ;;  %1468 = vst.msk [vmem:[#allocation3 + $0xd8] sm:$0xff] %vm1440_vm8, %v7753_v37  ;;  %v7778_v12 = vunpack.i.h.bf16 %v9045_v27  ;;  %v7130_v14 = vld [vmem:[%s8322_s29 + $0x40] sm:$0xf]  ;;  %v7566_v61 = vld [vmem:[%s8322_s29 + $0x30] sm:$0xff]  }
  0xf9   : > { %v9078_v8 = vpop.permute.xlu2 %7765  ;;  %v2106_v56 = vsel %vm8334_vm2, %v2101_v23, %v2105_v40  ;;  %v2191_v3 = vunpack.c.l.bf16 %v2096_v34  ;;  %v2621_v13 = vunpack.c.l.bf16 %v2542_v54  ;;  %v2472_v15 = vsel %vm8403_vm5, %v2470_v28, %v2471_v60  ;;  %1467 = vst.msk [vmem:[#allocation3 + $0xd0] sm:$0xff] %vm1440_vm8, %v7752_v2  ;;  %v7141_v2 = vld [vmem:[%s8322_s29 + $0x6c] sm:$0xe] }
  0xfa   : > { %v2192_v9 = vunpack.c.l.bf16 %v2106_v56  ;;  %v2601_v11 = vunpack.c.l.bf16 %v2472_v15  ;;  %v7777_v32 = vunpack.i.l.bf16 %v9045_v27  ;;  %v7728_v17 = vunpack.i.h.bf16 %v7726_v1  ;;  %1672 = vst.msk [vmem:[#allocation3 + $0x28] sm:$0xff] %vm1666_vm9, %v7778_v12  ;;  %v7143_v15 = vld [vmem:[%s8322_s29 + $0x74] sm:$0x1] }
  0xfb   : > { %v7984_v5 = vpack.i.bf16 %v2621_v13, %v2620_v59  ;;  %v7727_v18 = vunpack.i.l.bf16 %v7726_v1  ;;  %v7166_v21 = vrot.slane %v7120_v16, 9  ;;  %v2461_v29 = vrot.slane %v7121_v6, 5  ;;  %v7129_v1 = vld [vmem:[%s8322_s29 + $0x3c] sm:$0xe]  ;;  %v7131_v59 = vld [vmem:[%s8322_s29 + $0x44] sm:$0x1] }
  0xfc   : > { %v7914_v38 = vpack.i.bf16 %v2192_v9, %v2191_v3  ;;  %v7934_v4 = vpack.i.bf16 %v2601_v11, %v2600_v62  ;;  %1671 = vst.msk [vmem:[#allocation3 + $0x20] sm:$0xff] %vm1666_vm9, %v7777_v32  ;;  %v2464_v19 = vrot.slane %v7122_v0, 5  ;;  %v7180_v36 = vrot.slane %v7162_v41, 9  ;;  %v7142_v6 = vld [vmem:[%s8322_s29 + $0x70] sm:$0xf] }
  0xfd   : > { %7985 = vrot.lane.b32.xlu1 %v7984_v5, %s8259_s11  ;;  %v2559_v49 = vrot.slane %v7163_v46, 5  ;;  %v2562_v25 = vrot.slane %v7164_v55, 5  ;;  %1457 = vst.msk [vmem:[#allocation3 + $0x80] sm:$0xff] %vm1440_vm8, %v7727_v18  ;;  %v2462_v30 = vsel %vm8403_vm5, %v7166_v21, %v2461_v29  ;;  %v2463_v24 = vrot.slane %v2461_v29, 4 }
  0xfe   : > { %v9098_v27 = vpop.permute.xlu0 %7740  ;;  %7915 = vrot.lane.b32.xlu2 %v7914_v38, %s8258_s10  ;;  %v7170_v31 = vrot.slane %v7132_v48, 9  ;;  %v2489_v33 = vrot.slane %v7133_v20, 5  ;;  %1458 = vst.msk [vmem:[#allocation3 + $0x88] sm:$0xff] %vm1440_vm8, %v7728_v17  ;;  %v2598_v53 = vunpack.c.l.bf16 %v2462_v30  ;;  %v2492_v35 = vrot.slane %v7134_v51, 5  ;;  %v7138_v20 = vld [vmem:[%s8322_s29 + $0x60] sm:$0xe] }
  0xff   : > { %v9104_v22 = vpop.permute.xlu1 %7805  ;;  %7935 = vrot.lane.b32.xlu0 %v7934_v4, %s8259_s11  ;;  %v2560_v10 = vsel %vm8403_vm5, %v7180_v36, %v2559_v49  ;;  %v2561_v7 = vrot.slane %v2559_v49, 4  ;;  %v2465_v40 = vsel %vm8403_vm5, %v2463_v24, %v2464_v19  ;;  %v7768_v60 = vunpack.i.h.bf16 %v9078_v8  ;;  %v7139_v51 = vld [vmem:[%s8322_s29 + $0x64] sm:$0xf]  ;;  %v7140_v19 = vld [vmem:[%s8322_s29 + $0x68] sm:$0x1]  ;;  %v7191_v24 = vld [vmem:[%s8322_s29 + $0x54] sm:$0xff]  }
 0x100   : > { %v2626_v50 = vunpack.c.l.bf16 %v2560_v10  ;;  %v2490_v39 = vsel %vm8403_vm5, %v7170_v31, %v2489_v33  ;;  %v2491_v63 = vrot.slane %v2489_v33, 4  ;;  %v2599_v43 = vunpack.c.l.bf16 %v2465_v40  ;;  %v7150_v31 = vld [vmem:[%s8322_s29 + $0x90] sm:$0xe]  ;;  %v7151_v33 = vld [vmem:[%s8322_s29 + $0x94] sm:$0xf] }
 0x101   : > { %v9114_v42 = vpop.permute.xlu2 %7780  ;;  %v2563_v44 = vsel %vm8403_vm5, %v2561_v7, %v2562_v25  ;;  %v2606_v45 = vunpack.c.l.bf16 %v2490_v39  ;;  %v7767_v37 = vunpack.i.l.bf16 %v9078_v8  ;;  %v7793_v23 = vunpack.i.h.bf16 %v9067_v58  ;;  %1668 = vst.msk [vmem:[#allocation3 + $0x8] sm:$0xff] %vm1666_vm9, %v7768_v60  ;;  %v7152_v40 = vld [vmem:[%s8322_s29 + $0x98] sm:$0x1] }
 0x102   : > { %v2627_v52 = vunpack.c.l.bf16 %v2563_v44  ;;  %v2493_v57 = vsel %vm8403_vm5, %v2491_v63, %v2492_v35  ;;  %v7929_v28 = vpack.i.bf16 %v2599_v43, %v2598_v53  ;;  %v7792_v54 = vunpack.i.l.bf16 %v9067_v58 }
 0x103   : > { %v2607_v34 = vunpack.c.l.bf16 %v2493_v57  ;;  %v7743_v62 = vunpack.i.h.bf16 %v9098_v27  ;;  %1667 = vst.msk [vmem:[#allocation3] sm:$0xff] %vm1666_vm9, %v7767_v37  ;;  %v7742_v8 = vunpack.i.l.bf16 %v9098_v27  ;;  %v7169_v3 = vrot.slane %v7129_v1, 9 }
 0x104   : > { %v7999_v56 = vpack.i.bf16 %v2627_v52, %v2626_v50  ;;  %v2482_v13 = vrot.slane %v7130_v14, 5  ;;  %1677 = vst.msk [vmem:[#allocation3 + $0x50] sm:$0xff] %vm1666_vm9, %v7792_v54  ;;  %v2485_v0 = vrot.slane %v7131_v59, 5  ;;  %v7524_v46 = vunpack.c.l.bf16 %v7566_v61 }
 0x105   : > { %v7949_v16 = vpack.i.bf16 %v2607_v34, %v2606_v45  ;;  %v7525_v9 = vunpack.c.h.bf16 %v7566_v61  ;;  %1678 = vst.msk [vmem:[#allocation3 + $0x58] sm:$0xff] %vm1666_vm9, %v7793_v23  ;;  %v7173_v41 = vrot.slane %v7141_v2, 9  ;;  %v2510_v55 = vrot.slane %v7142_v6, 5 }
 0x106   : > { %v7756_v58 = vpop.permute.xlu0 %7755  ;;  %7930 = vrot.lane.b32.xlu2 %v7929_v28, %s8259_s11  ;;  %8000 = vrot.lane.b32.xlu1 %v7999_v56, %s8259_s11  ;;  %v2483_v11 = vsel %vm8403_vm5, %v7169_v3, %v2482_v13  ;;  %v2484_v12 = vrot.slane %v2482_v13, 4  ;;  %1463 = vst.msk [vmem:[#allocation3 + $0xb0] sm:$0xff] %vm1440_vm8, %v7742_v8  ;;  %v2513_v18 = vrot.slane %v7143_v15, 5  ;;  %v7783_v48 = vunpack.i.h.bf16 %v9114_v42  ;;  %v7147_v28 = vld [vmem:[%s8322_s29 + $0x84] sm:$0xe]  ;;  %v7569_v3 = vld [vmem:[%s8322_s29 + $0x78] sm:$0xff]  }
 0x107   : > { %v9141_v5 = vpop.permute.xlu1 %7820  ;;  %7950 = vrot.lane.b32.xlu0 %v7949_v16, %s8259_s11  ;;  %v2604_v32 = vunpack.c.l.bf16 %v2483_v11  ;;  %v8014_v17 = vpack.i.bf16 %v7525_v9, %v7524_v46  ;;  %1464 = vst.msk [vmem:[#allocation3 + $0xb8] sm:$0xff] %vm1440_vm8, %v7743_v62  ;;  %v2511_v4 = vsel %vm8403_vm5, %v7173_v41, %v2510_v55  ;;  %v2512_v21 = vrot.slane %v2510_v55, 4  ;;  %v7148_v56 = vld [vmem:[%s8322_s29 + $0x88] sm:$0xf]  ;;  %v7149_v8 = vld [vmem:[%s8322_s29 + $0x8c] sm:$0x1] }
 0x108   : > { %v2486_v38 = vsel %vm8403_vm5, %v2484_v12, %v2485_v0  ;;  %v7782_v29 = vunpack.i.l.bf16 %v9114_v42  ;;  %v2612_v25 = vunpack.c.l.bf16 %v2511_v4  ;;  %1674 = vst.msk [vmem:[#allocation3 + $0x38] sm:$0xff] %vm1666_vm9, %v7783_v48  ;;  %v7808_v27 = vunpack.i.h.bf16 %v9104_v22  ;;  %v7159_v46 = vld [vmem:[%s8322_s29 + $0xb4] sm:$0xe]  ;;  %v7160_v9 = vld [vmem:[%s8322_s29 + $0xb8] sm:$0xf] }
 0x109   : > { %v9155_v36 = vpop.permute.xlu2 %7795  ;;  %v2605_v49 = vunpack.c.l.bf16 %v2486_v38  ;;  %v7807_v30 = vunpack.i.l.bf16 %v9104_v22  ;;  %v2514_v53 = vsel %vm8403_vm5, %v2512_v21, %v2513_v18  ;;  %v7758_v10 = vunpack.i.h.bf16 %v7756_v58 }
 0x10a   : > { %1673 = vst.msk [vmem:[#allocation3 + $0x30] sm:$0xff] %vm1666_vm9, %v7782_v29  ;;  %v7757_v7 = vunpack.i.l.bf16 %v7756_v58  ;;  %v7172_v35 = vrot.slane %v7138_v20, 9  ;;  %v2613_v39 = vunpack.c.l.bf16 %v2514_v53  ;;  %v2503_v63 = vrot.slane %v7139_v51, 5 }
 0x10b   : > { %v7944_v50 = vpack.i.bf16 %v2605_v49, %v2604_v32  ;;  %1683 = vst.msk [vmem:[#allocation3 + $0x80] sm:$0xff] %vm1666_vm9, %v7807_v30  ;;  %v2506_v42 = vrot.slane %v7140_v19, 5  ;;  %v2832_v22 = vunpack.c.l.bf16 %v7191_v24  ;;  %v2833_v43 = vunpack.c.h.bf16 %v7191_v24  ;;  %v7161_v32 = vld [vmem:[%s8322_s29 + $0xbc] sm:$0x1] }
 0x10c   : > { %1684 = vst.msk [vmem:[#allocation3 + $0x88] sm:$0xff] %vm1666_vm9, %v7808_v27  ;;  %v7176_v44 = vrot.slane %v7150_v31, 9  ;;  %v2531_v45 = vrot.slane %v7151_v33, 5  ;;  %v7964_v60 = vpack.i.bf16 %v2613_v39, %v2612_v25  ;;  %v2504_v1 = vsel %vm8403_vm5, %v7172_v35, %v2503_v63  ;;  %v7156_v31 = vld [vmem:[%s8322_s29 + $0xa8] sm:$0xe] }
 0x10d   : > { %1469 = vst.msk [vmem:[#allocation3 + $0xe0] sm:$0xff] %vm1440_vm8, %v7757_v7  ;;  %v2505_v14 = vrot.slane %v2503_v63, 4  ;;  %v2534_v52 = vrot.slane %v7152_v40, 5  ;;  %v2610_v37 = vunpack.c.l.bf16 %v2504_v1  ;;  %v8029_v23 = vpack.i.bf16 %v2833_v43, %v2832_v22  ;;  %v7157_v33 = vld [vmem:[%s8322_s29 + $0xac] sm:$0xf] }
 0x10e   : > { %v7771_v57 = vpop.permute.xlu0 %7770  ;;  %7945 = vrot.lane.b32.xlu2 %v7944_v50, %s8259_s11  ;;  %8015 = vrot.lane.b32.xlu1 %v8014_v17, %s8260_s12  ;;  %1470 = vst.msk [vmem:[#allocation3 + $0xe8] sm:$0xff] %vm1440_vm8, %v7758_v10  ;;  %v2532_v59 = vsel %vm8403_vm5, %v7176_v44, %v2531_v45  ;;  %v2533_v61 = vrot.slane %v2531_v45, 4  ;;  %v7798_v2 = vunpack.i.h.bf16 %v9155_v36  ;;  %v7797_v6 = vunpack.i.l.bf16 %v9155_v36  ;;  %v7158_v40 = vld [vmem:[%s8322_s29 + $0xb0] sm:$0x1]  ;;  %v7203_v50 = vld [vmem:[%s8322_s29 + $0x9c] sm:$0xff]  }
 0x10f   : > { %v9178_v34 = vpop.permute.xlu1 %7835  ;;  %7965 = vrot.lane.b32.xlu0 %v7964_v60, %s8259_s11  ;;  %v2507_v54 = vsel %vm8403_vm5, %v2505_v14, %v2506_v42  ;;  %v2618_v62 = vunpack.c.l.bf16 %v2532_v59  ;;  %v7823_v16 = vunpack.i.h.bf16 %v9141_v5  ;;  %v7822_v0 = vunpack.i.l.bf16 %v9141_v5  ;;  %v7183_v44 = vld [vmem:[%s8322_s29 + $0x24] sm:$0xff]  }
 0x110   : > { %v2611_v13 = vunpack.c.l.bf16 %v2507_v54  ;;  %v2535_v15 = vsel %vm8403_vm5, %v2533_v61, %v2534_v52  ;;  %1679 = vst.msk [vmem:[#allocation3 + $0x60] sm:$0xff] %vm1666_vm9, %v7797_v6  ;;  %v7773_v12 = vunpack.i.h.bf16 %v7771_v57  ;;  %v7772_v41 = vunpack.i.l.bf16 %v7771_v57 }
 0x111   : > { %v7811_v58 = vpop.permute.xlu2 %7810  ;;  %v2619_v11 = vunpack.c.l.bf16 %v2535_v15  ;;  %v7175_v55 = vrot.slane %v7147_v28, 9  ;;  %1680 = vst.msk [vmem:[#allocation3 + $0x68] sm:$0xff] %vm1666_vm9, %v7798_v2  ;;  %v2524_v18 = vrot.slane %v7148_v56, 5  ;;  %v2527_v48 = vrot.slane %v7149_v8, 5 }
 0x112   : > { %v7959_v17 = vpack.i.bf16 %v2611_v13, %v2610_v37  ;;  %v7536_v20 = vunpack.c.l.bf16 %v7569_v3  ;;  %1689 = vst.msk [vmem:[#allocation3 + $0xb0] sm:$0xff] %vm1666_vm9, %v7822_v0  ;;  %v7537_v5 = vunpack.c.h.bf16 %v7569_v3  ;;  %v7179_v4 = vrot.slane %v7159_v46, 9  ;;  %v7572_v3 = vld [vmem:[%s8322_s29 + $0xc0] sm:$0xff]   ;;  %v7567_v0 = vld [vmem:[%s8322_s29 + $0x48] sm:$0xff]  }
 0x113   : > { %v7979_v38 = vpack.i.bf16 %v2619_v11, %v2618_v62  ;;  %v2552_v21 = vrot.slane %v7160_v9, 5  ;;  %1690 = vst.msk [vmem:[#allocation3 + $0xb8] sm:$0xff] %vm1666_vm9, %v7823_v16  ;;  %v2525_v29 = vsel %vm8403_vm5, %v7175_v55, %v2524_v18  ;;  %v2526_v51 = vrot.slane %v2524_v18, 4  ;;  %v7565_v62 = vld [vmem:[%s8322_s29 + $0x18] sm:$0xff]  }
 0x114   : > { %v2555_v19 = vrot.slane %v7161_v32, 5  ;;  %v7813_v36 = vunpack.i.h.bf16 %v7811_v58  ;;  %1669 = vst.msk [vmem:[#allocation3 + $0x10] sm:$0xff] %vm1666_vm9, %v7772_v41  ;;  %v2616_v49 = vunpack.c.l.bf16 %v2525_v29  ;;  %v8044_v25 = vpack.i.bf16 %v7537_v5, %v7536_v20  ;;  %v7187_v41 = vld [vmem:[%s8322_s29 + $0x3c] sm:$0xff]   ;;  %v7217_v29 = vld [vmem:[%s8322_s29 + $0x28] sm:$0xf] }
 0x115   : > { %v2553_v27 = vsel %vm8403_vm5, %v7179_v4, %v2552_v21  ;;  %v2554_v30 = vrot.slane %v2552_v21, 4  ;;  %1670 = vst.msk [vmem:[#allocation3 + $0x18] sm:$0xff] %vm1666_vm9, %v7773_v12  ;;  %v2528_v53 = vsel %vm8403_vm5, %v2526_v51, %v2527_v48  ;;  %v7812_v7 = vunpack.i.l.bf16 %v7811_v58  ;;  %v7216_v21 = vld [vmem:[%s8322_s29 + $0x24] sm:$0xf] }
 0x116   : > { %v7786_v24 = vpop.permute.xlu0 %7785  ;;  %7960 = vrot.lane.b32.xlu2 %v7959_v17, %s8259_s11  ;;  %8030 = vrot.lane.b32.xlu1 %v8029_v23, %s8260_s12  ;;  %v2624_v10 = vunpack.c.l.bf16 %v2553_v27  ;;  %v7838_v35 = vunpack.i.h.bf16 %v9178_v34  ;;  %v2617_v63 = vunpack.c.l.bf16 %v2528_v53  ;;  %1686 = vst.msk [vmem:[#allocation3 + $0x98] sm:$0xff] %vm1666_vm9, %v7813_v36  ;;  %v7837_v22 = vunpack.i.l.bf16 %v9178_v34  ;;  %v7218_v27 = vld [vmem:[%s8322_s29 + $0x2c] sm:$0x1] }
 0x117   : > { %v7851_v39 = vpop.permute.xlu1 %7850  ;;  %7980 = vrot.lane.b32.xlu0 %v7979_v38, %s8259_s11  ;;  %v2556_v42 = vsel %vm8403_vm5, %v2554_v30, %v2555_v19  ;;  %v7788_v43 = vunpack.i.h.bf16 %v7786_v24  ;;  %1685 = vst.msk [vmem:[#allocation3 + $0x90] sm:$0xff] %vm1666_vm9, %v7812_v7  ;;  %v7787_v60 = vunpack.i.l.bf16 %v7786_v24  ;;  %v7178_v1 = vrot.slane %v7156_v31, 9  ;;  %v7195_v30 = vld [vmem:[%s8322_s29 + $0x6c] sm:$0xff]  }
 0x118   : > { %v2625_v45 = vunpack.c.l.bf16 %v2556_v42  ;;  %v2545_v14 = vrot.slane %v7157_v33, 5  ;;  %v7974_v57 = vpack.i.bf16 %v2617_v63, %v2616_v49  ;;  %1695 = vst.msk [vmem:[#allocation3 + $0xe0] sm:$0xff] %vm1666_vm9, %v7837_v22  ;;  %v2548_v37 = vrot.slane %v7158_v40, 5 }
 0x119   : > { %v7826_v52 = vpop.permute.xlu2 %7825  ;;  %v2844_v23 = vunpack.c.l.bf16 %v7203_v50  ;;  %v2845_v59 = vunpack.c.h.bf16 %v7203_v50  ;;  %1696 = vst.msk [vmem:[#allocation3 + $0xe8] sm:$0xff] %vm1666_vm9, %v7838_v35  ;;  %v2824_v54 = vunpack.c.l.bf16 %v7183_v44  ;;  %v2825_v56 = vunpack.c.h.bf16 %v7183_v44  ;;  %v7568_v50 = vld [vmem:[%s8322_s29 + $0x60] sm:$0xff]  }
 0x11a   : > { %v7994_v61 = vpack.i.bf16 %v2625_v45, %v2624_v10  ;;  %v2546_v28 = vsel %vm8403_vm5, %v7178_v1, %v2545_v14  ;;  %v2547_v34 = vrot.slane %v2545_v14, 4  ;;  %1675 = vst.msk [vmem:[#allocation3 + $0x40] sm:$0xff] %vm1666_vm9, %v7787_v60  ;;  %v7828_v8 = vunpack.i.h.bf16 %v7826_v52  ;;  %v7225_v1 = vld [vmem:[%s8322_s29 + $0x48] sm:$0xf] }
 0x11b   : > { %v2622_v2 = vunpack.c.l.bf16 %v2546_v28  ;;  %v9227_v6 = vpack.i.bf16 %v2845_v59, %v2844_v23  ;;  %1676 = vst.msk [vmem:[#allocation3 + $0x48] sm:$0xff] %vm1666_vm9, %v7788_v43  ;;  %v7827_v15 = vunpack.i.l.bf16 %v7826_v52  ;;  %v7853_v16 = vunpack.i.h.bf16 %v7851_v39  ;;  %v7226_v59 = vld [vmem:[%s8322_s29 + $0x4c] sm:$0xf] }
 0x11c   : > { %v2549_v13 = vsel %vm8403_vm5, %v2547_v34, %v2548_v37  ;;  %v9234_v9 = vpack.i.bf16 %v2825_v56, %v2824_v54  ;;  %1692 = vst.msk [vmem:[#allocation3 + $0xc8] sm:$0xff] %vm1666_vm9, %v7828_v8  ;;  %v7852_v58 = vunpack.i.l.bf16 %v7851_v39  ;;  %v7520_v12 = vunpack.c.l.bf16 %v7565_v62 }
 0x11d   : > { %v2623_v46 = vunpack.c.l.bf16 %v2549_v13  ;;  %1691 = vst.msk [vmem:[#allocation3 + $0xc0] sm:$0xff] %vm1666_vm9, %v7827_v15  ;;  %v7521_v17 = vunpack.c.h.bf16 %v7565_v62  ;;  %v7548_v18 = vunpack.c.l.bf16 %v7572_v3  ;;  %v7549_v38 = vunpack.c.h.bf16 %v7572_v3  ;;  %v7227_v3 = vld [vmem:[%s8322_s29 + $0x50] sm:$0x1] }
 0x11e   : > { %v7801_v11 = vpop.permute.xlu0 %7800  ;;  %7975 = vrot.lane.b32.xlu2 %v7974_v57, %s8259_s11  ;;  %8045 = vrot.lane.b32.xlu1 %v8044_v25, %s8260_s12  ;;  %2326 = vst.msk [vmem:[#allocation3 + $0x10] sm:$0xff] %vm2323_vm10, %v7852_v58  ;;  %v7528_v5 = vunpack.c.l.bf16 %v7567_v0  ;;  %v7529_v4 = vunpack.c.h.bf16 %v7567_v0  ;;  %v2828_v25 = vunpack.c.l.bf16 %v7187_v41  ;;  %v2829_v10 = vunpack.c.h.bf16 %v7187_v41  ;;  %v7570_v58 = vld [vmem:[%s8322_s29 + $0x90] sm:$0xff]  }
 0x11f   : > { %v7803_v55 = vunpack.i.h.bf16 %v7801_v11  ;;  %v7802_v32 = vunpack.i.l.bf16 %v7801_v11  ;;  %v7866_v48 = vpop.permute.xlu1 %7865  ;;  %7995 = vrot.lane.b32.xlu0 %v7994_v61, %s8259_s11  ;;  %v7989_v20 = vpack.i.bf16 %v2623_v46, %v2622_v2  ;;  %2327 = vst.msk [vmem:[#allocation3 + $0x18] sm:$0xff] %vm2323_vm10, %v7853_v16  ;;  %v9246_v51 = vpack.i.bf16 %v7521_v17, %v7520_v12 }
 0x120   : > { %v7868_v36 = vunpack.i.h.bf16 %v7866_v48  ;;  %v7867_v49 = vunpack.i.l.bf16 %v7866_v48  ;;  %v9251_v24 = vpack.i.bf16 %v7549_v38, %v7548_v18  ;;  %v9253_v31 = vpack.i.bf16 %v7529_v4, %v7528_v5 }
 0x121   : > { %v7841_v19 = vpop.permute.xlu2 %7840  ;;  %1681 = vst.msk [vmem:[#allocation3 + $0x70] sm:$0xff] %vm1666_vm9, %v7802_v32  ;;  %v3088_v7 = vshrl.u32 %v7216_v21, 16  ;;  %v3091_v35 = vshll.u32 %v7216_v21, 16  ;;  %v3097_v40 = vshll.u32 %v7217_v29, 16  ;;  %v3101_v39 = vshrl.u32 %v7217_v29, 16 }
 0x122   : > { %v7843_v33 = vunpack.i.h.bf16 %v7841_v19  ;;  %v7842_v53 = vunpack.i.l.bf16 %v7841_v19  ;;  %1682 = vst.msk [vmem:[#allocation3 + $0x78] sm:$0xff] %vm1666_vm9, %v7803_v55  ;;  %v3107_v63 = vshll.u32 %v7218_v27, 16  ;;  %v2836_v42 = vunpack.c.l.bf16 %v7195_v30  ;;  %v7234_v55 = vld [vmem:[%s8322_s29 + $0x6c] sm:$0xf] }
 0x123   : > { %v2837_v22 = vunpack.c.h.bf16 %v7195_v30  ;;  %v9259_v43 = vpack.i.bf16 %v2829_v10, %v2828_v25  ;;  %v3090_v44 = vrot.slane %v3088_v7, 4  ;;  %v3093_v45 = vrot.slane %v3091_v35, 5  ;;  %2332 = vst.msk [vmem:[#allocation3 + $0x40] sm:$0xff] %vm2323_vm10, %v7867_v49 }
 0x124   : > { %1697 = vst.msk [vmem:[#allocation3 + $0xf0] sm:$0xff] %vm1666_vm9, %v7842_v53  ;;  %v3099_v60 = vrot.slane %v3097_v40, 5  ;;  %v3103_v52 = vrot.slane %v3101_v39, 4  ;;  %v3109_v57 = vrot.slane %v3107_v63, 5  ;;  %v7532_v23 = vunpack.c.l.bf16 %v7568_v50 }
 0x125   : > { %1698 = vst.msk [vmem:[#allocation3 + $0xf8] sm:$0xff] %vm1666_vm9, %v7843_v33  ;;  %v9263_v37 = vpack.i.bf16 %v2837_v22, %v2836_v42  ;;  %v3094_v34 = vor.u32 %v3093_v45, %v3090_v44  ;;  %v7533_v62 = vunpack.c.h.bf16 %v7568_v50  ;;  %v3160_v13 = vshrl.u32 %v7225_v1, 16  ;;  %v7235_v22 = vld [vmem:[%s8322_s29 + $0x70] sm:$0xf] }
 0x126   : > { %v7816_v14 = vpop.permute.xlu0 %7815  ;;  %7990 = vrot.lane.b32.xlu2 %v7989_v20, %s8259_s11  ;;  %8060 = vrot.lane.b32.xlu1 %v9227_v6, %s8260_s12  ;;  %2333 = vst.msk [vmem:[#allocation3 + $0x48] sm:$0xff] %vm2323_vm10, %v7868_v36  ;;  %v3104_v2 = vor.u32 %v3103_v52, %v3099_v60  ;;  %v3163_v0 = vshll.u32 %v7225_v1, 16  ;;  %v3169_v46 = vshll.u32 %v7226_v59, 16  ;;  %v3173_v48 = vshrl.u32 %v7226_v59, 16  ;;  %v7199_v20 = vld [vmem:[%s8322_s29 + $0x84] sm:$0xff]   ;;  %v7207_v52 = vld [vmem:[%s8322_s29 + $0xb4] sm:$0xff]  }
 0x127   : > { %v7818_v61 = vunpack.i.h.bf16 %v7816_v14  ;;  %v7817_v28 = vunpack.i.l.bf16 %v7816_v14  ;;  %v7881_v54 = vpop.permute.xlu1 %7880  ;;  %8010 = vrot.lane.b32.xlu0 %v9234_v9, %s8260_s12  ;;  %v3095_v6 = vrot.slane %v3094_v34, 4  ;;  %v9274_v16 = vpack.i.bf16 %v7533_v62, %v7532_v23 }
 0x128   : > { %v7883_v56 = vunpack.i.h.bf16 %v7881_v54  ;;  %v7882_v8 = vunpack.i.l.bf16 %v7881_v54  ;;  %v3105_v11 = vrot.slane %v3104_v2, 4  ;;  %v3162_v41 = vrot.slane %v3160_v13, 4 }
 0x129   : > { %1687 = vst.msk [vmem:[#allocation3 + $0xa0] sm:$0xff] %vm1666_vm9, %v7817_v28  ;;  %v7856_v15 = vpop.permute.xlu2 %7855  ;;  %v3100_v32 = vsel %vm8334_vm2, %v3095_v6, %v3099_v60  ;;  %v3165_v17 = vrot.slane %v3163_v0, 5  ;;  %v3171_v18 = vrot.slane %v3169_v46, 5  ;;  %v3179_v4 = vshll.u32 %v7227_v3, 16  ;;  %v7243_v28 = vld [vmem:[%s8322_s29 + $0x90] sm:$0xf] }
 0x12a   : > { %1688 = vst.msk [vmem:[#allocation3 + $0xa8] sm:$0xff] %vm1666_vm9, %v7818_v61  ;;  %v7858_v9 = vunpack.i.h.bf16 %v7856_v15  ;;  %v7857_v12 = vunpack.i.l.bf16 %v7856_v15  ;;  %v3110_v38 = vsel %vm8334_vm2, %v3105_v11, %v3109_v57  ;;  %v9285_v5 = vunpack.c.l.bf16 %v3100_v32 }
 0x12b   : > { %2338 = vst.msk [vmem:[#allocation3 + $0x70] sm:$0xff] %vm2323_vm10, %v7882_v8  ;;  %v7540_v21 = vunpack.c.l.bf16 %v7570_v58  ;;  %v9288_v29 = vunpack.c.l.bf16 %v3110_v38  ;;  %v3166_v19 = vor.u32 %v3165_v17, %v3162_v41  ;;  %v3175_v36 = vrot.slane %v3173_v48, 4  ;;  %v7244_v41 = vld [vmem:[%s8322_s29 + $0x94] sm:$0xf]  ;;  %v7245_v38 = vld [vmem:[%s8322_s29 + $0x98] sm:$0x1] }
 0x12c   : > { %2328 = vst.msk [vmem:[#allocation3 + $0x20] sm:$0xff] %vm2323_vm10, %v7857_v12  ;;  %v7541_v49 = vunpack.c.h.bf16 %v7570_v58  ;;  %v3181_v27 = vrot.slane %v3179_v4, 5  ;;  %v2840_v30 = vunpack.c.l.bf16 %v7199_v20  ;;  %v2841_v33 = vunpack.c.h.bf16 %v7199_v20 }
 0x12d   : > { %2329 = vst.msk [vmem:[#allocation3 + $0x28] sm:$0xff] %vm2323_vm10, %v7858_v9  ;;  %v3232_v53 = vshrl.u32 %v7234_v55, 16  ;;  %v8089_v10 = vpack.i.bf16 %v9288_v29, %v9285_v5  ;;  %v3167_v40 = vrot.slane %v3166_v19, 4  ;;  %v3176_v39 = vor.u32 %v3175_v36, %v3171_v18 }
 0x12e   : > { %2339 = vst.msk [vmem:[#allocation3 + $0x78] sm:$0xff] %vm2323_vm10, %v7883_v56  ;;  %v7831_v25 = vpop.permute.xlu0 %7830  ;;  %8005 = vrot.lane.b32.xlu2 %v9246_v51, %s8260_s12  ;;  %8075 = vrot.lane.b32.xlu1 %v9251_v24, %s8260_s12  ;;  %v9300_v63 = vpack.i.bf16 %v7541_v49, %v7540_v21  ;;  %v7236_v24 = vld [vmem:[%s8322_s29 + $0x74] sm:$0x1]  ;;  %v9307_v60 = vpack.i.bf16 %v2841_v33, %v2840_v30  ;;  %v3235_v14 = vshll.u32 %v7234_v55, 16  ;;  %v3241_v54 = vshll.u32 %v7235_v22, 16 }
 0x12f   : > { %v7833_v7 = vunpack.i.h.bf16 %v7831_v25  ;;  %v7832_v35 = vunpack.i.l.bf16 %v7831_v25  ;;  %v7896_v50 = vpop.permute.xlu1 %7895  ;;  %8025 = vrot.lane.b32.xlu0 %v9253_v31, %s8260_s12  ;;  %v3172_v44 = vsel %vm8334_vm2, %v3167_v40, %v3171_v18  ;;  %v3234_v1 = vrot.slane %v3232_v53, 4  ;;  %v7571_v31 = vld [vmem:[%s8322_s29 + $0xa8] sm:$0xff]  }
 0x130   : > { %v7898_v42 = vunpack.i.h.bf16 %v7896_v50  ;;  %v7897_v51 = vunpack.i.l.bf16 %v7896_v50  ;;  %v3177_v57 = vrot.slane %v3176_v39, 4  ;;  %v9312_v23 = vunpack.c.l.bf16 %v3172_v44 }
 0x131   : > { %1693 = vst.msk [vmem:[#allocation3 + $0xd0] sm:$0xff] %vm1666_vm9, %v7832_v35  ;;  %v7871_v45 = vpop.permute.xlu2 %7870  ;;  %v3237_v34 = vrot.slane %v3235_v14, 5  ;;  %v3245_v62 = vshrl.u32 %v7235_v22, 16  ;;  %v3251_v2 = vshll.u32 %v7236_v24, 16  ;;  %v2848_v8 = vunpack.c.l.bf16 %v7207_v52 }
 0x132   : > { %1694 = vst.msk [vmem:[#allocation3 + $0xd8] sm:$0xff] %vm1666_vm9, %v7833_v7  ;;  %v7873_v59 = vunpack.i.h.bf16 %v7871_v45  ;;  %v7872_v61 = vunpack.i.l.bf16 %v7871_v45  ;;  %v3182_v56 = vsel %vm8334_vm2, %v3177_v57, %v3181_v27  ;;  %v2849_v3 = vunpack.c.h.bf16 %v7207_v52  ;;  %v7214_v27 = vld [vmem:[%s8322_s29 + $0x1c] sm:$0xf] }
 0x133   : > { %2344 = vst.msk [vmem:[#allocation3 + $0xa0] sm:$0xff] %vm2323_vm10, %v7897_v51  ;;  %v7544_v13 = vunpack.c.l.bf16 %v7571_v31  ;;  %v3488_v6 = vunpack.c.l.bf16 %v3182_v56  ;;  %v3238_v15 = vor.u32 %v3237_v34, %v3234_v1  ;;  %v3243_v0 = vrot.slane %v3241_v54, 5 }
 0x134   : > { %2334 = vst.msk [vmem:[#allocation3 + $0x50] sm:$0xff] %vm2323_vm10, %v7872_v61  ;;  %v3247_v46 = vrot.slane %v3245_v62, 4  ;;  %v3253_v11 = vrot.slane %v3251_v2, 5  ;;  %v9321_v9 = vpack.i.bf16 %v2849_v3, %v2848_v8  ;;  %v7545_v12 = vunpack.c.h.bf16 %v7571_v31 }
 0x135   : > { %2335 = vst.msk [vmem:[#allocation3 + $0x58] sm:$0xff] %vm2323_vm10, %v7873_v59  ;;  %v3304_v55 = vshrl.u32 %v7243_v28, 16  ;;  %v8104_v32 = vpack.i.bf16 %v3488_v6, %v9312_v23  ;;  %v3239_v48 = vrot.slane %v3238_v15, 4  ;;  %v3307_v49 = vshll.u32 %v7243_v28, 16 }
 0x136   : > { %2345 = vst.msk [vmem:[#allocation3 + $0xa8] sm:$0xff] %vm2323_vm10, %v7898_v42  ;;  %v7846_v58 = vpop.permute.xlu0 %7845  ;;  %8020 = vrot.lane.b32.xlu2 %v9259_v43, %s8260_s12  ;;  %8090 = vrot.lane.b32.xlu1 %v8089_v10, %s8261_s13  ;;  %v3248_v5 = vor.u32 %v3247_v46, %v3243_v0  ;;  %v9331_v29 = vpack.i.bf16 %v7545_v12, %v7544_v13  ;;  %v7213_v43 = vld [vmem:[%s8322_s29 + $0x18] sm:$0xf]  ;;  %v3313_v25 = vshll.u32 %v7244_v41, 16  ;;  %v3317_v33 = vshrl.u32 %v7244_v41, 16  ;;  %v7211_v13 = vld [vmem:[%s8322_s29 + $0xcc] sm:$0xff]  }
 0x137   : > { %v7848_v17 = vunpack.i.h.bf16 %v7846_v58  ;;  %v7847_v18 = vunpack.i.l.bf16 %v7846_v58  ;;  %v7911_v20 = vpop.permute.xlu1 %7910  ;;  %8040 = vrot.lane.b32.xlu0 %v9263_v37, %s8260_s12  ;;  %v3244_v19 = vsel %vm8334_vm2, %v3239_v48, %v3243_v0  ;;  %v3306_v36 = vrot.slane %v3304_v55, 4  ;;  %v7215_v10 = vld [vmem:[%s8322_s29 + $0x20] sm:$0x1]  ;;  %v7252_v0 = vld [vmem:[%s8322_s29 + $0xb4] sm:$0xf] }
 0x138   : > { %v7913_v4 = vunpack.i.h.bf16 %v7911_v20  ;;  %v7912_v21 = vunpack.i.l.bf16 %v7911_v20  ;;  %v3249_v30 = vrot.slane %v3248_v5, 4  ;;  %v9339_v37 = vunpack.c.l.bf16 %v3244_v19  ;;  %v7253_v12 = vld [vmem:[%s8322_s29 + $0xb8] sm:$0xf]  ;;  %v7222_v5 = vld [vmem:[%s8322_s29 + $0x3c] sm:$0xf] }
 0x139   : > { %2324 = vst.msk [vmem:[#allocation3] sm:$0xff] %vm2323_vm10, %v7847_v18  ;;  %v3323_v53 = vshll.u32 %v7245_v38, 16  ;;  %v3309_v7 = vrot.slane %v3307_v49, 5  ;;  %v3315_v35 = vrot.slane %v3313_v25, 5  ;;  %v3064_v40 = vshrl.u32 %v7213_v43, 16 }
 0x13a   : > { %2325 = vst.msk [vmem:[#allocation3 + $0x8] sm:$0xff] %vm2323_vm10, %v7848_v17  ;;  %v3067_v50 = vshll.u32 %v7213_v43, 16  ;;  %v3254_v39 = vsel %vm8334_vm2, %v3249_v30, %v3253_v11  ;;  %v3319_v42 = vrot.slane %v3317_v33, 4  ;;  %v3073_v22 = vshll.u32 %v7214_v27, 16  ;;  %v7254_v19 = vld [vmem:[%s8322_s29 + $0xbc] sm:$0x1] }
 0x13b   : > { %2350 = vst.msk [vmem:[#allocation3 + $0xd0] sm:$0xff] %vm2323_vm10, %v7912_v21  ;;  %v3325_v51 = vrot.slane %v3323_v53, 5  ;;  %v3494_v24 = vunpack.c.l.bf16 %v3254_v39  ;;  %v3310_v44 = vor.u32 %v3309_v7, %v3306_v36  ;;  %v3066_v45 = vrot.slane %v3064_v40, 4  ;;  %v7223_v33 = vld [vmem:[%s8322_s29 + $0x40] sm:$0xf] }
 0x13c   : > { %2351 = vst.msk [vmem:[#allocation3 + $0xd8] sm:$0xff] %vm2323_vm10, %v7913_v4  ;;  %v3069_v1 = vrot.slane %v3067_v50, 5  ;;  %v3320_v31 = vor.u32 %v3319_v42, %v3315_v35  ;;  %v3075_v57 = vrot.slane %v3073_v22, 5  ;;  %v3077_v23 = vshrl.u32 %v7214_v27, 16 }
 0x13d   : > { %v7886_v14 = vpop.permute.xlu2 %7885  ;;  %v3083_v59 = vshll.u32 %v7215_v10, 16  ;;  %v8119_v61 = vpack.i.bf16 %v3494_v24, %v9339_v37  ;;  %v3311_v56 = vrot.slane %v3310_v44, 4  ;;  %v2852_v17 = vunpack.c.l.bf16 %v7211_v13 }
 0x13e   : > { %v7861_v52 = vpop.permute.xlu0 %7860  ;;  %8035 = vrot.lane.b32.xlu2 %v9274_v16, %s8260_s12  ;;  %8105 = vrot.lane.b32.xlu1 %v8104_v32, %s8261_s13  ;;  %v7888_v28 = vunpack.i.h.bf16 %v7886_v14  ;;  %v7887_v34 = vunpack.i.l.bf16 %v7886_v14  ;;  %v3321_v8 = vrot.slane %v3320_v31, 4  ;;  %v3070_v3 = vor.u32 %v3069_v1, %v3066_v45 }
 0x13f   : > { %v7863_v54 = vunpack.i.h.bf16 %v7861_v52  ;;  %v7926_v62 = vpop.permute.xlu1 %7925  ;;  %8055 = vrot.lane.b32.xlu0 %v9300_v63, %s8260_s12  ;;  %v7862_v2 = vunpack.i.l.bf16 %v7861_v52  ;;  %v3079_v16 = vrot.slane %v3077_v23, 4  ;;  %v3085_v6 = vrot.slane %v3083_v59, 5  ;;  %v7224_v52 = vld [vmem:[%s8322_s29 + $0x44] sm:$0x1] }
 0x140   : > { %2340 = vst.msk [vmem:[#allocation3 + $0x80] sm:$0xff] %vm2323_vm10, %v7887_v34  ;;  %v7928_v15 = vunpack.i.h.bf16 %v7926_v62  ;;  %v3316_v46 = vsel %vm8334_vm2, %v3311_v56, %v3315_v35  ;;  %v3326_v63 = vsel %vm8334_vm2, %v3321_v8, %v3325_v51  ;;  %v3071_v58 = vrot.slane %v3070_v3, 4 }
 0x141   : > { %2341 = vst.msk [vmem:[#allocation3 + $0x88] sm:$0xff] %vm2323_vm10, %v7888_v28  ;;  %v7927_v11 = vunpack.i.l.bf16 %v7926_v62  ;;  %v9362_v41 = vunpack.c.l.bf16 %v3316_v46  ;;  %v9364_v55 = vunpack.c.l.bf16 %v3326_v63  ;;  %v3080_v32 = vor.u32 %v3079_v16, %v3075_v57  ;;  %v7219_v28 = vld [vmem:[%s8322_s29 + $0x30] sm:$0xf]  ;;  %v7220_v16 = vld [vmem:[%s8322_s29 + $0x34] sm:$0xf] }
 0x142   : > { %2330 = vst.msk [vmem:[#allocation3 + $0x30] sm:$0xff] %vm2323_vm10, %v7862_v2  ;;  %v3076_v18 = vsel %vm8334_vm2, %v3071_v58, %v3075_v57  ;;  %v2853_v48 = vunpack.c.h.bf16 %v7211_v13  ;;  %v3376_v20 = vshrl.u32 %v7252_v0, 16  ;;  %v3379_v38 = vshll.u32 %v7252_v0, 16  ;;  %v7221_v46 = vld [vmem:[%s8322_s29 + $0x38] sm:$0x1] }
 0x143   : > { %2331 = vst.msk [vmem:[#allocation3 + $0x38] sm:$0xff] %vm2323_vm10, %v7863_v54  ;;  %v8134_v4 = vpack.i.bf16 %v9364_v55, %v9362_v41  ;;  %v3081_v21 = vrot.slane %v3080_v32, 4  ;;  %v9372_v43 = vunpack.c.l.bf16 %v3076_v18  ;;  %v3385_v36 = vshll.u32 %v7253_v12, 16  ;;  %v7261_v55 = vld [vmem:[%s8322_s29 + $0x18] sm:$0xe] }
 0x144   : > { %2757 = vst.msk [vmem:[#allocation3] sm:$0xff] %vm2756_vm11, %v7927_v11  ;;  %v9377_v25 = vpack.i.bf16 %v2853_v48, %v2852_v17  ;;  %v3378_v27 = vrot.slane %v3376_v20, 4  ;;  %v3381_v30 = vrot.slane %v3379_v38, 5  ;;  %v3389_v37 = vshrl.u32 %v7253_v12, 16 }
 0x145   : > { %2758 = vst.msk [vmem:[#allocation3 + $0x8] sm:$0xff] %vm2756_vm11, %v7928_v15  ;;  %v3086_v53 = vsel %vm8334_vm2, %v3081_v21, %v3085_v6  ;;  %v3387_v35 = vrot.slane %v3385_v36, 5  ;;  %v3395_v42 = vshll.u32 %v7254_v19, 16  ;;  %v3136_v51 = vshrl.u32 %v7222_v5, 16  ;;  %v7262_v21 = vld [vmem:[%s8322_s29 + $0x1c] sm:$0xf] }
 0x146   : > { %v7876_v49 = vpop.permute.xlu0 %7875  ;;  %8050 = vrot.lane.b32.xlu2 %v9307_v60, %s8260_s12  ;;  %8120 = vrot.lane.b32.xlu1 %v8119_v61, %s8261_s13  ;;  %v3480_v40 = vunpack.c.l.bf16 %v3086_v53  ;;  %v3382_v50 = vor.u32 %v3381_v30, %v3378_v27  ;;  %v3391_v39 = vrot.slane %v3389_v37, 4  ;;  %v3139_v60 = vshll.u32 %v7222_v5, 16  ;;  %v7231_v30 = vld [vmem:[%s8322_s29 + $0x60] sm:$0xf]  ;;  %v7232_v37 = vld [vmem:[%s8322_s29 + $0x64] sm:$0xf] }
 0x147   : > { %v7878_v10 = vunpack.i.h.bf16 %v7876_v49  ;;  %v7877_v7 = vunpack.i.l.bf16 %v7876_v49  ;;  %8070 = vrot.lane.b32.xlu0 %v9321_v9, %s8260_s12  ;;  %v3145_v22 = vshll.u32 %v7223_v33, 16  ;;  %v3149_v24 = vshrl.u32 %v7223_v33, 16  ;;  %v7941_v61 = vpop.permute.xlu1 %7940 }
 0x148   : > { %v8084_v44 = vpack.i.bf16 %v3480_v40, %v9372_v43  ;;  %v3383_v45 = vrot.slane %v3382_v50, 4  ;;  %v3392_v1 = vor.u32 %v3391_v39, %v3387_v35  ;;  %v3397_v14 = vrot.slane %v3395_v42, 5  ;;  %v7263_v43 = vld [vmem:[%s8322_s29 + $0x20] sm:$0x1] }
 0x149   : > { %2336 = vst.msk [vmem:[#allocation3 + $0x60] sm:$0xff] %vm2323_vm10, %v7877_v7  ;;  %v3138_v31 = vrot.slane %v3136_v51, 4  ;;  %v3141_v57 = vrot.slane %v3139_v60, 5  ;;  %v3147_v23 = vrot.slane %v3145_v22, 5  ;;  %v3151_v59 = vrot.slane %v3149_v24, 4 }
 0x14a   : > { %2337 = vst.msk [vmem:[#allocation3 + $0x68] sm:$0xff] %vm2323_vm10, %v7878_v10  ;;  %v7901_v9 = vpop.permute.xlu2 %7900  ;;  %v3388_v62 = vsel %vm8334_vm2, %v3383_v45, %v3387_v35  ;;  %v3393_v2 = vrot.slane %v3392_v1, 4  ;;  %v3155_v13 = vshll.u32 %v7224_v52, 16  ;;  %v7943_v15 = vunpack.i.h.bf16 %v7941_v61 }
 0x14b   : > { %v7903_v34 = vunpack.i.h.bf16 %v7901_v9  ;;  %v7902_v54 = vunpack.i.l.bf16 %v7901_v9  ;;  %v3505_v56 = vunpack.c.l.bf16 %v3388_v62  ;;  %v3142_v8 = vor.u32 %v3141_v57, %v3138_v31 }
 0x14c   : > { %v3152_v3 = vor.u32 %v3151_v59, %v3147_v23  ;;  %v3398_v6 = vsel %vm8334_vm2, %v3393_v2, %v3397_v14  ;;  %v7942_v0 = vunpack.i.l.bf16 %v7941_v61  ;;  %v3112_v63 = vshrl.u32 %v7219_v28, 16  ;;  %2764 = vst.msk [vmem:[#allocation3 + $0x38] sm:$0xff] %vm2756_vm11, %v7943_v15  ;;  %v7233_v59 = vld [vmem:[%s8322_s29 + $0x68] sm:$0x1]  ;;  %v7229_v15 = vld [vmem:[%s8322_s29 + $0x58] sm:$0xf] }
 0x14d   : > { %2346 = vst.msk [vmem:[#allocation3 + $0xb0] sm:$0xff] %vm2323_vm10, %v7902_v54  ;;  %v3506_v58 = vunpack.c.l.bf16 %v3398_v6  ;;  %v3143_v11 = vrot.slane %v3142_v8, 4  ;;  %v3157_v41 = vrot.slane %v3155_v13, 5  ;;  %v3121_v18 = vshll.u32 %v7220_v16, 16  ;;  %v7228_v8 = vld [vmem:[%s8322_s29 + $0x54] sm:$0xf] }
 0x14e   : > { %8065 = vrot.lane.b32.xlu2 %v9331_v29, %s8260_s12  ;;  %8135 = vrot.lane.b32.xlu1 %v8134_v4, %s8261_s13  ;;  %2347 = vst.msk [vmem:[#allocation3 + $0xb8] sm:$0xff] %vm2323_vm10, %v7903_v34  ;;  %v3153_v12 = vrot.slane %v3152_v3, 4  ;;  %v3114_v17 = vrot.slane %v3112_v63, 4  ;;  %v3115_v29 = vshll.u32 %v7219_v28, 16  ;;  %v3125_v48 = vshrl.u32 %v7220_v16, 16 }
 0x14f   : > { %8085 = vrot.lane.b32.xlu0 %v8084_v44, %s8261_s13  ;;  %2763 = vst.msk [vmem:[#allocation3 + $0x30] sm:$0xff] %vm2756_vm11, %v7942_v0  ;;  %v7891_v32 = vpop.permute.xlu0 %7890  ;;  %v8149_v20 = vpack.i.bf16 %v3506_v58, %v3505_v56  ;;  %v3148_v38 = vsel %vm8334_vm2, %v3143_v11, %v3147_v23  ;;  %v3123_v33 = vrot.slane %v3121_v18, 5  ;;  %v3131_v10 = vshll.u32 %v7221_v46, 16  ;;  %v7230_v18 = vld [vmem:[%s8322_s29 + $0x5c] sm:$0x1] }
 0x150   : > { %v3158_v5 = vsel %vm8334_vm2, %v3153_v12, %v3157_v41  ;;  %v7893_v4 = vunpack.i.h.bf16 %v7891_v32  ;;  %v3485_v19 = vunpack.c.l.bf16 %v3148_v38  ;;  %v7892_v49 = vunpack.i.l.bf16 %v7891_v32  ;;  %v7240_v32 = vld [vmem:[%s8322_s29 + $0x84] sm:$0xf] }
 0x151   : > { %v3486_v36 = vunpack.c.l.bf16 %v3158_v5  ;;  %v3117_v27 = vrot.slane %v3115_v29, 5  ;;  %v3127_v53 = vrot.slane %v3125_v48, 4  ;;  %v7309_v7 = vrot.slane %v7261_v55, 9 }
 0x152   : > { %2343 = vst.msk [vmem:[#allocation3 + $0x98] sm:$0xff] %vm2323_vm10, %v7893_v4  ;;  %v3770_v50 = vrot.slane %v7262_v21, 5  ;;  %v3773_v39 = vrot.slane %v7263_v43, 5  ;;  %v3133_v51 = vrot.slane %v3131_v10, 5  ;;  %v3208_v60 = vshrl.u32 %v7231_v30, 16 }
 0x153   : > { %v8099_v35 = vpack.i.bf16 %v3486_v36, %v3485_v19  ;;  %2342 = vst.msk [vmem:[#allocation3 + $0x90] sm:$0xff] %vm2323_vm10, %v7892_v49  ;;  %v3118_v40 = vor.u32 %v3117_v27, %v3114_v17  ;;  %v3128_v42 = vor.u32 %v3127_v53, %v3123_v33  ;;  %v3211_v22 = vshll.u32 %v7231_v30, 16  ;;  %v7241_v19 = vld [vmem:[%s8322_s29 + $0x88] sm:$0xf] }
 0x154   : > { %v3771_v44 = vsel %vm8403_vm5, %v7309_v7, %v3770_v50  ;;  %v3772_v45 = vrot.slane %v3770_v50, 4  ;;  %v3217_v1 = vshll.u32 %v7232_v37, 16  ;;  %v3210_v9 = vrot.slane %v3208_v60, 4  ;;  %v7242_v50 = vld [vmem:[%s8322_s29 + $0x8c] sm:$0x1] }
 0x155   : > { %v3119_v24 = vrot.slane %v3118_v40, 4  ;;  %v3129_v14 = vrot.slane %v3128_v42, 4  ;;  %v3912_v52 = vunpack.c.l.bf16 %v3771_v44  ;;  %v3213_v31 = vrot.slane %v3211_v22, 5 }
 0x156   : > { %8080 = vrot.lane.b32.xlu2 %v9377_v25, %s8260_s12  ;;  %8150 = vrot.lane.b32.xlu1 %v8149_v20, %s8261_s13  ;;  %v3774_v23 = vsel %vm8403_vm5, %v3772_v45, %v3773_v39  ;;  %v3219_v61 = vrot.slane %v3217_v1, 5  ;;  %v3221_v28 = vshrl.u32 %v7232_v37, 16  ;;  %v7956_v25 = vpop.permute.xlu1 %7955  ;;  %v3227_v63 = vshll.u32 %v7233_v59, 16 }
 0x157   : > { %8100 = vrot.lane.b32.xlu0 %v8099_v35, %s8261_s13  ;;  %v3124_v57 = vsel %vm8334_vm2, %v3119_v24, %v3123_v33  ;;  %v3134_v54 = vsel %vm8334_vm2, %v3129_v14, %v3133_v51  ;;  %v3913_v2 = vunpack.c.l.bf16 %v3774_v23  ;;  %v3214_v56 = vor.u32 %v3213_v31, %v3210_v9  ;;  %v7237_v9 = vld [vmem:[%s8322_s29 + $0x78] sm:$0xf] }
 0x158   : > { %v7916_v34 = vpop.permute.xlu2 %7915  ;;  %v3483_v62 = vunpack.c.l.bf16 %v3124_v57  ;;  %v3484_v16 = vunpack.c.l.bf16 %v3134_v54  ;;  %v3223_v6 = vrot.slane %v3221_v28, 4  ;;  %v7958_v58 = vunpack.i.h.bf16 %v7956_v25  ;;  %v7238_v54 = vld [vmem:[%s8322_s29 + $0x7c] sm:$0xf] }
 0x159   : > { %v7918_v3 = vunpack.i.h.bf16 %v7916_v34  ;;  %v7917_v13 = vunpack.i.l.bf16 %v7916_v34  ;;  %v8164_v0 = vpack.i.bf16 %v3913_v2, %v3912_v52  ;;  %v3215_v46 = vrot.slane %v3214_v56, 4 }
 0x15a   : > { %v8094_v11 = vpack.i.bf16 %v3484_v16, %v3483_v62  ;;  %v3224_v12 = vor.u32 %v3223_v6, %v3219_v61  ;;  %v7957_v41 = vunpack.i.l.bf16 %v7956_v25  ;;  %v3184_v55 = vshrl.u32 %v7228_v8, 16  ;;  %2770 = vst.msk [vmem:[#allocation3 + $0x68] sm:$0xff] %vm2756_vm11, %v7958_v58  ;;  %v7239_v62 = vld [vmem:[%s8322_s29 + $0x80] sm:$0x1] }
 0x15b   : > { %2352 = vst.msk [vmem:[#allocation3 + $0xe0] sm:$0xff] %vm2323_vm10, %v7917_v13  ;;  %v3220_v17 = vsel %vm8334_vm2, %v3215_v46, %v3219_v61  ;;  %v3229_v29 = vrot.slane %v3227_v63, 5  ;;  %v3187_v48 = vshll.u32 %v7228_v8, 16  ;;  %v3193_v20 = vshll.u32 %v7229_v15, 16 }
 0x15c   : > { %2353 = vst.msk [vmem:[#allocation3 + $0xe8] sm:$0xff] %vm2323_vm10, %v7918_v3  ;;  %v3225_v38 = vrot.slane %v3224_v12, 4  ;;  %v3491_v5 = vunpack.c.l.bf16 %v3220_v17  ;;  %v3186_v21 = vrot.slane %v3184_v55, 4  ;;  %v3197_v43 = vshrl.u32 %v7229_v15, 16  ;;  %v7249_v17 = vld [vmem:[%s8322_s29 + $0xa8] sm:$0xf] }
 0x15d   : > { %2769 = vst.msk [vmem:[#allocation3 + $0x60] sm:$0xff] %vm2756_vm11, %v7957_v41  ;;  %v7906_v4 = vpop.permute.xlu0 %7905  ;;  %v3189_v27 = vrot.slane %v3187_v48, 5  ;;  %v3195_v30 = vrot.slane %v3193_v20, 5  ;;  %v3203_v53 = vshll.u32 %v7230_v18, 16  ;;  %v3280_v10 = vshrl.u32 %v7240_v32, 16 }
 0x15e   : > { %8095 = vrot.lane.b32.xlu2 %v8094_v11, %s8261_s13  ;;  %8165 = vrot.lane.b32.xlu1 %v8164_v0, %s8262_s14  ;;  %v7908_v36 = vunpack.i.h.bf16 %v7906_v4  ;;  %v7907_v49 = vunpack.i.l.bf16 %v7906_v4  ;;  %v3230_v37 = vsel %vm8334_vm2, %v3225_v38, %v3229_v29  ;;  %v3199_v33 = vrot.slane %v3197_v43, 4 }
 0x15f   : > { %v3492_v7 = vunpack.c.l.bf16 %v3230_v37  ;;  %v3190_v40 = vor.u32 %v3189_v27, %v3186_v21  ;;  %v3283_v39 = vshll.u32 %v7240_v32, 16  ;;  %v3289_v42 = vshll.u32 %v7241_v19, 16 }
 0x160   : > { %v7931_v35 = vpop.permute.xlu2 %7930  ;;  %2348 = vst.msk [vmem:[#allocation3 + $0xc0] sm:$0xff] %vm2323_vm10, %v7907_v49  ;;  %v3200_v22 = vor.u32 %v3199_v33, %v3195_v30  ;;  %v3205_v24 = vrot.slane %v3203_v53, 5  ;;  %v3282_v14 = vrot.slane %v3280_v10, 4  ;;  %v3293_v23 = vshrl.u32 %v7241_v19, 16 }
 0x161   : > { %v7933_v51 = vunpack.i.h.bf16 %v7931_v35  ;;  %v7932_v60 = vunpack.i.l.bf16 %v7931_v35  ;;  %2349 = vst.msk [vmem:[#allocation3 + $0xc8] sm:$0xff] %vm2323_vm10, %v7908_v36  ;;  %v7971_v44 = vpop.permute.xlu1 %7970  ;;  %v8114_v45 = vpack.i.bf16 %v3492_v7, %v3491_v5  ;;  %v3191_v1 = vrot.slane %v3190_v40, 4  ;;  %v7250_v5 = vld [vmem:[%s8322_s29 + $0xac] sm:$0xf]  ;;  %v7251_v36 = vld [vmem:[%s8322_s29 + $0xb0] sm:$0x1] }
 0x162   : > { %v3285_v52 = vrot.slane %v3283_v39, 5  ;;  %v3201_v31 = vrot.slane %v3200_v22, 4  ;;  %v3291_v57 = vrot.slane %v3289_v42, 5  ;;  %v3299_v59 = vshll.u32 %v7242_v50, 16  ;;  %v7246_v42 = vld [vmem:[%s8322_s29 + $0x9c] sm:$0xf] }
 0x163   : > { %2759 = vst.msk [vmem:[#allocation3 + $0x10] sm:$0xff] %vm2756_vm11, %v7932_v60  ;;  %8115 = vrot.lane.b32.xlu0 %v8114_v45, %s8261_s13  ;;  %v3196_v61 = vsel %vm8334_vm2, %v3191_v1, %v3195_v30  ;;  %v7973_v25 = vunpack.i.h.bf16 %v7971_v44  ;;  %v7972_v34 = vunpack.i.l.bf16 %v7971_v44  ;;  %v3295_v8 = vrot.slane %v3293_v23, 4 }
 0x164   : > { %2760 = vst.msk [vmem:[#allocation3 + $0x18] sm:$0xff] %vm2756_vm11, %v7933_v51  ;;  %v3286_v28 = vor.u32 %v3285_v52, %v3282_v14  ;;  %v3206_v2 = vsel %vm8334_vm2, %v3201_v31, %v3205_v24  ;;  %v3489_v56 = vunpack.c.l.bf16 %v3196_v61  ;;  %v3301_v3 = vrot.slane %v3299_v59, 5  ;;  %v7247_v59 = vld [vmem:[%s8322_s29 + $0xa0] sm:$0xf] }
 0x165   : > { %v3490_v13 = vunpack.c.l.bf16 %v3206_v2  ;;  %2775 = vst.msk [vmem:[#allocation3 + $0x90] sm:$0xff] %vm2756_vm11, %v7972_v34  ;;  %v3256_v6 = vshrl.u32 %v7237_v9, 16  ;;  %v3259_v15 = vshll.u32 %v7237_v9, 16  ;;  %v3296_v0 = vor.u32 %v3295_v8, %v3291_v57  ;;  %v7248_v2 = vld [vmem:[%s8322_s29 + $0xa4] sm:$0x1] }
 0x166   : > { %v3287_v16 = vrot.slane %v3286_v28, 4  ;;  %2776 = vst.msk [vmem:[#allocation3 + $0x98] sm:$0xff] %vm2756_vm11, %v7973_v25  ;;  %v3265_v46 = vshll.u32 %v7238_v54, 16  ;;  %v3269_v63 = vshrl.u32 %v7238_v54, 16  ;;  %v3275_v58 = vshll.u32 %v7239_v62, 16 }
 0x167   : > { %v8109_v11 = vpack.i.bf16 %v3490_v13, %v3489_v56  ;;  %v3258_v55 = vrot.slane %v3256_v6, 4  ;;  %v3261_v32 = vrot.slane %v3259_v15, 5  ;;  %v3297_v29 = vrot.slane %v3296_v0, 4 }
 0x168   : > { %v3292_v12 = vsel %vm8334_vm2, %v3287_v16, %v3291_v57  ;;  %v7946_v41 = vpop.permute.xlu2 %7945  ;;  %v3267_v19 = vrot.slane %v3265_v46, 5  ;;  %v3271_v27 = vrot.slane %v3269_v63, 4  ;;  %v3277_v30 = vrot.slane %v3275_v58, 5  ;;  %v7258_v16 = vld [vmem:[%s8322_s29 + $0xcc] sm:$0xf] }
 0x169   : > { %v3497_v18 = vunpack.c.l.bf16 %v3292_v12  ;;  %v7948_v48 = vunpack.i.h.bf16 %v7946_v41  ;;  %v7947_v20 = vunpack.i.l.bf16 %v7946_v41  ;;  %v7921_v38 = vpop.permute.xlu0 %7920  ;;  %8110 = vrot.lane.b32.xlu2 %v8109_v11, %s8261_s13  ;;  %v3262_v43 = vor.u32 %v3261_v32, %v3258_v55  ;;  %v7259_v41 = vld [vmem:[%s8322_s29 + $0xd0] sm:$0xf] }
 0x16a   : > { %v7923_v4 = vunpack.i.h.bf16 %v7921_v38  ;;  %v7922_v21 = vunpack.i.l.bf16 %v7921_v38  ;;  %v3302_v49 = vsel %vm8334_vm2, %v3297_v29, %v3301_v3  ;;  %v3352_v37 = vshrl.u32 %v7249_v17, 16 }
 0x16b   : > { %2765 = vst.msk [vmem:[#allocation3 + $0x40] sm:$0xff] %vm2756_vm11, %v7947_v20  ;;  %v3498_v33 = vunpack.c.l.bf16 %v3302_v49  ;;  %v3263_v53 = vrot.slane %v3262_v43, 4  ;;  %v3355_v10 = vshll.u32 %v7249_v17, 16  ;;  %v3361_v7 = vshll.u32 %v7250_v5, 16 }
 0x16c   : > { %2766 = vst.msk [vmem:[#allocation3 + $0x48] sm:$0xff] %vm2756_vm11, %v7948_v48  ;;  %v3272_v35 = vor.u32 %v3271_v27, %v3267_v19  ;;  %v3354_v40 = vrot.slane %v3352_v37, 4  ;;  %v3365_v50 = vshrl.u32 %v7250_v5, 16  ;;  %v3371_v39 = vshll.u32 %v7251_v36, 16 }
 0x16d   : > { %2354 = vst.msk [vmem:[#allocation3 + $0xf0] sm:$0xff] %vm2323_vm10, %v7922_v21  ;;  %v8129_v51 = vpack.i.bf16 %v3498_v33, %v3497_v18  ;;  %v3268_v60 = vsel %vm8334_vm2, %v3263_v53, %v3267_v19  ;;  %v3357_v22 = vrot.slane %v3355_v10, 5  ;;  %v3363_v24 = vrot.slane %v3361_v7, 5  ;;  %v7260_v18 = vld [vmem:[%s8322_s29 + $0xd4] sm:$0x1] }
 0x16e   : > { %2355 = vst.msk [vmem:[#allocation3 + $0xf8] sm:$0xff] %vm2323_vm10, %v7923_v4  ;;  %v3273_v44 = vrot.slane %v3272_v35, 4  ;;  %v3495_v45 = vunpack.c.l.bf16 %v3268_v60  ;;  %v3367_v1 = vrot.slane %v3365_v50, 4  ;;  %v3373_v14 = vrot.slane %v3371_v39, 5  ;;  %v7270_v33 = vld [vmem:[%s8322_s29 + $0x3c] sm:$0xe] }
 0x16f   : > { %v7986_v52 = vpop.permute.xlu1 %7985  ;;  %8130 = vrot.lane.b32.xlu0 %v8129_v51, %s8261_s13  ;;  %v3358_v9 = vor.u32 %v3357_v22, %v3354_v40  ;;  %v3328_v61 = vshrl.u32 %v7246_v42, 16  ;;  %v3331_v0 = vshll.u32 %v7246_v42, 16  ;;  %v3337_v46 = vshll.u32 %v7247_v59, 16  ;;  %v7271_v53 = vld [vmem:[%s8322_s29 + $0x40] sm:$0xf] }
 0x170   : > { %v7961_v31 = vpop.permute.xlu2 %7960  ;;  %v7988_v57 = vunpack.i.h.bf16 %v7986_v52  ;;  %v7987_v23 = vunpack.i.l.bf16 %v7986_v52  ;;  %v3278_v28 = vsel %vm8334_vm2, %v3273_v44, %v3277_v30  ;;  %v3368_v25 = vor.u32 %v3367_v1, %v3363_v24  ;;  %v7272_v39 = vld [vmem:[%s8322_s29 + $0x44] sm:$0x1] }
 0x171   : > { %v7963_v34 = vunpack.i.h.bf16 %v7961_v31  ;;  %v7962_v54 = vunpack.i.l.bf16 %v7961_v31  ;;  %v7936_v62 = vpop.permute.xlu0 %7935  ;;  %v3496_v56 = vunpack.c.l.bf16 %v3278_v28  ;;  %v3359_v8 = vrot.slane %v3358_v9, 4 }
 0x172   : > { %2781 = vst.msk [vmem:[#allocation3 + $0xc0] sm:$0xff] %vm2756_vm11, %v7987_v23  ;;  %v7938_v3 = vunpack.i.h.bf16 %v7936_v62  ;;  %v7937_v13 = vunpack.i.l.bf16 %v7936_v62  ;;  %v3369_v6 = vrot.slane %v3368_v25, 4  ;;  %v3330_v15 = vrot.slane %v3328_v61, 4 }
 0x173   : > { %2771 = vst.msk [vmem:[#allocation3 + $0x70] sm:$0xff] %vm2756_vm11, %v7962_v54  ;;  %v8124_v63 = vpack.i.bf16 %v3496_v56, %v3495_v45  ;;  %v3364_v58 = vsel %vm8334_vm2, %v3359_v8, %v3363_v24  ;;  %v3341_v11 = vshrl.u32 %v7247_v59, 16  ;;  %v3347_v12 = vshll.u32 %v7248_v2, 16  ;;  %v7255_v2 = vld [vmem:[%s8322_s29 + $0xc0] sm:$0xf] }
 0x174   : > { %2772 = vst.msk [vmem:[#allocation3 + $0x78] sm:$0xff] %vm2756_vm11, %v7963_v34  ;;  %v3374_v55 = vsel %vm8334_vm2, %v3369_v6, %v3373_v14  ;;  %v3503_v32 = vunpack.c.l.bf16 %v3364_v58  ;;  %v3333_v17 = vrot.slane %v3331_v0, 5  ;;  %v3339_v29 = vrot.slane %v3337_v46, 5  ;;  %v7256_v56 = vld [vmem:[%s8322_s29 + $0xc4] sm:$0xf] }
 0x175   : > { %2782 = vst.msk [vmem:[#allocation3 + $0xc8] sm:$0xff] %vm2756_vm11, %v7988_v57  ;;  %8125 = vrot.lane.b32.xlu2 %v8124_v63, %s8261_s13  ;;  %v3504_v48 = vunpack.c.l.bf16 %v3374_v55  ;;  %v3343_v20 = vrot.slane %v3341_v11, 4  ;;  %v3349_v38 = vrot.slane %v3347_v12, 5  ;;  %v3424_v5 = vshrl.u32 %v7258_v16, 16  ;;  %v7257_v6 = vld [vmem:[%s8322_s29 + $0xc8] sm:$0x1] }
 0x176   : > { %2761 = vst.msk [vmem:[#allocation3 + $0x20] sm:$0xff] %vm2756_vm11, %v7937_v13  ;;  %v3334_v4 = vor.u32 %v3333_v17, %v3330_v15  ;;  %v3427_v21 = vshll.u32 %v7258_v16, 16  ;;  %v3433_v43 = vshll.u32 %v7259_v41, 16  ;;  %v3437_v19 = vshrl.u32 %v7259_v41, 16  ;;  %v7267_v15 = vld [vmem:[%s8322_s29 + $0x30] sm:$0xe] }
 0x177   : > { %2762 = vst.msk [vmem:[#allocation3 + $0x28] sm:$0xff] %vm2756_vm11, %v7938_v3  ;;  %v8144_v36 = vpack.i.bf16 %v3504_v48, %v3503_v32  ;;  %v3344_v49 = vor.u32 %v3343_v20, %v3339_v29  ;;  %v3426_v27 = vrot.slane %v3424_v5, 4  ;;  %v3443_v30 = vshll.u32 %v7260_v18, 16  ;;  %v7268_v11 = vld [vmem:[%s8322_s29 + $0x34] sm:$0xf] }
 0x178   : > { %v7976_v37 = vpop.permute.xlu2 %7975  ;;  %v8001_v10 = vpop.permute.xlu1 %8000  ;;  %v3335_v7 = vrot.slane %v3334_v4, 4  ;;  %v3429_v35 = vrot.slane %v3427_v21, 5  ;;  %v3435_v40 = vrot.slane %v3433_v43, 5  ;;  %v3439_v50 = vrot.slane %v3437_v19, 4  ;;  %v7269_v18 = vld [vmem:[%s8322_s29 + $0x38] sm:$0x1] }
 0x179   : > { %v7951_v42 = vpop.permute.xlu0 %7950  ;;  %8145 = vrot.lane.b32.xlu0 %v8144_v36, %s8261_s13  ;;  %v3345_v51 = vrot.slane %v3344_v49, 4  ;;  %v3445_v60 = vrot.slane %v3443_v30, 5  ;;  %v7978_v22 = vunpack.i.h.bf16 %v7976_v37  ;;  %v7977_v24 = vunpack.i.l.bf16 %v7976_v37  ;;  %v7279_v21 = vld [vmem:[%s8322_s29 + $0x60] sm:$0xe] }
 0x17a   : > { %v3340_v44 = vsel %vm8334_vm2, %v3335_v7, %v3339_v29  ;;  %v3430_v45 = vor.u32 %v3429_v35, %v3426_v27  ;;  %v3440_v1 = vor.u32 %v3439_v50, %v3435_v40  ;;  %v7312_v14 = vrot.slane %v7270_v33, 9  ;;  %v7280_v27 = vld [vmem:[%s8322_s29 + $0x64] sm:$0xf] }
 0x17b   : > { %v3350_v52 = vsel %vm8334_vm2, %v3345_v51, %v3349_v38  ;;  %v3501_v9 = vunpack.c.l.bf16 %v3340_v44  ;;  %2777 = vst.msk [vmem:[#allocation3 + $0xa0] sm:$0xff] %vm2756_vm11, %v7977_v24  ;;  %v3791_v31 = vrot.slane %v7271_v53, 5  ;;  %v3794_v57 = vrot.slane %v7272_v39, 5 }
 0x17c   : > { %v3502_v23 = vunpack.c.l.bf16 %v3350_v52  ;;  %v3431_v59 = vrot.slane %v3430_v45, 4  ;;  %v3441_v61 = vrot.slane %v3440_v1, 4  ;;  %2778 = vst.msk [vmem:[#allocation3 + $0xa8] sm:$0xff] %vm2756_vm11, %v7978_v22  ;;  %v8003_v28 = vunpack.i.h.bf16 %v8001_v10 }
 0x17d   : > { %v3792_v25 = vsel %vm8403_vm5, %v7312_v14, %v3791_v31  ;;  %v3793_v34 = vrot.slane %v3791_v31, 4  ;;  %v8002_v54 = vunpack.i.l.bf16 %v8001_v10  ;;  %v7953_v62 = vunpack.i.h.bf16 %v7951_v42  ;;  %v7281_v10 = vld [vmem:[%s8322_s29 + $0x68] sm:$0x1] }
 0x17e   : > { %v8139_v8 = vpack.i.bf16 %v3502_v23, %v3501_v9  ;;  %v3436_v3 = vsel %vm8334_vm2, %v3431_v59, %v3435_v40  ;;  %v3446_v13 = vsel %vm8334_vm2, %v3441_v61, %v3445_v60  ;;  %v3918_v16 = vunpack.c.l.bf16 %v3792_v25  ;;  %2788 = vst.msk [vmem:[#allocation3 + $0xf8] sm:$0xff] %vm2756_vm11, %v8003_v28  ;;  %v7264_v28 = vld [vmem:[%s8322_s29 + $0x24] sm:$0xe]  ;;  %v7265_v25 = vld [vmem:[%s8322_s29 + $0x28] sm:$0xf] }
 0x17f   : > { %v3509_v0 = vunpack.c.l.bf16 %v3436_v3  ;;  %v3510_v46 = vunpack.c.l.bf16 %v3446_v13  ;;  %v3795_v63 = vsel %vm8403_vm5, %v3793_v34, %v3794_v57  ;;  %2787 = vst.msk [vmem:[#allocation3 + $0xf0] sm:$0xff] %vm2756_vm11, %v8002_v54  ;;  %v7952_v58 = vunpack.i.l.bf16 %v7951_v42  ;;  %v7266_v34 = vld [vmem:[%s8322_s29 + $0x2c] sm:$0x1] }
 0x180   : > { %v7991_v12 = vpop.permute.xlu2 %7990  ;;  %v9519_v41 = vpop.permute.xlu1 %8015  ;;  %8140 = vrot.lane.b32.xlu2 %v8139_v8, %s8261_s13  ;;  %v3919_v55 = vunpack.c.l.bf16 %v3795_v63  ;;  %2768 = vst.msk [vmem:[#allocation3 + $0x58] sm:$0xff] %vm2756_vm11, %v7953_v62  ;;  %v3400_v32 = vshrl.u32 %v7255_v2, 16  ;;  %v3403_v17 = vshll.u32 %v7255_v2, 16  ;;  %v3409_v29 = vshll.u32 %v7256_v56, 16 }
 0x181   : > { %v9524_v48 = vpop.permute.xlu0 %7965  ;;  %v8159_v20 = vpack.i.bf16 %v3510_v46, %v3509_v0  ;;  %2767 = vst.msk [vmem:[#allocation3 + $0x50] sm:$0xff] %vm2756_vm11, %v7952_v58  ;;  %v3413_v38 = vshrl.u32 %v7256_v56, 16  ;;  %v3419_v5 = vshll.u32 %v7257_v6, 16  ;;  %v7311_v4 = vrot.slane %v7267_v15, 9  ;;  %v7288_v15 = vld [vmem:[%s8322_s29 + $0x84] sm:$0xe] }
 0x182   : > { %v8179_v43 = vpack.i.bf16 %v3919_v55, %v3918_v16  ;;  %v3402_v19 = vrot.slane %v3400_v32, 4  ;;  %v3405_v36 = vrot.slane %v3403_v17, 5  ;;  %v3411_v49 = vrot.slane %v3409_v29, 5  ;;  %v7289_v0 = vld [vmem:[%s8322_s29 + $0x88] sm:$0xf] }
 0x183   : > { %8160 = vrot.lane.b32.xlu0 %v8159_v20, %s8261_s13  ;;  %v3415_v30 = vrot.slane %v3413_v38, 4  ;;  %v3421_v37 = vrot.slane %v3419_v5, 5  ;;  %v3784_v33 = vrot.slane %v7268_v11, 5  ;;  %v3787_v53 = vrot.slane %v7269_v18, 5 }
 0x184   : > { %8180 = vrot.lane.b32.xlu1 %v8179_v43, %s8262_s14  ;;  %v3406_v7 = vor.u32 %v3405_v36, %v3402_v19  ;;  %v7993_v35 = vunpack.i.h.bf16 %v7991_v12  ;;  %v7992_v40 = vunpack.i.l.bf16 %v7991_v12  ;;  %v7315_v50 = vrot.slane %v7279_v21, 9  ;;  %v7290_v12 = vld [vmem:[%s8322_s29 + $0x8c] sm:$0x1]  ;;  %v7297_v43 = vld [vmem:[%s8322_s29 + $0xa8] sm:$0xe] }
 0x185   : > { %v3416_v39 = vor.u32 %v3415_v30, %v3411_v49  ;;  %v3785_v42 = vsel %vm8403_vm5, %v7311_v4, %v3784_v33  ;;  %v3786_v51 = vrot.slane %v3784_v33, 4  ;;  %v3812_v60 = vrot.slane %v7280_v27, 5  ;;  %v7298_v19 = vld [vmem:[%s8322_s29 + $0xac] sm:$0xf]  ;;  %v7299_v33 = vld [vmem:[%s8322_s29 + $0xb0] sm:$0x1] }
 0x186   : > { %v3407_v22 = vrot.slane %v3406_v7, 4  ;;  %v3916_v24 = vunpack.c.l.bf16 %v3785_v42  ;;  %2783 = vst.msk [vmem:[#allocation3 + $0xd0] sm:$0xff] %vm2756_vm11, %v7992_v40  ;;  %v3815_v44 = vrot.slane %v7281_v10, 5  ;;  %v8018_v61 = vunpack.i.h.bf16 %v9519_v41  ;;  %v7277_v42 = vld [vmem:[%s8322_s29 + $0x58] sm:$0xf] }
 0x187   : > { %v3417_v45 = vrot.slane %v3416_v39, 4  ;;  %v3788_v1 = vsel %vm8403_vm5, %v3786_v51, %v3787_v53  ;;  %2784 = vst.msk [vmem:[#allocation3 + $0xd8] sm:$0xff] %vm2756_vm11, %v7993_v35  ;;  %v3813_v14 = vsel %vm8403_vm5, %v7315_v50, %v3812_v60  ;;  %v3814_v52 = vrot.slane %v3812_v60, 4  ;;  %v7276_v39 = vld [vmem:[%s8322_s29 + $0x54] sm:$0xe] }
 0x188   : > { %v8006_v9 = vpop.permute.xlu2 %8005  ;;  %v9540_v31 = vpop.permute.xlu1 %8030  ;;  %v3412_v57 = vsel %vm8334_vm2, %v3407_v22, %v3411_v49  ;;  %v3917_v23 = vunpack.c.l.bf16 %v3788_v1  ;;  %v3924_v59 = vunpack.c.l.bf16 %v3813_v14  ;;  %v8017_v8 = vunpack.i.l.bf16 %v9519_v41  ;;  %2988 = vst.msk [vmem:[#allocation3 + $0x28] sm:$0xff] %vm2982_vm12, %v8018_v61 }
 0x189   : > { %v9548_v54 = vpop.permute.xlu0 %7980  ;;  %v3422_v62 = vsel %vm8334_vm2, %v3417_v45, %v3421_v37  ;;  %v3507_v2 = vunpack.c.l.bf16 %v3412_v57  ;;  %v3816_v56 = vsel %vm8403_vm5, %v3814_v52, %v3815_v44  ;;  %v7968_v6 = vunpack.i.h.bf16 %v9524_v48  ;;  %v7278_v44 = vld [vmem:[%s8322_s29 + $0x5c] sm:$0x1] }
 0x18a   : > { %v3508_v3 = vunpack.c.l.bf16 %v3422_v62  ;;  %v8174_v13 = vpack.i.bf16 %v3917_v23, %v3916_v24  ;;  %v3925_v16 = vunpack.c.l.bf16 %v3816_v56  ;;  %2987 = vst.msk [vmem:[#allocation3 + $0x20] sm:$0xff] %vm2982_vm12, %v8017_v8  ;;  %v7967_v46 = vunpack.i.l.bf16 %v9524_v48  ;;  %v7286_v56 = vld [vmem:[%s8322_s29 + $0x7c] sm:$0xf]  ;;  %v7287_v8 = vld [vmem:[%s8322_s29 + $0x80] sm:$0x1] }
 0x18b   : > { %v7310_v63 = vrot.slane %v7264_v28, 9  ;;  %v3777_v58 = vrot.slane %v7265_v25, 5  ;;  %v3780_v11 = vrot.slane %v7266_v34, 5  ;;  %2774 = vst.msk [vmem:[#allocation3 + $0x88] sm:$0xff] %vm2756_vm11, %v7968_v6  ;;  %v8008_v32 = vunpack.i.h.bf16 %v8006_v9  ;;  %v7275_v28 = vld [vmem:[%s8322_s29 + $0x50] sm:$0x1] }
 0x18c   : > { %v8154_v55 = vpack.i.bf16 %v3508_v3, %v3507_v2  ;;  %8175 = vrot.lane.b32.xlu0 %v8174_v13, %s8262_s14  ;;  %v8194_v41 = vpack.i.bf16 %v3925_v16, %v3924_v59  ;;  %v8007_v17 = vunpack.i.l.bf16 %v8006_v9  ;;  %2773 = vst.msk [vmem:[#allocation3 + $0x80] sm:$0xff] %vm2756_vm11, %v7967_v46  ;;  %v7318_v48 = vrot.slane %v7288_v15, 9  ;;  %v7273_v9 = vld [vmem:[%s8322_s29 + $0x48] sm:$0xe]  ;;  %v7285_v25 = vld [vmem:[%s8322_s29 + $0x78] sm:$0xe] }
 0x18d   : > { %v3778_v29 = vsel %vm8403_vm5, %v7310_v63, %v3777_v58  ;;  %v3779_v18 = vrot.slane %v3777_v58, 4  ;;  %v3833_v20 = vrot.slane %v7289_v0, 5  ;;  %v3836_v5 = vrot.slane %v7290_v12, 5  ;;  %2984 = vst.msk [vmem:[#allocation3 + $0x8] sm:$0xff] %vm2982_vm12, %v8008_v32 }
 0x18e   : > { %8155 = vrot.lane.b32.xlu2 %v8154_v55, %s8261_s13  ;;  %8195 = vrot.lane.b32.xlu1 %v8194_v41, %s8262_s14  ;;  %v3914_v38 = vunpack.c.l.bf16 %v3778_v29  ;;  %2983 = vst.msk [vmem:[#allocation3] sm:$0xff] %vm2982_vm12, %v8007_v17  ;;  %v8033_v4 = vunpack.i.h.bf16 %v9540_v31  ;;  %v8032_v21 = vunpack.i.l.bf16 %v9540_v31  ;;  %v7983_v30 = vunpack.i.h.bf16 %v9548_v54  ;;  %v7274_v31 = vld [vmem:[%s8322_s29 + $0x4c] sm:$0xf] }
 0x18f   : > { %v3781_v36 = vsel %vm8403_vm5, %v3779_v18, %v3780_v11  ;;  %v3834_v49 = vsel %vm8403_vm5, %v7318_v48, %v3833_v20  ;;  %v3835_v27 = vrot.slane %v3833_v20, 4  ;;  %v7982_v35 = vunpack.i.l.bf16 %v9548_v54 }
 0x190   : > { %v8021_v37 = vpop.permute.xlu2 %8020  ;;  %v8046_v53 = vpop.permute.xlu1 %8045  ;;  %v3915_v10 = vunpack.c.l.bf16 %v3781_v36  ;;  %v3930_v7 = vunpack.c.l.bf16 %v3834_v49  ;;  %2993 = vst.msk [vmem:[#allocation3 + $0x50] sm:$0xff] %vm2982_vm12, %v8032_v21  ;;  %v7321_v22 = vrot.slane %v7297_v43, 9  ;;  %v3854_v24 = vrot.slane %v7298_v19, 5  ;;  %v7283_v19 = vld [vmem:[%s8322_s29 + $0x70] sm:$0xf] }
 0x191   : > { %v8023_v40 = vunpack.i.h.bf16 %v8021_v37  ;;  %v7996_v50 = vpop.permute.xlu0 %7995  ;;  %v3837_v51 = vsel %vm8403_vm5, %v3835_v27, %v3836_v5  ;;  %2994 = vst.msk [vmem:[#allocation3 + $0x58] sm:$0xff] %vm2982_vm12, %v8033_v4  ;;  %v8022_v60 = vunpack.i.l.bf16 %v8021_v37  ;;  %v3857_v14 = vrot.slane %v7299_v33, 5  ;;  %v7284_v37 = vld [vmem:[%s8322_s29 + $0x74] sm:$0x1] }
 0x192   : > { %v8169_v45 = vpack.i.bf16 %v3915_v10, %v3914_v38  ;;  %v3931_v1 = vunpack.c.l.bf16 %v3837_v51  ;;  %2779 = vst.msk [vmem:[#allocation3 + $0xb0] sm:$0xff] %vm2756_vm11, %v7982_v35  ;;  %v8048_v52 = vunpack.i.h.bf16 %v8046_v53  ;;  %v3855_v57 = vsel %vm8403_vm5, %v7321_v22, %v3854_v24  ;;  %v7282_v38 = vld [vmem:[%s8322_s29 + $0x6c] sm:$0xe] }
 0x193   : > { %2780 = vst.msk [vmem:[#allocation3 + $0xb8] sm:$0xff] %vm2756_vm11, %v7983_v30  ;;  %v3856_v23 = vrot.slane %v3854_v24, 4  ;;  %v8047_v59 = vunpack.i.l.bf16 %v8046_v53  ;;  %v7998_v61 = vunpack.i.h.bf16 %v7996_v50  ;;  %v3936_v54 = vunpack.c.l.bf16 %v3855_v57 }
 0x194   : > { %v8209_v34 = vpack.i.bf16 %v3931_v1, %v3930_v7  ;;  %2989 = vst.msk [vmem:[#allocation3 + $0x30] sm:$0xff] %vm2982_vm12, %v8022_v60  ;;  %v7997_v62 = vunpack.i.l.bf16 %v7996_v50  ;;  %v7314_v2 = vrot.slane %v7276_v39, 9  ;;  %v3805_v13 = vrot.slane %v7277_v42, 5  ;;  %v7294_v39 = vld [vmem:[%s8322_s29 + $0x9c] sm:$0xe] }
 0x195   : > { %2990 = vst.msk [vmem:[#allocation3 + $0x38] sm:$0xff] %vm2982_vm12, %v8023_v40  ;;  %v3858_v3 = vsel %vm8403_vm5, %v3856_v23, %v3857_v14  ;;  %v3808_v16 = vrot.slane %v7278_v44, 5  ;;  %v7313_v6 = vrot.slane %v7273_v9, 9  ;;  %v3798_v0 = vrot.slane %v7274_v31, 5  ;;  %v7295_v42 = vld [vmem:[%s8322_s29 + $0xa0] sm:$0xf] }
 0x196   : > { %8170 = vrot.lane.b32.xlu2 %v8169_v45, %s8262_s14  ;;  %8210 = vrot.lane.b32.xlu1 %v8209_v34, %s8262_s14  ;;  %v3937_v15 = vunpack.c.l.bf16 %v3858_v3  ;;  %2999 = vst.msk [vmem:[#allocation3 + $0x80] sm:$0xff] %vm2982_vm12, %v8047_v59  ;;  %v3801_v46 = vrot.slane %v7275_v28, 5  ;;  %v7317_v63 = vrot.slane %v7285_v25, 9  ;;  %v3806_v12 = vsel %vm8403_vm5, %v7314_v2, %v3805_v13  ;;  %v7296_v44 = vld [vmem:[%s8322_s29 + $0xa4] sm:$0x1] }
 0x197   : > { %3000 = vst.msk [vmem:[#allocation3 + $0x88] sm:$0xff] %vm2982_vm12, %v8048_v52  ;;  %v3807_v55 = vrot.slane %v3805_v13, 4  ;;  %v3826_v41 = vrot.slane %v7286_v56, 5  ;;  %v3829_v32 = vrot.slane %v7287_v8, 5  ;;  %v3922_v21 = vunpack.c.l.bf16 %v3806_v12  ;;  %v7291_v59 = vld [vmem:[%s8322_s29 + $0x90] sm:$0xe] }
 0x198   : > { %v8036_v58 = vpop.permute.xlu2 %8035  ;;  %v8061_v11 = vpop.permute.xlu1 %8060  ;;  %v8224_v17 = vpack.i.bf16 %v3937_v15, %v3936_v54  ;;  %2785 = vst.msk [vmem:[#allocation3 + $0xe0] sm:$0xff] %vm2756_vm11, %v7997_v62  ;;  %v3799_v27 = vsel %vm8403_vm5, %v7313_v6, %v3798_v0  ;;  %v3800_v30 = vrot.slane %v3798_v0, 4  ;;  %v7316_v7 = vrot.slane %v7282_v38, 9  ;;  %v7292_v62 = vld [vmem:[%s8322_s29 + $0x94] sm:$0xf] }
 0x199   : > { %v8038_v29 = vunpack.i.h.bf16 %v8036_v58  ;;  %v8037_v18 = vunpack.i.l.bf16 %v8036_v58  ;;  %v8063_v48 = vunpack.i.h.bf16 %v8061_v11  ;;  %v8011_v20 = vpop.permute.xlu0 %8010  ;;  %2786 = vst.msk [vmem:[#allocation3 + $0xe8] sm:$0xff] %vm2756_vm11, %v7998_v61  ;;  %v8062_v5 = vunpack.i.l.bf16 %v8061_v11  ;;  %v7293_v2 = vld [vmem:[%s8322_s29 + $0x98] sm:$0x1] }
 0x19a   : > { %v3809_v4 = vsel %vm8403_vm5, %v3807_v55, %v3808_v16  ;;  %v8013_v43 = vunpack.i.h.bf16 %v8011_v20  ;;  %v8012_v49 = vunpack.i.l.bf16 %v8011_v20  ;;  %v3920_v33 = vunpack.c.l.bf16 %v3799_v27  ;;  %v7304_v16 = vld [vmem:[%s8322_s29 + $0xc4] sm:$0xf]  ;;  %v7301_v55 = vld [vmem:[%s8322_s29 + $0xb8] sm:$0xf] }
 0x19b   : > { %2995 = vst.msk [vmem:[#allocation3 + $0x60] sm:$0xff] %vm2982_vm12, %v8037_v18  ;;  %v3923_v36 = vunpack.c.l.bf16 %v3809_v4  ;;  %v3827_v53 = vsel %vm8403_vm5, %v7317_v63, %v3826_v41  ;;  %v3828_v10 = vrot.slane %v3826_v41, 4  ;;  %v3802_v40 = vsel %vm8403_vm5, %v3800_v30, %v3801_v46  ;;  %v7300_v4 = vld [vmem:[%s8322_s29 + $0xb4] sm:$0xe] }
 0x19c   : > { %2996 = vst.msk [vmem:[#allocation3 + $0x68] sm:$0xff] %vm2982_vm12, %v8038_v29  ;;  %v3819_v50 = vrot.slane %v7283_v19, 5  ;;  %v3921_v51 = vunpack.c.l.bf16 %v3802_v40  ;;  %v3928_v22 = vunpack.c.l.bf16 %v3827_v53  ;;  %v3822_v24 = vrot.slane %v7284_v37, 5  ;;  %v7302_v37 = vld [vmem:[%s8322_s29 + $0xbc] sm:$0x1] }
 0x19d   : > { %3005 = vst.msk [vmem:[#allocation3 + $0xb0] sm:$0xff] %vm2982_vm12, %v8062_v5  ;;  %v8189_v35 = vpack.i.bf16 %v3923_v36, %v3922_v21  ;;  %v3830_v60 = vsel %vm8403_vm5, %v3828_v10, %v3829_v32  ;;  %v7320_v57 = vrot.slane %v7294_v39, 9  ;;  %v3847_v23 = vrot.slane %v7295_v42, 5  ;;  %v7303_v32 = vld [vmem:[%s8322_s29 + $0xc0] sm:$0xe] }
 0x19e   : > { %3006 = vst.msk [vmem:[#allocation3 + $0xb8] sm:$0xff] %vm2982_vm12, %v8063_v48  ;;  %8225 = vrot.lane.b32.xlu1 %v8224_v17, %s8262_s14  ;;  %v3929_v45 = vunpack.c.l.bf16 %v3830_v60  ;;  %v3820_v1 = vsel %vm8403_vm5, %v7316_v7, %v3819_v50  ;;  %v3821_v14 = vrot.slane %v3819_v50, 4  ;;  %v8184_v52 = vpack.i.bf16 %v3921_v51, %v3920_v33  ;;  %v7305_v17 = vld [vmem:[%s8322_s29 + $0xc8] sm:$0x1] }
 0x19f   : > { %8190 = vrot.lane.b32.xlu0 %v8189_v35, %s8262_s14  ;;  %2985 = vst.msk [vmem:[#allocation3 + $0x10] sm:$0xff] %vm2982_vm12, %v8012_v49  ;;  %v3850_v54 = vrot.slane %v7296_v44, 5  ;;  %v3926_v13 = vunpack.c.l.bf16 %v3820_v1  ;;  %v3849_v0 = vrot.slane %v3847_v23, 4  ;;  %v7319_v46 = vrot.slane %v7291_v59, 9 }
 0x1a0   : > { %2986 = vst.msk [vmem:[#allocation3 + $0x18] sm:$0xff] %vm2982_vm12, %v8013_v43  ;;  %v8051_v9 = vpop.permute.xlu2 %8050  ;;  %v8076_v31 = vpop.permute.xlu1 %8075  ;;  %8185 = vrot.lane.b32.xlu2 %v8184_v52, %s8262_s14  ;;  %v8204_v8 = vpack.i.bf16 %v3929_v45, %v3928_v22  ;;  %v3823_v3 = vsel %vm8403_vm5, %v3821_v14, %v3822_v24  ;;  %v3848_v58 = vsel %vm8403_vm5, %v7320_v57, %v3847_v23  ;;  %v3840_v11 = vrot.slane %v7292_v62, 5 }
 0x1a1   : > { %v8053_v61 = vunpack.i.h.bf16 %v8051_v9  ;;  %v8052_v28 = vunpack.i.l.bf16 %v8051_v9  ;;  %v8077_v25 = vunpack.i.l.bf16 %v8076_v31  ;;  %v8026_v34 = vpop.permute.xlu0 %8025  ;;  %v8078_v56 = vunpack.i.h.bf16 %v8076_v31 }
 0x1a2   : > { %v8027_v6 = vunpack.i.l.bf16 %v8026_v34  ;;  %v3927_v15 = vunpack.c.l.bf16 %v3823_v3  ;;  %v8028_v63 = vunpack.i.h.bf16 %v8026_v34  ;;  %v3843_v12 = vrot.slane %v7293_v2, 5 }
 0x1a3   : > { %3001 = vst.msk [vmem:[#allocation3 + $0x90] sm:$0xff] %vm2982_vm12, %v8052_v28  ;;  %v3851_v41 = vsel %vm8403_vm5, %v3849_v0, %v3850_v54  ;;  %v3868_v29 = vrot.slane %v7304_v16, 5  ;;  %v3842_v48 = vrot.slane %v3840_v11, 4  ;;  %v3934_v20 = vunpack.c.l.bf16 %v3848_v58 }
 0x1a4   : > { %3002 = vst.msk [vmem:[#allocation3 + $0x98] sm:$0xff] %vm2982_vm12, %v8053_v61  ;;  %v8199_v18 = vpack.i.bf16 %v3927_v15, %v3926_v13  ;;  %v3935_v38 = vunpack.c.l.bf16 %v3851_v41  ;;  %v3841_v5 = vsel %vm8403_vm5, %v7319_v46, %v3840_v11  ;;  %v3861_v21 = vrot.slane %v7301_v55, 5 }
 0x1a5   : > { %3011 = vst.msk [vmem:[#allocation3 + $0xe0] sm:$0xff] %vm2982_vm12, %v8077_v25  ;;  %v3844_v36 = vsel %vm8403_vm5, %v3842_v48, %v3843_v12  ;;  %v7323_v49 = vrot.slane %v7303_v32, 9  ;;  %v3870_v27 = vrot.slane %v3868_v29, 4  ;;  %v3871_v30 = vrot.slane %v7305_v17, 5  ;;  %v4157_v12 = vld [vmem:[%s11213_s1 + $0x10] sm:$0x3] }
 0x1a6   : > { %3012 = vst.msk [vmem:[#allocation3 + $0xe8] sm:$0xff] %vm2982_vm12, %v8078_v56  ;;  %v3932_v40 = vunpack.c.l.bf16 %v3841_v5  ;;  %v3933_v50 = vunpack.c.l.bf16 %v3844_v36  ;;  %v7322_v39 = vrot.slane %v7300_v4, 9  ;;  %v8219_v42 = vpack.i.bf16 %v3935_v38, %v3934_v20  ;;  %v7449_v5 = vld [vmem:[%s11213_s1 + $0x8] sm:$0xff] }
 0x1a7   : > { %8205 = vrot.lane.b32.xlu0 %v8204_v8, %s8262_s14  ;;  %2991 = vst.msk [vmem:[#allocation3 + $0x40] sm:$0xff] %vm2982_vm12, %v8027_v6  ;;  %v3863_v60 = vrot.slane %v3861_v21, 4  ;;  %v3864_v22 = vrot.slane %v7302_v37, 5  ;;  %v3869_v44 = vsel %vm8403_vm5, %v7323_v49, %v3868_v29  ;;  %v3872_v45 = vsel %vm8403_vm5, %v3870_v27, %v3871_v30 }
 0x1a8   : > { %2992 = vst.msk [vmem:[#allocation3 + $0x48] sm:$0xff] %vm2982_vm12, %v8028_v63  ;;  %v8066_v43 = vpop.permute.xlu2 %8065  ;;  %v8091_v19 = vpop.permute.xlu1 %8090  ;;  %8200 = vrot.lane.b32.xlu2 %v8199_v18, %s8262_s14  ;;  %v8214_v1 = vpack.i.bf16 %v3933_v50, %v3932_v40  ;;  %v3940_v14 = vunpack.c.l.bf16 %v3869_v44  ;;  %v3941_v52 = vunpack.c.l.bf16 %v3872_v45  ;;  %v3862_v9 = vsel %vm8403_vm5, %v7322_v39, %v3861_v21 }
 0x1a9   : > { %v8068_v33 = vunpack.i.h.bf16 %v8066_v43  ;;  %v8067_v53 = vunpack.i.l.bf16 %v8066_v43  ;;  %v8092_v10 = vunpack.i.l.bf16 %v8091_v19  ;;  %v8041_v7 = vpop.permute.xlu0 %8040  ;;  %v8093_v35 = vunpack.i.h.bf16 %v8091_v19 }
 0x1aa   : > { %v8042_v51 = vunpack.i.l.bf16 %v8041_v7  ;;  %v8043_v24 = vunpack.i.h.bf16 %v8041_v7  ;;  %v3865_v31 = vsel %vm8403_vm5, %v3863_v60, %v3864_v22  ;;  %v3938_v54 = vunpack.c.l.bf16 %v3862_v9 }
 0x1ab   : > { %3007 = vst.msk [vmem:[#allocation3 + $0xc0] sm:$0xff] %vm2982_vm12, %v8067_v53  ;;  %v3939_v62 = vunpack.c.l.bf16 %v3865_v31  ;;  %v8234_v2 = vpack.i.bf16 %v3941_v52, %v3940_v14  ;;  %v4171_v55 = vunpack.c.l.b16 %v4157_v12  ;;  %vm4847_vm7 = vcmask 195712  }
 0x1ac   : > { %3008 = vst.msk [vmem:[#allocation3 + $0xc8] sm:$0xff] %vm2982_vm12, %v8068_v33  ;;  %v7448_v33 = vld [vmem:[%s11213_s1] sm:$0xff]  ;;  %vm5040_vm8 = vcmask 261312   ;;  %vm5233_vm9 = vcmask 326912   ;;  %vm5426_vm10 = vcmask 392512   ;;  %vm6176_vm11 = vcmask 1043456  }
 0x1ad   : > { %3642 = vst.msk [vmem:[#allocation3 + $0x10] sm:$0xff] %vm3639_vm13, %v8092_v10  ;;  %v8229_v3 = vpack.i.bf16 %v3939_v62, %v3938_v54  ;;  %v4174_v32 = vpack.c.b16 %v4171_v55, %v4171_v55 }
 0x1ae   : > { %3643 = vst.msk [vmem:[#allocation3 + $0x18] sm:$0xff] %vm3639_vm13, %v8093_v35 }
 0x1af   : > { %8220 = vrot.lane.b32.xlu0 %v8219_v42, %s8262_s14  ;;  %2997 = vst.msk [vmem:[#allocation3 + $0x70] sm:$0xff] %vm2982_vm12, %v8042_v51  ;;  %v4228_v38 = vsel %vm4226_vm14, %v4174_v32, 0 }
 0x1b0   : > { %2998 = vst.msk [vmem:[#allocation3 + $0x78] sm:$0xff] %vm2982_vm12, %v8043_v24  ;;  %v8081_v57 = vpop.permute.xlu2 %8080  ;;  %v8106_v23 = vpop.permute.xlu1 %8105  ;;  %8215 = vrot.lane.b32.xlu2 %v8214_v1, %s8262_s14  ;;  %4235 = vmatpush.bf16.msra.mxu0 %v4228_v38 }
 0x1b1   : > { %v8083_v59 = vunpack.i.h.bf16 %v8081_v57  ;;  %v8082_v61 = vunpack.i.l.bf16 %v8081_v57  ;;  %v8107_v28 = vunpack.i.l.bf16 %v8106_v23  ;;  %v8056_v25 = vpop.permute.xlu0 %8055  ;;  %v8108_v34 = vunpack.i.h.bf16 %v8106_v23  ;;  %7573 = vmatpush.bf16.msra.mxu3 %v4228_v38 }
 0x1b2   : > { %v8057_v56 = vunpack.i.l.bf16 %v8056_v25  ;;  %v8058_v8 = vunpack.i.h.bf16 %v8056_v25 }
 0x1b3   : > { %3013 = vst.msk [vmem:[#allocation3 + $0xf0] sm:$0xff] %vm2982_vm12, %v8082_v61 }
 0x1b4   : > { %3014 = vst.msk [vmem:[#allocation3 + $0xf8] sm:$0xff] %vm2982_vm12, %v8083_v59  ;;  %4236 = vmatpush.bf16.msra.mxu0 %v7449_v5 }
 0x1b5   : > { %3648 = vst.msk [vmem:[#allocation3 + $0x40] sm:$0xff] %vm3639_vm13, %v8107_v28  ;;  %7574 = vmatpush.bf16.msra.mxu3 %v7449_v5 }
 0x1b6   : > { %3649 = vst.msk [vmem:[#allocation3 + $0x48] sm:$0xff] %vm3639_vm13, %v8108_v34 }
 0x1b7   : > { %8235 = vrot.lane.b32.xlu0 %v8234_v2, %s8262_s14  ;;  %3003 = vst.msk [vmem:[#allocation3 + $0xa0] sm:$0xff] %vm2982_vm12, %v8057_v56 }
 0x1b8   : > { %3004 = vst.msk [vmem:[#allocation3 + $0xa8] sm:$0xff] %vm2982_vm12, %v8058_v8  ;;  %v8096_v13 = vpop.permute.xlu2 %8095  ;;  %v8121_v16 = vpop.permute.xlu1 %8120  ;;  %8230 = vrot.lane.b32.xlu2 %v8229_v3, %s8262_s14  ;;  %4237 = vmatpush.bf16.msra.mxu0 %v7448_v33 }
 0x1b9   : > { %v8098_v6 = vunpack.i.h.bf16 %v8096_v13  ;;  %v8097_v15 = vunpack.i.l.bf16 %v8096_v13  ;;  %v8122_v0 = vunpack.i.l.bf16 %v8121_v16  ;;  %v8071_v46 = vpop.permute.xlu0 %8070  ;;  %v8123_v63 = vunpack.i.h.bf16 %v8121_v16  ;;  %7575 = vmatpush.bf16.msra.mxu3 %v7448_v33 }
 0x1ba   : > { %v8072_v58 = vunpack.i.l.bf16 %v8071_v46  ;;  %v8073_v11 = vunpack.i.h.bf16 %v8071_v46 }
 0x1bb   : > { %3644 = vst.msk [vmem:[#allocation3 + $0x20] sm:$0xff] %vm3639_vm13, %v8097_v15 }
 0x1bc   : > { %3645 = vst.msk [vmem:[#allocation3 + $0x28] sm:$0xff] %vm3639_vm13, %v8098_v6 }
 0x1bd   : > { %3654 = vst.msk [vmem:[#allocation3 + $0x70] sm:$0xff] %vm3639_vm13, %v8122_v0 }
 0x1be   : > { %3655 = vst.msk [vmem:[#allocation3 + $0x78] sm:$0xff] %vm3639_vm13, %v8123_v63 }
 0x1bf   : > { %3009 = vst.msk [vmem:[#allocation3 + $0xd0] sm:$0xff] %vm2982_vm12, %v8072_v58 }
 0x1c0   : > { %3010 = vst.msk [vmem:[#allocation3 + $0xd8] sm:$0xff] %vm2982_vm12, %v8073_v11  ;;  %v8136_v41 = vpop.permute.xlu1 %8135  ;;  %vm5620_vm12 = vcmask 458112  }
 0x1c1   : > { %v8138_v17 = vunpack.i.h.bf16 %v8136_v41  ;;  %v8137_v29 = vunpack.i.l.bf16 %v8136_v41  ;;  %v8086_v18 = vpop.permute.xlu0 %8085 }
 0x1c2   : > { %v8088_v48 = vunpack.i.h.bf16 %v8086_v18  ;;  %v8087_v20 = vunpack.i.l.bf16 %v8086_v18 }
 0x1c3   : > { %3660 = vst.msk [vmem:[#allocation3 + $0xa0] sm:$0xff] %vm3639_vm13, %v8137_v29  ;;  %v8111_v4 = vpop.permute.xlu2 %8110 }
 0x1c4   : > { %3661 = vst.msk [vmem:[#allocation3 + $0xa8] sm:$0xff] %vm3639_vm13, %v8138_v17  ;;  %v8113_v21 = vunpack.i.h.bf16 %v8111_v4  ;;  %v8112_v43 = vunpack.i.l.bf16 %v8111_v4 }
 0x1c5   : > { %3640 = vst.msk [vmem:[#allocation3] sm:$0xff] %vm3639_vm13, %v8087_v20 }
 0x1c6   : > { %3641 = vst.msk [vmem:[#allocation3 + $0x8] sm:$0xff] %vm3639_vm13, %v8088_v48 }
 0x1c7   : > { %3650 = vst.msk [vmem:[#allocation3 + $0x50] sm:$0xff] %vm3639_vm13, %v8112_v43 }
 0x1c8   : > { %3651 = vst.msk [vmem:[#allocation3 + $0x58] sm:$0xff] %vm3639_vm13, %v8113_v21  ;;  %v8151_v19 = vpop.permute.xlu1 %8150 }
 0x1c9   : > { %v8153_v36 = vunpack.i.h.bf16 %v8151_v19  ;;  %v8152_v49 = vunpack.i.l.bf16 %v8151_v19  ;;  %v8101_v27 = vpop.permute.xlu0 %8100 }
 0x1ca   : > { %v8103_v30 = vunpack.i.h.bf16 %v8101_v27  ;;  %v8102_v37 = vunpack.i.l.bf16 %v8101_v27 }
 0x1cb   : > { %3666 = vst.msk [vmem:[#allocation3 + $0xd0] sm:$0xff] %vm3639_vm13, %v8152_v49 }
 0x1cc   : > { %3667 = vst.msk [vmem:[#allocation3 + $0xd8] sm:$0xff] %vm3639_vm13, %v8153_v36 }
 0x1cd   : > { %3646 = vst.msk [vmem:[#allocation3 + $0x30] sm:$0xff] %vm3639_vm13, %v8102_v37 }
 0x1ce   : > { %3647 = vst.msk [vmem:[#allocation3 + $0x38] sm:$0xff] %vm3639_vm13, %v8103_v30 }
 0x1cf   : > { %v8126_v53 = vpop.permute.xlu2 %8125 }
 0x1d0   : > { %v8166_v10 = vpop.permute.xlu1 %8165  ;;  %v8128_v7 = vunpack.i.h.bf16 %v8126_v53  ;;  %v8127_v35 = vunpack.i.l.bf16 %v8126_v53 }
 0x1d1   : > { %v8167_v40 = vunpack.i.l.bf16 %v8166_v10  ;;  %v8168_v50 = vunpack.i.h.bf16 %v8166_v10 }
 0x1d2   : > { %3656 = vst.msk [vmem:[#allocation3 + $0x80] sm:$0xff] %vm3639_vm13, %v8127_v35 }
 0x1d3   : > { %3657 = vst.msk [vmem:[#allocation3 + $0x88] sm:$0xff] %vm3639_vm13, %v8128_v7 }
 0x1d4   : > { %4073 = vst.msk [vmem:[#allocation3] sm:$0xff] %vm4072_vm15, %v8167_v40 }
 0x1d5   : > { %4074 = vst.msk [vmem:[#allocation3 + $0x8] sm:$0xff] %vm4072_vm15, %v8168_v50  ;;  %v8116_v39 = vpop.permute.xlu0 %8115 }
 0x1d6   : > { %v8118_v42 = vunpack.i.h.bf16 %v8116_v39  ;;  %v8117_v51 = vunpack.i.l.bf16 %v8116_v39 }
 0x1d8   : > { %3652 = vst.msk [vmem:[#allocation3 + $0x60] sm:$0xff] %vm3639_vm13, %v8117_v51 }
 0x1d9   : > { %3653 = vst.msk [vmem:[#allocation3 + $0x68] sm:$0xff] %vm3639_vm13, %v8118_v42 }
 0x1da   : > { %v8141_v60 = vpop.permute.xlu2 %8140 }
 0x1db   : > { %v8143_v22 = vunpack.i.h.bf16 %v8141_v60  ;;  %v8142_v24 = vunpack.i.l.bf16 %v8141_v60  ;;  %v4105_v44 = vld [vmem:[#allocation3] sm:$0xff] }
 0x1dc   : > { %v4106_v45 = vld [vmem:[#allocation3 + $0x8] sm:$0xff] }
 0x1dd   : > { %3662 = vst.msk [vmem:[#allocation3 + $0xb0] sm:$0xff] %vm3639_vm13, %v8142_v24  ;;  %v4137_v1 = vpack.c.bf16 %v4106_v45, %v4105_v44 }
 0x1de   : > { %3663 = vst.msk [vmem:[#allocation3 + $0xb8] sm:$0xff] %vm3639_vm13, %v8143_v22 }
 0x1df   : > { %7333 = vmatmul.msk.bf16.vlgmr.msra.gmra.mxu0 %vm4177_vm0, %v4137_v1 }
 0x1e1   : > { %v8131_v14 = vpop.permute.xlu0 %8130 }
 0x1e2   : > { %v8133_v52 = vunpack.i.h.bf16 %v8131_v14  ;;  %v8132_v9 = vunpack.i.l.bf16 %v8131_v14 }
 0x1e4   : > { %3658 = vst.msk [vmem:[#allocation3 + $0x90] sm:$0xff] %vm3639_vm13, %v8132_v9 }
 0x1e5   : > { %3659 = vst.msk [vmem:[#allocation3 + $0x98] sm:$0xff] %vm3639_vm13, %v8133_v52 }
 0x1e8   : > { %v8156_v31 = vpop.permute.xlu2 %8155 }
 0x1e9   : > { %v8158_v57 = vunpack.i.h.bf16 %v8156_v31  ;;  %v8157_v23 = vunpack.i.l.bf16 %v8156_v31 }
 0x1eb   : > { %3668 = vst.msk [vmem:[#allocation3 + $0xe0] sm:$0xff] %vm3639_vm13, %v8157_v23  ;;  %v8146_v59 = vpop.permute.xlu0 %8145 }
 0x1ec   : > { %3669 = vst.msk [vmem:[#allocation3 + $0xe8] sm:$0xff] %vm3639_vm13, %v8158_v57  ;;  %v8148_v61 = vunpack.i.h.bf16 %v8146_v59  ;;  %v8147_v28 = vunpack.i.l.bf16 %v8146_v59 }
 0x1ee   : > { %3664 = vst.msk [vmem:[#allocation3 + $0xc0] sm:$0xff] %vm3639_vm13, %v8147_v28 }
 0x1ef   : > { %3665 = vst.msk [vmem:[#allocation3 + $0xc8] sm:$0xff] %vm3639_vm13, %v8148_v61 }
 0x1f0   : > { %v8171_v25 = vpop.permute.xlu2 %8170 }
 0x1f1   : > { %v8173_v34 = vunpack.i.h.bf16 %v8171_v25  ;;  %v8172_v54 = vunpack.i.l.bf16 %v8171_v25 }
 0x1f3   : > { %4075 = vst.msk [vmem:[#allocation3 + $0x10] sm:$0xff] %vm4072_vm15, %v8172_v54 }
 0x1f4   : > { %4076 = vst.msk [vmem:[#allocation3 + $0x18] sm:$0xff] %vm4072_vm15, %v8173_v34 }
 0x1f5   : > { %v8161_v62 = vpop.permute.xlu0 %8160 }
 0x1f6   : > { %v8163_v2 = vunpack.i.h.bf16 %v8161_v62  ;;  %v8162_v56 = vunpack.i.l.bf16 %v8161_v62  ;;  %v8181_v8 = vpop.permute.xlu1 %8180 }
 0x1f7   : > { %v8183_v3 = vunpack.i.h.bf16 %v8181_v8  ;;  %v8182_v13 = vunpack.i.l.bf16 %v8181_v8 }
 0x1f8   : > { %3670 = vst.msk [vmem:[#allocation3 + $0xf0] sm:$0xff] %vm3639_vm13, %v8162_v56 }
 0x1f9   : > { %3671 = vst.msk [vmem:[#allocation3 + $0xf8] sm:$0xff] %vm3639_vm13, %v8163_v2  ;;  %vm5813_vm13 = vcmask 523712  }
 0x1fa   : > { %4079 = vst.msk [vmem:[#allocation3 + $0x30] sm:$0xff] %vm4072_vm15, %v8182_v13  ;;  %v4107_v16 = vld [vmem:[#allocation3 + $0x10] sm:$0xff]  ;;  %v8186_v15 = vpop.permute.xlu2 %8185 }
 0x1fb   : > { %4080 = vst.msk [vmem:[#allocation3 + $0x38] sm:$0xff] %vm4072_vm15, %v8183_v3  ;;  %v4108_v6 = vld [vmem:[#allocation3 + $0x18] sm:$0xff]  ;;  %v8188_v46 = vunpack.i.h.bf16 %v8186_v15  ;;  %v8187_v63 = vunpack.i.l.bf16 %v8186_v15  ;;  %v7307_v3 = vld [vmem:[%s8322_s29 + $0xd0] sm:$0xf] }
 0x1fc   : > { %v4138_v0 = vpack.c.bf16 %v4108_v6, %v4107_v16  ;;  %v3875_v13 = vrot.slane %v7307_v3, 5  ;;  %v7306_v16 = vld [vmem:[%s8322_s29 + $0xcc] sm:$0xe]  ;;  %v7308_v6 = vld [vmem:[%s8322_s29 + $0xd4] sm:$0x1] }
 0x1fd   : > { %4081 = vst.msk [vmem:[#allocation3 + $0x40] sm:$0xff] %vm4072_vm15, %v8187_v63 }
 0x1fe   : > { %7334 = vmatmul.msk.bf16.gmra.mxu0 %vm4177_vm0, %v4138_v0  ;;  %v8176_v58 = vpop.permute.xlu0 %8175  ;;  %4082 = vst.msk [vmem:[#allocation3 + $0x48] sm:$0xff] %vm4072_vm15, %v8188_v46  ;;  %v7324_v46 = vrot.slane %v7306_v16, 9  ;;  %v3877_v63 = vrot.slane %v3875_v13, 4 }
 0x1ff   : > { %v8178_v11 = vunpack.i.h.bf16 %v8176_v58  ;;  %v8177_v12 = vunpack.i.l.bf16 %v8176_v58  ;;  %v3878_v58 = vrot.slane %v7308_v6, 5 }
 0x200   : > { %v8196_v55 = vpop.permute.xlu1 %8195 }
 0x201   : > { %4077 = vst.msk [vmem:[#allocation3 + $0x20] sm:$0xff] %vm4072_vm15, %v8177_v12  ;;  %v8198_v41 = vunpack.i.h.bf16 %v8196_v55  ;;  %v8197_v32 = vunpack.i.l.bf16 %v8196_v55  ;;  %v4111_v50 = vld [vmem:[#allocation3 + $0x30] sm:$0xff]  ;;  %v3879_v12 = vsel %vm8403_vm5, %v3877_v63, %v3878_v58 }
 0x202   : > { %4078 = vst.msk [vmem:[#allocation3 + $0x28] sm:$0xff] %vm4072_vm15, %v8178_v11  ;;  %v8201_v17 = vpop.permute.xlu2 %8200  ;;  %v4112_v39 = vld [vmem:[#allocation3 + $0x38] sm:$0xff]  ;;  %v3876_v11 = vsel %vm8403_vm5, %v7324_v46, %v3875_v13  ;;  %vm4654_vm5 = vcmask 130112  }
 0x203   : > { %4085 = vst.msk [vmem:[#allocation3 + $0x60] sm:$0xff] %vm4072_vm15, %v8197_v32  ;;  %v8203_v29 = vunpack.i.h.bf16 %v8201_v17  ;;  %v8202_v18 = vunpack.i.l.bf16 %v8201_v17  ;;  %v4140_v24 = vpack.c.bf16 %v4112_v39, %v4111_v50  ;;  %v3943_v32 = vunpack.c.l.bf16 %v3879_v12 }
 0x204   : > { %4086 = vst.msk [vmem:[#allocation3 + $0x68] sm:$0xff] %vm4072_vm15, %v8198_v41  ;;  %v4113_v57 = vld [vmem:[#allocation3 + $0x40] sm:$0xff]  ;;  %v3942_v41 = vunpack.c.l.bf16 %v3876_v11 }
 0x205   : > { %4087 = vst.msk [vmem:[#allocation3 + $0x70] sm:$0xff] %vm4072_vm15, %v8202_v18  ;;  %v4114_v23 = vld [vmem:[#allocation3 + $0x48] sm:$0xff] }
 0x206   : > { %4088 = vst.msk [vmem:[#allocation3 + $0x78] sm:$0xff] %vm4072_vm15, %v8203_v29  ;;  %v4141_v25 = vpack.c.bf16 %v4114_v23, %v4113_v57  ;;  %v8239_v17 = vpack.i.bf16 %v3943_v32, %v3942_v41  ;;  %v8263_v29 = vmov 0.0  }
 0x207   : > { %4352 = vst.msk [vmem:[#allocation2] sm:$0xff] %vm4351_vm1, %v8263_v29 }
 0x208   : > { %v8211_v48 = vpop.permute.xlu1 %8210  ;;  %v4109_v20 = vld [vmem:[#allocation3 + $0x20] sm:$0xff]  ;;  %8240 = vrot.lane.b32.xlu1 %v8239_v17, %s8262_s14  ;;  %4353 = vst.msk [vmem:[#allocation2 + $0x8] sm:$0xff] %vm4351_vm1, %v8263_v29 }
 0x209   : > { %v8213_v38 = vunpack.i.h.bf16 %v8211_v48  ;;  %v8212_v5 = vunpack.i.l.bf16 %v8211_v48  ;;  %v4110_v4 = vld [vmem:[#allocation3 + $0x28] sm:$0xff]  ;;  %4357 = vst.msk [vmem:[#allocation2 + $0x198] sm:$0xff] %vm4351_vm1, %v8263_v29 }
 0x20a   : > { %v4139_v21 = vpack.c.bf16 %v4110_v4, %v4109_v20  ;;  %v8216_v43 = vpop.permute.xlu2 %8215  ;;  %v4117_v15 = vld [vmem:[#allocation3 + $0x60] sm:$0xff]  ;;  %4358 = vst.msk [vmem:[#allocation2 + $0x1a0] sm:$0xff] %vm4351_vm1, %v8263_v29  ;;  %v9800_v20 = vld [vmem:[%s11214_s2] ss:$0 sm:$0xff] }
 0x20b   : > { %4091 = vst.msk [vmem:[#allocation3 + $0x90] sm:$0xff] %vm4072_vm15, %v8212_v5  ;;  %v8218_v19 = vunpack.i.h.bf16 %v8216_v43  ;;  %v8217_v36 = vunpack.i.l.bf16 %v8216_v43  ;;  %v4118_v0 = vld [vmem:[#allocation3 + $0x68] sm:$0xff] }
 0x20c   : > { %4092 = vst.msk [vmem:[#allocation3 + $0x98] sm:$0xff] %vm4072_vm15, %v8213_v38  ;;  %v4143_v55 = vpack.c.bf16 %v4118_v0, %v4117_v15  ;;  %v4119_v18 = vld [vmem:[#allocation3 + $0x70] sm:$0xff] }
 0x20d   : > { %4093 = vst.msk [vmem:[#allocation3 + $0xa0] sm:$0xff] %vm4072_vm15, %v8217_v36  ;;  %v4120_v48 = vld [vmem:[#allocation3 + $0x78] sm:$0xff] }
 0x20e   : > { %7335 = vmatmul.msk.bf16.gmra.mxu0 %vm4177_vm0, %v4139_v21  ;;  %4094 = vst.msk [vmem:[#allocation3 + $0xa8] sm:$0xff] %vm4072_vm15, %v8218_v19  ;;  %v4144_v38 = vpack.c.bf16 %v4120_v48, %v4119_v18 }
 0x20f   : > { %4361 = vst.msk [vmem:[#allocation2] sm:$0x1] %vm4360_vm3, %v8263_v29  ;;  %v4494_v47 = vld [vmem:[#allocation2 + $0x1] sm:$0xff] }
 0x210   : > { %v8226_v49 = vpop.permute.xlu1 %8225  ;;  %4362 = vst.msk [vmem:[#allocation2 + $0x18] sm:$0x1] %vm4360_vm3, %v8263_v29  ;;  %4558 = vrot.lane.b32.xlu2 %v4494_v47, %s8256_s8 }
 0x211   : > { %v8191_v27 = vpop.permute.xlu0 %8190  ;;  %v8228_v30 = vunpack.i.h.bf16 %v8226_v49  ;;  %v8227_v37 = vunpack.i.l.bf16 %v8226_v49  ;;  %4363 = vst.msk [vmem:[#allocation2 + $0x30] sm:$0x1] %vm4360_vm3, %v8263_v29 }
 0x212   : > { %v8192_v33 = vunpack.i.l.bf16 %v8191_v27  ;;  %v8193_v53 = vunpack.i.h.bf16 %v8191_v27  ;;  %v8231_v10 = vpop.permute.xlu2 %8230  ;;  %4364 = vst.msk [vmem:[#allocation2 + $0x48] sm:$0x1] %vm4360_vm3, %v8263_v29 }
 0x213   : > { %4097 = vst.msk [vmem:[#allocation3 + $0xc0] sm:$0xff] %vm4072_vm15, %v8227_v37  ;;  %v8233_v7 = vunpack.i.h.bf16 %v8231_v10  ;;  %v8232_v35 = vunpack.i.l.bf16 %v8231_v10 }
 0x214   : > { %4098 = vst.msk [vmem:[#allocation3 + $0xc8] sm:$0xff] %vm4072_vm15, %v8228_v30 }
 0x215   : > { %4083 = vst.msk [vmem:[#allocation3 + $0x50] sm:$0xff] %vm4072_vm15, %v8192_v33 }
 0x216   : > { %4084 = vst.msk [vmem:[#allocation3 + $0x58] sm:$0xff] %vm4072_vm15, %v8193_v53 }
 0x217   : > { %4099 = vst.msk [vmem:[#allocation3 + $0xd0] sm:$0xff] %vm4072_vm15, %v8232_v35  ;;  %v4124_v35 = vld [vmem:[#allocation3 + $0x98] sm:$0xff] }
 0x218   : > { %4100 = vst.msk [vmem:[#allocation3 + $0xd8] sm:$0xff] %vm4072_vm15, %v8233_v7  ;;  %v4123_v7 = vld [vmem:[#allocation3 + $0x90] sm:$0xff] }
 0x219   : > { %v8206_v40 = vpop.permute.xlu0 %8205  ;;  %4365 = vst.msk [vmem:[#allocation2 + $0x60] sm:$0x1] %vm4360_vm3, %v8263_v29 }
 0x21a   : > { %v8208_v42 = vunpack.i.h.bf16 %v8206_v40  ;;  %v8207_v51 = vunpack.i.l.bf16 %v8206_v40  ;;  %v4129_v60 = vld [vmem:[#allocation3 + $0xc0] sm:$0xff]  ;;  %4355 = vst.msk [vmem:[#allocation2 + $0x10] sm:$0x3] %vm4354_vm4, %v8263_v29 }
 0x21b   : > { %v4130_v22 = vld [vmem:[#allocation3 + $0xc8] sm:$0xff]  ;;  %4359 = vst.msk [vmem:[#allocation2 + $0x1a8] sm:$0x3] %vm4354_vm4, %v8263_v29 }
 0x21c   : > { %4089 = vst.msk [vmem:[#allocation3 + $0x80] sm:$0xff] %vm4072_vm15, %v8207_v51  ;;  %v4149_v44 = vpack.c.bf16 %v4130_v22, %v4129_v60  ;;  %v4115_v62 = vld [vmem:[#allocation3 + $0x50] sm:$0xff] }
 0x21d   : > { %4090 = vst.msk [vmem:[#allocation3 + $0x88] sm:$0xff] %vm4072_vm15, %v8208_v42  ;;  %v4116_v2 = vld [vmem:[#allocation3 + $0x58] sm:$0xff]  ;;  %v4146_v42 = vpack.c.bf16 %v4124_v35, %v4123_v7 }
 0x21e   : > { %7336 = vmatmul.msk.bf16.gmra.mxu0 %vm4177_vm0, %v4140_v24  ;;  %7345 = vmatmul.msk.bf16.vlgmr.msra.gmra.mxu3 %vm4177_vm0, %v4149_v44  ;;  %v4131_v52 = vld [vmem:[#allocation3 + $0xd0] sm:$0xff]  ;;  %v4142_v8 = vpack.c.bf16 %v4116_v2, %v4115_v62  ;;  %4366 = vst.msk [vmem:[#allocation2 + $0x78] sm:$0x1] %vm4360_vm3, %v8263_v29 }
 0x21f   : > { %v4132_v9 = vld [vmem:[#allocation3 + $0xd8] sm:$0xff]  ;;  %4367 = vst.msk [vmem:[#allocation2 + $0x90] sm:$0x1] %vm4360_vm3, %v8263_v29 }
 0x220   : > { %v4150_v28 = vpack.c.bf16 %v4132_v9, %v4131_v52  ;;  %4368 = vst.msk [vmem:[#allocation2 + $0xa8] sm:$0x1] %vm4360_vm3, %v8263_v29 }
 0x221   : > { %v8221_v45 = vpop.permute.xlu0 %8220  ;;  %4369 = vst.msk [vmem:[#allocation2 + $0xc0] sm:$0x1] %vm4360_vm3, %v8263_v29  ;;  %v4495_v43 = vld [vmem:[#allocation2 + $0x9] sm:$0xff] }
 0x222   : > { %v8223_v1 = vunpack.i.h.bf16 %v8221_v45  ;;  %v8222_v14 = vunpack.i.l.bf16 %v8221_v45  ;;  %4370 = vst.msk [vmem:[#allocation2 + $0xd8] sm:$0x1] %vm4360_vm3, %v8263_v29  ;;  %4560 = vrot.lane.b32.xlu0 %v4495_v43, %s8256_s8 }
 0x223   : > { %4371 = vst.msk [vmem:[#allocation2 + $0xf0] sm:$0x1] %vm4360_vm3, %v8263_v29  ;;  %v4121_v30 = vld [vmem:[#allocation3 + $0x80] sm:$0xff] }
 0x224   : > { %4095 = vst.msk [vmem:[#allocation3 + $0xb0] sm:$0xff] %vm4072_vm15, %v8222_v14  ;;  %v4122_v37 = vld [vmem:[#allocation3 + $0x88] sm:$0xff] }
 0x225   : > { %4096 = vst.msk [vmem:[#allocation3 + $0xb8] sm:$0xff] %vm4072_vm15, %v8223_v1  ;;  %v4145_v33 = vpack.c.bf16 %v4122_v37, %v4121_v30  ;;  %v4125_v1 = vld [vmem:[#allocation3 + $0xa0] sm:$0xff]  ;;  %v4126_v14 = vld [vmem:[#allocation3 + $0xa8] sm:$0xff] }
 0x226   : > { %4372 = vst.msk [vmem:[#allocation2 + $0x108] sm:$0x1] %vm4360_vm3, %v8263_v29 }
 0x227   : > { %4373 = vst.msk [vmem:[#allocation2 + $0x120] sm:$0x1] %vm4360_vm3, %v8263_v29 }
 0x228   : > { %4374 = vst.msk [vmem:[#allocation2 + $0x138] sm:$0x1] %vm4360_vm3, %v8263_v29 }
 0x229   : > { %v8236_v31 = vpop.permute.xlu0 %8235  ;;  %4375 = vst.msk [vmem:[#allocation2 + $0x150] sm:$0x1] %vm4360_vm3, %v8263_v29 }
 0x22a   : > { %v8238_v59 = vunpack.i.h.bf16 %v8236_v31  ;;  %v8237_v61 = vunpack.i.l.bf16 %v8236_v31  ;;  %4376 = vst.msk [vmem:[#allocation2 + $0x168] sm:$0x1] %vm4360_vm3, %v8263_v29  ;;  %v4147_v31 = vpack.c.bf16 %v4126_v14, %v4125_v1 }
 0x22b   : > { %4377 = vst.msk [vmem:[#allocation2 + $0x180] sm:$0x1] %vm4360_vm3, %v8263_v29  ;;  %v4127_v62 = vld [vmem:[#allocation3 + $0xb0] sm:$0xff] }
 0x22c   : > { %4101 = vst.msk [vmem:[#allocation3 + $0xe0] sm:$0xff] %vm4072_vm15, %v8237_v61  ;;  %v4128_v2 = vld [vmem:[#allocation3 + $0xb8] sm:$0xff] }
 0x22d   : > { %4102 = vst.msk [vmem:[#allocation3 + $0xe8] sm:$0xff] %vm4072_vm15, %v8238_v59  ;;  %v4148_v3 = vpack.c.bf16 %v4128_v2, %v4127_v62 }
 0x22e   : > { %7337 = vmatmul.msk.bf16.gmra.mxu0 %vm4177_vm0, %v4141_v25  ;;  %7346 = vmatmul.msk.bf16.gmra.mxu3 %vm4177_vm0, %v4150_v28  ;;  %4378 = vst.msk [vmem:[#allocation2 + $0x198] sm:$0x1] %vm4360_vm3, %v8263_v29 }
 0x22f   : > { %4379 = vst.msk [vmem:[#allocation2 + $0x11] sm:$0x1] %vm4360_vm3, %v8263_v29 }
 0x230   : > { %4380 = vst.msk [vmem:[#allocation2 + $0x29] sm:$0x1] %vm4360_vm3, %v8263_v29 }
 0x231   : > { %4381 = vst.msk [vmem:[#allocation2 + $0x41] sm:$0x1] %vm4360_vm3, %v8263_v29 }
 0x232   : > { %4382 = vst.msk [vmem:[#allocation2 + $0x59] sm:$0x1] %vm4360_vm3, %v8263_v29 }
 0x233   : > { %v4133_v34 = vld [vmem:[#allocation3 + $0xe0] sm:$0xff]  ;;  %4383 = vst.msk [vmem:[#allocation2 + $0x71] sm:$0x1] %vm4360_vm3, %v8263_v29 }
 0x234   : > { %v4134_v54 = vld [vmem:[#allocation3 + $0xe8] sm:$0xff]  ;;  %4384 = vst.msk [vmem:[#allocation2 + $0x89] sm:$0x1] %vm4360_vm3, %v8263_v29 }
 0x235   : > { %v4151_v56 = vpack.c.bf16 %v4134_v54, %v4133_v34  ;;  %4385 = vst.msk [vmem:[#allocation2 + $0xa1] sm:$0x1] %vm4360_vm3, %v8263_v29 }
 0x236   : > { %4386 = vst.msk [vmem:[#allocation2 + $0xb9] sm:$0x1] %vm4360_vm3, %v8263_v29 }
 0x237   : > { %4387 = vst.msk [vmem:[#allocation2 + $0xd1] sm:$0x1] %vm4360_vm3, %v8263_v29 }
 0x238   : > { %4388 = vst.msk [vmem:[#allocation2 + $0xe9] sm:$0x1] %vm4360_vm3, %v8263_v29 }
 0x239   : > { %4389 = vst.msk [vmem:[#allocation2 + $0x101] sm:$0x1] %vm4360_vm3, %v8263_v29 }
 0x23a   : > { %4390 = vst.msk [vmem:[#allocation2 + $0x119] sm:$0x1] %vm4360_vm3, %v8263_v29 }
 0x23b   : > { %4391 = vst.msk [vmem:[#allocation2 + $0x131] sm:$0x1] %vm4360_vm3, %v8263_v29 }
 0x23c   : > { %4392 = vst.msk [vmem:[#allocation2 + $0x149] sm:$0x1] %vm4360_vm3, %v8263_v29 }
 0x23d   : > { %4393 = vst.msk [vmem:[#allocation2 + $0x161] sm:$0x1] %vm4360_vm3, %v8263_v29 }
 0x23e   : > { %7338 = vmatmul.msk.bf16.gmra.mxu0 %vm4177_vm0, %v4142_v8  ;;  %7347 = vmatmul.msk.bf16.gmra.mxu3 %vm4177_vm0, %v4151_v56  ;;  %4394 = vst.msk [vmem:[#allocation2 + $0x179] sm:$0x1] %vm4360_vm3, %v8263_v29 }
 0x23f   : > { %4395 = vst.msk [vmem:[#allocation2 + $0x191] sm:$0x1] %vm4360_vm3, %v8263_v29 }
 0x240   : > { %4396 = vst.msk [vmem:[#allocation2 + $0x1a9] sm:$0x1] %vm4360_vm3, %v8263_v29 }
 0x24e   : > { %7339 = vmatmul.msk.bf16.gmra.mxu0 %vm4177_vm0, %v4143_v55 }
 0x25c   : > { %v4239_v5 = vpop.f32.mrf.mxu0 }
 0x25d   : > { %v4240_v4 = vadd.f32 %v9800_v20, %v4239_v5 }
 0x25e   : > { %7340 = vmatmul.msk.bf16.gmra.mxu0 %vm4177_vm0, %v4144_v38 }
 0x25f   : > { %v4319_v21 = vmax.f32 %v4240_v4, 0.0  ;;  %v4430_v4 = vld [vmem:[#allocation2] sm:$0xff] }
 0x260   : > { %4462 = vst.msk [vmem:[#allocation4] sm:$0xff] %vm4351_vm1, %v4430_v4 }
 0x261   : > { %4398 = vst.msk [vmem:[#allocation2 + $0x19] sm:$0xff] %vm4351_vm1, %v4319_v21 }
 0x264   : > { %v4241_v19 = vpop.f32.mrf.mxu0 }
 0x265   : > { %v4242_v36 = vadd.f32 %v9800_v20, %v4241_v19 }
 0x267   : > { %v4320_v49 = vmax.f32 %v4242_v36, 0.0 }
 0x268   : > { %v4496_v27 = vld [vmem:[#allocation2 + $0x19] sm:$0xff] }
 0x269   : > { %4399 = vst.msk [vmem:[#allocation2 + $0x21] sm:$0xff] %vm4351_vm1, %v4320_v49  ;;  %4562 = vrot.lane.b32.xlu1 %v4496_v27, %s8256_s8  ;;  %v9874_v40 = vld [vmem:[#allocation2 + $0x18] sm:$0xff] }
 0x26a   : > { %4464 = vst.msk [vmem:[#allocation4 + $0x10] sm:$0xff] %vm4351_vm1, %v9874_v40  ;;  %v4559_v19 = vpop.permute.xlu2 %4558 }
 0x26b   : > { %4655 = vst.msk [vmem:[#allocation4] sm:$0xff] %vm4654_vm5, %v4559_v19 }
 0x26e   : > { %7341 = vmatmul.msk.bf16.gmra.mxu0 %vm4177_vm0, %v4145_v33 }
 0x270   : > { %v4497_v53 = vld [vmem:[#allocation2 + $0x21] sm:$0xff] }
 0x271   : > { %4564 = vrot.lane.b32.xlu2 %v4497_v53, %s8256_s8  ;;  %v9870_v10 = vld [vmem:[#allocation2 + $0x20] sm:$0xff] }
 0x272   : > { %4465 = vst.msk [vmem:[#allocation4 + $0x18] sm:$0xff] %vm4351_vm1, %v9870_v10 }
 0x27a   : > { %v8241_v14 = vpop.permute.xlu1 %8240 }
 0x27b   : > { %v4244_v50 = vpop.f32.mrf.mxu0 }
 0x27c   : > { %v4245_v39 = vadd.f32 %v9800_v20, %v4244_v50 }
 0x27e   : > { %v4321_v51 = vmax.f32 %v4245_v39, 0.0  ;;  %7342 = vmatmul.msk.bf16.gmra.mxu0 %vm4177_vm0, %v4146_v42 }
 0x280   : > { %4400 = vst.msk [vmem:[#allocation2 + $0x31] sm:$0xff] %vm4351_vm1, %v4321_v51 }
 0x283   : > { %v4246_v60 = vpop.f32.mrf.mxu0 }
 0x284   : > { %v4247_v22 = vadd.f32 %v9800_v20, %v4246_v60 }
 0x286   : > { %v4322_v24 = vmax.f32 %v4247_v22, 0.0 }
 0x287   : > { %v4498_v44 = vld [vmem:[#allocation2 + $0x31] sm:$0xff] }
 0x288   : > { %v9886_v45 = vld [vmem:[#allocation2 + $0x30] sm:$0xff]  ;;  %4401 = vst.msk [vmem:[#allocation2 + $0x39] sm:$0xff] %vm4351_vm1, %v4322_v24  ;;  %4566 = vrot.lane.b32.xlu0 %v4498_v44, %s8256_s8 }
 0x289   : > { %4466 = vst.msk [vmem:[#allocation4 + $0x20] sm:$0xff] %vm4351_vm1, %v9886_v45 }
 0x28b   : > { %v4249_v52 = vpop.f32.mrf.mxu0 }
 0x28c   : > { %v4250_v9 = vadd.f32 %v9800_v20, %v4249_v52 }
 0x28e   : > { %v4323_v57 = vmax.f32 %v4250_v9, 0.0  ;;  %7343 = vmatmul.msk.bf16.gmra.mxu0 %vm4177_vm0, %v4147_v31  ;;  %v8243_v9 = vunpack.i.h.bf16 %v8241_v14  ;;  %v8242_v31 = vunpack.i.l.bf16 %v8241_v14 }
 0x28f   : > { %v4499_v23 = vld [vmem:[#allocation2 + $0x39] sm:$0xff] }
 0x290   : > { %4402 = vst.msk [vmem:[#allocation2 + $0x49] sm:$0xff] %vm4351_vm1, %v4323_v57  ;;  %4568 = vrot.lane.b32.xlu1 %v4499_v23, %s8256_s8  ;;  %v9896_v59 = vld [vmem:[#allocation2 + $0x38] sm:$0xff] }
 0x291   : > { %4467 = vst.msk [vmem:[#allocation4 + $0x28] sm:$0xff] %vm4351_vm1, %v9896_v59 }
 0x292   : > { %4103 = vst.msk [vmem:[#allocation3 + $0xf0] sm:$0xff] %vm4072_vm15, %v8242_v31 }
 0x293   : > { %v4251_v61 = vpop.f32.mrf.mxu0  ;;  %4104 = vst.msk [vmem:[#allocation3 + $0xf8] sm:$0xff] %vm4072_vm15, %v8243_v9  ;;  %vm6127_vm15 = vcmask 588800  }
 0x294   : > { %v4252_v28 = vadd.f32 %v9800_v20, %v4251_v61 }
 0x296   : > { %v4324_v25 = vmax.f32 %v4252_v28, 0.0 }
 0x297   : > { %v4500_v34 = vld [vmem:[#allocation2 + $0x49] sm:$0xff] }
 0x298   : > { %v9901_v54 = vld [vmem:[#allocation2 + $0x48] sm:$0xff]  ;;  %4403 = vst.msk [vmem:[#allocation2 + $0x51] sm:$0xff] %vm4351_vm1, %v4324_v25  ;;  %4570 = vrot.lane.b32.xlu2 %v4500_v34, %s8256_s8 }
 0x299   : > { %4468 = vst.msk [vmem:[#allocation4 + $0x30] sm:$0xff] %vm4351_vm1, %v9901_v54 }
 0x29a   : > { %v4136_v9 = vld [vmem:[#allocation3 + $0xf8] sm:$0xff] }
 0x29b   : > { %v4254_v56 = vpop.f32.mrf.mxu0 }
 0x29c   : > { %v4255_v8 = vadd.f32 %v9800_v20, %v4254_v56 }
 0x29e   : > { %v4325_v13 = vmax.f32 %v4255_v8, 0.0  ;;  %7344 = vmatmul.msk.bf16.gmra.mxu0 %vm4177_vm0, %v4148_v3 }
 0x29f   : > { %v4501_v16 = vld [vmem:[#allocation2 + $0x51] sm:$0xff] }
 0x2a0   : > { %4404 = vst.msk [vmem:[#allocation2 + $0x61] sm:$0xff] %vm4351_vm1, %v4325_v13  ;;  %4572 = vrot.lane.b32.xlu0 %v4501_v16, %s8256_s8  ;;  %v9911_v6 = vld [vmem:[#allocation2 + $0x50] sm:$0xff] }
 0x2a1   : > { %v4299_v15 = vpop.f32.mrf.mxu3  ;;  %4469 = vst.msk [vmem:[#allocation4 + $0x38] sm:$0xff] %vm4351_vm1, %v9911_v6 }
 0x2a2   : > { %v4300_v0 = vadd.f32 %v9800_v20, %v4299_v15 }
 0x2a3   : > { %v4256_v46 = vpop.f32.mrf.mxu0 }
 0x2a4   : > { %v4257_v63 = vadd.f32 %v9800_v20, %v4256_v46  ;;  %v4343_v58 = vmax.f32 %v4300_v0, 0.0 }
 0x2a6   : > { %v4326_v11 = vmax.f32 %v4257_v63, 0.0  ;;  %4422 = vst.msk [vmem:[#allocation2 + $0x139] sm:$0xff] %vm4351_vm1, %v4343_v58 }
 0x2a7   : > { %v9918_v12 = vld [vmem:[#allocation2 + $0x61] sm:$0xff] }
 0x2a8   : > { %v9920_v55 = vld [vmem:[#allocation2 + $0x60] sm:$0xff]  ;;  %4405 = vst.msk [vmem:[#allocation2 + $0x69] sm:$0xff] %vm4351_vm1, %v4326_v11  ;;  %4574 = vrot.lane.b32.xlu1 %v9918_v12, %s8256_s8  ;;  %v4431_v11 = vld [vmem:[#allocation2 + $0x8] sm:$0xff] }
 0x2a9   : > { %v4301_v41 = vpop.f32.mrf.mxu3  ;;  %4470 = vst.msk [vmem:[#allocation4 + $0x40] sm:$0xff] %vm4351_vm1, %v9920_v55 }
 0x2aa   : > { %v4302_v32 = vadd.f32 %v9800_v20, %v4301_v41  ;;  %4463 = vst.msk [vmem:[#allocation4 + $0x8] sm:$0xff] %vm4351_vm1, %v4431_v11  ;;  %v4561_v41 = vpop.permute.xlu0 %4560  ;;  %v10089_v11 = vld [vmem:[#allocation2 + $0x3a] sm:$0xff] }
 0x2ab   : > { %v4259_v17 = vpop.f32.mrf.mxu0  ;;  %4656 = vst.msk [vmem:[#allocation4 + $0x8] sm:$0xff] %vm4654_vm5, %v4561_v41 }
 0x2ac   : > { %v4260_v29 = vadd.f32 %v9800_v20, %v4259_v17  ;;  %v4344_v47 = vmax.f32 %v4302_v32, 0.0  ;;  %11233 = vst [vmem:[#allocation7_spill] sm:$0xff] %v10089_v11 }
 0x2ad   : > { %v9929_v18 = vld [vmem:[#allocation2 + $0x138] sm:$0xff] }
 0x2ae   : > { %v4327_v48 = vmax.f32 %v4260_v29, 0.0  ;;  %4423 = vst.msk [vmem:[#allocation2 + $0x141] sm:$0xff] %vm4351_vm1, %v4344_v47  ;;  %v4520_v28 = vld [vmem:[#allocation2 + $0x139] sm:$0xff] }
 0x2af   : > { %v4503_v38 = vld [vmem:[#allocation2 + $0x69] sm:$0xff]  ;;  %4488 = vst.msk [vmem:[#allocation4 + $0xd0] sm:$0xff] %vm4351_vm1, %v9929_v18 }
 0x2b0   : > { %v9932_v5 = vld [vmem:[#allocation2 + $0x68] sm:$0xff]  ;;  %4406 = vst.msk [vmem:[#allocation2 + $0x79] sm:$0xff] %vm4351_vm1, %v4327_v48  ;;  %4576 = vrot.lane.b32.xlu2 %v4503_v38, %s8256_s8 }
 0x2b1   : > { %v4304_v21 = vpop.f32.mrf.mxu3  ;;  %4471 = vst.msk [vmem:[#allocation4 + $0x48] sm:$0xff] %vm4351_vm1, %v9932_v5 }
 0x2b2   : > { %v4305_v43 = vadd.f32 %v9800_v20, %v4304_v21 }
 0x2b3   : > { %v4261_v36 = vpop.f32.mrf.mxu0 }
 0x2b4   : > { %v4262_v49 = vadd.f32 %v9800_v20, %v4261_v36  ;;  %v4345_v27 = vmax.f32 %v4305_v43, 0.0 }
 0x2b5   : > { %v9944_v30 = vld [vmem:[#allocation2 + $0x140] sm:$0xff] }
 0x2b6   : > { %v4328_v37 = vmax.f32 %v4262_v49, 0.0  ;;  %4424 = vst.msk [vmem:[#allocation2 + $0x151] sm:$0xff] %vm4351_vm1, %v4345_v27  ;;  %v4521_v63 = vld [vmem:[#allocation2 + $0x141] sm:$0xff] }
 0x2b7   : > { %v9947_v33 = vld [vmem:[#allocation2 + $0x79] sm:$0xff]  ;;  %4489 = vst.msk [vmem:[#allocation4 + $0xd8] sm:$0xff] %vm4351_vm1, %v9944_v30 }
 0x2b8   : > { %v9949_v53 = vld [vmem:[#allocation2 + $0x78] sm:$0xff]  ;;  %4407 = vst.msk [vmem:[#allocation2 + $0x81] sm:$0xff] %vm4351_vm1, %v4328_v37  ;;  %4578 = vrot.lane.b32.xlu0 %v9947_v33, %s8256_s8 }
 0x2b9   : > { %v4306_v7 = vpop.f32.mrf.mxu3  ;;  %4472 = vst.msk [vmem:[#allocation4 + $0x50] sm:$0xff] %vm4351_vm1, %v9949_v53 }
 0x2ba   : > { %v4307_v35 = vadd.f32 %v9800_v20, %v4306_v7 }
 0x2bb   : > { %v4264_v50 = vpop.f32.mrf.mxu0 }
 0x2bc   : > { %v4265_v39 = vadd.f32 %v9800_v20, %v4264_v50  ;;  %v4346_v42 = vmax.f32 %v4307_v35, 0.0 }
 0x2bd   : > { %v9960_v51 = vld [vmem:[#allocation2 + $0x150] sm:$0xff] }
 0x2be   : > { %v4329_v60 = vmax.f32 %v4265_v39, 0.0  ;;  %4425 = vst.msk [vmem:[#allocation2 + $0x159] sm:$0xff] %vm4351_vm1, %v4346_v42  ;;  %v10018_v38 = vld [vmem:[#allocation2 + $0x151] sm:$0xff] }
 0x2bf   : > { %v9963_v22 = vld [vmem:[#allocation2 + $0x81] sm:$0xff]  ;;  %4490 = vst.msk [vmem:[#allocation4 + $0xe0] sm:$0xff] %vm4351_vm1, %v9960_v51  ;;  %v4688_v42 = vld [vmem:[#allocation2 + $0xa] sm:$0xff] }
 0x2c0   : > { %4408 = vst.msk [vmem:[#allocation2 + $0x91] sm:$0xff] %vm4351_vm1, %v4329_v60  ;;  %4580 = vrot.lane.b32.xlu1 %v9963_v22, %s8256_s8  ;;  %v9970_v24 = vld [vmem:[#allocation2 + $0x80] sm:$0xff] }
 0x2c1   : > { %v4309_v44 = vpop.f32.mrf.mxu3  ;;  %4473 = vst.msk [vmem:[#allocation4 + $0x58] sm:$0xff] %vm4351_vm1, %v9970_v24 }
 0x2c2   : > { %v4310_v1 = vadd.f32 %v9800_v20, %v4309_v44  ;;  %v4687_v44 = vld [vmem:[#allocation2 + $0x2] sm:$0xff] }
 0x2c3   : > { %v4266_v52 = vpop.f32.mrf.mxu0 }
 0x2c4   : > { %v4267_v57 = vadd.f32 %v9800_v20, %v4266_v52  ;;  %v4347_v23 = vmax.f32 %v4310_v1, 0.0  ;;  %v4135_v52 = vld [vmem:[#allocation3 + $0xf0] sm:$0xff] }
 0x2c5   : > { %v9983_v62 = vld [vmem:[#allocation2 + $0x158] sm:$0xff]  ;;  %v4152_v31 = vpack.c.bf16 %v4136_v9, %v4135_v52  ;;  %v10125_v9 = vld [vmem:[#allocation2 + $0x62] sm:$0xff] }
 0x2c6   : > { %v4330_v61 = vmax.f32 %v4267_v57, 0.0  ;;  %4426 = vst.msk [vmem:[#allocation2 + $0x169] sm:$0xff] %vm4351_vm1, %v4347_v23  ;;  %v10046_v7 = vld [vmem:[#allocation2 + $0x159] sm:$0xff] }
 0x2c7   : > { %v9978_v25 = vld [vmem:[#allocation2 + $0x91] sm:$0xff]  ;;  %4491 = vst.msk [vmem:[#allocation4 + $0xe8] sm:$0xff] %vm4351_vm1, %v9983_v62  ;;  %7348 = vmatmul.msk.bf16.gmra.mxu3 %vm4177_vm0, %v4152_v31  ;;  %v4697_v31 = vld [vmem:[#allocation2 + $0x7a] sm:$0xff] }
 0x2c8   : > { %v9981_v34 = vld [vmem:[#allocation2 + $0x90] sm:$0xff]  ;;  %4409 = vst.msk [vmem:[#allocation2 + $0x99] sm:$0xff] %vm4351_vm1, %v4330_v61  ;;  %4582 = vrot.lane.b32.xlu2 %v9978_v25, %s8256_s8  ;;  %4610 = vrot.lane.b32.xlu1 %v4520_v28, %s8256_s8 }
 0x2c9   : > { %v4311_v2 = vpop.f32.mrf.mxu3  ;;  %4474 = vst.msk [vmem:[#allocation4 + $0x60] sm:$0xff] %vm4351_vm1, %v9981_v34  ;;  %v10068_v28 = vld [vmem:[#allocation2 + $0x32] sm:$0xff] }
 0x2ca   : > { %v4312_v56 = vadd.f32 %v9800_v20, %v4311_v2  ;;  %11232 = vst [vmem:[#allocation6_spill] sm:$0xff] %v10068_v28  ;;  %v10070_v2 = vld [vmem:[#allocation2 + $0x1a] sm:$0xff] }
 0x2cb   : > { %v4269_v8 = vpop.f32.mrf.mxu0  ;;  %v4565_v3 = vpop.permute.xlu2 %4564  ;;  %11235 = vst [vmem:[#allocation9_spill] sm:$0xff] %v10125_v9 }
 0x2cc   : > { %v4270_v13 = vadd.f32 %v9800_v20, %v4269_v8  ;;  %v4348_v16 = vmax.f32 %v4312_v56, 0.0  ;;  %4658 = vst.msk [vmem:[#allocation4 + $0x18] sm:$0xff] %vm4654_vm5, %v4565_v3 }
 0x2cd   : > { %v9996_v15 = vld [vmem:[#allocation2 + $0x168] sm:$0xff] }
 0x2ce   : > { %v4331_v0 = vmax.f32 %v4270_v13, 0.0  ;;  %4427 = vst.msk [vmem:[#allocation2 + $0x171] sm:$0xff] %vm4351_vm1, %v4348_v16  ;;  %v10014_v29 = vld [vmem:[#allocation2 + $0x169] sm:$0xff] }
 0x2cf   : > { %v9999_v46 = vld [vmem:[#allocation2 + $0x99] sm:$0xff]  ;;  %4492 = vst.msk [vmem:[#allocation4 + $0xf0] sm:$0xff] %vm4351_vm1, %v9996_v15 }
 0x2d0   : > { %4410 = vst.msk [vmem:[#allocation2 + $0xa9] sm:$0xff] %vm4351_vm1, %v4331_v0  ;;  %4584 = vrot.lane.b32.xlu0 %v9999_v46, %s8256_s8  ;;  %4612 = vrot.lane.b32.xlu2 %v4521_v63, %s8256_s8  ;;  %v10007_v58 = vld [vmem:[#allocation2 + $0x98] sm:$0xff] }
 0x2d1   : > { %4475 = vst.msk [vmem:[#allocation4 + $0x68] sm:$0xff] %vm4351_vm1, %v10007_v58 }
 0x2d3   : > { %v4271_v32 = vpop.f32.mrf.mxu0 }
 0x2d4   : > { %v4272_v17 = vadd.f32 %v9800_v20, %v4271_v32  ;;  %v10098_v32 = vld [vmem:[#allocation2 + $0x22] sm:$0xff] }
 0x2d5   : > { %v10016_v48 = vld [vmem:[#allocation2 + $0x170] sm:$0xff] }
 0x2d6   : > { %v4332_v47 = vmax.f32 %v4272_v17, 0.0  ;;  %4493 = vst.msk [vmem:[#allocation4 + $0xf8] sm:$0xff] %vm4351_vm1, %v10016_v48  ;;  %v10037_v27 = vld [vmem:[#allocation2 + $0x171] sm:$0xff] }
 0x2d7   : > { %v10020_v4 = vld [vmem:[#allocation2 + $0xa9] sm:$0xff] }
 0x2d8   : > { %v10022_v21 = vld [vmem:[#allocation2 + $0xa8] sm:$0xff]  ;;  %4411 = vst.msk [vmem:[#allocation2 + $0xb1] sm:$0xff] %vm4351_vm1, %v4332_v47  ;;  %4614 = vrot.lane.b32.xlu0 %v10018_v38, %s8256_s8  ;;  %4618 = vrot.lane.b32.xlu2 %v10014_v29, %s8256_s8 }
 0x2d9   : > { %4586 = vrot.lane.b32.xlu1 %v10020_v4, %s8256_s8  ;;  %4476 = vst.msk [vmem:[#allocation4 + $0x70] sm:$0xff] %vm4351_vm1, %v10022_v21 }
 0x2db   : > { %v4274_v43 = vpop.f32.mrf.mxu0  ;;  %v4563_v19 = vpop.permute.xlu1 %4562 }
 0x2dc   : > { %v4275_v36 = vadd.f32 %v9800_v20, %v4274_v43  ;;  %4657 = vst.msk [vmem:[#allocation4 + $0x10] sm:$0xff] %vm4654_vm5, %v4563_v19 }
 0x2de   : > { %v4333_v49 = vmax.f32 %v4275_v36, 0.0  ;;  %v10106_v36 = vld [vmem:[#allocation2 + $0x52] sm:$0xff] }
 0x2df   : > { %v10039_v37 = vld [vmem:[#allocation2 + $0xb1] sm:$0xff]  ;;  %11234 = vst [vmem:[#allocation8_spill] sm:$0xff] %v10106_v36 }
 0x2e0   : > { %4412 = vst.msk [vmem:[#allocation2 + $0xc1] sm:$0xff] %vm4351_vm1, %v4333_v49  ;;  %4620 = vrot.lane.b32.xlu0 %v10037_v27, %s8256_s8  ;;  %4588 = vrot.lane.b32.xlu2 %v10039_v37, %s8256_s8  ;;  %v10048_v35 = vld [vmem:[#allocation2 + $0xb0] sm:$0xff] }
 0x2e1   : > { %4616 = vrot.lane.b32.xlu1 %v10046_v7, %s8256_s8  ;;  %4477 = vst.msk [vmem:[#allocation4 + $0x78] sm:$0xff] %vm4351_vm1, %v10048_v35 }
 0x2e3   : > { %v4276_v50 = vpop.f32.mrf.mxu0 }
 0x2e4   : > { %v4277_v39 = vadd.f32 %v9800_v20, %v4276_v50  ;;  %v10115_v50 = vld [vmem:[#allocation2 + $0x4a] sm:$0xff] }
 0x2e6   : > { %v4334_v60 = vmax.f32 %v4277_v39, 0.0 }
 0x2e7   : > { %v10055_v1 = vld [vmem:[#allocation2 + $0xc1] sm:$0xff] }
 0x2e8   : > { %v10057_v14 = vld [vmem:[#allocation2 + $0xc0] sm:$0xff]  ;;  %4413 = vst.msk [vmem:[#allocation2 + $0xc9] sm:$0xff] %vm4351_vm1, %v4334_v60  ;;  %4590 = vrot.lane.b32.xlu0 %v10055_v1, %s8256_s8  ;;  %4753 = vrot.lane.b32.xlu2 %v4688_v42, %s8258_s10 }
 0x2e9   : > { %4751 = vrot.lane.b32.xlu1 %v4687_v44, %s8258_s10  ;;  %4478 = vst.msk [vmem:[#allocation4 + $0x80] sm:$0xff] %vm4351_vm1, %v10057_v14 }
 0x2eb   : > { %v4279_v57 = vpop.f32.mrf.mxu0 }
 0x2ec   : > { %v4280_v23 = vadd.f32 %v9800_v20, %v4279_v57 }
 0x2ee   : > { %v4335_v61 = vmax.f32 %v4280_v23, 0.0 }
 0x2ef   : > { %v10072_v56 = vld [vmem:[#allocation2 + $0xc9] sm:$0xff] }
 0x2f0   : > { %4414 = vst.msk [vmem:[#allocation2 + $0xd9] sm:$0xff] %vm4351_vm1, %v4335_v61  ;;  %4759 = vrot.lane.b32.xlu2 %v10068_v28, %s8258_s10  ;;  %4755 = vrot.lane.b32.xlu0 %v10070_v2, %s8258_s10  ;;  %v10079_v8 = vld [vmem:[#allocation2 + $0xc8] sm:$0xff] }
 0x2f1   : > { %4592 = vrot.lane.b32.xlu1 %v10072_v56, %s8256_s8  ;;  %4479 = vst.msk [vmem:[#allocation4 + $0x88] sm:$0xff] %vm4351_vm1, %v10079_v8 }
 0x2f2   : > { %v4571_v3 = vpop.permute.xlu2 %4570 }
 0x2f3   : > { %4661 = vst.msk [vmem:[#allocation4 + $0x30] sm:$0xff] %vm4654_vm5, %v4571_v3  ;;  %v4281_v13 = vpop.f32.mrf.mxu0 }
 0x2f4   : > { %v4282_v16 = vadd.f32 %v9800_v20, %v4281_v13 }
 0x2f6   : > { %v4336_v0 = vmax.f32 %v4282_v16, 0.0 }
 0x2f7   : > { %v10087_v63 = vld [vmem:[#allocation2 + $0xd9] sm:$0xff] }
 0x2f8   : > { %v10091_v41 = vld [vmem:[#allocation2 + $0xd8] sm:$0xff]  ;;  %4415 = vst.msk [vmem:[#allocation2 + $0xe1] sm:$0xff] %vm4351_vm1, %v4336_v0  ;;  %4594 = vrot.lane.b32.xlu2 %v10087_v63, %s8256_s8  ;;  %4761 = vrot.lane.b32.xlu0 %v10089_v11, %s8258_s10 }
 0x2f9   : > { %4757 = vrot.lane.b32.xlu1 %v10098_v32, %s8258_s10  ;;  %4480 = vst.msk [vmem:[#allocation4 + $0x90] sm:$0xff] %vm4351_vm1, %v10091_v41 }
 0x2fa   : > { %v4567_v17 = vpop.permute.xlu0 %4566 }
 0x2fb   : > { %4659 = vst.msk [vmem:[#allocation4 + $0x20] sm:$0xff] %vm4654_vm5, %v4567_v17  ;;  %v4284_v47 = vpop.f32.mrf.mxu0  ;;  %v4698_v17 = vld [vmem:[#allocation2 + $0x82] sm:$0xff] }
 0x2fc   : > { %v4285_v43 = vadd.f32 %v9800_v20, %v4284_v47  ;;  %v4696_v47 = vld [vmem:[#allocation2 + $0x6a] sm:$0xff] }
 0x2fe   : > { %v4337_v19 = vmax.f32 %v4285_v43, 0.0 }
 0x2ff   : > { %v10108_v49 = vld [vmem:[#allocation2 + $0xe1] sm:$0xff] }
 0x300   : > { %4416 = vst.msk [vmem:[#allocation2 + $0xf1] sm:$0xff] %vm4351_vm1, %v4337_v19  ;;  %4765 = vrot.lane.b32.xlu2 %v10106_v36, %s8258_s10  ;;  %4596 = vrot.lane.b32.xlu0 %v10108_v49, %s8256_s8  ;;  %v10117_v39 = vld [vmem:[#allocation2 + $0xe0] sm:$0xff] }
 0x301   : > { %4763 = vrot.lane.b32.xlu1 %v10115_v50, %s8258_s10  ;;  %4481 = vst.msk [vmem:[#allocation4 + $0x98] sm:$0xff] %vm4351_vm1, %v10117_v39 }
 0x302   : > { %v4569_v42 = vpop.permute.xlu1 %4568 }
 0x303   : > { %4660 = vst.msk [vmem:[#allocation4 + $0x28] sm:$0xff] %vm4654_vm5, %v4569_v42  ;;  %v4286_v60 = vpop.f32.mrf.mxu0 }
 0x304   : > { %v4287_v44 = vadd.f32 %v9800_v20, %v4286_v60 }
 0x306   : > { %v4338_v52 = vmax.f32 %v4287_v44, 0.0 }
 0x307   : > { %v10127_v57 = vld [vmem:[#allocation2 + $0xf1] sm:$0xff] }
 0x308   : > { %v10129_v23 = vld [vmem:[#allocation2 + $0xf0] sm:$0xff]  ;;  %4417 = vst.msk [vmem:[#allocation2 + $0xf9] sm:$0xff] %vm4351_vm1, %v4338_v52  ;;  %4771 = vrot.lane.b32.xlu2 %v4697_v31, %s8258_s10  ;;  %4767 = vrot.lane.b32.xlu0 %v10125_v9, %s8258_s10  ;;  %v4700_v52 = vld [vmem:[#allocation2 + $0x9a] sm:$0xff] }
 0x309   : > { %4598 = vrot.lane.b32.xlu1 %v10127_v57, %s8256_s8  ;;  %4482 = vst.msk [vmem:[#allocation4 + $0xa0] sm:$0xff] %vm4351_vm1, %v10129_v23 }
 0x30a   : > { %v4577_v61 = vpop.permute.xlu2 %4576 }
 0x30b   : > { %4664 = vst.msk [vmem:[#allocation4 + $0x48] sm:$0xff] %vm4654_vm5, %v4577_v61  ;;  %v4289_v3 = vpop.f32.mrf.mxu0 }
 0x30c   : > { %v4290_v13 = vadd.f32 %v9800_v20, %v4289_v3  ;;  %v4699_v3 = vld [vmem:[#allocation2 + $0x92] sm:$0xff] }
 0x30e   : > { %v4339_v16 = vmax.f32 %v4290_v13, 0.0 }
 0x30f   : > { %v10141_v0 = vld [vmem:[#allocation2 + $0xf9] sm:$0xff] }
 0x310   : > { %4418 = vst.msk [vmem:[#allocation2 + $0x109] sm:$0xff] %vm4351_vm1, %v4339_v16  ;;  %4600 = vrot.lane.b32.xlu2 %v10141_v0, %s8256_s8  ;;  %4773 = vrot.lane.b32.xlu0 %v4698_v17, %s8258_s10  ;;  %v10147_v43 = vld [vmem:[#allocation2 + $0xf8] sm:$0xff] }
 0x311   : > { %4769 = vrot.lane.b32.xlu1 %v4696_v47, %s8258_s10  ;;  %4483 = vst.msk [vmem:[#allocation4 + $0xa8] sm:$0xff] %vm4351_vm1, %v10147_v43  ;;  %v4707_v9 = vld [vmem:[#allocation2 + $0xf2] sm:$0xff] }
 0x312   : > { %v4573_v19 = vpop.permute.xlu0 %4572 }
 0x313   : > { %4662 = vst.msk [vmem:[#allocation4 + $0x38] sm:$0xff] %vm4654_vm5, %v4573_v19  ;;  %v4291_v42 = vpop.f32.mrf.mxu0  ;;  %v4703_v19 = vld [vmem:[#allocation2 + $0xc2] sm:$0xff] }
 0x314   : > { %v4292_v60 = vadd.f32 %v9800_v20, %v4291_v42  ;;  %v4701_v42 = vld [vmem:[#allocation2 + $0xaa] sm:$0xff] }
 0x316   : > { %v4340_v44 = vmax.f32 %v4292_v60, 0.0 }
 0x317   : > { %v10154_v31 = vld [vmem:[#allocation2 + $0x109] sm:$0xff] }
 0x318   : > { %v10156_v61 = vld [vmem:[#allocation2 + $0x108] sm:$0xff]  ;;  %4419 = vst.msk [vmem:[#allocation2 + $0x111] sm:$0xff] %vm4351_vm1, %v4340_v44  ;;  %4777 = vrot.lane.b32.xlu2 %v4700_v52, %s8258_s10  ;;  %4602 = vrot.lane.b32.xlu0 %v10154_v31, %s8256_s8 }
 0x319   : > { %4775 = vrot.lane.b32.xlu1 %v4699_v3, %s8258_s10  ;;  %4484 = vst.msk [vmem:[#allocation4 + $0xb0] sm:$0xff] %vm4351_vm1, %v10156_v61 }
 0x31a   : > { %v4575_v13 = vpop.permute.xlu1 %4574 }
 0x31b   : > { %4663 = vst.msk [vmem:[#allocation4 + $0x40] sm:$0xff] %vm4654_vm5, %v4575_v13  ;;  %v4294_v16 = vpop.f32.mrf.mxu0 }
 0x31c   : > { %v4295_v17 = vadd.f32 %v9800_v20, %v4294_v16 }
 0x31e   : > { %v4341_v47 = vmax.f32 %v4295_v17, 0.0 }
 0x31f   : > { %v10167_v60 = vld [vmem:[#allocation2 + $0x111] sm:$0xff] }
 0x320   : > { %4420 = vst.msk [vmem:[#allocation2 + $0x121] sm:$0xff] %vm4351_vm1, %v4341_v47  ;;  %4783 = vrot.lane.b32.xlu2 %v4703_v19, %s8258_s10  ;;  %4779 = vrot.lane.b32.xlu0 %v4701_v42, %s8258_s10  ;;  %v10172_v44 = vld [vmem:[#allocation2 + $0x110] sm:$0xff] }
 0x321   : > { %4604 = vrot.lane.b32.xlu1 %v10167_v60, %s8256_s8  ;;  %4485 = vst.msk [vmem:[#allocation4 + $0xb8] sm:$0xff] %vm4351_vm1, %v10172_v44  ;;  %v4704_v47 = vld [vmem:[#allocation2 + $0xca] sm:$0xff]  ;;  %v4702_v42 = vld [vmem:[#allocation2 + $0xb2] sm:$0xff] }
 0x322   : > { %v4583_v52 = vpop.permute.xlu2 %4582  ;;  %v4710_v28 = vld [vmem:[#allocation2 + $0x112] sm:$0xff] }
 0x323   : > { %4667 = vst.msk [vmem:[#allocation4 + $0x60] sm:$0xff] %vm4654_vm5, %v4583_v52  ;;  %v4296_v3 = vpop.f32.mrf.mxu0 }
 0x324   : > { %v4297_v13 = vadd.f32 %v9800_v20, %v4296_v3 }
 0x326   : > { %v4342_v16 = vmax.f32 %v4297_v13, 0.0  ;;  %v4706_v13 = vld [vmem:[#allocation2 + $0xe2] sm:$0xff] }
 0x327   : > { %v10180_v17 = vld [vmem:[#allocation2 + $0x121] sm:$0xff] }
 0x328   : > { %v10182_v19 = vld [vmem:[#allocation2 + $0x120] sm:$0xff]  ;;  %4421 = vst.msk [vmem:[#allocation2 + $0x129] sm:$0xff] %vm4351_vm1, %v4342_v16  ;;  %4606 = vrot.lane.b32.xlu2 %v10180_v17, %s8256_s8  ;;  %4785 = vrot.lane.b32.xlu0 %v4704_v47, %s8258_s10 }
 0x329   : > { %4781 = vrot.lane.b32.xlu1 %v4702_v42, %s8258_s10  ;;  %4486 = vst.msk [vmem:[#allocation4 + $0xc0] sm:$0xff] %vm4351_vm1, %v10182_v19  ;;  %v4705_v16 = vld [vmem:[#allocation2 + $0xda] sm:$0xff] }
 0x32a   : > { %v4579_v52 = vpop.permute.xlu0 %4578  ;;  %v4613_v3 = vpop.permute.xlu2 %4612 }
 0x32b   : > { %4665 = vst.msk [vmem:[#allocation4 + $0x50] sm:$0xff] %vm4654_vm5, %v4579_v52 }
 0x32c   : > { %4682 = vst.msk [vmem:[#allocation4 + $0xd8] sm:$0xff] %vm4654_vm5, %v4613_v3  ;;  %v4709_v3 = vld [vmem:[#allocation2 + $0x10a] sm:$0xff] }
 0x32f   : > { %v10193_v26 = vld [vmem:[#allocation2 + $0x129] sm:$0xff] }
 0x330   : > { %4789 = vrot.lane.b32.xlu2 %v4706_v13, %s8258_s10  ;;  %4608 = vrot.lane.b32.xlu0 %v10193_v26, %s8256_s8  ;;  %v10198_v47 = vld [vmem:[#allocation2 + $0x128] sm:$0xff]  ;;  %v4708_v13 = vld [vmem:[#allocation2 + $0xfa] sm:$0xff]  ;;  %s8267_s8 = smov 64  }
 0x331   : > { %4787 = vrot.lane.b32.xlu1 %v4705_v16, %s8258_s10  ;;  %4487 = vst.msk [vmem:[#allocation4 + $0xc8] sm:$0xff] %vm4351_vm1, %v10198_v47  ;;  %v4712_v11 = vld [vmem:[#allocation2 + $0x12a] sm:$0xff] }
 0x332   : > { %v4619_v42 = vpop.permute.xlu2 %4618  ;;  %v4581_v52 = vpop.permute.xlu1 %4580 }
 0x333   : > { %4685 = vst.msk [vmem:[#allocation4 + $0xf0] sm:$0xff] %vm4654_vm5, %v4619_v42  ;;  %v4711_v42 = vld [vmem:[#allocation2 + $0x122] sm:$0xff] }
 0x334   : > { %4666 = vst.msk [vmem:[#allocation4 + $0x58] sm:$0xff] %vm4654_vm5, %v4581_v52 }
 0x338   : > { %4795 = vrot.lane.b32.xlu2 %v4709_v3, %s8258_s10  ;;  %4791 = vrot.lane.b32.xlu0 %v4707_v9, %s8258_s10  ;;  %v4715_v3 = vld [vmem:[#allocation2 + $0x152] sm:$0xff] }
 0x339   : > { %4793 = vrot.lane.b32.xlu1 %v4708_v13, %s8258_s10  ;;  %v4714_v13 = vld [vmem:[#allocation2 + $0x142] sm:$0xff] }
 0x33a   : > { %v4589_v36 = vpop.permute.xlu2 %4588  ;;  %v4611_v16 = vpop.permute.xlu1 %4610 }
 0x33b   : > { %4670 = vst.msk [vmem:[#allocation4 + $0x78] sm:$0xff] %vm4654_vm5, %v4589_v36  ;;  %v4713_v36 = vld [vmem:[#allocation2 + $0x13a] sm:$0xff] }
 0x33c   : > { %4681 = vst.msk [vmem:[#allocation4 + $0xd0] sm:$0xff] %vm4654_vm5, %v4611_v16 }
 0x340   : > { %4801 = vrot.lane.b32.xlu2 %v4712_v11, %s8258_s10  ;;  %4797 = vrot.lane.b32.xlu0 %v4710_v28, %s8258_s10 }
 0x341   : > { %4799 = vrot.lane.b32.xlu1 %v4711_v42, %s8258_s10  ;;  %v4718_v42 = vld [vmem:[#allocation2 + $0x172] sm:$0xff] }
 0x342   : > { %v4585_v52 = vpop.permute.xlu0 %4584  ;;  %v4754_v9 = vpop.permute.xlu2 %4753 }
 0x343   : > { %4668 = vst.msk [vmem:[#allocation4 + $0x68] sm:$0xff] %vm4654_vm5, %v4585_v52  ;;  %v4716_v52 = vld [vmem:[#allocation2 + $0x15a] sm:$0xff] }
 0x344   : > { %4849 = vst.msk [vmem:[#allocation4 + $0x8] sm:$0xff] %vm4847_vm7, %v4754_v9  ;;  %v4717_v9 = vld [vmem:[#allocation2 + $0x16a] sm:$0xff] }
 0x348   : > { %4807 = vrot.lane.b32.xlu2 %v4715_v3, %s8258_s10  ;;  %4803 = vrot.lane.b32.xlu0 %v4713_v36, %s8258_s10 }
 0x349   : > { %4805 = vrot.lane.b32.xlu1 %v4714_v13, %s8258_s10 }
 0x34a   : > { %v4615_v28 = vpop.permute.xlu0 %4614  ;;  %v4760_v11 = vpop.permute.xlu2 %4759 }
 0x34b   : > { %4683 = vst.msk [vmem:[#allocation4 + $0xe0] sm:$0xff] %vm4654_vm5, %v4615_v28  ;;  %v4587_v16 = vpop.permute.xlu1 %4586 }
 0x34c   : > { %4852 = vst.msk [vmem:[#allocation4 + $0x20] sm:$0xff] %vm4847_vm7, %v4760_v11 }
 0x34d   : > { %4669 = vst.msk [vmem:[#allocation4 + $0x70] sm:$0xff] %vm4654_vm5, %v4587_v16 }
 0x350   : > { %4813 = vrot.lane.b32.xlu2 %v4718_v42, %s8258_s10  ;;  %4809 = vrot.lane.b32.xlu0 %v4716_v52, %s8258_s10 }
 0x351   : > { %4811 = vrot.lane.b32.xlu1 %v4717_v9, %s8258_s10  ;;  %s10908_s10 = scalar_lea.vmem %s11219_s7, %s7447_s28 }
 0x352   : > { %v4621_v3 = vpop.permute.xlu0 %4620  ;;  %v4595_v36 = vpop.permute.xlu2 %4594 }
 0x353   : > { %4686 = vst.msk [vmem:[#allocation4 + $0xf8] sm:$0xff] %vm4654_vm5, %v4621_v3  ;;  %v4617_v13 = vpop.permute.xlu1 %4616  ;;  %v4314_v3 = vpop.f32.mrf.mxu3 }
 0x354   : > { %4673 = vst.msk [vmem:[#allocation4 + $0x90] sm:$0xff] %vm4654_vm5, %v4595_v36  ;;  %v4315_v36 = vadd.f32 %v9800_v20, %v4314_v3  ;;  %v10327_v3 = vld [vmem:[#allocation2 + $0x39] sm:$0xff] }
 0x355   : > { %4684 = vst.msk [vmem:[#allocation4 + $0xe8] sm:$0xff] %vm4654_vm5, %v4617_v13 }
 0x358   : > { %4948 = vrot.lane.b32.xlu2 %v9886_v45, %s8260_s12  ;;  %4944 = vrot.lane.b32.xlu0 %v9874_v40, %s8260_s12 }
 0x359   : > { %4946 = vrot.lane.b32.xlu1 %v9870_v10, %s8260_s12 }
 0x35a   : > { %v4591_v28 = vpop.permute.xlu0 %4590  ;;  %v4766_v11 = vpop.permute.xlu2 %4765 }
 0x35b   : > { %4671 = vst.msk [vmem:[#allocation4 + $0x80] sm:$0xff] %vm4654_vm5, %v4591_v28  ;;  %v4752_v16 = vpop.permute.xlu1 %4751 }
 0x35c   : > { %4855 = vst.msk [vmem:[#allocation4 + $0x38] sm:$0xff] %vm4847_vm7, %v4766_v11  ;;  %v4349_v11 = vmax.f32 %v4315_v36, 0.0  ;;  %v5074_v36 = vld [vmem:[#allocation2 + $0x21] sm:$0xff] }
 0x35d   : > { %4848 = vst.msk [vmem:[#allocation4] sm:$0xff] %vm4847_vm7, %v4752_v16 }
 0x35e   : > { %4428 = vst.msk [vmem:[#allocation2 + $0x181] sm:$0xff] %vm4351_vm1, %v4349_v11 }
 0x360   : > { %4954 = vrot.lane.b32.xlu2 %v9911_v6, %s8260_s12  ;;  %4950 = vrot.lane.b32.xlu0 %v9896_v59, %s8260_s12 }
 0x361   : > { %4952 = vrot.lane.b32.xlu1 %v9901_v54, %s8260_s12 }
 0x362   : > { %v4772_v40 = vpop.permute.xlu2 %4771  ;;  %v4756_v10 = vpop.permute.xlu0 %4755 }
 0x363   : > { %4858 = vst.msk [vmem:[#allocation4 + $0x50] sm:$0xff] %vm4847_vm7, %v4772_v40  ;;  %v4593_v42 = vpop.permute.xlu1 %4592 }
 0x364   : > { %4850 = vst.msk [vmem:[#allocation4 + $0x10] sm:$0xff] %vm4847_vm7, %v4756_v10 }
 0x365   : > { %4672 = vst.msk [vmem:[#allocation4 + $0x88] sm:$0xff] %vm4654_vm5, %v4593_v42 }
 0x368   : > { %4960 = vrot.lane.b32.xlu2 %v9949_v53, %s8260_s12  ;;  %4956 = vrot.lane.b32.xlu0 %v9920_v55, %s8260_s12 }
 0x369   : > { %4958 = vrot.lane.b32.xlu1 %v9932_v5, %s8260_s12 }
 0x36a   : > { %v4601_v52 = vpop.permute.xlu2 %4600  ;;  %v4762_v54 = vpop.permute.xlu0 %4761 }
 0x36b   : > { %4676 = vst.msk [vmem:[#allocation4 + $0xa8] sm:$0xff] %vm4654_vm5, %v4601_v52  ;;  %v4758_v9 = vpop.permute.xlu1 %4757 }
 0x36c   : > { %4853 = vst.msk [vmem:[#allocation4 + $0x28] sm:$0xff] %vm4847_vm7, %v4762_v54  ;;  %v4910_v54 = vld [vmem:[#allocation2 + $0x180] sm:$0xff] }
 0x36d   : > { %4851 = vst.msk [vmem:[#allocation4 + $0x18] sm:$0xff] %vm4847_vm7, %v4758_v9 }
 0x370   : > { %4966 = vrot.lane.b32.xlu2 %v10007_v58, %s8260_s12  ;;  %4962 = vrot.lane.b32.xlu0 %v9970_v24, %s8260_s12  ;;  %v4316_v58 = vpop.f32.mrf.mxu3 }
 0x371   : > { %4964 = vrot.lane.b32.xlu1 %v9981_v34, %s8260_s12  ;;  %v4317_v34 = vadd.f32 %v9800_v20, %v4316_v58  ;;  %v10339_v58 = vld [vmem:[#allocation2 + $0x49] sm:$0xff] }
 0x372   : > { %v4778_v13 = vpop.permute.xlu2 %4777  ;;  %v4597_v28 = vpop.permute.xlu0 %4596 }
 0x373   : > { %4861 = vst.msk [vmem:[#allocation4 + $0x68] sm:$0xff] %vm4847_vm7, %v4778_v13  ;;  %v4764_v16 = vpop.permute.xlu1 %4763  ;;  %v4350_v42 = vmax.f32 %v4317_v34, 0.0  ;;  %v10332_v13 = vld [vmem:[#allocation2 + $0x31] sm:$0xff] }
 0x374   : > { %4674 = vst.msk [vmem:[#allocation4 + $0x98] sm:$0xff] %vm4654_vm5, %v4597_v28  ;;  %v10345_v34 = vld [vmem:[#allocation2 + $0x51] sm:$0xff] }
 0x375   : > { %4854 = vst.msk [vmem:[#allocation4 + $0x30] sm:$0xff] %vm4847_vm7, %v4764_v16 }
 0x376   : > { %4429 = vst.msk [vmem:[#allocation2 + $0x189] sm:$0xff] %vm4351_vm1, %v4350_v42 }
 0x378   : > { %4972 = vrot.lane.b32.xlu2 %v10057_v14, %s8260_s12  ;;  %4968 = vrot.lane.b32.xlu0 %v10022_v21, %s8260_s12 }
 0x379   : > { %4970 = vrot.lane.b32.xlu1 %v10048_v35, %s8260_s12 }
 0x37a   : > { %v4784_v40 = vpop.permute.xlu2 %4783  ;;  %v4768_v10 = vpop.permute.xlu0 %4767 }
 0x37b   : > { %4864 = vst.msk [vmem:[#allocation4 + $0x80] sm:$0xff] %vm4847_vm7, %v4784_v40  ;;  %v4599_v52 = vpop.permute.xlu1 %4598 }
 0x37c   : > { %4856 = vst.msk [vmem:[#allocation4 + $0x40] sm:$0xff] %vm4847_vm7, %v4768_v10 }
 0x37d   : > { %4675 = vst.msk [vmem:[#allocation4 + $0xa0] sm:$0xff] %vm4654_vm5, %v4599_v52  ;;  %v10352_v52 = vld [vmem:[#allocation2 + $0x69] sm:$0xff] }
 0x380   : > { %4978 = vrot.lane.b32.xlu2 %v10117_v39, %s8260_s12  ;;  %4974 = vrot.lane.b32.xlu0 %v10079_v8, %s8260_s12 }
 0x381   : > { %4976 = vrot.lane.b32.xlu1 %v10091_v41, %s8260_s12 }
 0x382   : > { %v4607_v20 = vpop.permute.xlu2 %4606  ;;  %v4774_v21 = vpop.permute.xlu0 %4773 }
 0x383   : > { %4679 = vst.msk [vmem:[#allocation4 + $0xc0] sm:$0xff] %vm4654_vm5, %v4607_v20  ;;  %v4770_v35 = vpop.permute.xlu1 %4769 }
 0x384   : > { %4859 = vst.msk [vmem:[#allocation4 + $0x58] sm:$0xff] %vm4847_vm7, %v4774_v21 }
 0x385   : > { %4857 = vst.msk [vmem:[#allocation4 + $0x48] sm:$0xff] %vm4847_vm7, %v4770_v35 }
 0x388   : > { %4984 = vrot.lane.b32.xlu2 %v10156_v61, %s8260_s12  ;;  %4980 = vrot.lane.b32.xlu0 %v10129_v23, %s8260_s12 }
 0x389   : > { %4982 = vrot.lane.b32.xlu1 %v10147_v43, %s8260_s12 }
 0x38a   : > { %v4790_v14 = vpop.permute.xlu2 %4789  ;;  %v4603_v8 = vpop.permute.xlu0 %4602 }
 0x38b   : > { %4867 = vst.msk [vmem:[#allocation4 + $0x98] sm:$0xff] %vm4847_vm7, %v4790_v14  ;;  %v4776_v41 = vpop.permute.xlu1 %4775  ;;  %v5097_v14 = vld [vmem:[#allocation2 + $0x139] sm:$0xff] }
 0x38c   : > { %4677 = vst.msk [vmem:[#allocation4 + $0xb0] sm:$0xff] %vm4654_vm5, %v4603_v8  ;;  %v5098_v8 = vld [vmem:[#allocation2 + $0x141] sm:$0xff] }
 0x38d   : > { %4860 = vst.msk [vmem:[#allocation4 + $0x60] sm:$0xff] %vm4847_vm7, %v4776_v41 }
 0x390   : > { %4990 = vrot.lane.b32.xlu2 %v10198_v47, %s8260_s12  ;;  %4986 = vrot.lane.b32.xlu0 %v10172_v44, %s8260_s12  ;;  %v5073_v47 = vld [vmem:[#allocation2 + $0x19] sm:$0xff] }
 0x391   : > { %4988 = vrot.lane.b32.xlu1 %v10182_v19, %s8260_s12 }
 0x392   : > { %v4796_v39 = vpop.permute.xlu2 %4795  ;;  %v4780_v23 = vpop.permute.xlu0 %4779 }
 0x393   : > { %4870 = vst.msk [vmem:[#allocation4 + $0xb0] sm:$0xff] %vm4847_vm7, %v4796_v39  ;;  %v4605_v43 = vpop.permute.xlu1 %4604  ;;  %v5103_v39 = vld [vmem:[#allocation2 + $0x181] sm:$0xff] }
 0x394   : > { %4862 = vst.msk [vmem:[#allocation4 + $0x70] sm:$0xff] %vm4847_vm7, %v4780_v23 }
 0x395   : > { %4678 = vst.msk [vmem:[#allocation4 + $0xb8] sm:$0xff] %vm4654_vm5, %v4605_v43  ;;  %v5104_v43 = vld [vmem:[#allocation2 + $0x189] sm:$0xff] }
 0x398   : > { %4996 = vrot.lane.b32.xlu2 %v9960_v51, %s8260_s12  ;;  %4992 = vrot.lane.b32.xlu0 %v9929_v18, %s8260_s12 }
 0x399   : > { %4994 = vrot.lane.b32.xlu1 %v9944_v30, %s8260_s12 }
 0x39a   : > { %v4802_v61 = vpop.permute.xlu2 %4801  ;;  %v4786_v44 = vpop.permute.xlu0 %4785 }
 0x39b   : > { %4865 = vst.msk [vmem:[#allocation4 + $0x88] sm:$0xff] %vm4847_vm7, %v4786_v44  ;;  %v4782_v19 = vpop.permute.xlu1 %4781  ;;  %v11237_v44 = vld [vmem:[#allocation7_spill] sm:$0xff] }
 0x39c   : > { %4863 = vst.msk [vmem:[#allocation4 + $0x78] sm:$0xff] %vm4847_vm7, %v4782_v19 }
 0x3a0   : > { %5002 = vrot.lane.b32.xlu2 %v10016_v48, %s8260_s12  ;;  %4998 = vrot.lane.b32.xlu0 %v9983_v62, %s8260_s12  ;;  %v4911_v62 = vld [vmem:[#allocation2 + $0x188] sm:$0xff] }
 0x3a1   : > { %5000 = vrot.lane.b32.xlu1 %v9996_v15, %s8260_s12 }
 0x3a2   : > { %v4808_v18 = vpop.permute.xlu2 %4807  ;;  %v4609_v51 = vpop.permute.xlu0 %4608 }
 0x3a3   : > { %4876 = vst.msk [vmem:[#allocation4 + $0xe0] sm:$0xff] %vm4847_vm7, %v4808_v18  ;;  %v4788_v30 = vpop.permute.xlu1 %4787 }
 0x3a4   : > { %4680 = vst.msk [vmem:[#allocation4 + $0xc8] sm:$0xff] %vm4654_vm5, %v4609_v51  ;;  %v11239_v51 = vld [vmem:[#allocation9_spill] sm:$0xff] }
 0x3a5   : > { %4873 = vst.msk [vmem:[#allocation4 + $0xc8] sm:$0xff] %vm4847_vm7, %v4802_v61 }
 0x3a6   : > { %4866 = vst.msk [vmem:[#allocation4 + $0x90] sm:$0xff] %vm4847_vm7, %v4788_v30 }
 0x3a8   : > { %5137 = vrot.lane.b32.xlu2 %v5073_v47, %s8262_s14  ;;  %5004 = vrot.lane.b32.xlu0 %v4910_v54, %s8260_s12 }
 0x3a9   : > { %5006 = vrot.lane.b32.xlu1 %v4911_v62, %s8260_s12  ;;  %v7381_v62 = vld [vmem:[%s8322_s29 + $0xc] sm:$0xf] }
 0x3aa   : > { %v4814_v15 = vpop.permute.xlu2 %4813  ;;  %v4792_v48 = vpop.permute.xlu0 %4791 }
 0x3ab   : > { %4879 = vst.msk [vmem:[#allocation4 + $0xf8] sm:$0xff] %vm4847_vm7, %v4814_v15  ;;  %v4794_v9 = vpop.permute.xlu1 %4793  ;;  %v7382_v15 = vld [vmem:[%s8322_s29 + $0x10] sm:$0xf] }
 0x3ac   : > { %4868 = vst.msk [vmem:[#allocation4 + $0xa0] sm:$0xff] %vm4847_vm7, %v4792_v48  ;;  %v6318_v48 = vshrl.u32 %v7381_v62, 16 }
 0x3ad   : > { %4869 = vst.msk [vmem:[#allocation4 + $0xa8] sm:$0xff] %vm4847_vm7, %v4794_v9  ;;  %v6321_v9 = vshll.u32 %v7381_v62, 16  ;;  %v5849_v62 = vld [vmem:[#allocation2 + $0x52] sm:$0xff] }
 0x3b0   : > { %5143 = vrot.lane.b32.xlu2 %v10327_v3, %s8262_s14  ;;  %5139 = vrot.lane.b32.xlu0 %v5074_v36, %s8262_s14  ;;  %v6327_v36 = vshll.u32 %v7382_v15, 16 }
 0x3b1   : > { %5141 = vrot.lane.b32.xlu1 %v10332_v13, %s8262_s14 }
 0x3b2   : > { %v4949_v28 = vpop.permute.xlu2 %4948  ;;  %v4798_v11 = vpop.permute.xlu0 %4797 }
 0x3b3   : > { %5043 = vst.msk [vmem:[#allocation4 + $0x10] sm:$0xff] %vm5040_vm8, %v4949_v28  ;;  %v4800_v16 = vpop.permute.xlu1 %4799  ;;  %v6320_v28 = vrot.slane %v6318_v48, 4 }
 0x3b4   : > { %4871 = vst.msk [vmem:[#allocation4 + $0xb8] sm:$0xff] %vm4847_vm7, %v4798_v11  ;;  %v6323_v11 = vrot.slane %v6321_v9, 5 }
 0x3b5   : > { %4872 = vst.msk [vmem:[#allocation4 + $0xc0] sm:$0xff] %vm4847_vm7, %v4800_v16  ;;  %v6329_v16 = vrot.slane %v6327_v36, 5  ;;  %v7387_v36 = vld [vmem:[%s8322_s29 + $0x24] sm:$0xf] }
 0x3b8   : > { %5149 = vrot.lane.b32.xlu2 %v9918_v12, %s8262_s14  ;;  %5145 = vrot.lane.b32.xlu0 %v10339_v58, %s8262_s14 }
 0x3b9   : > { %5147 = vrot.lane.b32.xlu1 %v10345_v34, %s8262_s14 }
 0x3ba   : > { %v4955_v40 = vpop.permute.xlu2 %4954  ;;  %v4804_v10 = vpop.permute.xlu0 %4803 }
 0x3bb   : > { %5046 = vst.msk [vmem:[#allocation4 + $0x28] sm:$0xff] %vm5040_vm8, %v4955_v40  ;;  %v4806_v42 = vpop.permute.xlu1 %4805 }
 0x3bc   : > { %4874 = vst.msk [vmem:[#allocation4 + $0xd0] sm:$0xff] %vm4847_vm7, %v4804_v10  ;;  %v7383_v10 = vld [vmem:[%s8322_s29 + $0x14] sm:$0x1] }
 0x3bd   : > { %4875 = vst.msk [vmem:[#allocation4 + $0xd8] sm:$0xff] %vm4847_vm7, %v4806_v42  ;;  %v6324_v42 = vor.u32 %v6323_v11, %v6320_v28  ;;  %v6366_v28 = vshrl.u32 %v7387_v36, 16  ;;  %v6369_v11 = vshll.u32 %v7387_v36, 16 }
 0x3c0   : > { %5155 = vrot.lane.b32.xlu2 %v9963_v22, %s8262_s14  ;;  %5151 = vrot.lane.b32.xlu0 %v10352_v52, %s8262_s14 }
 0x3c1   : > { %5153 = vrot.lane.b32.xlu1 %v9947_v33, %s8262_s14 }
 0x3c2   : > { %v4961_v12 = vpop.permute.xlu2 %4960  ;;  %v4810_v20 = vpop.permute.xlu0 %4809 }
 0x3c3   : > { %5049 = vst.msk [vmem:[#allocation4 + $0x40] sm:$0xff] %vm5040_vm8, %v4961_v12  ;;  %v4812_v21 = vpop.permute.xlu1 %4811 }
 0x3c4   : > { %4877 = vst.msk [vmem:[#allocation4 + $0xe8] sm:$0xff] %vm4847_vm7, %v4810_v20  ;;  %v6337_v20 = vshll.u32 %v7383_v10, 16  ;;  %v6371_v10 = vrot.slane %v6369_v11, 5 }
 0x3c5   : > { %4878 = vst.msk [vmem:[#allocation4 + $0xf0] sm:$0xff] %vm4847_vm7, %v4812_v21  ;;  %v6701_v21 = vld [vmem:[%s11217_s5] sm:$0x3] }
 0x3c8   : > { %5161 = vrot.lane.b32.xlu2 %v10020_v4, %s8262_s14  ;;  %5157 = vrot.lane.b32.xlu0 %v9978_v25, %s8262_s14 }
 0x3c9   : > { %5159 = vrot.lane.b32.xlu1 %v9999_v46, %s8262_s14 }
 0x3ca   : > { %v4967_v22 = vpop.permute.xlu2 %4966  ;;  %v4945_v33 = vpop.permute.xlu0 %4944 }
 0x3cb   : > { %5052 = vst.msk [vmem:[#allocation4 + $0x58] sm:$0xff] %vm5040_vm8, %v4967_v22  ;;  %v4947_v35 = vpop.permute.xlu1 %4946 }
 0x3cc   : > { %5041 = vst.msk [vmem:[#allocation4] sm:$0xff] %vm5040_vm8, %v4945_v33 }
 0x3cd   : > { %5042 = vst.msk [vmem:[#allocation4 + $0x8] sm:$0xff] %vm5040_vm8, %v4947_v35  ;;  %v10462_v35 = vsel %vm4226_vm14, %v6701_v21, 0  ;;  %v5657_v21 = vld [vmem:[#allocation2 + $0x61] sm:$0xff]  ;;  %vm6006_vm14 = vcmask 589312  }
 0x3ce   : > { %6812 = vmatpush.bf16.msra.mxu2 %v10462_v35 }
 0x3d0   : > { %5167 = vrot.lane.b32.xlu2 %v10072_v56, %s8262_s14  ;;  %5163 = vrot.lane.b32.xlu0 %v10039_v37, %s8262_s14 }
 0x3d1   : > { %5165 = vrot.lane.b32.xlu1 %v10055_v1, %s8262_s14 }
 0x3d2   : > { %v4973_v25 = vpop.permute.xlu2 %4972  ;;  %v4951_v46 = vpop.permute.xlu0 %4950 }
 0x3d3   : > { %5055 = vst.msk [vmem:[#allocation4 + $0x70] sm:$0xff] %vm5040_vm8, %v4973_v25  ;;  %v4953_v4 = vpop.permute.xlu1 %4952  ;;  %v6325_v25 = vrot.slane %v6324_v42, 4 }
 0x3d4   : > { %5044 = vst.msk [vmem:[#allocation4 + $0x18] sm:$0xff] %vm5040_vm8, %v4951_v46  ;;  %v6339_v46 = vrot.slane %v6337_v20, 5  ;;  %v7389_v20 = vld [vmem:[%s8322_s29 + $0x2c] sm:$0x1] }
 0x3d5   : > { %5045 = vst.msk [vmem:[#allocation4 + $0x20] sm:$0xff] %vm5040_vm8, %v4953_v4  ;;  %v6330_v4 = vsel %vm8334_vm2, %v6325_v25, %v6329_v16  ;;  %v6385_v25 = vshll.u32 %v7389_v20, 16 }
 0x3d8   : > { %5173 = vrot.lane.b32.xlu2 %v10127_v57, %s8262_s14  ;;  %5169 = vrot.lane.b32.xlu0 %v10087_v63, %s8262_s14 }
 0x3d9   : > { %5171 = vrot.lane.b32.xlu1 %v10108_v49, %s8262_s14 }
 0x3da   : > { %v4979_v37 = vpop.permute.xlu2 %4978  ;;  %v4957_v1 = vpop.permute.xlu0 %4956 }
 0x3db   : > { %5058 = vst.msk [vmem:[#allocation4 + $0x88] sm:$0xff] %vm5040_vm8, %v4979_v37  ;;  %v4959_v56 = vpop.permute.xlu1 %4958 }
 0x3dc   : > { %5047 = vst.msk [vmem:[#allocation4 + $0x30] sm:$0xff] %vm5040_vm8, %v4957_v1  ;;  %v6706_v1 = vunpack.c.l.b16 %v6330_v4 }
 0x3dd   : > { %5048 = vst.msk [vmem:[#allocation4 + $0x38] sm:$0xff] %vm5040_vm8, %v4959_v56 }
 0x3e0   : > { %5179 = vrot.lane.b32.xlu2 %v10167_v60, %s8262_s14  ;;  %5175 = vrot.lane.b32.xlu0 %v10141_v0, %s8262_s14 }
 0x3e1   : > { %5177 = vrot.lane.b32.xlu1 %v10154_v31, %s8262_s14 }
 0x3e2   : > { %v4985_v63 = vpop.permute.xlu2 %4984  ;;  %v4963_v49 = vpop.permute.xlu0 %4962 }
 0x3e3   : > { %5061 = vst.msk [vmem:[#allocation4 + $0xa0] sm:$0xff] %vm5040_vm8, %v4985_v63  ;;  %v4965_v57 = vpop.permute.xlu1 %4964  ;;  %v5462_v63 = vld [vmem:[#allocation2 + $0x48] sm:$0xff] }
 0x3e4   : > { %5050 = vst.msk [vmem:[#allocation4 + $0x48] sm:$0xff] %vm5040_vm8, %v4963_v49  ;;  %v5846_v49 = vld [vmem:[#allocation2 + $0x32] sm:$0xff] }
 0x3e5   : > { %5051 = vst.msk [vmem:[#allocation4 + $0x50] sm:$0xff] %vm5040_vm8, %v4965_v57 }
 0x3e8   : > { %5185 = vrot.lane.b32.xlu2 %v5097_v14, %s8262_s14  ;;  %5181 = vrot.lane.b32.xlu0 %v10180_v17, %s8262_s14 }
 0x3e9   : > { %5183 = vrot.lane.b32.xlu1 %v10193_v26, %s8262_s14 }
 0x3ea   : > { %v4991_v0 = vpop.permute.xlu2 %4990  ;;  %v4969_v31 = vpop.permute.xlu0 %4968 }
 0x3eb   : > { %5064 = vst.msk [vmem:[#allocation4 + $0xb8] sm:$0xff] %vm5040_vm8, %v4991_v0  ;;  %v4971_v60 = vpop.permute.xlu1 %4970 }
 0x3ec   : > { %5053 = vst.msk [vmem:[#allocation4 + $0x60] sm:$0xff] %vm5040_vm8, %v4969_v31 }
 0x3ed   : > { %5054 = vst.msk [vmem:[#allocation4 + $0x68] sm:$0xff] %vm5040_vm8, %v4971_v60  ;;  %v7384_v60 = vld [vmem:[%s8322_s29 + $0x18] sm:$0xf] }
 0x3f0   : > { %5191 = vrot.lane.b32.xlu2 %v10046_v7, %s8262_s14  ;;  %5187 = vrot.lane.b32.xlu0 %v5098_v8, %s8262_s14  ;;  %v7385_v8 = vld [vmem:[%s8322_s29 + $0x1c] sm:$0xf] }
 0x3f1   : > { %5189 = vrot.lane.b32.xlu1 %v10018_v38, %s8262_s14 }
 0x3f2   : > { %v4997_v17 = vpop.permute.xlu2 %4996  ;;  %v4975_v26 = vpop.permute.xlu0 %4974 }
 0x3f3   : > { %5067 = vst.msk [vmem:[#allocation4 + $0xd0] sm:$0xff] %vm5040_vm8, %v4997_v17  ;;  %v4977_v41 = vpop.permute.xlu1 %4976  ;;  %v6342_v17 = vshrl.u32 %v7384_v60, 16 }
 0x3f4   : > { %5056 = vst.msk [vmem:[#allocation4 + $0x78] sm:$0xff] %vm5040_vm8, %v4975_v26  ;;  %v6345_v26 = vshll.u32 %v7384_v60, 16 }
 0x3f5   : > { %5057 = vst.msk [vmem:[#allocation4 + $0x80] sm:$0xff] %vm5040_vm8, %v4977_v41  ;;  %v6351_v41 = vshll.u32 %v7385_v8, 16 }
 0x3f8   : > { %5197 = vrot.lane.b32.xlu2 %v5103_v39, %s8262_s14  ;;  %5193 = vrot.lane.b32.xlu0 %v10014_v29, %s8262_s14  ;;  %v6355_v39 = vshrl.u32 %v7385_v8, 16  ;;  %v7390_v8 = vld [vmem:[%s8322_s29 + $0x30] sm:$0xf] }
 0x3f9   : > { %5195 = vrot.lane.b32.xlu1 %v10037_v27, %s8262_s14 }
 0x3fa   : > { %v5003_v7 = vpop.permute.xlu2 %5002  ;;  %v4981_v38 = vpop.permute.xlu0 %4980 }
 0x3fb   : > { %5070 = vst.msk [vmem:[#allocation4 + $0xe8] sm:$0xff] %vm5040_vm8, %v5003_v7  ;;  %v4983_v23 = vpop.permute.xlu1 %4982  ;;  %v6344_v7 = vrot.slane %v6342_v17, 4  ;;  %v7391_v17 = vld [vmem:[%s8322_s29 + $0x34] sm:$0xf] }
 0x3fc   : > { %5059 = vst.msk [vmem:[#allocation4 + $0x90] sm:$0xff] %vm5040_vm8, %v4981_v38  ;;  %v6347_v38 = vrot.slane %v6345_v26, 5  ;;  %v6390_v26 = vshrl.u32 %v7390_v8, 16 }
 0x3fd   : > { %5060 = vst.msk [vmem:[#allocation4 + $0x98] sm:$0xff] %vm5040_vm8, %v4983_v23  ;;  %v6353_v23 = vrot.slane %v6351_v41, 5  ;;  %v6393_v41 = vshll.u32 %v7390_v8, 16 }
 0x400   : > { %5332 = vrot.lane.b32.xlu2 %v10098_v32, %s8264_s23  ;;  %5199 = vrot.lane.b32.xlu0 %v5104_v43, %s8262_s14  ;;  %v11236_v32 = vld [vmem:[#allocation6_spill] sm:$0xff]  ;;  %v6357_v43 = vrot.slane %v6355_v39, 4  ;;  %v6399_v39 = vshll.u32 %v7391_v17, 16 }
 0x401   : > { %5330 = vrot.lane.b32.xlu1 %v10070_v2, %s8264_s23 }
 0x402   : > { %v5138_v29 = vpop.permute.xlu2 %5137  ;;  %v4987_v27 = vpop.permute.xlu0 %4986 }
 0x403   : > { %5234 = vst.msk [vmem:[#allocation4] sm:$0xff] %vm5233_vm9, %v5138_v29  ;;  %v4989_v61 = vpop.permute.xlu1 %4988  ;;  %v7386_v29 = vld [vmem:[%s8322_s29 + $0x20] sm:$0x1] }
 0x404   : > { %5062 = vst.msk [vmem:[#allocation4 + $0xa8] sm:$0xff] %vm5040_vm8, %v4987_v27  ;;  %v6348_v27 = vor.u32 %v6347_v38, %v6344_v7  ;;  %v6403_v7 = vshrl.u32 %v7391_v17, 16  ;;  %v6392_v38 = vrot.slane %v6390_v26, 4  ;;  %v7396_v26 = vld [vmem:[%s8322_s29 + $0x48] sm:$0xf] }
 0x405   : > { %5063 = vst.msk [vmem:[#allocation4 + $0xb0] sm:$0xff] %vm5040_vm8, %v4989_v61  ;;  %v6358_v61 = vor.u32 %v6357_v43, %v6353_v23  ;;  %v6401_v43 = vrot.slane %v6399_v39, 5  ;;  %v6438_v39 = vshrl.u32 %v7396_v26, 16 }
 0x408   : > { %5338 = vrot.lane.b32.xlu2 %v10115_v50, %s8264_s23  ;;  %5334 = vrot.lane.b32.xlu0 %v11236_v32, %s8264_s23  ;;  %v11238_v50 = vld [vmem:[#allocation8_spill] sm:$0xff]  ;;  %v6361_v32 = vshll.u32 %v7386_v29, 16  ;;  %v6405_v29 = vrot.slane %v6403_v7, 4  ;;  %v6441_v7 = vshll.u32 %v7396_v26, 16 }
 0x409   : > { %5336 = vrot.lane.b32.xlu1 %v11237_v44, %s8264_s23 }
 0x40a   : > { %v5144_v2 = vpop.permute.xlu2 %5143  ;;  %v4993_v19 = vpop.permute.xlu0 %4992 }
 0x40b   : > { %5237 = vst.msk [vmem:[#allocation4 + $0x18] sm:$0xff] %vm5233_vm9, %v5144_v2  ;;  %v4995_v18 = vpop.permute.xlu1 %4994 }
 0x40c   : > { %5065 = vst.msk [vmem:[#allocation4 + $0xc0] sm:$0xff] %vm5040_vm8, %v4993_v19  ;;  %v6349_v19 = vrot.slane %v6348_v27, 4  ;;  %v5659_v27 = vld [vmem:[#allocation2 + $0x79] sm:$0xff] }
 0x40d   : > { %5066 = vst.msk [vmem:[#allocation4 + $0xc8] sm:$0xff] %vm5040_vm8, %v4995_v18  ;;  %v6359_v18 = vrot.slane %v6358_v61, 4  ;;  %v7392_v61 = vld [vmem:[%s8322_s29 + $0x38] sm:$0x1] }
 0x410   : > { %5524 = vrot.lane.b32.xlu2 %v9886_v45, %s8265_s26  ;;  %5340 = vrot.lane.b32.xlu0 %v11238_v50, %s8264_s23  ;;  %v6331_v45 = vshrl.u32 %v7382_v15, 16  ;;  %v6363_v50 = vrot.slane %v6361_v32, 5 }
 0x411   : > { %5342 = vrot.lane.b32.xlu1 %v11239_v51, %s8264_s23 }
 0x412   : > { %v5150_v30 = vpop.permute.xlu2 %5149  ;;  %v4999_v47 = vpop.permute.xlu0 %4998  ;;  %v6333_v40 = vrot.slane %v6331_v45, 4  ;;  %v7388_v45 = vld [vmem:[%s8322_s29 + $0x28] sm:$0xf] }
 0x413   : > { %5240 = vst.msk [vmem:[#allocation4 + $0x30] sm:$0xff] %vm5233_vm9, %v5150_v30  ;;  %v5001_v54 = vpop.permute.xlu1 %5000 }
 0x414   : > { %5068 = vst.msk [vmem:[#allocation4 + $0xd8] sm:$0xff] %vm5040_vm8, %v4999_v47  ;;  %v6334_v12 = vor.u32 %v6333_v40, %v6329_v16  ;;  %v5848_v47 = vld [vmem:[#allocation2 + $0x4a] sm:$0xff]  ;;  %v6379_v16 = vshrl.u32 %v7388_v45, 16  ;;  %v6368_v40 = vrot.slane %v6366_v28, 4  ;;  %v7394_v28 = vld [vmem:[%s8322_s29 + $0x40] sm:$0xf] }
 0x415   : > { %5069 = vst.msk [vmem:[#allocation4 + $0xe0] sm:$0xff] %vm5040_vm8, %v5001_v54 }
 0x418   : > { %5719 = vrot.lane.b32.xlu2 %v10327_v3, %s8266_s27  ;;  %5526 = vrot.lane.b32.xlu0 %v9896_v59, %s8265_s26  ;;  %v6335_v3 = vrot.slane %v6334_v12, 4  ;;  %v6381_v12 = vrot.slane %v6379_v16, 4  ;;  %v6423_v16 = vshll.u32 %v7394_v28, 16 }
 0x419   : > { %5717 = vrot.lane.b32.xlu1 %v10332_v13, %s8266_s27 }
 0x41a   : > { %v5156_v22 = vpop.permute.xlu2 %5155  ;;  %v5005_v33 = vpop.permute.xlu0 %5004  ;;  %v6340_v37 = vsel %vm8334_vm2, %v6335_v3, %v6339_v46 }
 0x41b   : > { %5243 = vst.msk [vmem:[#allocation4 + $0x48] sm:$0xff] %vm5233_vm9, %v5156_v22  ;;  %v5007_v59 = vpop.permute.xlu1 %5006  ;;  %v6707_v56 = vunpack.c.l.b16 %v6340_v37  ;;  %v6372_v22 = vor.u32 %v6371_v10, %v6368_v40  ;;  %v6387_v37 = vrot.slane %v6385_v25, 5  ;;  %v6427_v40 = vshrl.u32 %v7394_v28, 16  ;;  %v7453_v28 = vld [vmem:[%s11215_s3 + $0x18] sm:$0xff] }
 0x41c   : > { %5071 = vst.msk [vmem:[#allocation4 + $0xf0] sm:$0xff] %vm5040_vm8, %v5005_v33 }
 0x41d   : > { %5072 = vst.msk [vmem:[#allocation4 + $0xf8] sm:$0xff] %vm5040_vm8, %v5007_v59  ;;  %v6738_v57 = vpack.c.b16 %v6707_v56, %v6706_v1  ;;  %v6373_v59 = vrot.slane %v6372_v22, 4  ;;  %v6429_v20 = vrot.slane %v6427_v40, 4  ;;  %v7395_v22 = vld [vmem:[%s8322_s29 + $0x44] sm:$0x1]  ;;  %v5484_v40 = vld [vmem:[#allocation2 + $0x150] sm:$0xff] }
 0x41f   : > { %7429 = vmatmul.msk.bf16.vlgmr.msra.gmra.mxu2 %vm344_vm6, %v6738_v57  ;;  %v5850_v57 = vld [vmem:[#allocation2 + $0x62] sm:$0xff] }
 0x420   : > { %5528 = vrot.lane.b32.xlu2 %v5462_v63, %s8265_s26  ;;  %5910 = vrot.lane.b32.xlu0 %v5846_v49, %s8267_s8  ;;  %v5273_v49 = vld [vmem:[#allocation2 + $0x6a] sm:$0xff] }
 0x421   : > { %5912 = vrot.lane.b32.xlu1 %v11237_v44, %s8267_s8 }
 0x422   : > { %v5162_v14 = vpop.permute.xlu2 %5161  ;;  %v5140_v0 = vpop.permute.xlu0 %5139 }
 0x423   : > { %5246 = vst.msk [vmem:[#allocation4 + $0x60] sm:$0xff] %vm5233_vm9, %v5162_v14  ;;  %v5142_v31 = vpop.permute.xlu1 %5141 }
 0x424   : > { %5235 = vst.msk [vmem:[#allocation4 + $0x8] sm:$0xff] %vm5233_vm9, %v5140_v0 }
 0x425   : > { %5236 = vst.msk [vmem:[#allocation4 + $0x10] sm:$0xff] %vm5233_vm9, %v5142_v31 }
 0x428   : > { %5723 = vrot.lane.b32.xlu2 %v10345_v34, %s8266_s27  ;;  %5530 = vrot.lane.b32.xlu0 %v9911_v6, %s8265_s26  ;;  %v6354_v34 = vsel %vm8334_vm2, %v6349_v19, %v6353_v23  ;;  %v6364_v6 = vsel %vm8334_vm2, %v6359_v18, %v6363_v50  ;;  %v6395_v23 = vrot.slane %v6393_v41, 5  ;;  %v7397_v41 = vld [vmem:[%s8322_s29 + $0x4c] sm:$0xf] }
 0x429   : > { %5721 = vrot.lane.b32.xlu1 %v10339_v58, %s8266_s27  ;;  %v6708_v58 = vunpack.c.l.b16 %v6354_v34  ;;  %v6709_v30 = vunpack.c.l.b16 %v6364_v6 }
 0x42a   : > { %v5168_v44 = vpop.permute.xlu2 %5167  ;;  %v5146_v2 = vpop.permute.xlu0 %5145  ;;  %v6396_v32 = vor.u32 %v6395_v23, %v6392_v38  ;;  %v6447_v38 = vshll.u32 %v7397_v41, 16  ;;  %v6451_v23 = vshrl.u32 %v7397_v41, 16 }
 0x42b   : > { %5249 = vst.msk [vmem:[#allocation4 + $0x78] sm:$0xff] %vm5233_vm9, %v5168_v44  ;;  %v5148_v51 = vpop.permute.xlu1 %5147  ;;  %v6739_v54 = vpack.c.b16 %v6709_v30, %v6708_v58  ;;  %v6406_v44 = vor.u32 %v6405_v29, %v6401_v43  ;;  %v6443_v29 = vrot.slane %v6441_v7, 5 }
 0x42c   : > { %5238 = vst.msk [vmem:[#allocation4 + $0x20] sm:$0xff] %vm5233_vm9, %v5146_v2  ;;  %v6409_v2 = vshll.u32 %v7392_v61, 16  ;;  %v6397_v50 = vrot.slane %v6396_v32, 4  ;;  %v6453_v61 = vrot.slane %v6451_v23, 4  ;;  %v5290_v32 = vld [vmem:[#allocation2 + $0x13a] sm:$0xff] }
 0x42d   : > { %5239 = vst.msk [vmem:[#allocation4 + $0x28] sm:$0xff] %vm5233_vm9, %v5148_v51  ;;  %v6407_v51 = vrot.slane %v6406_v44, 4  ;;  %v10570_v44 = vld [vmem:[#allocation2 + $0x92] sm:$0xff] }
 0x42e   : > { %v6411_v34 = vrot.slane %v6409_v2, 5  ;;  %v6402_v58 = vsel %vm8334_vm2, %v6397_v50, %v6401_v43  ;;  %v6440_v43 = vrot.slane %v6438_v39, 4  ;;  %v7398_v2 = vld [vmem:[%s8322_s29 + $0x50] sm:$0x1] }
 0x42f   : > { %7430 = vmatmul.msk.bf16.gmra.mxu2 %vm344_vm6, %v6739_v54  ;;  %v5660_v54 = vld [vmem:[#allocation2 + $0x81] sm:$0xff] }
 0x430   : > { %5532 = vrot.lane.b32.xlu2 %v9920_v55, %s8265_s26  ;;  %5914 = vrot.lane.b32.xlu0 %v5848_v47, %s8267_s8  ;;  %v6375_v55 = vshll.u32 %v7388_v45, 16  ;;  %v5853_v47 = vld [vmem:[#allocation2 + $0x82] sm:$0xff]  ;;  %v7393_v45 = vld [vmem:[%s8322_s29 + $0x3c] sm:$0xf]  ;;  %v6444_v50 = vor.u32 %v6443_v29, %v6440_v43 }
 0x431   : > { %5916 = vrot.lane.b32.xlu1 %v5849_v62, %s8267_s8  ;;  %v6414_v11 = vshrl.u32 %v7393_v45, 16  ;;  %v10626_v29 = vld [vmem:[#allocation2 + $0x15a] sm:$0xff] }
 0x432   : > { %v5174_v15 = vpop.permute.xlu2 %5173  ;;  %v5152_v48 = vpop.permute.xlu0 %5151  ;;  %v6377_v42 = vrot.slane %v6375_v55, 5  ;;  %v6417_v55 = vshll.u32 %v7393_v45, 16 }
 0x433   : > { %5252 = vst.msk [vmem:[#allocation4 + $0x90] sm:$0xff] %vm5233_vm9, %v5174_v15  ;;  %v5154_v9 = vpop.permute.xlu1 %5153  ;;  %v5852_v15 = vld [vmem:[#allocation2 + $0x7a] sm:$0xff]  ;;  %v6416_v10 = vrot.slane %v6414_v11, 4 }
 0x434   : > { %5241 = vst.msk [vmem:[#allocation4 + $0x38] sm:$0xff] %vm5233_vm9, %v5152_v48  ;;  %v6382_v33 = vor.u32 %v6381_v12, %v6377_v42  ;;  %v6425_v12 = vrot.slane %v6423_v16, 5  ;;  %v5485_v11 = vld [vmem:[#allocation2 + $0x158] sm:$0xff] }
 0x435   : > { %5242 = vst.msk [vmem:[#allocation4 + $0x40] sm:$0xff] %vm5233_vm9, %v5154_v9 }
 0x436   : > { %v6383_v4 = vrot.slane %v6382_v33, 4  ;;  %v6430_v25 = vor.u32 %v6429_v20, %v6425_v12 }
 0x438   : > { %5727 = vrot.lane.b32.xlu2 %v10352_v52, %s8266_s27  ;;  %5534 = vrot.lane.b32.xlu0 %v9932_v5, %s8265_s26  ;;  %v6378_v52 = vsel %vm8334_vm2, %v6373_v59, %v6377_v42  ;;  %v6388_v5 = vsel %vm8334_vm2, %v6383_v4, %v6387_v37  ;;  %v6419_v42 = vrot.slane %v6417_v55, 5  ;;  %v6431_v37 = vrot.slane %v6430_v25, 4  ;;  %v5291_v55 = vld [vmem:[#allocation2 + $0x142] sm:$0xff] }
 0x439   : > { %5725 = vrot.lane.b32.xlu1 %v5657_v21, %s8266_s27  ;;  %v6710_v56 = vunpack.c.l.b16 %v6378_v52  ;;  %v6711_v63 = vunpack.c.l.b16 %v6388_v5  ;;  %v5468_v21 = vld [vmem:[#allocation2 + $0x90] sm:$0xff] }
 0x43a   : > { %v5180_v3 = vpop.permute.xlu2 %5179  ;;  %v5158_v46 = vpop.permute.xlu0 %5157  ;;  %v6420_v33 = vor.u32 %v6419_v42, %v6416_v10 }
 0x43b   : > { %5255 = vst.msk [vmem:[#allocation4 + $0xa8] sm:$0xff] %vm5233_vm9, %v5180_v3  ;;  %v5160_v1 = vpop.permute.xlu1 %5159  ;;  %v6740_v14 = vpack.c.b16 %v6711_v63, %v6710_v56  ;;  %v6433_v3 = vshll.u32 %v7395_v22, 16  ;;  %v7400_v22 = vld [vmem:[%s8322_s29 + $0x58] sm:$0xf] }
 0x43c   : > { %5244 = vst.msk [vmem:[#allocation4 + $0x50] sm:$0xff] %vm5233_vm9, %v5158_v46  ;;  %v6421_v4 = vrot.slane %v6420_v33, 4 }
 0x43d   : > { %5245 = vst.msk [vmem:[#allocation4 + $0x58] sm:$0xff] %vm5233_vm9, %v5160_v1  ;;  %v6435_v1 = vrot.slane %v6433_v3, 5  ;;  %v6471_v3 = vshll.u32 %v7400_v22, 16 }
 0x43e   : > { %v6426_v5 = vsel %vm8334_vm2, %v6421_v4, %v6425_v12  ;;  %v7452_v12 = vld [vmem:[%s11215_s3 + $0x10] sm:$0xff] }
 0x43f   : > { %7431 = vmatmul.msk.bf16.gmra.mxu2 %vm344_vm6, %v6740_v14  ;;  %v6436_v56 = vsel %vm8334_vm2, %v6431_v37, %v6435_v1  ;;  %v6714_v63 = vunpack.c.l.b16 %v6426_v5  ;;  %v5469_v14 = vld [vmem:[#allocation2 + $0x98] sm:$0xff]  ;;  %v6473_v1 = vrot.slane %v6471_v3, 5 }
 0x440   : > { %5344 = vrot.lane.b32.xlu2 %v5273_v49, %s8264_s23  ;;  %5918 = vrot.lane.b32.xlu0 %v5850_v57, %s8267_s8  ;;  %v5662_v57 = vld [vmem:[#allocation2 + $0x99] sm:$0xff] }
 0x441   : > { %5920 = vrot.lane.b32.xlu1 %v5273_v49, %s8267_s8  ;;  %v6715_v49 = vunpack.c.l.b16 %v6436_v56  ;;  %v10609_v5 = vld [vmem:[#allocation2 + $0x152] sm:$0xff] }
 0x442   : > { %v5186_v0 = vpop.permute.xlu2 %5185  ;;  %v5164_v31 = vpop.permute.xlu0 %5163  ;;  %v5677_v56 = vld [vmem:[#allocation2 + $0x151] sm:$0xff] }
 0x443   : > { %5258 = vst.msk [vmem:[#allocation4 + $0xc0] sm:$0xff] %vm5233_vm9, %v5186_v0  ;;  %v5166_v60 = vpop.permute.xlu1 %5165  ;;  %v6742_v0 = vpack.c.b16 %v6715_v49, %v6714_v63  ;;  %v7401_v63 = vld [vmem:[%s8322_s29 + $0x5c] sm:$0x1] }
 0x444   : > { %5247 = vst.msk [vmem:[#allocation4 + $0x68] sm:$0xff] %vm5233_vm9, %v5164_v31  ;;  %v5661_v31 = vld [vmem:[#allocation2 + $0x91] sm:$0xff]  ;;  %v5678_v49 = vld [vmem:[#allocation2 + $0x159] sm:$0xff] }
 0x445   : > { %5248 = vst.msk [vmem:[#allocation4 + $0x70] sm:$0xff] %vm5233_vm9, %v5166_v60 }
 0x448   : > { %5729 = vrot.lane.b32.xlu2 %v5659_v27, %s8266_s27  ;;  %5536 = vrot.lane.b32.xlu0 %v9949_v53, %s8265_s26  ;;  %v6412_v53 = vsel %vm8334_vm2, %v6407_v51, %v6411_v34  ;;  %v6449_v27 = vrot.slane %v6447_v38, 5  ;;  %v6457_v34 = vshll.u32 %v7398_v2, 16 }
 0x449   : > { %5538 = vrot.lane.b32.xlu1 %v9970_v24, %s8265_s26  ;;  %v6712_v24 = vunpack.c.l.b16 %v6402_v58  ;;  %v6713_v30 = vunpack.c.l.b16 %v6412_v53 }
 0x44a   : > { %v5192_v19 = vpop.permute.xlu2 %5191  ;;  %v5170_v18 = vpop.permute.xlu0 %5169  ;;  %v6454_v51 = vor.u32 %v6453_v61, %v6449_v27 }
 0x44b   : > { %5261 = vst.msk [vmem:[#allocation4 + $0xd8] sm:$0xff] %vm5233_vm9, %v5192_v19  ;;  %v5172_v6 = vpop.permute.xlu1 %5171  ;;  %v6741_v62 = vpack.c.b16 %v6713_v30, %v6712_v24  ;;  %v10576_v19 = vld [vmem:[#allocation2 + $0x9a] sm:$0xff]  ;;  %v6445_v24 = vrot.slane %v6444_v50, 4 }
 0x44c   : > { %5250 = vst.msk [vmem:[#allocation4 + $0x80] sm:$0xff] %vm5233_vm9, %v5170_v18  ;;  %v6095_v18 = vld [vmem:[%s11215_s3 + $0x20] sm:$0xf]  ;;  %v6455_v30 = vrot.slane %v6454_v51, 4 }
 0x44d   : > { %5251 = vst.msk [vmem:[#allocation4 + $0x88] sm:$0xff] %vm5233_vm9, %v5172_v6  ;;  %v6117_v6 = vunpack.c.l.b16 %v6095_v18  ;;  %v7402_v18 = vld [vmem:[%s8322_s29 + $0x60] sm:$0xf] }
 0x44e   : > { %v6489_v50 = vshll.u32 %v7402_v18, 16 }
 0x44f   : > { %7432 = vmatmul.msk.bf16.gmra.mxu2 %vm344_vm6, %v6741_v62  ;;  %v6122_v62 = vpack.c.b16 %v6117_v6, %v6117_v6 }
 0x450   : > { %5924 = vrot.lane.b32.xlu2 %v5853_v47, %s8267_s8  ;;  %5731 = vrot.lane.b32.xlu0 %v5660_v54, %s8266_s27 }
 0x451   : > { %5922 = vrot.lane.b32.xlu1 %v5852_v15, %s8267_s8 }
 0x452   : > { %v5198_v48 = vpop.permute.xlu2 %5197  ;;  %v5176_v9 = vpop.permute.xlu0 %5175 }
 0x453   : > { %5264 = vst.msk [vmem:[#allocation4 + $0xf0] sm:$0xff] %vm5233_vm9, %v5198_v48  ;;  %v5178_v36 = vpop.permute.xlu1 %5177 }
 0x454   : > { %5253 = vst.msk [vmem:[#allocation4 + $0x98] sm:$0xff] %vm5233_vm9, %v5176_v9  ;;  %v6178_v9 = vsel %vm6176_vm11, %v6122_v62, 0 }
 0x455   : > { %5254 = vst.msk [vmem:[#allocation4 + $0xa0] sm:$0xff] %vm5233_vm9, %v5178_v36  ;;  %6183 = vmatpush.bf16.msra.mxu1 %v6178_v9  ;;  %7576 = vmatpush.bf16.msrb.mxu3 %v6178_v9 }
 0x458   : > { %5540 = vrot.lane.b32.xlu2 %v5468_v21, %s8265_s26  ;;  %5346 = vrot.lane.b32.xlu0 %v5852_v15, %s8264_s23  ;;  %v6450_v15 = vsel %vm8334_vm2, %v6445_v24, %v6449_v27  ;;  %v7399_v21 = vld [vmem:[%s8322_s29 + $0x54] sm:$0xf]  ;;  %v5663_v24 = vld [vmem:[#allocation2 + $0xa9] sm:$0xff] }
 0x459   : > { %5348 = vrot.lane.b32.xlu1 %v5853_v47, %s8264_s23  ;;  %v6459_v47 = vrot.slane %v6457_v34, 5  ;;  %v6716_v36 = vunpack.c.l.b16 %v6450_v15  ;;  %6184 = vmatpush.bf16.msra.mxu1 %v7453_v28  ;;  %v6462_v33 = vshrl.u32 %v7399_v21, 16  ;;  %v6465_v25 = vshll.u32 %v7399_v21, 16  ;;  %v5664_v21 = vld [vmem:[#allocation2 + $0xb1] sm:$0xff] }
 0x45a   : > { %v5333_v46 = vpop.permute.xlu2 %5332  ;;  %v5182_v59 = vpop.permute.xlu0 %5181  ;;  %7577 = vmatpush.bf16.msrb.mxu3 %v7453_v28 }
 0x45b   : > { %5428 = vst.msk [vmem:[#allocation4 + $0x8] sm:$0xff] %vm5426_vm10, %v5333_v46  ;;  %v5184_v52 = vpop.permute.xlu1 %5183  ;;  %v6460_v48 = vsel %vm8334_vm2, %v6455_v30, %v6459_v47  ;;  %v6475_v46 = vshrl.u32 %v7400_v22, 16  ;;  %v6464_v4 = vrot.slane %v6462_v33, 4  ;;  %v6467_v37 = vrot.slane %v6465_v25, 5  ;;  %v5470_v30 = vld [vmem:[#allocation2 + $0xa8] sm:$0xff] }
 0x45c   : > { %5256 = vst.msk [vmem:[#allocation4 + $0xb0] sm:$0xff] %vm5233_vm9, %v5182_v59  ;;  %v6717_v45 = vunpack.c.l.b16 %v6460_v48  ;;  %v7451_v59 = vld [vmem:[%s11215_s3 + $0x8] sm:$0xff] }
 0x45d   : > { %5257 = vst.msk [vmem:[#allocation4 + $0xb8] sm:$0xff] %vm5233_vm9, %v5184_v52  ;;  %6185 = vmatpush.bf16.msra.mxu1 %v7452_v12  ;;  %v6477_v52 = vrot.slane %v6475_v46, 4  ;;  %v7404_v47 = vld [vmem:[%s8322_s29 + $0x68] sm:$0x1]  ;;  %v10660_v33 = vld [vmem:[#allocation2 + $0xaa] sm:$0xff] }
 0x45e   : > { %v6743_v16 = vpack.c.b16 %v6717_v45, %v6716_v36  ;;  %7578 = vmatpush.bf16.msrb.mxu3 %v7452_v12  ;;  %v6505_v48 = vshll.u32 %v7404_v47, 16  ;;  %v7405_v46 = vld [vmem:[%s8322_s29 + $0x6c] sm:$0xf] }
 0x45f   : > { %7433 = vmatmul.msk.bf16.gmra.mxu2 %vm344_vm6, %v6742_v0  ;;  %v6481_v0 = vshll.u32 %v7401_v63, 16 }
 0x460   : > { %5735 = vrot.lane.b32.xlu2 %v5662_v57, %s8266_s27  ;;  %5542 = vrot.lane.b32.xlu0 %v5469_v14, %s8265_s26  ;;  %v6468_v57 = vor.u32 %v6467_v37, %v6464_v4  ;;  %v6478_v14 = vor.u32 %v6477_v52, %v6473_v1  ;;  %v6510_v4 = vshrl.u32 %v7405_v46, 16  ;;  %v6513_v37 = vshll.u32 %v7405_v46, 16 }
 0x461   : > { %5733 = vrot.lane.b32.xlu1 %v5661_v31, %s8266_s27  ;;  %6186 = vmatpush.bf16.msra.mxu1 %v7451_v59  ;;  %v6483_v41 = vrot.slane %v6481_v0, 5  ;;  %v7407_v0 = vld [vmem:[%s8322_s29 + $0x74] sm:$0x1] }
 0x462   : > { %v5339_v60 = vpop.permute.xlu2 %5338  ;;  %v5188_v8 = vpop.permute.xlu0 %5187  ;;  %v6479_v26 = vrot.slane %v6478_v14, 4  ;;  %7579 = vmatpush.bf16.msrb.mxu3 %v7451_v59  ;;  %v7406_v59 = vld [vmem:[%s8322_s29 + $0x70] sm:$0xf]  ;;  %v6515_v63 = vrot.slane %v6513_v37, 5  ;;  %v5486_v14 = vld [vmem:[#allocation2 + $0x168] sm:$0xff] }
 0x463   : > { %5431 = vst.msk [vmem:[#allocation4 + $0x20] sm:$0xff] %vm5426_vm10, %v5339_v60  ;;  %v5190_v17 = vpop.permute.xlu1 %5189  ;;  %v6523_v52 = vshrl.u32 %v7406_v59, 16 }
 0x464   : > { %5259 = vst.msk [vmem:[#allocation4 + $0xc8] sm:$0xff] %vm5233_vm9, %v5188_v8  ;;  %v7450_v8 = vld [vmem:[%s11215_s3] sm:$0xff]  ;;  %v6484_v38 = vsel %vm8334_vm2, %v6479_v26, %v6483_v41 }
 0x465   : > { %5260 = vst.msk [vmem:[#allocation4 + $0xd0] sm:$0xff] %vm5233_vm9, %v5190_v17  ;;  %v6469_v17 = vrot.slane %v6468_v57, 4  ;;  %v6719_v43 = vunpack.c.l.b16 %v6484_v38  ;;  %6187 = vmatpush.bf16.msra.mxu1 %v7450_v8  ;;  %v6525_v57 = vrot.slane %v6523_v52, 4  ;;  %v5473_v52 = vld [vmem:[#allocation2 + $0xc8] sm:$0xff] }
 0x466   : > { %7580 = vmatpush.bf16.msrb.mxu3 %v7450_v8  ;;  %v6529_v8 = vshll.u32 %v7407_v0, 16  ;;  %v7412_v0 = vld [vmem:[%s8322_s29 + $0x88] sm:$0xf] }
 0x467   : > { %v6474_v7 = vsel %vm8334_vm2, %v6469_v17, %v6473_v1  ;;  %v6519_v1 = vshll.u32 %v7406_v59, 16 }
 0x468   : > { %5378 = vrot.lane.b32.xlu2 %v5290_v32, %s8264_s23  ;;  %5926 = vrot.lane.b32.xlu0 %v10570_v44, %s8267_s8  ;;  %v6718_v23 = vunpack.c.l.b16 %v6474_v7  ;;  %v6531_v38 = vrot.slane %v6529_v8, 5  ;;  %v6567_v8 = vshll.u32 %v7412_v0, 16 }
 0x469   : > { %5928 = vrot.lane.b32.xlu1 %v10576_v19, %s8267_s8 }
 0x46a   : > { %v5525_v58 = vpop.permute.xlu2 %5524  ;;  %v5194_v53 = vpop.permute.xlu0 %5193  ;;  %v6744_v27 = vpack.c.b16 %v6719_v43, %v6718_v23  ;;  %7581 = vmatpush.bf16.msra.mxu3 %v10462_v35  ;;  %v7403_v35 = vld [vmem:[%s8322_s29 + $0x64] sm:$0xf] }
 0x46b   : > { %5262 = vst.msk [vmem:[#allocation4 + $0xe0] sm:$0xff] %vm5233_vm9, %v5194_v53  ;;  %v5196_v54 = vpop.permute.xlu1 %5195  ;;  %v6495_v51 = vshll.u32 %v7403_v35, 16  ;;  %v6499_v34 = vshrl.u32 %v7403_v35, 16  ;;  %v5487_v35 = vld [vmem:[#allocation2 + $0x170] sm:$0xff] }
 0x46c   : > { %5263 = vst.msk [vmem:[#allocation4 + $0xe8] sm:$0xff] %vm5233_vm9, %v5196_v54  ;;  %v5471_v54 = vld [vmem:[#allocation2 + $0xb0] sm:$0xff] }
 0x46d   : > { %v6501_v53 = vrot.slane %v6499_v34, 4 }
 0x46f   : > { %7434 = vmatmul.msk.bf16.gmra.mxu2 %vm344_vm6, %v6743_v16 }
 0x470   : > { %5574 = vrot.lane.b32.xlu2 %v5485_v11, %s8265_s26  ;;  %5380 = vrot.lane.b32.xlu0 %v5291_v55, %s8264_s23  ;;  %v6507_v11 = vrot.slane %v6505_v48, 5 }
 0x471   : > { %5572 = vrot.lane.b32.xlu1 %v5484_v40, %s8265_s26 }
 0x472   : > { %v10596_v10 = vpop.permute.xlu2 %5719  ;;  %v5200_v42 = vpop.permute.xlu0 %5199 }
 0x473   : > { %5265 = vst.msk [vmem:[#allocation4 + $0xf8] sm:$0xff] %vm5233_vm9, %v5200_v42  ;;  %v5331_v20 = vpop.permute.xlu1 %5330 }
 0x474   : > { %5427 = vst.msk [vmem:[#allocation4] sm:$0xff] %vm5426_vm10, %v5331_v20  ;;  %v10655_v20 = vld [vmem:[#allocation2 + $0xb2] sm:$0xff] }
 0x475   : > { %5621 = vst.msk [vmem:[#allocation4] sm:$0xff] %vm5620_vm12, %v5525_v58  ;;  %v6491_v58 = vrot.slane %v6489_v50, 5  ;;  %v5679_v50 = vld [vmem:[#allocation2 + $0x169] sm:$0xff] }
 0x478   : > { %5958 = vrot.lane.b32.xlu2 %v10609_v5, %s8267_s8  ;;  %5765 = vrot.lane.b32.xlu0 %v5677_v56, %s8266_s27  ;;  %v6512_v56 = vrot.slane %v6510_v4, 4 }
 0x479   : > { %5767 = vrot.lane.b32.xlu1 %v5678_v49, %s8266_s27  ;;  %v6521_v49 = vrot.slane %v6519_v1, 5 }
 0x47a   : > { %v5529_v31 = vpop.permute.xlu2 %5528  ;;  %v5335_v60 = vpop.permute.xlu0 %5334 }
 0x47b   : > { %5429 = vst.msk [vmem:[#allocation4 + $0x10] sm:$0xff] %vm5426_vm10, %v5335_v60  ;;  %v5337_v39 = vpop.permute.xlu1 %5336  ;;  %v6526_v60 = vor.u32 %v6525_v57, %v6521_v49 }
 0x47c   : > { %5430 = vst.msk [vmem:[#allocation4 + $0x18] sm:$0xff] %vm5426_vm10, %v5337_v39 }
 0x47d   : > { %5623 = vst.msk [vmem:[#allocation4 + $0x10] sm:$0xff] %vm5620_vm12, %v5529_v31  ;;  %v6516_v31 = vor.u32 %v6515_v63, %v6512_v56  ;;  %v6527_v7 = vrot.slane %v6526_v60, 4 }
 0x47f   : > { %7435 = vmatmul.msk.bf16.gmra.mxu2 %vm344_vm6, %v6744_v27  ;;  %v6517_v39 = vrot.slane %v6516_v31, 4 }
 0x480   : > { %5352 = vrot.lane.b32.xlu2 %v10576_v19, %s8264_s23  ;;  %5960 = vrot.lane.b32.xlu0 %v10626_v29, %s8267_s8  ;;  %v6486_v19 = vshrl.u32 %v7402_v18, 16  ;;  %v5680_v18 = vld [vmem:[#allocation2 + $0x171] sm:$0xff] }
 0x481   : > { %5350 = vrot.lane.b32.xlu1 %v10570_v44, %s8264_s23  ;;  %v6497_v44 = vrot.slane %v6495_v51, 5  ;;  %v6522_v27 = vsel %vm8334_vm2, %v6517_v39, %v6521_v49  ;;  %v6569_v39 = vrot.slane %v6567_v8, 5 }
 0x482   : > { %v10636_v61 = vpop.permute.xlu2 %5723  ;;  %v5341_v32 = vpop.permute.xlu0 %5340  ;;  %v6488_v6 = vrot.slane %v6486_v19, 4 }
 0x483   : > { %5432 = vst.msk [vmem:[#allocation4 + $0x28] sm:$0xff] %vm5426_vm10, %v5341_v32  ;;  %v5343_v2 = vpop.permute.xlu1 %5342  ;;  %v6502_v15 = vor.u32 %v6501_v53, %v6497_v44  ;;  %v6722_v32 = vunpack.c.l.b16 %v6522_v27 }
 0x484   : > { %5433 = vst.msk [vmem:[#allocation4 + $0x30] sm:$0xff] %vm5426_vm10, %v5343_v2  ;;  %v6492_v62 = vor.u32 %v6491_v58, %v6488_v6  ;;  %v7408_v6 = vld [vmem:[%s8322_s29 + $0x78] sm:$0xf]  ;;  %v7409_v58 = vld [vmem:[%s8322_s29 + $0x7c] sm:$0xf] }
 0x485   : > { %v6503_v28 = vrot.slane %v6502_v15, 4  ;;  %v6534_v53 = vshrl.u32 %v7408_v6, 16  ;;  %v6547_v47 = vshrl.u32 %v7409_v58, 16 }
 0x486   : > { %v6493_v45 = vrot.slane %v6492_v62, 4 }
 0x487   : > { %v6508_v40 = vsel %vm8334_vm2, %v6503_v28, %v6507_v11  ;;  %v6549_v48 = vrot.slane %v6547_v47, 4 }
 0x488   : > { %5737 = vrot.lane.b32.xlu2 %v5663_v24, %s8266_s27  ;;  %5544 = vrot.lane.b32.xlu0 %v5470_v30, %s8265_s26  ;;  %v6498_v16 = vsel %vm8334_vm2, %v6493_v45, %v6497_v44  ;;  %v6721_v12 = vunpack.c.l.b16 %v6508_v40  ;;  %v6537_v24 = vshll.u32 %v7408_v6, 16  ;;  %v6543_v30 = vshll.u32 %v7409_v58, 16  ;;  %v10706_v45 = vld [vmem:[#allocation2 + $0x172] sm:$0xff] }
 0x489   : > { %5546 = vrot.lane.b32.xlu1 %v5471_v54, %s8265_s26  ;;  %v6720_v42 = vunpack.c.l.b16 %v6498_v16  ;;  %v6536_v54 = vrot.slane %v6534_v53, 4 }
 0x48a   : > { %v5533_v9 = vpop.permute.xlu2 %5532  ;;  %v5527_v36 = vpop.permute.xlu0 %5526  ;;  %v6539_v62 = vrot.slane %v6537_v24, 5  ;;  %v6545_v15 = vrot.slane %v6543_v30, 5 }
 0x48b   : > { %5625 = vst.msk [vmem:[#allocation4 + $0x20] sm:$0xff] %vm5620_vm12, %v5533_v9  ;;  %v5718_v55 = vpop.permute.xlu1 %5717  ;;  %v6745_v22 = vpack.c.b16 %v6721_v12, %v6720_v42  ;;  %v10699_v9 = vld [vmem:[#allocation2 + $0x16a] sm:$0xff] }
 0x48c   : > { %5622 = vst.msk [vmem:[#allocation4 + $0x8] sm:$0xff] %vm5620_vm12, %v5527_v36  ;;  %v7410_v36 = vld [vmem:[%s8322_s29 + $0x80] sm:$0x1]  ;;  %v6540_v28 = vor.u32 %v6539_v62, %v6536_v54  ;;  %v6550_v11 = vor.u32 %v6549_v48, %v6545_v15  ;;  %v10756_v62 = vld [vmem:[#allocation2 + $0xca] sm:$0xff] }
 0x48d   : > { %5814 = vst.msk [vmem:[#allocation4] sm:$0xff] %vm5813_vm13, %v5718_v55  ;;  %v6553_v55 = vshll.u32 %v7410_v36, 16 }
 0x48e   : > { %5815 = vst.msk [vmem:[#allocation4 + $0x8] sm:$0xff] %vm5813_vm13, %v10596_v10  ;;  %v6541_v12 = vrot.slane %v6540_v28, 4  ;;  %v7414_v28 = vld [vmem:[%s8322_s29 + $0x90] sm:$0xf] }
 0x48f   : > { %7436 = vmatmul.msk.bf16.gmra.mxu2 %vm344_vm6, %v6745_v22  ;;  %v6555_v22 = vrot.slane %v6553_v55, 5 }
 0x490   : > { %5932 = vrot.lane.b32.xlu2 %v10655_v20, %s8267_s8  ;;  %5739 = vrot.lane.b32.xlu0 %v5664_v21, %s8266_s27  ;;  %v6551_v21 = vrot.slane %v6550_v11, 4  ;;  %v6546_v59 = vsel %vm8334_vm2, %v6541_v12, %v6545_v15  ;;  %v7415_v11 = vld [vmem:[%s8322_s29 + $0x94] sm:$0xf] }
 0x491   : > { %5930 = vrot.lane.b32.xlu1 %v10660_v33, %s8267_s8  ;;  %v6724_v37 = vunpack.c.l.b16 %v6546_v59  ;;  %v6595_v12 = vshrl.u32 %v7415_v11, 16  ;;  %v7416_v59 = vld [vmem:[%s8322_s29 + $0x98] sm:$0x1] }
 0x492   : > { %v10665_v25 = vpop.permute.xlu2 %5727  ;;  %v5911_v10 = vpop.permute.xlu0 %5910  ;;  %v6556_v4 = vsel %vm8334_vm2, %v6551_v21, %v6555_v22 }
 0x493   : > { %6007 = vst.msk [vmem:[#allocation4] sm:$0xff] %vm6006_vm14, %v5911_v10  ;;  %v5913_v3 = vpop.permute.xlu1 %5912  ;;  %v6725_v1 = vunpack.c.l.b16 %v6556_v4  ;;  %v5489_v4 = vld [vmem:[#allocation2 + $0x188] sm:$0xff] }
 0x494   : > { %6008 = vst.msk [vmem:[#allocation4 + $0x8] sm:$0xff] %vm6006_vm14, %v5913_v3 }
 0x495   : > { %v6747_v56 = vpack.c.b16 %v6725_v1, %v6724_v37 }
 0x498   : > { %5576 = vrot.lane.b32.xlu2 %v5486_v14, %s8265_s26  ;;  %5382 = vrot.lane.b32.xlu0 %v10609_v5, %s8264_s23  ;;  %v7411_v14 = vld [vmem:[%s8322_s29 + $0x84] sm:$0xf] }
 0x499   : > { %5384 = vrot.lane.b32.xlu1 %v10626_v29, %s8264_s23  ;;  %v6532_v29 = vsel %vm8334_vm2, %v6527_v7, %v6531_v38  ;;  %v6558_v60 = vshrl.u32 %v7411_v14, 16  ;;  %v10736_v38 = vld [vmem:[#allocation2 + $0xc2] sm:$0xff] }
 0x49a   : > { %v5345_v17 = vpop.permute.xlu2 %5344  ;;  %v5531_v26 = vpop.permute.xlu0 %5530  ;;  %v6039_v41 = vld [vmem:[#allocation4] sm:$0xff]  ;;  %v6723_v2 = vunpack.c.l.b16 %v6532_v29 }
 0x49b   : > { %5434 = vst.msk [vmem:[#allocation4 + $0x38] sm:$0xff] %vm5426_vm10, %v5345_v17  ;;  %v5722_v23 = vpop.permute.xlu1 %5721  ;;  %v6040_v43 = vld [vmem:[#allocation4 + $0x8] sm:$0xff]  ;;  %v6571_v17 = vshrl.u32 %v7412_v0, 16 }
 0x49c   : > { %5624 = vst.msk [vmem:[#allocation4 + $0x18] sm:$0xff] %vm5620_vm12, %v5531_v26  ;;  %v6071_v5 = vpack.c.bf16 %v6040_v43, %v6039_v41  ;;  %v6746_v19 = vpack.c.b16 %v6723_v2, %v6722_v32  ;;  %v6560_v26 = vrot.slane %v6558_v60, 4  ;;  %v7413_v43 = vld [vmem:[%s8322_s29 + $0x8c] sm:$0x1] }
 0x49d   : > { %5817 = vst.msk [vmem:[#allocation4 + $0x18] sm:$0xff] %vm5813_vm13, %v10636_v61  ;;  %v6573_v7 = vrot.slane %v6571_v17, 4  ;;  %v6577_v32 = vshll.u32 %v7413_v43, 16  ;;  %v5874_v43 = vld [vmem:[#allocation2 + $0x182] sm:$0xff] }
 0x49e   : > { %5816 = vst.msk [vmem:[#allocation4 + $0x10] sm:$0xff] %vm5813_vm13, %v5722_v23  ;;  %7365 = vmatmul.msk.bf16.vlgmr.msra.gmra.mxu1 %vm6127_vm15, %v6071_v5  ;;  %v5665_v23 = vld [vmem:[#allocation2 + $0xc1] sm:$0xff]  ;;  %v5666_v5 = vld [vmem:[#allocation2 + $0xc9] sm:$0xff] }
 0x49f   : > { %7437 = vmatmul.msk.bf16.gmra.mxu2 %vm344_vm6, %v6746_v19  ;;  %v6574_v29 = vor.u32 %v6573_v7, %v6569_v39  ;;  %v10790_v7 = vld [vmem:[#allocation2 + $0x18a] sm:$0xff] }
 0x4a0   : > { %5771 = vrot.lane.b32.xlu2 %v5680_v18, %s8266_s27  ;;  %5578 = vrot.lane.b32.xlu0 %v5487_v35, %s8265_s26 }
 0x4a1   : > { %5769 = vrot.lane.b32.xlu1 %v5679_v50, %s8266_s27  ;;  %v6575_v50 = vrot.slane %v6574_v29, 4 }
 0x4a2   : > { %v10691_v61 = vpop.permute.xlu2 %5729  ;;  %v5915_v51 = vpop.permute.xlu0 %5914 }
 0x4a3   : > { %6009 = vst.msk [vmem:[#allocation4 + $0x10] sm:$0xff] %vm6006_vm14, %v5915_v51  ;;  %v5917_v34 = vpop.permute.xlu1 %5916  ;;  %v10697_v44 = vpop.f32.mrf.mxu2  ;;  %v6579_v51 = vrot.slane %v6577_v32, 5  ;;  %v7417_v32 = vld [vmem:[%s8322_s29 + $0x9c] sm:$0xf] }
 0x4a4   : > { %6010 = vst.msk [vmem:[#allocation4 + $0x18] sm:$0xff] %vm6006_vm14, %v5917_v34 }
 0x4a5   : > { %v6580_v30 = vsel %vm8334_vm2, %v6575_v50, %v6579_v51  ;;  %v6609_v50 = vshll.u32 %v7417_v32, 16 }
 0x4a6   : > { %v6727_v54 = vunpack.c.l.b16 %v6580_v30 }
 0x4a8   : > { %5354 = vrot.lane.b32.xlu2 %v10660_v33, %s8264_s23  ;;  %5962 = vrot.lane.b32.xlu0 %v10699_v9, %s8267_s8 }
 0x4a9   : > { %5964 = vrot.lane.b32.xlu1 %v10706_v45, %s8267_s8 }
 0x4aa   : > { %v10710_v16 = vpop.permute.xlu2 %5924  ;;  %v5535_v40 = vpop.permute.xlu0 %5534  ;;  %v6041_v42 = vld [vmem:[#allocation4 + $0x10] sm:$0xff] }
 0x4ab   : > { %5626 = vst.msk [vmem:[#allocation4 + $0x28] sm:$0xff] %vm5620_vm12, %v5535_v40  ;;  %v5726_v33 = vpop.permute.xlu1 %5725  ;;  %v6042_v10 = vld [vmem:[#allocation4 + $0x18] sm:$0xff]  ;;  %v10715_v46 = vpop.f32.mrf.mxu2  ;;  %v6585_v40 = vshll.u32 %v7414_v28, 16 }
 0x4ac   : > { %5819 = vst.msk [vmem:[#allocation4 + $0x28] sm:$0xff] %vm5813_vm13, %v10665_v25  ;;  %v6072_v3 = vpack.c.bf16 %v6042_v10, %v6041_v42  ;;  %v5472_v25 = vld [vmem:[#allocation2 + $0xc0] sm:$0xff]  ;;  %v6591_v42 = vshll.u32 %v7415_v11, 16 }
 0x4ad   : > { %5818 = vst.msk [vmem:[#allocation4 + $0x20] sm:$0xff] %vm5813_vm13, %v5726_v33  ;;  %v6587_v21 = vrot.slane %v6585_v40, 5  ;;  %v6597_v33 = vrot.slane %v6595_v12, 4  ;;  %v5681_v10 = vld [vmem:[#allocation2 + $0x181] sm:$0xff] }
 0x4ae   : > { %7366 = vmatmul.msk.bf16.gmra.mxu1 %vm6127_vm15, %v6072_v3  ;;  %v6593_v22 = vrot.slane %v6591_v42, 5  ;;  %v5488_v3 = vld [vmem:[#allocation2 + $0x180] sm:$0xff] }
 0x4af   : > { %7438 = vmatmul.msk.bf16.gmra.mxu2 %vm344_vm6, %v6747_v56 }
 0x4b0   : > { %5550 = vrot.lane.b32.xlu2 %v5473_v52, %s8265_s26  ;;  %5356 = vrot.lane.b32.xlu0 %v10655_v20, %s8264_s23  ;;  %v6561_v20 = vshll.u32 %v7411_v14, 16  ;;  %v6598_v1 = vor.u32 %v6597_v33, %v6593_v22  ;;  %v6601_v52 = vshll.u32 %v7416_v59, 16  ;;  %v5475_v33 = vld [vmem:[#allocation2 + $0xe0] sm:$0xff] }
 0x4b1   : > { %5548 = vrot.lane.b32.xlu1 %v5472_v25, %s8265_s26 }
 0x4b2   : > { %v10728_v63 = vpop.permute.xlu2 %5540  ;;  %v5919_v49 = vpop.permute.xlu0 %5918  ;;  %v6563_v41 = vrot.slane %v6561_v20, 5 }
 0x4b3   : > { %6011 = vst.msk [vmem:[#allocation4 + $0x20] sm:$0xff] %vm6006_vm14, %v5919_v49  ;;  %v5921_v57 = vpop.permute.xlu1 %5920  ;;  %v10734_v31 = vpop.f32.mrf.mxu2  ;;  %v6599_v49 = vrot.slane %v6598_v1, 4 }
 0x4b4   : > { %6012 = vst.msk [vmem:[#allocation4 + $0x28] sm:$0xff] %vm6006_vm14, %v5921_v57  ;;  %v6564_v27 = vor.u32 %v6563_v41, %v6560_v26  ;;  %v6603_v57 = vrot.slane %v6601_v52, 5 }
 0x4b6   : > { %v6565_v19 = vrot.slane %v6564_v27, 4  ;;  %v6604_v8 = vsel %vm8334_vm2, %v6599_v49, %v6603_v57  ;;  %v5861_v49 = vld [vmem:[#allocation2 + $0xe2] sm:$0xff] }
 0x4b7   : > { %v6729_v41 = vunpack.c.l.b16 %v6604_v8  ;;  %v5490_v8 = vld [vmem:[#allocation2 + $0x198] sm:$0xff] }
 0x4b8   : > { %5934 = vrot.lane.b32.xlu2 %v10736_v38, %s8267_s8  ;;  %5741 = vrot.lane.b32.xlu0 %v5665_v23, %s8266_s27  ;;  %v6570_v24 = vsel %vm8334_vm2, %v6565_v19, %v6569_v39  ;;  %v5682_v23 = vld [vmem:[#allocation2 + $0x189] sm:$0xff]  ;;  %v6606_v19 = vshrl.u32 %v7417_v32, 16 }
 0x4b9   : > { %5743 = vrot.lane.b32.xlu1 %v5666_v5, %s8266_s27  ;;  %v6726_v47 = vunpack.c.l.b16 %v6570_v24 }
 0x4ba   : > { %v10743_v2 = vpop.permute.xlu2 %5735  ;;  %v5537_v18 = vpop.permute.xlu0 %5536  ;;  %v6043_v35 = vld [vmem:[#allocation4 + $0x20] sm:$0xff] }
 0x4bb   : > { %5627 = vst.msk [vmem:[#allocation4 + $0x30] sm:$0xff] %vm5620_vm12, %v5537_v18  ;;  %v5539_v34 = vpop.permute.xlu1 %5538  ;;  %v6044_v6 = vld [vmem:[#allocation4 + $0x28] sm:$0xff]  ;;  %v10748_v53 = vpop.f32.mrf.mxu2  ;;  %v7418_v18 = vld [vmem:[%s8322_s29 + $0xa0] sm:$0xf] }
 0x4bc   : > { %5820 = vst.msk [vmem:[#allocation4 + $0x30] sm:$0xff] %vm5813_vm13, %v10691_v61  ;;  %v6073_v58 = vpack.c.bf16 %v6044_v6, %v6043_v35  ;;  %v6748_v61 = vpack.c.b16 %v6727_v54, %v6726_v47  ;;  %v6615_v51 = vshll.u32 %v7418_v18, 16  ;;  %v6608_v6 = vrot.slane %v6606_v19, 4  ;;  %v5474_v47 = vld [vmem:[#allocation2 + $0xd8] sm:$0xff]  ;;  %v7419_v54 = vld [vmem:[%s8322_s29 + $0xa4] sm:$0x1] }
 0x4bd   : > { %5628 = vst.msk [vmem:[#allocation4 + $0x38] sm:$0xff] %vm5620_vm12, %v5539_v34  ;;  %v6619_v34 = vshrl.u32 %v7418_v18, 16 }
 0x4be   : > { %7367 = vmatmul.msk.bf16.gmra.mxu1 %vm6127_vm15, %v6073_v58  ;;  %v6611_v58 = vrot.slane %v6609_v50, 5  ;;  %v6617_v24 = vrot.slane %v6615_v51, 5  ;;  %v5877_v50 = vld [vmem:[#allocation2 + $0x1a2] sm:$0xff] }
 0x4bf   : > { %7439 = vmatmul.msk.bf16.gmra.mxu2 %vm344_vm6, %v6748_v61  ;;  %v6621_v30 = vrot.slane %v6619_v34, 4 }
 0x4c0   : > { %5388 = vrot.lane.b32.xlu2 %v10706_v45, %s8264_s23  ;;  %5936 = vrot.lane.b32.xlu0 %v10756_v62, %s8267_s8  ;;  %v6582_v45 = vshrl.u32 %v7414_v28, 16  ;;  %v6612_v61 = vor.u32 %v6611_v58, %v6608_v6 }
 0x4c1   : > { %5386 = vrot.lane.b32.xlu1 %v10699_v9, %s8264_s23 }
 0x4c2   : > { %v5379_v15 = vpop.permute.xlu2 %5378  ;;  %v5732_v48 = vpop.permute.xlu0 %5731  ;;  %v6584_v9 = vrot.slane %v6582_v45, 4  ;;  %v6613_v28 = vrot.slane %v6612_v61, 4 }
 0x4c3   : > { %5451 = vst.msk [vmem:[#allocation4 + $0xc0] sm:$0xff] %vm5426_vm10, %v5379_v15  ;;  %v5923_v36 = vpop.permute.xlu1 %5922  ;;  %v10769_v55 = vpop.f32.mrf.mxu2  ;;  %v6622_v15 = vor.u32 %v6621_v30, %v6617_v24  ;;  %v5476_v30 = vld [vmem:[#allocation2 + $0xf0] sm:$0xff] }
 0x4c4   : > { %5821 = vst.msk [vmem:[#allocation4 + $0x38] sm:$0xff] %vm5813_vm13, %v5732_v48  ;;  %v6588_v37 = vor.u32 %v6587_v21, %v6584_v9  ;;  %v6625_v48 = vshll.u32 %v7419_v54, 16  ;;  %v6618_v12 = vsel %vm8334_vm2, %v6613_v28, %v6617_v24  ;;  %v5668_v21 = vld [vmem:[#allocation2 + $0xe1] sm:$0xff]  ;;  %v5669_v24 = vld [vmem:[#allocation2 + $0xf1] sm:$0xff] }
 0x4c5   : > { %6014 = vst.msk [vmem:[#allocation4 + $0x38] sm:$0xff] %vm6006_vm14, %v10710_v16  ;;  %v6623_v11 = vrot.slane %v6622_v15, 4 }
 0x4c6   : > { %6013 = vst.msk [vmem:[#allocation4 + $0x30] sm:$0xff] %vm6006_vm14, %v5923_v36  ;;  %v6589_v25 = vrot.slane %v6588_v37, 4  ;;  %v6627_v45 = vrot.slane %v6625_v48, 5 }
 0x4c8   : > { %5773 = vrot.lane.b32.xlu2 %v5681_v10, %s8266_s27  ;;  %5580 = vrot.lane.b32.xlu0 %v5488_v3, %s8265_s26  ;;  %v6594_v20 = vsel %vm8334_vm2, %v6589_v25, %v6593_v22  ;;  %v5667_v10 = vld [vmem:[#allocation2 + $0xd9] sm:$0xff] }
 0x4c9   : > { %5582 = vrot.lane.b32.xlu1 %v5489_v4, %s8265_s26  ;;  %v6728_v26 = vunpack.c.l.b16 %v6594_v20  ;;  %v5860_v25 = vld [vmem:[#allocation2 + $0xda] sm:$0xff] }
 0x4ca   : > { %v10778_v16 = vpop.permute.xlu2 %5574  ;;  %v5347_v56 = vpop.permute.xlu0 %5346  ;;  %v5491_v20 = vld [vmem:[#allocation2 + $0x1a0] sm:$0xff] }
 0x4cb   : > { %5435 = vst.msk [vmem:[#allocation4 + $0x40] sm:$0xff] %vm5426_vm10, %v5347_v56  ;;  %v5349_v14 = vpop.permute.xlu1 %5348  ;;  %v10783_v60 = vpop.f32.mrf.mxu2 }
 0x4cc   : > { %5629 = vst.msk [vmem:[#allocation4 + $0x40] sm:$0xff] %vm5620_vm12, %v10728_v63  ;;  %v6046_v0 = vld [vmem:[#allocation4 + $0x38] sm:$0xff]  ;;  %v6749_v63 = vpack.c.b16 %v6729_v41, %v6728_v26 }
 0x4cd   : > { %5436 = vst.msk [vmem:[#allocation4 + $0x48] sm:$0xff] %vm5426_vm10, %v5349_v14  ;;  %v6045_v17 = vld [vmem:[#allocation4 + $0x30] sm:$0xff] }
 0x4ce   : > { %v6074_v39 = vpack.c.bf16 %v6046_v0, %v6045_v17 }
 0x4cf   : > { %7440 = vmatmul.msk.bf16.gmra.mxu2 %vm344_vm6, %v6749_v63  ;;  %v5876_v63 = vld [vmem:[#allocation2 + $0x19a] sm:$0xff] }
 0x4d0   : > { %7368 = vmatmul.msk.bf16.gmra.mxu1 %vm6127_vm15, %v6074_v39  ;;  %5968 = vrot.lane.b32.xlu2 %v10790_v7, %s8267_s8 }
 0x4d1   : > { %5775 = vrot.lane.b32.xlu0 %v5682_v23, %s8266_s27  ;;  %5966 = vrot.lane.b32.xlu1 %v5874_v43, %s8267_s8  ;;  %v5683_v23 = vld [vmem:[#allocation2 + $0x199] sm:$0xff] }
 0x4d2   : > { %v10797_v5 = vpop.permute.xlu2 %5958  ;;  %v5543_v27 = vpop.permute.xlu0 %5542 }
 0x4d3   : > { %5630 = vst.msk [vmem:[#allocation4 + $0x48] sm:$0xff] %vm5620_vm12, %v5543_v27  ;;  %v5734_v29 = vpop.permute.xlu1 %5733  ;;  %v10805_v35 = vpop.f32.mrf.mxu2 }
 0x4d4   : > { %5823 = vst.msk [vmem:[#allocation4 + $0x48] sm:$0xff] %vm5813_vm13, %v10743_v2 }
 0x4d5   : > { %5822 = vst.msk [vmem:[#allocation4 + $0x40] sm:$0xff] %vm5813_vm13, %v5734_v29 }
 0x4d8   : > { %5552 = vrot.lane.b32.xlu2 %v5474_v47, %s8265_s26  ;;  %v5477_v47 = vld [vmem:[#allocation2 + $0xf8] sm:$0xff] }
 0x4d9   : > { %5358 = vrot.lane.b32.xlu0 %v10736_v38, %s8264_s23  ;;  %5360 = vrot.lane.b32.xlu1 %v10756_v62, %s8264_s23  ;;  %v6628_v38 = vsel %vm8334_vm2, %v6623_v11, %v6627_v45  ;;  %v6730_v62 = vunpack.c.l.b16 %v6618_v12  ;;  %v5863_v11 = vld [vmem:[#allocation2 + $0xfa] sm:$0xff] }
 0x4da   : > { %v5353_v2 = vpop.permute.xlu2 %5352  ;;  %v5927_v36 = vpop.permute.xlu0 %5926  ;;  %v6731_v9 = vunpack.c.l.b16 %v6628_v38  ;;  %v5670_v45 = vld [vmem:[#allocation2 + $0xf9] sm:$0xff] }
 0x4db   : > { %5438 = vst.msk [vmem:[#allocation4 + $0x58] sm:$0xff] %vm5426_vm10, %v5353_v2  ;;  %v5929_v40 = vpop.permute.xlu1 %5928  ;;  %v10816_v42 = vpop.f32.mrf.mxu2 }
 0x4dc   : > { %6015 = vst.msk [vmem:[#allocation4 + $0x40] sm:$0xff] %vm6006_vm14, %v5927_v36  ;;  %v6750_v22 = vpack.c.b16 %v6731_v9, %v6730_v62 }
 0x4dd   : > { %6016 = vst.msk [vmem:[#allocation4 + $0x48] sm:$0xff] %vm6006_vm14, %v5929_v40  ;;  %v5862_v40 = vld [vmem:[#allocation2 + $0xf2] sm:$0xff] }
 0x4df   : > { %7441 = vmatmul.msk.bf16.gmra.mxu2 %vm344_vm6, %v6750_v22  ;;  %v5478_v22 = vld [vmem:[#allocation2 + $0x108] sm:$0xff] }
 0x4e0   : > { %5747 = vrot.lane.b32.xlu2 %v5668_v21, %s8266_s27  ;;  %v10889_v21 = vld [vmem:[%s11218_s6] ss:$0 sm:$0xff] }
 0x4e1   : > { %5554 = vrot.lane.b32.xlu0 %v5475_v33, %s8265_s26  ;;  %5745 = vrot.lane.b32.xlu1 %v5667_v10, %s8266_s27  ;;  %v10895_v33 = vld [vmem:[%s11216_s4] ss:$0 sm:$0xff]  ;;  %v6815_v10 = vadd.f32 %v10889_v21, %v10697_v44 }
 0x4e2   : > { %v5738_v3 = vpop.permute.xlu2 %5737  ;;  %v5381_v59 = vpop.permute.xlu0 %5380 }
 0x4e3   : > { %5452 = vst.msk [vmem:[#allocation4 + $0xc8] sm:$0xff] %vm5426_vm10, %v5381_v59  ;;  %v5573_v4 = vpop.permute.xlu1 %5572  ;;  %v6047_v37 = vld [vmem:[#allocation4 + $0x40] sm:$0xff]  ;;  %v10830_v52 = vpop.f32.mrf.mxu2 }
 0x4e4   : > { %5646 = vst.msk [vmem:[#allocation4 + $0xc8] sm:$0xff] %vm5620_vm12, %v10778_v16  ;;  %v6048_v1 = vld [vmem:[#allocation4 + $0x48] sm:$0xff] }
 0x4e5   : > { %5645 = vst.msk [vmem:[#allocation4 + $0xc0] sm:$0xff] %vm5620_vm12, %v5573_v4  ;;  %v6075_v56 = vpack.c.bf16 %v6048_v1, %v6047_v37 }
 0x4e7   : > { %7369 = vmatmul.msk.bf16.gmra.mxu1 %vm6127_vm15, %v6075_v56  ;;  %v5672_v56 = vld [vmem:[#allocation2 + $0x111] sm:$0xff] }
 0x4e8   : > { %5390 = vrot.lane.b32.xlu2 %v5874_v43, %s8264_s23  ;;  %v5684_v43 = vld [vmem:[#allocation2 + $0x1a1] sm:$0xff] }
 0x4e9   : > { %5938 = vrot.lane.b32.xlu0 %v5860_v25, %s8267_s8  ;;  %5940 = vrot.lane.b32.xlu1 %v5861_v49, %s8267_s8 }
 0x4ea   : > { %v5933_v57 = vpop.permute.xlu2 %5932  ;;  %v5766_v14 = vpop.permute.xlu0 %5765 }
 0x4eb   : > { %5838 = vst.msk [vmem:[#allocation4 + $0xc0] sm:$0xff] %vm5813_vm13, %v5766_v14  ;;  %v5768_v16 = vpop.permute.xlu1 %5767  ;;  %v10840_v0 = vpop.f32.mrf.mxu2  ;;  %v6817_v14 = vadd.f32 %v10889_v21, %v10715_v46  ;;  %v5865_v46 = vld [vmem:[#allocation2 + $0x112] sm:$0xff] }
 0x4ec   : > { %6031 = vst.msk [vmem:[#allocation4 + $0xc0] sm:$0xff] %vm6006_vm14, %v10797_v5 }
 0x4ed   : > { %5839 = vst.msk [vmem:[#allocation4 + $0xc8] sm:$0xff] %vm5813_vm13, %v5768_v16 }
 0x4f0   : > { %5586 = vrot.lane.b32.xlu2 %v5491_v20, %s8265_s26 }
 0x4f1   : > { %5392 = vrot.lane.b32.xlu0 %v10790_v7, %s8264_s23  ;;  %5584 = vrot.lane.b32.xlu1 %v5490_v8, %s8265_s26 }
 0x4f2   : > { %v5577_v17 = vpop.permute.xlu2 %5576  ;;  %v5961_v26 = vpop.permute.xlu0 %5960 }
 0x4f3   : > { %6032 = vst.msk [vmem:[#allocation4 + $0xc8] sm:$0xff] %vm6006_vm14, %v5961_v26  ;;  %v5351_v41 = vpop.permute.xlu1 %5350  ;;  %v10849_v39 = vpop.f32.mrf.mxu2  ;;  %v6063_v27 = vld [vmem:[#allocation4 + $0xc0] sm:$0xff] }
 0x4f4   : > { %5437 = vst.msk [vmem:[#allocation4 + $0x50] sm:$0xff] %vm5426_vm10, %v5351_v41 }
 0x4f8   : > { %5970 = vrot.lane.b32.xlu2 %v5876_v63, %s8267_s8 }
 0x4f9   : > { %5777 = vrot.lane.b32.xlu0 %v5683_v23, %s8266_s27  ;;  %5779 = vrot.lane.b32.xlu1 %v5684_v43, %s8266_s27 }
 0x4fa   : > { %v5772_v7 = vpop.permute.xlu2 %5771  ;;  %v5545_v5 = vpop.permute.xlu0 %5544  ;;  %v6064_v29 = vld [vmem:[#allocation4 + $0xc8] sm:$0xff] }
 0x4fb   : > { %5631 = vst.msk [vmem:[#allocation4 + $0x50] sm:$0xff] %vm5620_vm12, %v5545_v5  ;;  %v5547_v32 = vpop.permute.xlu1 %5546  ;;  %v6083_v18 = vpack.c.bf16 %v6064_v29, %v6063_v27  ;;  %v10856_v19 = vpop.f32.mrf.mxu2  ;;  %v6820_v27 = vadd.f32 %v10889_v21, %v10734_v31  ;;  %v5480_v31 = vld [vmem:[#allocation2 + $0x120] sm:$0xff] }
 0x4fc   : > { %5824 = vst.msk [vmem:[#allocation4 + $0x50] sm:$0xff] %vm5813_vm13, %v5738_v3 }
 0x4fd   : > { %5632 = vst.msk [vmem:[#allocation4 + $0x58] sm:$0xff] %vm5620_vm12, %v5547_v32  ;;  %7377 = vmatmul.msk.bf16.vlgmr.msrb.gmra.mxu3 %vm6127_vm15, %v6083_v18 }
 0x500   : > { %5364 = vrot.lane.b32.xlu2 %v5861_v49, %s8264_s23  ;;  %v5479_v49 = vld [vmem:[#allocation2 + $0x110] sm:$0xff] }
 0x501   : > { %5972 = vrot.lane.b32.xlu0 %v5877_v50, %s8267_s8  ;;  %5362 = vrot.lane.b32.xlu1 %v5860_v25, %s8264_s23 }
 0x502   : > { %v5355_v51 = vpop.permute.xlu2 %5354  ;;  %v5740_v34 = vpop.permute.xlu0 %5739 }
 0x503   : > { %5439 = vst.msk [vmem:[#allocation4 + $0x60] sm:$0xff] %vm5426_vm10, %v5355_v51  ;;  %v5931_v6 = vpop.permute.xlu1 %5930  ;;  %v10865_v58 = vpop.f32.mrf.mxu2 }
 0x504   : > { %5825 = vst.msk [vmem:[#allocation4 + $0x58] sm:$0xff] %vm5813_vm13, %v5740_v34 }
 0x505   : > { %6018 = vst.msk [vmem:[#allocation4 + $0x58] sm:$0xff] %vm6006_vm14, %v5933_v57  ;;  %v5671_v57 = vld [vmem:[#allocation2 + $0x109] sm:$0xff] }
 0x506   : > { %6017 = vst.msk [vmem:[#allocation4 + $0x50] sm:$0xff] %vm6006_vm14, %v5931_v6  ;;  %v5481_v6 = vld [vmem:[#allocation2 + $0x128] sm:$0xff] }
 0x508   : > { %5749 = vrot.lane.b32.xlu2 %v5669_v24, %s8266_s27  ;;  %v6822_v24 = vadd.f32 %v10889_v21, %v10748_v53  ;;  %v5674_v53 = vld [vmem:[#allocation2 + $0x129] sm:$0xff] }
 0x509   : > { %5556 = vrot.lane.b32.xlu0 %v5476_v30, %s8265_s26  ;;  %5558 = vrot.lane.b32.xlu1 %v5477_v47, %s8265_s26 }
 0x50a   : > { %v5551_v54 = vpop.permute.xlu2 %5550  ;;  %v5383_v61 = vpop.permute.xlu0 %5382 }
 0x50b   : > { %5453 = vst.msk [vmem:[#allocation4 + $0xd0] sm:$0xff] %vm5426_vm10, %v5383_v61  ;;  %v5385_v15 = vpop.permute.xlu1 %5384  ;;  %v10874_v2 = vpop.f32.mrf.mxu2 }
 0x50c   : > { %5647 = vst.msk [vmem:[#allocation4 + $0xd0] sm:$0xff] %vm5620_vm12, %v5577_v17  ;;  %v6050_v48 = vld [vmem:[#allocation4 + $0x58] sm:$0xff] }
 0x50d   : > { %5454 = vst.msk [vmem:[#allocation4 + $0xd8] sm:$0xff] %vm5426_vm10, %v5385_v15  ;;  %v6049_v36 = vld [vmem:[#allocation4 + $0x50] sm:$0xff] }
 0x50e   : > { %v6076_v28 = vpack.c.bf16 %v6050_v48, %v6049_v36 }
 0x510   : > { %7370 = vmatmul.msk.bf16.gmra.mxu1 %vm6127_vm15, %v6076_v28  ;;  %5944 = vrot.lane.b32.xlu2 %v5863_v11, %s8267_s8  ;;  %v5866_v28 = vld [vmem:[#allocation2 + $0x122] sm:$0xff] }
 0x511   : > { %5751 = vrot.lane.b32.xlu0 %v5670_v45, %s8266_s27  ;;  %5942 = vrot.lane.b32.xlu1 %v5862_v40, %s8267_s8  ;;  %v6825_v45 = vadd.f32 %v10889_v21, %v10769_v55 }
 0x512   : > { %v5935_v12 = vpop.permute.xlu2 %5934  ;;  %v5579_v38 = vpop.permute.xlu0 %5578 }
 0x513   : > { %5648 = vst.msk [vmem:[#allocation4 + $0xd8] sm:$0xff] %vm5620_vm12, %v5579_v38  ;;  %v5770_v62 = vpop.permute.xlu1 %5769  ;;  %v10884_v9 = vpop.f32.mrf.mxu2 }
 0x514   : > { %5841 = vst.msk [vmem:[#allocation4 + $0xd8] sm:$0xff] %vm5813_vm13, %v5772_v7  ;;  %v5286_v7 = vld [vmem:[#allocation2 + $0x10a] sm:$0xff] }
 0x515   : > { %5840 = vst.msk [vmem:[#allocation4 + $0xd0] sm:$0xff] %vm5813_vm13, %v5770_v62 }
 0x518   : > { %5560 = vrot.lane.b32.xlu2 %v5478_v22, %s8265_s26 }
 0x519   : > { %5366 = vrot.lane.b32.xlu0 %v5862_v40, %s8264_s23  ;;  %5368 = vrot.lane.b32.xlu1 %v5863_v11, %s8264_s23  ;;  %v5673_v11 = vld [vmem:[#allocation2 + $0x121] sm:$0xff] }
 0x51a   : > { %v5389_v3 = vpop.permute.xlu2 %5388  ;;  %v5963_v59 = vpop.permute.xlu0 %5962 }
 0x51b   : > { %5456 = vst.msk [vmem:[#allocation4 + $0xe8] sm:$0xff] %vm5426_vm10, %v5389_v3  ;;  %v6189_v4 = vpop.f32.mrf.mxu1  ;;  %v5965_v37 = vpop.permute.xlu1 %5964 }
 0x51c   : > { %6033 = vst.msk [vmem:[#allocation4 + $0xd0] sm:$0xff] %vm6006_vm14, %v5963_v59  ;;  %v6190_v1 = vadd.f32 %v10895_v33, %v6189_v4  ;;  %v10911_v25 = vpop.f32.mrf.mxu2 }
 0x51d   : > { %6034 = vst.msk [vmem:[#allocation4 + $0xd8] sm:$0xff] %vm6006_vm14, %v5965_v37  ;;  %v5289_v37 = vld [vmem:[#allocation2 + $0x12a] sm:$0xff] }
 0x51e   : > { %v6894_v44 = vadd.f32 %v6815_v10, %v6190_v1 }
 0x520   : > { %6926 = vst.msk [vmem:[%s10908_s10] sm:$0xff] %vm4351_vm1, %v6894_v44  ;;  %5755 = vrot.lane.b32.xlu2 %v5672_v56, %s8266_s27  ;;  %v6827_v44 = vadd.f32 %v10889_v21, %v10783_v60 }
 0x521   : > { %5562 = vrot.lane.b32.xlu0 %v5479_v49, %s8265_s26  ;;  %5753 = vrot.lane.b32.xlu1 %v5671_v57, %s8266_s27 }
 0x522   : > { %v5774_v16 = vpop.permute.xlu2 %5773  ;;  %v5357_v20 = vpop.permute.xlu0 %5356 }
 0x523   : > { %5440 = vst.msk [vmem:[#allocation4 + $0x68] sm:$0xff] %vm5426_vm10, %v5357_v20  ;;  %v6191_v8 = vpop.f32.mrf.mxu1  ;;  %v5549_v17 = vpop.permute.xlu1 %5548  ;;  %v6065_v26 = vld [vmem:[#allocation4 + $0xd0] sm:$0xff] }
 0x524   : > { %5634 = vst.msk [vmem:[#allocation4 + $0x68] sm:$0xff] %vm5620_vm12, %v5551_v54  ;;  %v6192_v41 = vadd.f32 %v10895_v33, %v6191_v8  ;;  %v6066_v63 = vld [vmem:[#allocation4 + $0xd8] sm:$0xff]  ;;  %v10930_v5 = vpop.f32.mrf.mxu2  ;;  %v5675_v20 = vld [vmem:[#allocation2 + $0x139] sm:$0xff] }
 0x525   : > { %5633 = vst.msk [vmem:[#allocation4 + $0x60] sm:$0xff] %vm5620_vm12, %v5549_v17  ;;  %v6084_v23 = vpack.c.bf16 %v6066_v63, %v6065_v26  ;;  %v5482_v8 = vld [vmem:[#allocation2 + $0x138] sm:$0xff]  ;;  %v5483_v17 = vld [vmem:[#allocation2 + $0x140] sm:$0xff] }
 0x526   : > { %v6895_v43 = vadd.f32 %v6817_v14, %v6192_v41 }
 0x527   : > { %7378 = vmatmul.msk.bf16.gmra.mxu3 %vm6127_vm15, %v6084_v23  ;;  %v6830_v23 = vadd.f32 %v10889_v21, %v10805_v35  ;;  %v5676_v35 = vld [vmem:[#allocation2 + $0x141] sm:$0xff] }
 0x528   : > { %6927 = vst.msk [vmem:[%s10908_s10 + $0x8] sm:$0xff] %vm4351_vm1, %v6895_v43  ;;  %5370 = vrot.lane.b32.xlu2 %v5286_v7, %s8264_s23 }
 0x529   : > { %5946 = vrot.lane.b32.xlu0 %v5286_v7, %s8267_s8  ;;  %5948 = vrot.lane.b32.xlu1 %v5865_v46, %s8267_s8 }
 0x52a   : > { %v5969_v29 = vpop.permute.xlu2 %5968  ;;  %v5742_v32 = vpop.permute.xlu0 %5741 }
 0x52b   : > { %5826 = vst.msk [vmem:[#allocation4 + $0x60] sm:$0xff] %vm5813_vm13, %v5742_v32  ;;  %v5744_v18 = vpop.permute.xlu1 %5743  ;;  %v6194_v50 = vpop.f32.mrf.mxu1  ;;  %v5869_v32 = vld [vmem:[#allocation2 + $0x142] sm:$0xff] }
 0x52c   : > { %6019 = vst.msk [vmem:[#allocation4 + $0x60] sm:$0xff] %vm6006_vm14, %v5935_v12  ;;  %v6195_v51 = vadd.f32 %v10895_v33, %v6194_v50  ;;  %v10948_v48 = vpop.f32.mrf.mxu2  ;;  %v5868_v50 = vld [vmem:[#allocation2 + $0x13a] sm:$0xff] }
 0x52d   : > { %5827 = vst.msk [vmem:[#allocation4 + $0x68] sm:$0xff] %vm5813_vm13, %v5744_v18 }
 0x52e   : > { %v6896_v34 = vadd.f32 %v6820_v27, %v6195_v51 }
 0x530   : > { %6928 = vst.msk [vmem:[%s10908_s10 + $0x10] sm:$0xff] %vm4351_vm1, %v6896_v34  ;;  %5566 = vrot.lane.b32.xlu2 %v5481_v6, %s8265_s26 }
 0x531   : > { %5372 = vrot.lane.b32.xlu0 %v5865_v46, %s8264_s23  ;;  %5564 = vrot.lane.b32.xlu1 %v5480_v31, %s8265_s26 }
 0x532   : > { %v5553_v30 = vpop.permute.xlu2 %5552  ;;  %v5937_v47 = vpop.permute.xlu0 %5936 }
 0x533   : > { %6020 = vst.msk [vmem:[#allocation4 + $0x68] sm:$0xff] %vm6006_vm14, %v5937_v47  ;;  %v5387_v54 = vpop.permute.xlu1 %5386  ;;  %v6196_v61 = vpop.f32.mrf.mxu1  ;;  %v6051_v38 = vld [vmem:[#allocation4 + $0x60] sm:$0xff] }
 0x534   : > { %5455 = vst.msk [vmem:[#allocation4 + $0xe0] sm:$0xff] %vm5426_vm10, %v5387_v54  ;;  %v6197_v15 = vadd.f32 %v10895_v33, %v6196_v61  ;;  %v10964_v4 = vpop.f32.mrf.mxu2 }
 0x536   : > { %v6897_v36 = vadd.f32 %v6822_v24, %v6197_v15  ;;  %v6832_v24 = vadd.f32 %v10889_v21, %v10816_v42 }
 0x538   : > { %6929 = vst.msk [vmem:[%s10908_s10 + $0x18] sm:$0xff] %vm4351_vm1, %v6897_v36  ;;  %5950 = vrot.lane.b32.xlu2 %v5866_v28, %s8267_s8 }
 0x539   : > { %5757 = vrot.lane.b32.xlu0 %v5673_v11, %s8266_s27  ;;  %5759 = vrot.lane.b32.xlu1 %v5674_v53, %s8266_s27  ;;  %v6835_v11 = vadd.f32 %v10889_v21, %v10830_v52 }
 0x53a   : > { %v10957_v40 = vpop.permute.xlu2 %5747  ;;  %v5581_v12 = vpop.permute.xlu0 %5580  ;;  %v6052_v62 = vld [vmem:[#allocation4 + $0x68] sm:$0xff] }
 0x53b   : > { %5649 = vst.msk [vmem:[#allocation4 + $0xe0] sm:$0xff] %vm5620_vm12, %v5581_v12  ;;  %v5583_v22 = vpop.permute.xlu1 %5582  ;;  %v6199_v10 = vpop.f32.mrf.mxu1  ;;  %v6077_v3 = vpack.c.bf16 %v6052_v62, %v6051_v38 }
 0x53c   : > { %5842 = vst.msk [vmem:[#allocation4 + $0xe0] sm:$0xff] %vm5813_vm13, %v5774_v16  ;;  %v6200_v59 = vadd.f32 %v10895_v33, %v6199_v10  ;;  %v10979_v60 = vpop.f32.mrf.mxu2 }
 0x53d   : > { %5650 = vst.msk [vmem:[#allocation4 + $0xe8] sm:$0xff] %vm5620_vm12, %v5583_v22  ;;  %7371 = vmatmul.msk.bf16.gmra.mxu1 %vm6127_vm15, %v6077_v3 }
 0x53e   : > { %v6898_v55 = vadd.f32 %v6825_v45, %v6200_v59  ;;  %v6837_v59 = vadd.f32 %v10889_v21, %v10840_v0 }
 0x540   : > { %6930 = vst.msk [vmem:[%s10908_s10 + $0x20] sm:$0xff] %vm4351_vm1, %v6898_v55  ;;  %5376 = vrot.lane.b32.xlu2 %v5289_v37, %s8264_s23 }
 0x541   : > { %5952 = vrot.lane.b32.xlu0 %v5289_v37, %s8267_s8  ;;  %5374 = vrot.lane.b32.xlu1 %v5866_v28, %s8264_s23 }
 0x542   : > { %v5391_v1 = vpop.permute.xlu2 %5390 }
 0x543   : > { %5457 = vst.msk [vmem:[#allocation4 + $0xf0] sm:$0xff] %vm5426_vm10, %v5391_v1  ;;  %v5776_v56 = vpop.permute.xlu0 %5775  ;;  %v5967_v49 = vpop.permute.xlu1 %5966 }
 0x544   : > { %5843 = vst.msk [vmem:[#allocation4 + $0xe8] sm:$0xff] %vm5813_vm13, %v5776_v56  ;;  %v6201_v57 = vpop.f32.mrf.mxu1  ;;  %v10997_v34 = vpop.f32.mrf.mxu2  ;;  %v7420_v56 = vld [vmem:[%s8322_s29 + $0xa8] sm:$0xf] }
 0x545   : > { %6036 = vst.msk [vmem:[#allocation4 + $0xe8] sm:$0xff] %vm6006_vm14, %v5969_v29  ;;  %v6202_v14 = vadd.f32 %v10895_v33, %v6201_v57  ;;  %v6630_v0 = vshrl.u32 %v7420_v56, 16 }
 0x546   : > { %6035 = vst.msk [vmem:[#allocation4 + $0xe0] sm:$0xff] %vm6006_vm14, %v5967_v49  ;;  %v7421_v49 = vld [vmem:[%s8322_s29 + $0xac] sm:$0xf] }
 0x547   : > { %v6899_v16 = vadd.f32 %v6827_v44, %v6202_v14 }
 0x548   : > { %5761 = vrot.lane.b32.xlu2 %v5675_v20, %s8266_s27  ;;  %v6639_v20 = vshll.u32 %v7421_v49, 16 }
 0x549   : > { %6931 = vst.msk [vmem:[%s10908_s10 + $0x28] sm:$0xff] %vm4351_vm1, %v6899_v16  ;;  %5568 = vrot.lane.b32.xlu0 %v5482_v8, %s8265_s26  ;;  %5570 = vrot.lane.b32.xlu1 %v5483_v17, %s8265_s26  ;;  %v6633_v16 = vshll.u32 %v7420_v56, 16  ;;  %v6643_v8 = vshrl.u32 %v7421_v49, 16 }
 0x54a   : > { %v5587_v26 = vpop.permute.xlu2 %5586 }
 0x54b   : > { %v5359_v41 = vpop.permute.xlu0 %5358  ;;  %v5361_v63 = vpop.permute.xlu1 %5360 }
 0x54c   : > { %5441 = vst.msk [vmem:[#allocation4 + $0x70] sm:$0xff] %vm5426_vm10, %v5359_v41  ;;  %v6068_v43 = vld [vmem:[#allocation4 + $0xe8] sm:$0xff]  ;;  %v11010_v42 = vpop.f32.mrf.mxu2 }
 0x54d   : > { %5635 = vst.msk [vmem:[#allocation4 + $0x70] sm:$0xff] %vm5620_vm12, %v5553_v30  ;;  %v6204_v7 = vpop.f32.mrf.mxu1  ;;  %v6067_v46 = vld [vmem:[#allocation4 + $0xe0] sm:$0xff] }
 0x54e   : > { %5442 = vst.msk [vmem:[#allocation4 + $0x78] sm:$0xff] %vm5426_vm10, %v5361_v63  ;;  %v6205_v27 = vadd.f32 %v10895_v33, %v6204_v7  ;;  %v6085_v29 = vpack.c.bf16 %v6068_v43, %v6067_v46  ;;  %v6632_v63 = vrot.slane %v6630_v0, 4  ;;  %v6641_v43 = vrot.slane %v6639_v20, 5  ;;  %v7422_v46 = vld [vmem:[%s8322_s29 + $0xb0] sm:$0x1] }
 0x54f   : > { %v6645_v7 = vrot.slane %v6643_v8, 4  ;;  %v7425_v20 = vld [vmem:[%s8322_s29 + $0xbc] sm:$0x1] }
 0x550   : > { %v6900_v18 = vadd.f32 %v6830_v23, %v6205_v27  ;;  %7379 = vmatmul.msk.bf16.gmra.mxu3 %vm6127_vm15, %v6085_v29  ;;  %5956 = vrot.lane.b32.xlu2 %v5869_v32, %s8267_s8  ;;  %v6635_v23 = vrot.slane %v6633_v16, 5  ;;  %v6649_v32 = vshll.u32 %v7422_v46, 16 }
 0x551   : > { %5763 = vrot.lane.b32.xlu0 %v5676_v35, %s8266_s27  ;;  %5954 = vrot.lane.b32.xlu1 %v5868_v50, %s8267_s8  ;;  %v6646_v29 = vor.u32 %v6645_v7, %v6641_v43  ;;  %v6673_v7 = vshll.u32 %v7425_v20, 16 }
 0x552   : > { %6932 = vst.msk [vmem:[%s10908_s10 + $0x30] sm:$0xff] %vm4351_vm1, %v6900_v18  ;;  %v5971_v51 = vpop.permute.xlu2 %5970  ;;  %v6636_v27 = vor.u32 %v6635_v23, %v6632_v63 }
 0x553   : > { %v5555_v6 = vpop.permute.xlu0 %5554  ;;  %v5746_v31 = vpop.permute.xlu1 %5745 }
 0x554   : > { %5636 = vst.msk [vmem:[#allocation4 + $0x78] sm:$0xff] %vm5620_vm12, %v5555_v6  ;;  %v11019_v10 = vpop.f32.mrf.mxu2 }
 0x555   : > { %5829 = vst.msk [vmem:[#allocation4 + $0x78] sm:$0xff] %vm5813_vm13, %v10957_v40  ;;  %v6206_v30 = vpop.f32.mrf.mxu1 }
 0x556   : > { %5828 = vst.msk [vmem:[#allocation4 + $0x70] sm:$0xff] %vm5813_vm13, %v5746_v31  ;;  %v6207_v47 = vadd.f32 %v10895_v33, %v6206_v30  ;;  %v6637_v30 = vrot.slane %v6636_v27, 4 }
 0x558   : > { %v6901_v54 = vadd.f32 %v6832_v24, %v6207_v47  ;;  %v6647_v47 = vrot.slane %v6646_v29, 4  ;;  %v6840_v29 = vadd.f32 %v10889_v21, %v10849_v39 }
 0x55a   : > { %6933 = vst.msk [vmem:[%s10908_s10 + $0x38] sm:$0xff] %vm4351_vm1, %v6901_v54  ;;  %v5365_v61 = vpop.permute.xlu2 %5364  ;;  %v6651_v54 = vrot.slane %v6649_v32, 5 }
 0x55b   : > { %5444 = vst.msk [vmem:[#allocation4 + $0x88] sm:$0xff] %vm5426_vm10, %v5365_v61  ;;  %v5939_v15 = vpop.permute.xlu0 %5938  ;;  %v5941_v36 = vpop.permute.xlu1 %5940 }
 0x55c   : > { %6021 = vst.msk [vmem:[#allocation4 + $0x70] sm:$0xff] %vm6006_vm14, %v5939_v15  ;;  %v11034_v14 = vpop.f32.mrf.mxu2  ;;  %v7423_v15 = vld [vmem:[%s8322_s29 + $0xb4] sm:$0xf] }
 0x55d   : > { %6022 = vst.msk [vmem:[#allocation4 + $0x78] sm:$0xff] %vm6006_vm14, %v5941_v36  ;;  %v7424_v36 = vld [vmem:[%s8322_s29 + $0xb8] sm:$0xf] }
 0x562   : > { %v5750_v28 = vpop.permute.xlu2 %5749 }
 0x563   : > { %v5393_v53 = vpop.permute.xlu0 %5392  ;;  %v5585_v45 = vpop.permute.xlu1 %5584  ;;  %v6053_v40 = vld [vmem:[#allocation4 + $0x70] sm:$0xff] }
 0x564   : > { %5458 = vst.msk [vmem:[#allocation4 + $0xf8] sm:$0xff] %vm5426_vm10, %v5393_v53  ;;  %v6209_v12 = vpop.f32.mrf.mxu1  ;;  %v6054_v38 = vld [vmem:[#allocation4 + $0x78] sm:$0xff]  ;;  %v6874_v35 = vpop.f32.mrf.mxu2 }
 0x565   : > { %5652 = vst.msk [vmem:[#allocation4 + $0xf8] sm:$0xff] %vm5620_vm12, %v5587_v26  ;;  %v6210_v62 = vadd.f32 %v10895_v33, %v6209_v12  ;;  %v6078_v22 = vpack.c.bf16 %v6054_v38, %v6053_v40  ;;  %v6875_v61 = vadd.f32 %v10889_v21, %v6874_v35  ;;  %v6654_v12 = vshrl.u32 %v7423_v15, 16 }
 0x566   : > { %5651 = vst.msk [vmem:[#allocation4 + $0xf0] sm:$0xff] %vm5620_vm12, %v5585_v45  ;;  %v6642_v45 = vsel %vm8334_vm2, %v6637_v30, %v6641_v43  ;;  %v6657_v38 = vshll.u32 %v7423_v15, 16 }
 0x567   : > { %v6902_v3 = vadd.f32 %v6835_v11, %v6210_v62  ;;  %7372 = vmatmul.msk.bf16.gmra.mxu1 %vm6127_vm15, %v6078_v22  ;;  %v6663_v62 = vshll.u32 %v7424_v36, 16  ;;  %v6667_v22 = vshrl.u32 %v7424_v36, 16  ;;  %v6656_v56 = vrot.slane %v6654_v12, 4 }
 0x568   : > { %v6659_v49 = vrot.slane %v6657_v38, 5  ;;  %v6842_v12 = vadd.f32 %v10889_v21, %v10856_v19 }
 0x569   : > { %6934 = vst.msk [vmem:[%s10908_s10 + $0x40] sm:$0xff] %vm4351_vm1, %v6902_v3  ;;  %v6669_v0 = vrot.slane %v6667_v22, 4 }
 0x56a   : > { %v11024_v52 = vpop.permute.xlu2 %5944  ;;  %v6660_v23 = vor.u32 %v6659_v49, %v6656_v56  ;;  %v7428_v56 = vld [vmem:[%s8322_s29 + $0xc8] sm:$0x1] }
 0x56b   : > { %v5778_v55 = vpop.permute.xlu0 %5777  ;;  %v5780_v37 = vpop.permute.xlu1 %5779  ;;  %v6697_v20 = vshll.u32 %v7428_v56, 16 }
 0x56c   : > { %5844 = vst.msk [vmem:[#allocation4 + $0xf0] sm:$0xff] %vm5813_vm13, %v5778_v55  ;;  %v6211_v1 = vpop.f32.mrf.mxu1 }
 0x56d   : > { %6037 = vst.msk [vmem:[#allocation4 + $0xf0] sm:$0xff] %vm6006_vm14, %v5971_v51  ;;  %v6212_v44 = vadd.f32 %v10895_v33, %v6211_v1  ;;  %v6732_v1 = vunpack.c.l.b16 %v6642_v45 }
 0x56e   : > { %5845 = vst.msk [vmem:[#allocation4 + $0xf8] sm:$0xff] %vm5813_vm13, %v5780_v37  ;;  %v6876_v37 = vpop.f32.mrf.mxu2 }
 0x56f   : > { %v6903_v57 = vadd.f32 %v6837_v59, %v6212_v44  ;;  %v6877_v16 = vadd.f32 %v10889_v21, %v6876_v37 }
 0x571   : > { %6935 = vst.msk [vmem:[%s10908_s10 + $0x48] sm:$0xff] %vm4351_vm1, %v6903_v57  ;;  %v6665_v57 = vrot.slane %v6663_v62, 5 }
 0x572   : > { %v11038_v17 = vpop.permute.xlu2 %5560 }
 0x573   : > { %v5973_v26 = vpop.permute.xlu0 %5972  ;;  %v5363_v41 = vpop.permute.xlu1 %5362  ;;  %v6670_v43 = vor.u32 %v6669_v0, %v6665_v57 }
 0x574   : > { %6038 = vst.msk [vmem:[#allocation4 + $0xf8] sm:$0xff] %vm6006_vm14, %v5973_v26  ;;  %v6069_v6 = vld [vmem:[#allocation4 + $0xf0] sm:$0xff] }
 0x575   : > { %5443 = vst.msk [vmem:[#allocation4 + $0x80] sm:$0xff] %vm5426_vm10, %v5363_v41 }
 0x57a   : > { %v11043_v18 = vpop.permute.xlu2 %5755 }
 0x57b   : > { %v5557_v50 = vpop.permute.xlu0 %5556  ;;  %v5559_v51 = vpop.permute.xlu1 %5558  ;;  %v6070_v31 = vld [vmem:[#allocation4 + $0xf8] sm:$0xff] }
 0x57c   : > { %5637 = vst.msk [vmem:[#allocation4 + $0x80] sm:$0xff] %vm5620_vm12, %v5557_v50  ;;  %v6086_v24 = vpack.c.bf16 %v6070_v31, %v6069_v6  ;;  %v6661_v6 = vrot.slane %v6660_v23, 4  ;;  %v6671_v31 = vrot.slane %v6670_v43, 4 }
 0x57d   : > { %5830 = vst.msk [vmem:[#allocation4 + $0x80] sm:$0xff] %vm5813_vm13, %v5750_v28  ;;  %v6652_v28 = vsel %vm8334_vm2, %v6647_v47, %v6651_v54  ;;  %v7426_v47 = vld [vmem:[%s8322_s29 + $0xc0] sm:$0xf]  ;;  %v7427_v54 = vld [vmem:[%s8322_s29 + $0xc4] sm:$0xf] }
 0x57e   : > { %5638 = vst.msk [vmem:[#allocation4 + $0x88] sm:$0xff] %vm5620_vm12, %v5559_v51  ;;  %7380 = vmatmul.msk.bf16.gmra.mxu3 %vm6127_vm15, %v6086_v24  ;;  %v6733_v44 = vunpack.c.l.b16 %v6652_v28  ;;  %v6675_v24 = vrot.slane %v6673_v7, 5  ;;  %v6681_v45 = vshll.u32 %v7426_v47, 16  ;;  %v6687_v28 = vshll.u32 %v7427_v54, 16 }
 0x580   : > { %v6249_v11 = vpop.f32.mrf.mxu3  ;;  %v6751_v63 = vpack.c.b16 %v6733_v44, %v6732_v1  ;;  %v6676_v15 = vsel %vm8334_vm2, %v6671_v31, %v6675_v24  ;;  %v6689_v37 = vrot.slane %v6687_v28, 5  ;;  %v6845_v31 = vadd.f32 %v10889_v21, %v10865_v58 }
 0x581   : > { %v6250_v53 = vadd.f32 %v10895_v33, %v6249_v11  ;;  %v6847_v58 = vadd.f32 %v10889_v21, %v10874_v2 }
 0x582   : > { %v5371_v40 = vpop.permute.xlu2 %5370 }
 0x583   : > { %v6918_v3 = vadd.f32 %v6875_v61, %v6250_v53  ;;  %5447 = vst.msk [vmem:[#allocation4 + $0xa0] sm:$0xff] %vm5426_vm10, %v5371_v40  ;;  %v5752_v59 = vpop.permute.xlu0 %5751  ;;  %v5943_v55 = vpop.permute.xlu1 %5942  ;;  %v6678_v53 = vshrl.u32 %v7426_v47, 16  ;;  %v6691_v40 = vshrl.u32 %v7427_v54, 16 }
 0x584   : > { %5831 = vst.msk [vmem:[#allocation4 + $0x88] sm:$0xff] %vm5813_vm13, %v5752_v59 }
 0x585   : > { %6950 = vst.msk [vmem:[%s10908_s10 + $0xc0] sm:$0xff] %vm4351_vm1, %v6918_v3  ;;  %v6735_v3 = vunpack.c.l.b16 %v6676_v15  ;;  %v6680_v59 = vrot.slane %v6678_v53, 4  ;;  %v6693_v1 = vrot.slane %v6691_v40, 4 }
 0x586   : > { %6024 = vst.msk [vmem:[#allocation4 + $0x88] sm:$0xff] %vm6006_vm14, %v11024_v52 }
 0x587   : > { %6023 = vst.msk [vmem:[#allocation4 + $0x80] sm:$0xff] %vm6006_vm14, %v5943_v55  ;;  %v6683_v55 = vrot.slane %v6681_v45, 5 }
 0x588   : > { %v6251_v8 = vpop.f32.mrf.mxu3 }
 0x589   : > { %v6252_v26 = vadd.f32 %v10895_v33, %v6251_v8  ;;  %v6684_v0 = vor.u32 %v6683_v55, %v6680_v59 }
 0x58a   : > { %v11067_v41 = vpop.permute.xlu2 %5566 }
 0x58b   : > { %v6919_v52 = vadd.f32 %v6877_v16, %v6252_v26  ;;  %v5367_v46 = vpop.permute.xlu0 %5366  ;;  %v5369_v27 = vpop.permute.xlu1 %5368  ;;  %v6694_v16 = vor.u32 %v6693_v1, %v6689_v37  ;;  %v6685_v8 = vrot.slane %v6684_v0, 4 }
 0x58c   : > { %5445 = vst.msk [vmem:[#allocation4 + $0x90] sm:$0xff] %vm5426_vm10, %v5367_v46 }
 0x58d   : > { %6951 = vst.msk [vmem:[%s10908_s10 + $0xc8] sm:$0xff] %vm4351_vm1, %v6919_v52  ;;  %v6214_v32 = vpop.f32.mrf.mxu1  ;;  %v6056_v35 = vld [vmem:[#allocation4 + $0x88] sm:$0xff]  ;;  %v6695_v26 = vrot.slane %v6694_v16, 4  ;;  %v6690_v52 = vsel %vm8334_vm2, %v6685_v8, %v6689_v37  ;;  %v6855_v16 = vadd.f32 %v10889_v21, %v10930_v5  ;;  %v6857_v5 = vadd.f32 %v10889_v21, %v10948_v48 }
 0x58e   : > { %5639 = vst.msk [vmem:[#allocation4 + $0x90] sm:$0xff] %vm5620_vm12, %v11038_v17  ;;  %v6215_v50 = vadd.f32 %v10895_v33, %v6214_v32  ;;  %7442 = vmatmul.msk.bf16.vlgmr.msra.gmra.mxu3 %vm344_vm6, %v6751_v63  ;;  %v6055_v51 = vld [vmem:[#allocation4 + $0x80] sm:$0xff]  ;;  %v6666_v17 = vsel %vm8334_vm2, %v6661_v6, %v6665_v57  ;;  %v6699_v63 = vrot.slane %v6697_v20, 5  ;;  %v6736_v32 = vunpack.c.l.b16 %v6690_v52 }
 0x58f   : > { %5446 = vst.msk [vmem:[#allocation4 + $0x98] sm:$0xff] %vm5426_vm10, %v5369_v27  ;;  %v6079_v39 = vpack.c.bf16 %v6056_v35, %v6055_v51  ;;  %v6734_v22 = vunpack.c.l.b16 %v6666_v17 }
 0x590   : > { %v6904_v30 = vadd.f32 %v6840_v29, %v6215_v50  ;;  %v6700_v46 = vsel %vm8334_vm2, %v6695_v26, %v6699_v63 }
 0x591   : > { %7373 = vmatmul.msk.bf16.gmra.mxu1 %vm6127_vm15, %v6079_v39  ;;  %v6752_v49 = vpack.c.b16 %v6735_v3, %v6734_v22  ;;  %v6737_v35 = vunpack.c.l.b16 %v6700_v46  ;;  %v6850_v3 = vadd.f32 %v10889_v21, %v10884_v9 }
 0x592   : > { %6936 = vst.msk [vmem:[%s10908_s10 + $0x50] sm:$0xff] %vm4351_vm1, %v6904_v30  ;;  %v5951_v61 = vpop.permute.xlu2 %5950 }
 0x593   : > { %v5563_v36 = vpop.permute.xlu0 %5562  ;;  %v5754_v11 = vpop.permute.xlu1 %5753  ;;  %v6753_v50 = vpack.c.b16 %v6737_v35, %v6736_v32 }
 0x594   : > { %5640 = vst.msk [vmem:[#allocation4 + $0x98] sm:$0xff] %vm5620_vm12, %v5563_v36 }
 0x595   : > { %5833 = vst.msk [vmem:[#allocation4 + $0x98] sm:$0xff] %vm5813_vm13, %v11043_v18  ;;  %v6216_v38 = vpop.f32.mrf.mxu1 }
 0x596   : > { %5832 = vst.msk [vmem:[#allocation4 + $0x90] sm:$0xff] %vm5813_vm13, %v5754_v11  ;;  %v6217_v62 = vadd.f32 %v10895_v33, %v6216_v38 }
 0x598   : > { %v6905_v44 = vadd.f32 %v6842_v12, %v6217_v62 }
 0x59a   : > { %6937 = vst.msk [vmem:[%s10908_s10 + $0x58] sm:$0xff] %vm4351_vm1, %v6905_v44  ;;  %v5377_v19 = vpop.permute.xlu2 %5376  ;;  %v6852_v44 = vadd.f32 %v10889_v21, %v10911_v25 }
 0x59b   : > { %5450 = vst.msk [vmem:[#allocation4 + $0xb8] sm:$0xff] %vm5426_vm10, %v5377_v19  ;;  %v5947_v18 = vpop.permute.xlu0 %5946  ;;  %v5949_v57 = vpop.permute.xlu1 %5948 }
 0x59c   : > { %6025 = vst.msk [vmem:[#allocation4 + $0x90] sm:$0xff] %vm6006_vm14, %v5947_v18 }
 0x59d   : > { %6026 = vst.msk [vmem:[#allocation4 + $0x98] sm:$0xff] %vm6006_vm14, %v5949_v57 }
 0x59e   : > { %7443 = vmatmul.msk.bf16.gmra.mxu3 %vm344_vm6, %v6752_v49 }
 0x5a2   : > { %v5762_v24 = vpop.permute.xlu2 %5761 }
 0x5a3   : > { %v5373_v23 = vpop.permute.xlu0 %5372  ;;  %v5565_v43 = vpop.permute.xlu1 %5564  ;;  %v6057_v7 = vld [vmem:[#allocation4 + $0x90] sm:$0xff] }
 0x5a4   : > { %5448 = vst.msk [vmem:[#allocation4 + $0xa8] sm:$0xff] %vm5426_vm10, %v5373_v23  ;;  %v6058_v27 = vld [vmem:[#allocation4 + $0x98] sm:$0xff] }
 0x5a5   : > { %5642 = vst.msk [vmem:[#allocation4 + $0xa8] sm:$0xff] %vm5620_vm12, %v11067_v41  ;;  %v6080_v29 = vpack.c.bf16 %v6058_v27, %v6057_v7 }
 0x5a6   : > { %5641 = vst.msk [vmem:[#allocation4 + $0xa0] sm:$0xff] %vm5620_vm12, %v5565_v43 }
 0x5a7   : > { %7374 = vmatmul.msk.bf16.gmra.mxu1 %vm6127_vm15, %v6080_v29 }
 0x5aa   : > { %v5957_v40 = vpop.permute.xlu2 %5956  ;;  %v6254_v22 = vpop.f32.mrf.mxu3 }
 0x5ab   : > { %v5758_v51 = vpop.permute.xlu0 %5757  ;;  %v5760_v6 = vpop.permute.xlu1 %5759  ;;  %v6255_v63 = vadd.f32 %v10895_v33, %v6254_v22 }
 0x5ac   : > { %5834 = vst.msk [vmem:[#allocation4 + $0xa0] sm:$0xff] %vm5813_vm13, %v5758_v51 }
 0x5ad   : > { %6027 = vst.msk [vmem:[#allocation4 + $0xa0] sm:$0xff] %vm6006_vm14, %v5951_v61 }
 0x5ae   : > { %5835 = vst.msk [vmem:[#allocation4 + $0xa8] sm:$0xff] %vm5813_vm13, %v5760_v6  ;;  %7444 = vmatmul.msk.bf16.gmra.mxu3 %vm344_vm6, %v6753_v50 }
 0x5b2   : > { %v6256_v37 = vpop.f32.mrf.mxu3 }
 0x5b3   : > { %v5953_v13 = vpop.permute.xlu0 %5952  ;;  %v5375_v41 = vpop.permute.xlu1 %5374  ;;  %v6257_v29 = vadd.f32 %v10895_v33, %v6256_v37 }
 0x5b4   : > { %6028 = vst.msk [vmem:[#allocation4 + $0xa8] sm:$0xff] %vm6006_vm14, %v5953_v13  ;;  %v6059_v61 = vld [vmem:[#allocation4 + $0xa0] sm:$0xff] }
 0x5b5   : > { %5449 = vst.msk [vmem:[#allocation4 + $0xb0] sm:$0xff] %vm5426_vm10, %v5375_v41  ;;  %v6860_v41 = vadd.f32 %v10889_v21, %v10964_v4 }
 0x5ba   : > { %v6219_v39 = vpop.f32.mrf.mxu1 }
 0x5bb   : > { %v5569_v30 = vpop.permute.xlu0 %5568  ;;  %v5571_v47 = vpop.permute.xlu1 %5570  ;;  %v6220_v54 = vadd.f32 %v10895_v33, %v6219_v39  ;;  %v6060_v17 = vld [vmem:[#allocation4 + $0xa8] sm:$0xff] }
 0x5bc   : > { %5643 = vst.msk [vmem:[#allocation4 + $0xb0] sm:$0xff] %vm5620_vm12, %v5569_v30  ;;  %v6081_v15 = vpack.c.bf16 %v6060_v17, %v6059_v61  ;;  %v6862_v17 = vadd.f32 %v10889_v21, %v10979_v60 }
 0x5bd   : > { %5836 = vst.msk [vmem:[#allocation4 + $0xb0] sm:$0xff] %vm5813_vm13, %v5762_v24  ;;  %v6906_v36 = vadd.f32 %v6845_v31, %v6220_v54 }
 0x5be   : > { %5644 = vst.msk [vmem:[#allocation4 + $0xb8] sm:$0xff] %vm5620_vm12, %v5571_v47  ;;  %7375 = vmatmul.msk.bf16.gmra.mxu1 %vm6127_vm15, %v6081_v15 }
 0x5bf   : > { %6938 = vst.msk [vmem:[%s10908_s10 + $0x60] sm:$0xff] %vm4351_vm1, %v6906_v36 }
 0x5c2   : > { %v6221_v11 = vpop.f32.mrf.mxu1 }
 0x5c3   : > { %v5764_v53 = vpop.permute.xlu0 %5763  ;;  %v5955_v45 = vpop.permute.xlu1 %5954  ;;  %v6222_v28 = vadd.f32 %v10895_v33, %v6221_v11 }
 0x5c4   : > { %5837 = vst.msk [vmem:[#allocation4 + $0xb8] sm:$0xff] %vm5813_vm13, %v5764_v53 }
 0x5c5   : > { %6030 = vst.msk [vmem:[#allocation4 + $0xb8] sm:$0xff] %vm6006_vm14, %v5957_v40  ;;  %v6907_v12 = vadd.f32 %v6847_v58, %v6222_v28 }
 0x5c6   : > { %6029 = vst.msk [vmem:[#allocation4 + $0xb0] sm:$0xff] %vm6006_vm14, %v5955_v45 }
 0x5c7   : > { %6939 = vst.msk [vmem:[%s10908_s10 + $0x68] sm:$0xff] %vm4351_vm1, %v6907_v12  ;;  %v6865_v12 = vadd.f32 %v10889_v21, %v10997_v34  ;;  %v6870_v34 = vadd.f32 %v10889_v21, %v11019_v10 }
 0x5cc   : > { %v6062_v38 = vld [vmem:[#allocation4 + $0xb8] sm:$0xff] }
 0x5cd   : > { %v6061_v62 = vld [vmem:[#allocation4 + $0xb0] sm:$0xff] }
 0x5ce   : > { %v6082_v2 = vpack.c.bf16 %v6062_v38, %v6061_v62 }
 0x5d0   : > { %7376 = vmatmul.msk.bf16.gmra.mxu1 %vm6127_vm15, %v6082_v2 }
 0x5d3   : > { %v6259_v49 = vpop.f32.mrf.mxu3 }
 0x5d4   : > { %v6260_v51 = vadd.f32 %v10895_v33, %v6259_v49 }
 0x5db   : > { %v6261_v9 = vpop.f32.mrf.mxu3 }
 0x5dc   : > { %v6262_v30 = vadd.f32 %v10895_v33, %v6261_v9 }
 0x5e4   : > { %v6224_v59 = vpop.f32.mrf.mxu1 }
 0x5e5   : > { %v6225_v55 = vadd.f32 %v10895_v33, %v6224_v59 }
 0x5e7   : > { %v6908_v1 = vadd.f32 %v6850_v3, %v6225_v55  ;;  %v6867_v3 = vadd.f32 %v10889_v21, %v11010_v42 }
 0x5e9   : > { %6940 = vst.msk [vmem:[%s10908_s10 + $0x70] sm:$0xff] %vm4351_vm1, %v6908_v1 }
 0x5ec   : > { %v6226_v56 = vpop.f32.mrf.mxu1 }
 0x5ed   : > { %v6227_v19 = vadd.f32 %v10895_v33, %v6226_v56 }
 0x5ef   : > { %v6909_v18 = vadd.f32 %v6852_v44, %v6227_v19  ;;  %v6872_v19 = vadd.f32 %v10889_v21, %v11034_v14 }
 0x5f1   : > { %6941 = vst.msk [vmem:[%s10908_s10 + $0x78] sm:$0xff] %vm4351_vm1, %v6909_v18 }
 0x601   : > { %v6264_v57 = vpop.f32.mrf.mxu3 }
 0x602   : > { %v6265_v58 = vadd.f32 %v10895_v33, %v6264_v57 }
 0x609   : > { %v6266_v0 = vpop.f32.mrf.mxu3 }
 0x60a   : > { %v6267_v60 = vadd.f32 %v10895_v33, %v6266_v0 }
 0x60e   : > { %v6229_v20 = vpop.f32.mrf.mxu1 }
 0x60f   : > { %v6230_v8 = vadd.f32 %v10895_v33, %v6229_v20 }
 0x611   : > { %v6910_v25 = vadd.f32 %v6855_v16, %v6230_v8  ;;  %v6879_v26 = vpop.f32.mrf.mxu3 }
 0x612   : > { %v6880_v23 = vadd.f32 %v10889_v21, %v6879_v26 }
 0x613   : > { %6942 = vst.msk [vmem:[%s10908_s10 + $0x80] sm:$0xff] %vm4351_vm1, %v6910_v25 }
 0x614   : > { %v6920_v43 = vadd.f32 %v6880_v23, %v6255_v63 }
 0x616   : > { %6952 = vst.msk [vmem:[%s10908_s10 + $0xd0] sm:$0xff] %vm4351_vm1, %v6920_v43  ;;  %v6231_v7 = vpop.f32.mrf.mxu1 }
 0x617   : > { %v6232_v52 = vadd.f32 %v10895_v33, %v6231_v7 }
 0x619   : > { %v6911_v46 = vadd.f32 %v6857_v5, %v6232_v52  ;;  %v6881_v27 = vpop.f32.mrf.mxu3 }
 0x61a   : > { %v6882_v32 = vadd.f32 %v10889_v21, %v6881_v27 }
 0x61b   : > { %6943 = vst.msk [vmem:[%s10908_s10 + $0x88] sm:$0xff] %vm4351_vm1, %v6911_v46 }
 0x61c   : > { %v6921_v35 = vadd.f32 %v6882_v32, %v6257_v29 }
 0x61e   : > { %6953 = vst.msk [vmem:[%s10908_s10 + $0xd8] sm:$0xff] %vm4351_vm1, %v6921_v35 }
 0x621   : > { %v6884_v50 = vpop.f32.mrf.mxu3 }
 0x622   : > { %v6885_v48 = vadd.f32 %v10889_v21, %v6884_v50 }
 0x624   : > { %v6922_v6 = vadd.f32 %v6885_v48, %v6260_v51  ;;  %v6234_v13 = vpop.f32.mrf.mxu1 }
 0x625   : > { %v6235_v31 = vadd.f32 %v10895_v33, %v6234_v13 }
 0x626   : > { %6954 = vst.msk [vmem:[%s10908_s10 + $0xe0] sm:$0xff] %vm4351_vm1, %v6922_v6 }
 0x627   : > { %v6912_v24 = vadd.f32 %v6860_v41, %v6235_v31 }
 0x629   : > { %6944 = vst.msk [vmem:[%s10908_s10 + $0x90] sm:$0xff] %vm4351_vm1, %v6912_v24  ;;  %v6886_v39 = vpop.f32.mrf.mxu3 }
 0x62a   : > { %v6887_v47 = vadd.f32 %v10889_v21, %v6886_v39 }
 0x62c   : > { %v6923_v54 = vadd.f32 %v6887_v47, %v6262_v30  ;;  %v6236_v61 = vpop.f32.mrf.mxu1 }
 0x62d   : > { %v6237_v4 = vadd.f32 %v10895_v33, %v6236_v61 }
 0x62e   : > { %6955 = vst.msk [vmem:[%s10908_s10 + $0xe8] sm:$0xff] %vm4351_vm1, %v6923_v54 }
 0x62f   : > { %v6913_v15 = vadd.f32 %v6862_v17, %v6237_v4 }
 0x631   : > { %6945 = vst.msk [vmem:[%s10908_s10 + $0x98] sm:$0xff] %vm4351_vm1, %v6913_v15  ;;  %v6889_v36 = vpop.f32.mrf.mxu3 }
 0x632   : > { %v6890_v11 = vadd.f32 %v10889_v21, %v6889_v36 }
 0x634   : > { %v6924_v53 = vadd.f32 %v6890_v11, %v6265_v58 }
 0x636   : > { %6956 = vst.msk [vmem:[%s10908_s10 + $0xf0] sm:$0xff] %vm4351_vm1, %v6924_v53 }
 0x639   : > { %v6891_v45 = vpop.f32.mrf.mxu3 }
 0x63a   : > { %v6892_v28 = vadd.f32 %v10889_v21, %v6891_v45 }
 0x63b   : > { %v6239_v40 = vpop.f32.mrf.mxu1 }
 0x63c   : > { %v6925_v38 = vadd.f32 %v6892_v28, %v6267_v60  ;;  %v6240_v62 = vadd.f32 %v10895_v33, %v6239_v40 }
 0x63e   : > { %6957 = vst.msk [vmem:[%s10908_s10 + $0xf8] sm:$0xff] %vm4351_vm1, %v6925_v38  ;;  %v6914_v2 = vadd.f32 %v6865_v12, %v6240_v62 }
 0x640   : > { %6946 = vst.msk [vmem:[%s10908_s10 + $0xa0] sm:$0xff] %vm4351_vm1, %v6914_v2 }
 0x643   : > { %v6241_v22 = vpop.f32.mrf.mxu1 }
 0x644   : > { %v6242_v59 = vadd.f32 %v10895_v33, %v6241_v22 }
 0x646   : > { %v6915_v55 = vadd.f32 %v6867_v3, %v6242_v59 }
 0x648   : > { %6947 = vst.msk [vmem:[%s10908_s10 + $0xa8] sm:$0xff] %vm4351_vm1, %v6915_v55 }
 0x64d   : > { %v6244_v37 = vpop.f32.mrf.mxu1 }
 0x64e   : > { %v6245_v1 = vadd.f32 %v10895_v33, %v6244_v37 }
 0x650   : > { %v6916_v44 = vadd.f32 %v6870_v34, %v6245_v1 }
 0x652   : > { %6948 = vst.msk [vmem:[%s10908_s10 + $0xb0] sm:$0xff] %vm4351_vm1, %v6916_v44 }
 0x655   : > { %v6246_v56 = vpop.f32.mrf.mxu1 }
 0x656   : > { %v6247_v42 = vadd.f32 %v10895_v33, %v6246_v56 }
 0x658   : > { %v6917_v49 = vadd.f32 %v6872_v19, %v6247_v42 }
 0x65a   : > { %6949 = vst.msk [vmem:[%s10908_s10 + $0xb8] sm:$0xff] %vm4351_vm1, %v6917_v49 }
 0x65b PF: > { %s17_s24 = sadd.s32 1, %s8253_s24  }
 0x65c   : > { %p14_p4 = scmp.ge.s32.totalorder %s17_s24, 4  }
 0x65e   :  { %16 = sbr.rel (!%p14_p4) target bundleno = 1 (0x1), region = 83 }

</bundles_post_ra>
